<compile_context>
chip_gen: v7x
topology: tpu7x:2x2x1
jax: 0.10.0
libtpu: 0.0.40
codegen_flags: <defaults>
</compile_context>

<pallas_src>
import jax
import jax.numpy as jnp
import numpy as np
from jax.experimental import pallas as pl
from jax.experimental.pallas import tpu as pltpu

N_CH = 20
KK = 5 * 5                      # 25 conv taps (kh*5+kw)
POOL_OUT = 6
SPATIAL = POOL_OUT * POOL_OUT   # 36 pooled spatial positions (ph*6+pw)
NPOS = 4                        # 2x2 max-pool window positions (ih*2+iw)
PK = SPATIAL * KK               # 900 im2col lanes: s*25 + k
FLAT = N_CH * SPATIAL           # 720 flattened conv lanes: s*20 + c
HID = 500


def _round_up(x, m):
    return (x + m - 1) // m * m


# ----------------------------- fused kernel ----------------------------------

def fused_net_kernel(patches_ref, wbig_ref, bcf_ref, w1_ref, b1_ref,
                     w2t_ref, b2_ref, out_ref):
    # patches_ref: (4, TB, 900) f32   im2col patches per pool-window position
    # wbig_ref:    (900, 720)  f32    block-diagonal conv weight
    # bcf_ref:     (1, 720)    f32    conv bias tiled over spatial
    # w1_ref:      (720, 500)  bf16   fc1 weight (rows permuted to s*20+c order)
    # b1_ref:      (1, 500)    f32
    # w2t_ref:     (1, 500)    f32    fc2 weight, lane-dense (transposed)
    # b2_ref:      (1, 1)      f32
    # out_ref:     (TB, 1)     f32    logits
    wbig = wbig_ref[...]
    bcf = bcf_ref[...]

    def conv_at(j):                           # j: static pool-window position
        c = jnp.dot(patches_ref[j], wbig, preferred_element_type=jnp.float32)
        return jnp.maximum(c + bcf, 0.0)      # ReLU(conv + b): (TB, 720) lane-dense

    pooled = conv_at(0)
    for j in range(1, NPOS):                  # 2x2 max-pool, fully in-register
        pooled = jnp.maximum(pooled, conv_at(j))

    # fc1: bf16 operands on the MXU, f32 accumulation; bias + ReLU in f32.
    h = jnp.dot(pooled.astype(jnp.bfloat16), w1_ref[...],
                preferred_element_type=jnp.float32)
    h = jnp.maximum(h + b1_ref[...], 0.0)     # (TB, 500)

    # fc2: lane-dense multiply + lane reduction (avoids a [500,1] MXU call).
    out_ref[...] = jnp.sum(h * w2t_ref[...], axis=-1, keepdims=True) + b2_ref[...]


def fused_net(patches, p, tile_b):
    _, Bp, _ = patches.shape
    n_tiles = Bp // tile_b
    return pl.pallas_call(
        fused_net_kernel,
        out_shape=jax.ShapeDtypeStruct((Bp, 1), jnp.float32),
        grid_spec=pltpu.PrefetchScalarGridSpec(
            num_scalar_prefetch=0,
            grid=(n_tiles,),
            in_specs=[
                pl.BlockSpec((NPOS, tile_b, PK), lambda i: (0, i, 0)),
                pl.BlockSpec((PK, FLAT), lambda i: (0, 0)),
                pl.BlockSpec((1, FLAT), lambda i: (0, 0)),
                pl.BlockSpec((FLAT, HID), lambda i: (0, 0)),
                pl.BlockSpec((1, HID), lambda i: (0, 0)),
                pl.BlockSpec((1, HID), lambda i: (0, 0)),
                pl.BlockSpec((1, 1), lambda i: (0, 0)),
            ],
            out_specs=pl.BlockSpec((tile_b, 1), lambda i: (i, 0)),
        ),
        compiler_params=pltpu.CompilerParams(
            dimension_semantics=("parallel",)),   # v7x: shard batch tiles on 2 TCs
    )(patches, p["wbig"], p["bc_flat"], p["w1"], p["b1"], p["w2t"], p["b2"])


# ----------------------------- host-side glue ---------------------------------

def im2col_patches(images):
    """[B,1,28,28] -> [4, B, 900] (slice-based, no gather).

    axis0 = 2x2 pool-window position j = ih*2 + iw;
    last axis = pooled-spatial-major, conv-tap-minor: (ph*6+pw)*25 + (kh*5+kw).
    """
    B = images.shape[0]
    p = jax.lax.conv_general_dilated_patches(
        images, filter_shape=(5, 5), window_strides=(2, 2), padding="VALID",
        dimension_numbers=("NCHW", "OIHW", "NCHW"))      # (B, 25, 12, 12)
    p = p.reshape(B, KK, POOL_OUT, 2, POOL_OUT, 2)       # (b, k, ph, ih, pw, iw)
    p = p.transpose(3, 5, 0, 2, 4, 1)                    # (ih, iw, b, ph, pw, k)
    return p.reshape(NPOS, B, PK)


def prepare_params(raw):
    """Repack PyTorch-style params into the layouts the fused kernel expects."""
    wc_mat = raw["wc"].reshape(N_CH, KK).T                        # (25, 20)
    eye = jnp.eye(SPATIAL, dtype=jnp.float32)
    # Block-diagonal conv weight: wbig[s*25+k, t*20+c] = (s==t) * wc[k, c]
    wbig = jnp.einsum("st,kc->sktc", eye, wc_mat).reshape(PK, FLAT)
    bc_flat = jnp.tile(raw["bc"], SPATIAL).reshape(1, FLAT)       # index s*20+c
    # Fold the PyTorch (c,h,w) flatten order into w1: our row r = s*20+c maps
    # to torch row c*36+s.
    r = np.arange(FLAT)
    perm = (r % N_CH) * SPATIAL + (r // N_CH)
    return {
        "wbig": wbig,
        "bc_flat": bc_flat,
        "w1": raw["w1"][perm, :].astype(jnp.bfloat16),            # bf16 MXU path
        "b1": raw["b1"].reshape(1, HID),
        "w2t": raw["w2"].reshape(1, HID),                         # lane-dense fc2
        "b2": raw["b2"].reshape(1, 1),
    }


def init_params(key):
    """Deterministic PyTorch-style (uniform fan-in) init."""
    ks = jax.random.split(key, 6)
    kc = 1.0 / np.sqrt(1 * 5 * 5)
    k1 = 1.0 / np.sqrt(FLAT)
    k2 = 1.0 / np.sqrt(HID)
    raw = {
        "wc": jax.random.uniform(ks[0], (N_CH, 1, 5, 5), jnp.float32, -kc, kc),
        "bc": jax.random.uniform(ks[1], (N_CH,), jnp.float32, -kc, kc),
        "w1": jax.random.uniform(ks[2], (FLAT, HID), jnp.float32, -k1, k1),
        "b1": jax.random.uniform(ks[3], (HID,), jnp.float32, -k1, k1),
        "w2": jax.random.uniform(ks[4], (HID, 1), jnp.float32, -k2, k2),
        "b2": jax.random.uniform(ks[5], (1,), jnp.float32, -k2, k2),
    }
    return raw, prepare_params(raw)


def net_forward(params, batch):
    images = batch["images"].astype(jnp.float32)
    targets = (batch["targets"] == 6).astype(jnp.int32)           # .long()
    B = images.shape[0]

    patches = im2col_patches(images)                              # (4, B, 900)
    tile_b = min(128, _round_up(max(B, 1), 8))
    Bp = _round_up(B, tile_b)
    if Bp != B:
        patches = jnp.pad(patches, ((0, 0), (0, Bp - B), (0, 0)))

    logits = fused_net(patches, params, tile_b)[:B]               # (B, 1)
    # TODO(synk): OutputClassificationBinary (trw loss/output wrapper) has no
    # Pallas equivalent; return raw logits + binarized int32 targets instead.
    return {"softmax_logits": logits, "targets": targets}


def reference_forward(raw, images):
    x = jax.lax.conv_general_dilated(
        images, raw["wc"], window_strides=(2, 2), padding="VALID",
        dimension_numbers=("NCHW", "OIHW", "NCHW"))
    x = jax.nn.relu(x + raw["bc"][None, :, None, None])           # [B,20,12,12]
    B = x.shape[0]
    x = x.reshape(B, N_CH, POOL_OUT, 2, POOL_OUT, 2).max(axis=(3, 5))
    x = x.reshape(B, FLAT)                                        # (c,h,w) flatten
    x = jax.nn.relu(x @ raw["w1"] + raw["b1"])
    return x @ raw["w2"] + raw["b2"]


if __name__ == "__main__":
    key = jax.random.PRNGKey(0)
    kp, kx, kt = jax.random.split(key, 3)
    raw, params = init_params(kp)

    B = 2
    images = jax.random.normal(kx, (B, 1, 28, 28), jnp.float32)   # MNIST-sized
    targets = jax.random.randint(kt, (B,), 0, 10, jnp.int32)
    batch = {"images": images, "targets": targets}

    out = net_forward(params, batch)
    logits = jax.block_until_ready(out["softmax_logits"])
    _ = jax.block_until_ready(out["targets"])

    ref = jax.block_until_ready(reference_forward(raw, images))
    np.testing.assert_allclose(np.asarray(logits), np.asarray(ref),
                               rtol=1e-2, atol=1e-2)
    print("KERNEL_OK")
</pallas_src>

<mosaic_0001>
module attributes {stable_mosaic.version = 11 : i64} {
  func.func @fused_net_kernel(%arg0: i32, %arg1: memref<4x8x900xf32, #tpu.memory_space<vmem>>, %arg2: memref<900x720xf32, #tpu.memory_space<vmem>>, %arg3: memref<1x720xf32, #tpu.memory_space<vmem>>, %arg4: memref<720x500xbf16, #tpu.memory_space<vmem>>, %arg5: memref<1x500xf32, #tpu.memory_space<vmem>>, %arg6: memref<1x500xf32, #tpu.memory_space<vmem>>, %arg7: memref<1x1xf32, #tpu.memory_space<vmem>>, %arg8: memref<8x1xf32, #tpu.memory_space<vmem>>) attributes {dimension_semantics = [#tpu.dimension_semantics<parallel>], iteration_bounds = array<i64: 1>, scalar_prefetch = 0 : i64, scratch_operands = 0 : i64, tpu.core_type = #tpu.core_type<tc>, window_params = [{transform_indices = @transform_0, window_bounds = array<i64: 4, 8, 900>}, {pipeline_mode = #tpu.pipeline_mode<synchronous>, transform_indices = @transform_1, window_bounds = array<i64: 900, 720>}, {pipeline_mode = #tpu.pipeline_mode<synchronous>, transform_indices = @transform_2, window_bounds = array<i64: 1, 720>}, {pipeline_mode = #tpu.pipeline_mode<synchronous>, transform_indices = @transform_3, window_bounds = array<i64: 720, 500>}, {pipeline_mode = #tpu.pipeline_mode<synchronous>, transform_indices = @transform_4, window_bounds = array<i64: 1, 500>}, {pipeline_mode = #tpu.pipeline_mode<synchronous>, transform_indices = @transform_5, window_bounds = array<i64: 1, 500>}, {pipeline_mode = #tpu.pipeline_mode<synchronous>, transform_indices = @transform_6, window_bounds = array<i64: 1, 1>}, {transform_indices = @transform_7, window_bounds = array<i64: 8, 1>}]} {
    %c0 = arith.constant 0 : index
    %c0_0 = arith.constant 0 : index
    %0 = vector.load %arg2[%c0, %c0_0] : memref<900x720xf32, #tpu.memory_space<vmem>>, vector<900x720xf32>
    %c0_1 = arith.constant 0 : index
    %c0_2 = arith.constant 0 : index
    %1 = vector.load %arg3[%c0_1, %c0_2] : memref<1x720xf32, #tpu.memory_space<vmem>>, vector<1x720xf32>
    %c0_3 = arith.constant 0 : index
    %c0_4 = arith.constant 0 : index
    %c0_5 = arith.constant 0 : index
    %2 = vector.load %arg1[%c0_3, %c0_4, %c0_5] : memref<4x8x900xf32, #tpu.memory_space<vmem>>, vector<1x8x900xf32>
    %3 = vector.shape_cast %2 : vector<1x8x900xf32> to vector<8x900xf32>
    %cst = arith.constant dense<0.000000e+00> : vector<8x720xf32>
    %4 = tpu.matmul %3, %0, %cst {dimension_numbers = #tpu.dot_dimension_numbers<[1], [0], [0], [1], [0, 0, 1, 1], [], []>} : vector<8x900xf32>, vector<900x720xf32>, vector<8x720xf32> -> vector<8x720xf32>
    %5 = vector.broadcast %1 : vector<1x720xf32> to vector<8x720xf32>
    %6 = arith.addf %4, %5 : vector<8x720xf32>
    %cst_6 = arith.constant 0.000000e+00 : f32
    %7 = vector.broadcast %cst_6 : f32 to vector<8x720xf32>
    %8 = arith.maximumf %6, %7 : vector<8x720xf32>
    %c1 = arith.constant 1 : index
    %c0_7 = arith.constant 0 : index
    %c0_8 = arith.constant 0 : index
    %9 = vector.load %arg1[%c1, %c0_7, %c0_8] : memref<4x8x900xf32, #tpu.memory_space<vmem>>, vector<1x8x900xf32>
    %10 = vector.shape_cast %9 : vector<1x8x900xf32> to vector<8x900xf32>
    %cst_9 = arith.constant dense<0.000000e+00> : vector<8x720xf32>
    %11 = tpu.matmul %10, %0, %cst_9 {dimension_numbers = #tpu.dot_dimension_numbers<[1], [0], [0], [1], [0, 0, 1, 1], [], []>} : vector<8x900xf32>, vector<900x720xf32>, vector<8x720xf32> -> vector<8x720xf32>
    %12 = vector.broadcast %1 : vector<1x720xf32> to vector<8x720xf32>
    %13 = arith.addf %11, %12 : vector<8x720xf32>
    %cst_10 = arith.constant 0.000000e+00 : f32
    %14 = vector.broadcast %cst_10 : f32 to vector<8x720xf32>
    %15 = arith.maximumf %13, %14 : vector<8x720xf32>
    %16 = arith.maximumf %8, %15 : vector<8x720xf32>
    %c2 = arith.constant 2 : index
    %c0_11 = arith.constant 0 : index
    %c0_12 = arith.constant 0 : index
    %17 = vector.load %arg1[%c2, %c0_11, %c0_12] : memref<4x8x900xf32, #tpu.memory_space<vmem>>, vector<1x8x900xf32>
    %18 = vector.shape_cast %17 : vector<1x8x900xf32> to vector<8x900xf32>
    %cst_13 = arith.constant dense<0.000000e+00> : vector<8x720xf32>
    %19 = tpu.matmul %18, %0, %cst_13 {dimension_numbers = #tpu.dot_dimension_numbers<[1], [0], [0], [1], [0, 0, 1, 1], [], []>} : vector<8x900xf32>, vector<900x720xf32>, vector<8x720xf32> -> vector<8x720xf32>
    %20 = vector.broadcast %1 : vector<1x720xf32> to vector<8x720xf32>
    %21 = arith.addf %19, %20 : vector<8x720xf32>
    %cst_14 = arith.constant 0.000000e+00 : f32
    %22 = vector.broadcast %cst_14 : f32 to vector<8x720xf32>
    %23 = arith.maximumf %21, %22 : vector<8x720xf32>
    %24 = arith.maximumf %16, %23 : vector<8x720xf32>
    %c3 = arith.constant 3 : index
    %c0_15 = arith.constant 0 : index
    %c0_16 = arith.constant 0 : index
    %25 = vector.load %arg1[%c3, %c0_15, %c0_16] : memref<4x8x900xf32, #tpu.memory_space<vmem>>, vector<1x8x900xf32>
    %26 = vector.shape_cast %25 : vector<1x8x900xf32> to vector<8x900xf32>
    %cst_17 = arith.constant dense<0.000000e+00> : vector<8x720xf32>
    %27 = tpu.matmul %26, %0, %cst_17 {dimension_numbers = #tpu.dot_dimension_numbers<[1], [0], [0], [1], [0, 0, 1, 1], [], []>} : vector<8x900xf32>, vector<900x720xf32>, vector<8x720xf32> -> vector<8x720xf32>
    %28 = vector.broadcast %1 : vector<1x720xf32> to vector<8x720xf32>
    %29 = arith.addf %27, %28 : vector<8x720xf32>
    %cst_18 = arith.constant 0.000000e+00 : f32
    %30 = vector.broadcast %cst_18 : f32 to vector<8x720xf32>
    %31 = arith.maximumf %29, %30 : vector<8x720xf32>
    %32 = arith.maximumf %24, %31 : vector<8x720xf32>
    %33 = arith.truncf %32 : vector<8x720xf32> to vector<8x720xbf16>
    %c0_19 = arith.constant 0 : index
    %c0_20 = arith.constant 0 : index
    %34 = vector.load %arg4[%c0_19, %c0_20] : memref<720x500xbf16, #tpu.memory_space<vmem>>, vector<720x500xbf16>
    %cst_21 = arith.constant dense<0.000000e+00> : vector<8x500xf32>
    %35 = tpu.matmul %33, %34, %cst_21 {dimension_numbers = #tpu.dot_dimension_numbers<[1], [0], [0], [1], [0, 0, 1, 1], [], []>} : vector<8x720xbf16>, vector<720x500xbf16>, vector<8x500xf32> -> vector<8x500xf32>
    %c0_22 = arith.constant 0 : index
    %c0_23 = arith.constant 0 : index
    %36 = vector.load %arg5[%c0_22, %c0_23] : memref<1x500xf32, #tpu.memory_space<vmem>>, vector<1x500xf32>
    %37 = vector.broadcast %36 : vector<1x500xf32> to vector<8x500xf32>
    %38 = arith.addf %35, %37 : vector<8x500xf32>
    %cst_24 = arith.constant 0.000000e+00 : f32
    %39 = vector.broadcast %cst_24 : f32 to vector<8x500xf32>
    %40 = arith.maximumf %38, %39 : vector<8x500xf32>
    %c0_25 = arith.constant 0 : index
    %c0_26 = arith.constant 0 : index
    %41 = vector.load %arg6[%c0_25, %c0_26] : memref<1x500xf32, #tpu.memory_space<vmem>>, vector<1x500xf32>
    %42 = vector.broadcast %41 : vector<1x500xf32> to vector<8x500xf32>
    %43 = arith.mulf %40, %42 : vector<8x500xf32>
    %cst_27 = arith.constant dense<0.000000e+00> : vector<8xf32>
    %44 = vector.multi_reduction <add>, %43, %cst_27 [1] : vector<8x500xf32> to vector<8xf32>
    %45 = vector.shape_cast %44 : vector<8xf32> to vector<8x1xf32>
    %c0_28 = arith.constant 0 : index
    %c0_29 = arith.constant 0 : index
    %46 = vector.load %arg7[%c0_28, %c0_29] : memref<1x1xf32, #tpu.memory_space<vmem>>, vector<1x1xf32>
    %47 = vector.broadcast %46 : vector<1x1xf32> to vector<8x1xf32>
    %48 = arith.addf %45, %47 : vector<8x1xf32>
    %c0_30 = arith.constant 0 : index
    %c0_31 = arith.constant 0 : index
    %49 = vector.load %arg8[%c0_30, %c0_31] : memref<8x1xf32, #tpu.memory_space<vmem>>, vector<8x1xf32>
    tpu.vector_store %arg8[%c0_30, %c0_31], %48 {strides = array<i32>} : memref<8x1xf32, #tpu.memory_space<vmem>>, vector<8x1xf32>,
    return
  }
  func.func @transform_0(%arg0: i32) -> (i32, i32, i32) {
    %c0_i32 = arith.constant 0 : i32
    %c0_i32_0 = arith.constant 0 : i32
    %c0_i32_1 = arith.constant 0 : i32
    return %c0_i32, %arg0, %c0_i32_0 : i32, i32, i32
  }
  func.func @transform_1(%arg0: i32) -> (i32, i32) {
    %c0_i32 = arith.constant 0 : i32
    %c0_i32_0 = arith.constant 0 : i32
    %c0_i32_1 = arith.constant 0 : i32
    return %c0_i32, %c0_i32_0 : i32, i32
  }
  func.func @transform_2(%arg0: i32) -> (i32, i32) {
    %c0_i32 = arith.constant 0 : i32
    %c0_i32_0 = arith.constant 0 : i32
    %c0_i32_1 = arith.constant 0 : i32
    return %c0_i32, %c0_i32_0 : i32, i32
  }
  func.func @transform_3(%arg0: i32) -> (i32, i32) {
    %c0_i32 = arith.constant 0 : i32
    %c0_i32_0 = arith.constant 0 : i32
    %c0_i32_1 = arith.constant 0 : i32
    return %c0_i32, %c0_i32_0 : i32, i32
  }
  func.func @transform_4(%arg0: i32) -> (i32, i32) {
    %c0_i32 = arith.constant 0 : i32
    %c0_i32_0 = arith.constant 0 : i32
    %c0_i32_1 = arith.constant 0 : i32
    return %c0_i32, %c0_i32_0 : i32, i32
  }
  func.func @transform_5(%arg0: i32) -> (i32, i32) {
    %c0_i32 = arith.constant 0 : i32
    %c0_i32_0 = arith.constant 0 : i32
    %c0_i32_1 = arith.constant 0 : i32
    return %c0_i32, %c0_i32_0 : i32, i32
  }
  func.func @transform_6(%arg0: i32) -> (i32, i32) {
    %c0_i32 = arith.constant 0 : i32
    %c0_i32_0 = arith.constant 0 : i32
    %c0_i32_1 = arith.constant 0 : i32
    return %c0_i32, %c0_i32_0 : i32, i32
  }
  func.func @transform_7(%arg0: i32) -> (i32, i32) {
    %c0_i32 = arith.constant 0 : i32
    %c0_i32_0 = arith.constant 0 : i32
    return %arg0, %c0_i32 : i32, i32
  }
}

</mosaic_0001>

<bundles_post_ra>
// kernel: tpu_custom_call.1
= control target key start
LH: loop header
LB: loop body
LE: loop exit
PB: predicated region body
PF: predicated region fallthrough
CT: control target
= control target key end

     0   :  { %s11672_s0 = inlined_call_operand.hbm [shape: f32[4,8,900], index: 0, kind: input, shape index: {}]   ;;  %s11673_s1 = inlined_call_operand.hbm [shape: f32[900,720], index: 1, kind: input, shape index: {}]   ;;  %s11674_s2 = inlined_call_operand.hbm [shape: f32[1,720], index: 2, kind: input, shape index: {}]   ;;  %s11675_s3 = inlined_call_operand.hbm [shape: bf16[720,500], index: 3, kind: input, shape index: {}]   ;;  %s11676_s4 = inlined_call_operand.hbm [shape: f32[1,500], index: 4, kind: input, shape index: {}]   ;;  %s11677_s5 = inlined_call_operand.hbm [shape: f32[1,500], index: 5, kind: input, shape index: {}]   ;;  %s11678_s6 = inlined_call_operand.<no memory space> [shape: f32[1,1], index: 6, kind: input, shape index: {}]   ;;  %s11679_s7 = inlined_call_operand.vmem [shape: f32[8,1], index: 7, kind: output, shape index: {}]  }
   0x1   :  { %v12_v0 = vstv %s11678_s6 }
   0x2   :  { %13 = vst [vmem:[#allocation2] sm:$0x1] %v12_v0 }
   0x3   :  { %14 = vsyncpa [#allocation4], 0 }
   0x4   :  { %15 = vsyncpa [#allocation6], 0 }
   0x5   :  { %16 = vsyncpa [#allocation9], 0 }
   0x6   :  { %17 = vsyncpa [#allocation12], 0  ;;  %s9209_s26 = smov [#allocation5]   ;;  %s9069_s30 = scalar_lea.hbm %s11673_s1, 86784 }
   0x7   :  { %s35_s27 = sshll.u32 %s9209_s26, 4  ;;  %p9070_p0 = scmp.ne.s32.totalorder %s11673_s1, %s9069_s30  ;;  %s36_s27 = int_to_ptr.vmem [resolvable:$true] %s35_s27 }
   0x8   :  { %p9073_p1 = scmp.lt.u32.totalorder %s9069_s30, %s11673_s1 }
   0xa   :  { %p9075_p2 = pnand %p9073_p1, %p9070_p0 }
   0xc   :  { %9078 = shalt.err (!%p9075_p2)
}
   0xd   :  { %s9079_s6 = scalar_lea.vmem %s36_s27, 86784  ;;  %p9084_p4 = scmp.lt.s32.totalorder %s36_s27, %s36_s27 }
   0xe   :  { %p9080_p3 = scmp.ne.s32.totalorder %s36_s27, %s9079_s6  ;;  %p9085_p5 = scmp.lt.s32.totalorder %s9079_s6, %s9079_s6 }
  0x10   :  { %p9086_p6 = por %p9085_p5, %p9084_p4 }
  0x12   :  { %p9087_p7 = pnand %p9086_p6, %p9080_p3 }
  0x14   :  { %9090 = shalt.err (!%p9087_p7)
}
  0x15   :  { %s9210_s12 = smov 768   ;;  %s9211_s13 = smov 48  }
  0x16   :  { %41 = dma.hbm_to_vmem [thread:$0]  %s11673_s1, 86784, %s36_s27, [#allocation6], %s9210_s12, %s9210_s12, %s9211_s13  }
  0x17   :  { %s9212_s16 = smov [#allocation8]   ;;  %s9091_s20 = scalar_lea.hbm %s11675_s3, 23040 }
  0x18   :  { %s57_s17 = sshll.u32 %s9212_s16, 4  ;;  %p9092_p8 = scmp.ne.s32.totalorder %s11675_s3, %s9091_s20  ;;  %s58_s17 = int_to_ptr.vmem [resolvable:$true] %s57_s17 }
  0x19   :  { %p9095_p9 = scmp.lt.u32.totalorder %s9091_s20, %s11675_s3 }
  0x1b   :  { %p9097_p10 = pnand %p9095_p9, %p9092_p8 }
  0x1d   :  { %9100 = shalt.err (!%p9097_p10)
}
  0x1e   :  { %s9101_s25 = scalar_lea.vmem %s58_s17, 23040  ;;  %p9106_p12 = scmp.lt.s32.totalorder %s58_s17, %s58_s17 }
  0x1f   :  { %p9102_p11 = scmp.ne.s32.totalorder %s58_s17, %s9101_s25  ;;  %p9107_p13 = scmp.lt.s32.totalorder %s9101_s25, %s9101_s25 }
  0x21   :  { %p9108_p0 = por %p9107_p13, %p9106_p12 }
  0x23   :  { %p9109_p1 = pnand %p9108_p0, %p9102_p11 }
  0x25   :  { %9112 = shalt.err (!%p9109_p1)
}
  0x26   :  { %s9213_s1 = smov 256   ;;  %s9214_s26 = smov 16  }
  0x27   :  { %63 = dma.hbm_to_vmem [thread:$0]  %s11675_s3, 23040, %s58_s17, [#allocation9], %s9213_s1, %s9213_s1, %s9214_s26  }
  0x28   :  { %s9215_s29 = smov [#allocation3]   ;;  %s9113_s10 = scalar_lea.hbm %s11672_s0, 4096 }
  0x29   :  { %s23_s30 = sshll.u32 %s9215_s29, 4  ;;  %p9114_p2 = scmp.ne.s32.totalorder %s11672_s0, %s9113_s10  ;;  %s24_s30 = int_to_ptr.vmem [resolvable:$true] %s23_s30 }
  0x2a   :  { %p9117_p3 = scmp.lt.u32.totalorder %s9113_s10, %s11672_s0 }
  0x2c   :  { %p9119_p4 = pnand %p9117_p3, %p9114_p2 }
  0x2e   :  { %9122 = shalt.err (!%p9119_p4)
}
  0x2f   :  { %s9123_s14 = scalar_lea.vmem %s24_s30, 4096  ;;  %p9128_p6 = scmp.lt.s32.totalorder %s24_s30, %s24_s30 }
  0x30   :  { %p9124_p5 = scmp.ne.s32.totalorder %s24_s30, %s9123_s14  ;;  %p9129_p7 = scmp.lt.s32.totalorder %s9123_s14, %s9123_s14 }
  0x32   :  { %p9130_p8 = por %p9129_p7, %p9128_p6 }
  0x34   :  { %p9131_p9 = pnand %p9130_p8, %p9124_p5 }
  0x36   :  { %9134 = shalt.err (!%p9131_p9)
}
  0x37   :  { %s9216_s3 = smov 1024   ;;  %s9217_s15 = smov 64  }
  0x38   :  { %29 = dma.hbm_to_vmem [thread:$0]  %s11672_s0, 4096, %s24_s30, [#allocation4], %s9216_s3, %s9216_s3, %s9217_s15  }
  0x39   :  { %s9218_s18 = smov [#allocation7]   ;;  %s9219_s20 = smov [#allocation10]  }
  0x3a   :  { %s48_s19 = sshll.u32 %s9218_s18, 4  ;;  %s70_s21 = sshll.u32 %s9219_s20, 4  ;;  %s49_s19 = int_to_ptr.vmem [resolvable:$true] %s48_s19  ;;  %s71_s21 = int_to_ptr.vmem [resolvable:$true] %s70_s21 }
  0x3b   :  { %s9135_s24 = scalar_lea.hbm %s11674_s2, 96 }
  0x3c   :  { %p9136_p10 = scmp.ne.s32.totalorder %s11674_s2, %s9135_s24  ;;  %p9139_p11 = scmp.lt.u32.totalorder %s9135_s24, %s11674_s2 }
  0x3e   :  { %p9141_p12 = pnand %p9139_p11, %p9136_p10 }
  0x40   :  { %9144 = shalt.err (!%p9141_p12)
}
  0x41   :  { %s9145_s0 = scalar_lea.vmem %s49_s19, 96  ;;  %p9150_p0 = scmp.lt.s32.totalorder %s49_s19, %s49_s19 }
  0x42   :  { %p9146_p13 = scmp.ne.s32.totalorder %s49_s19, %s9145_s0  ;;  %p9151_p1 = scmp.lt.s32.totalorder %s9145_s0, %s9145_s0 }
  0x44   :  { %p9152_p2 = por %p9151_p1, %p9150_p0 }
  0x46   :  { %p9153_p3 = pnand %p9152_p2, %p9146_p13 }
  0x48   :  { %9156 = shalt.err (!%p9153_p3)
}
  0x49   :  { %51 = dma.hbm_to_vmem [thread:$0]  %s11674_s2, 96, %s49_s19, [#allocation6]  }
  0x4a   :  { %s9157_s9 = scalar_lea.hbm %s11676_s4, 64 }
  0x4b   :  { %p9158_p4 = scmp.ne.s32.totalorder %s11676_s4, %s9157_s9  ;;  %p9161_p5 = scmp.lt.u32.totalorder %s9157_s9, %s11676_s4 }
  0x4d   :  { %p9163_p6 = pnand %p9161_p5, %p9158_p4 }
  0x4f   :  { %9166 = shalt.err (!%p9163_p6)
}
  0x50   :  { %s9167_s13 = scalar_lea.vmem %s71_s21, 64  ;;  %p9172_p8 = scmp.lt.s32.totalorder %s71_s21, %s71_s21 }
  0x51   :  { %p9168_p7 = scmp.ne.s32.totalorder %s71_s21, %s9167_s13  ;;  %p9173_p9 = scmp.lt.s32.totalorder %s9167_s13, %s9167_s13 }
  0x53   :  { %p9174_p10 = por %p9173_p9, %p9172_p8 }
  0x55   :  { %p9175_p11 = pnand %p9174_p10, %p9168_p7 }
  0x57   :  { %9178 = shalt.err (!%p9175_p11)
}
  0x58   :  { %73 = dma.hbm_to_vmem [thread:$0]  %s11676_s4, 64, %s71_s21, [#allocation9]  }
  0x59   :  { %s9220_s3 = smov [#allocation11]   ;;  %s9179_s18 = scalar_lea.hbm %s11677_s5, 64 }
  0x5a   :  { %s80_s15 = sshll.u32 %s9220_s3, 4  ;;  %p9180_p12 = scmp.ne.s32.totalorder %s11677_s5, %s9179_s18  ;;  %s81_s15 = int_to_ptr.vmem [resolvable:$true] %s80_s15 }
  0x5b   :  { %p9183_p13 = scmp.lt.u32.totalorder %s9179_s18, %s11677_s5 }
  0x5d   :  { %p9185_p0 = pnand %p9183_p13, %p9180_p12 }
  0x5f   :  { %9188 = shalt.err (!%p9185_p0)
}
  0x60   :  { %s9189_s24 = scalar_lea.vmem %s81_s15, 64  ;;  %p9194_p2 = scmp.lt.s32.totalorder %s81_s15, %s81_s15 }
  0x61   :  { %p9190_p1 = scmp.ne.s32.totalorder %s81_s15, %s9189_s24  ;;  %p9195_p3 = scmp.lt.s32.totalorder %s9189_s24, %s9189_s24 }
  0x63   :  { %p9196_p4 = por %p9195_p3, %p9194_p2 }
  0x65   :  { %p9197_p5 = pnand %p9196_p4, %p9190_p1 }
  0x67   :  { %9200 = shalt.err (!%p9197_p5)
}
  0x68   :  { %83 = dma.hbm_to_vmem [thread:$0]  %s11677_s5, 64, %s81_s15, [#allocation12]  }
  0x69   :  { %9201 = dma.done.wait [#allocation4], 4096  }
  0x6a   :  { %9202 = vsyncadd [#allocation4], 4294963200 }
  0x6b   :  { %9203 = dma.done.wait [#allocation6], 86880  }
  0x6c   :  { %9204 = vsyncadd [#allocation6], 4294880416 }
  0x6d   :  { %9205 = dma.done.wait [#allocation9], 23104  }
  0x6e   :  { %9206 = vsyncadd [#allocation9], 4294944192 }
  0x6f   :  { %9207 = dma.done.wait [#allocation12], 64  }
  0x70   :  { %9208 = vsyncadd [#allocation12], 4294967232  ;;  %v106_v1 = vld [vmem:[#allocation5 + $0x8] sm:$0xff]  ;;  %v112_v2 = vld [vmem:[#allocation5 + $0x38] sm:$0xff]  ;;  %vm823_vm0 = vcmask 31744   ;;  %vm827_vm1 = vcmask 1043456  }
  0x71   :  { %v108_v3 = vld [vmem:[#allocation5 + $0x18] sm:$0xff]  ;;  %v9336_v4 = vpack.c.bf16 %v112_v2, %v106_v1  ;;  %v114_v5 = vld [vmem:[#allocation5 + $0x48] sm:$0xff]  ;;  %v105_v6 = vld [vmem:[#allocation5] sm:$0xff]  ;;  %vm5440_vm2 = vcmask 654336   ;;  %vm5722_vm3 = vcmask 949248   ;;  %vm5735_vm4 = vcmask 7168  }
  0x72   :  { %v111_v7 = vld [vmem:[#allocation5 + $0x30] sm:$0xff]  ;;  %v9338_v8 = vpack.c.bf16 %v114_v5, %v108_v3  ;;  %v113_v11 = vld [vmem:[#allocation5 + $0x40] sm:$0xff]  ;;  %v118_v12 = vld [vmem:[#allocation5 + $0x68] sm:$0xff] }
  0x73   :  { %12441 = vst [vmem:[#allocation17_spill] sm:$0xff] %v9336_v4  ;;  %v9340_v9 = vpack.c.bf16 %v111_v7, %v105_v6  ;;  %v107_v10 = vld [vmem:[#allocation5 + $0x10] sm:$0xff]  ;;  %5965 = vmatprep.subr.bf16.mxu0 %v9336_v4  ;;  %v124_v14 = vld [vmem:[#allocation5 + $0x98] sm:$0xff]  ;;  %v126_v16 = vld [vmem:[#allocation5 + $0xa8] sm:$0xff] }
  0x74   :  { %12442 = vst [vmem:[#allocation18_spill] sm:$0xff] %v9338_v8  ;;  %v9343_v13 = vpack.c.bf16 %v113_v11, %v107_v10  ;;  %v120_v15 = vld [vmem:[#allocation5 + $0x78] sm:$0xff]  ;;  %6189 = vmatprep.subr.bf16.mxu1 %v9338_v8  ;;  %v9347_v17 = vpack.c.bf16 %v124_v14, %v118_v12  ;;  %v117_v19 = vld [vmem:[#allocation5 + $0x60] sm:$0xff]  ;;  %v123_v20 = vld [vmem:[#allocation5 + $0x90] sm:$0xff] }
  0x75   :  { %12443 = vst [vmem:[#allocation19_spill] sm:$0xff] %v9340_v9  ;;  %5967 = vmatpush1.bf16.msra.mxu0 %v9340_v9  ;;  %v9349_v18 = vpack.c.bf16 %v126_v16, %v120_v15  ;;  %v119_v21 = vld [vmem:[#allocation5 + $0x70] sm:$0xff]  ;;  %v9352_v22 = vpack.c.bf16 %v123_v20, %v117_v19  ;;  %v125_v23 = vld [vmem:[#allocation5 + $0xa0] sm:$0xff]  ;;  %v130_v24 = vld [vmem:[#allocation5 + $0xc8] sm:$0xff] }
  0x76   :  { %12444 = vst [vmem:[#allocation20_spill] sm:$0xff] %v9343_v13  ;;  %12445 = vst [vmem:[#allocation21_spill] sm:$0xff] %v9347_v17  ;;  %6191 = vmatpush1.bf16.msra.mxu1 %v9343_v13  ;;  %v136_v25 = vld [vmem:[#allocation5 + $0xf8] sm:$0xff]  ;;  %5969 = vmatprep.subr.bf16.mxu0 %v9347_v17  ;;  %v9356_v26 = vpack.c.bf16 %v125_v23, %v119_v21  ;;  %v138_v29 = vld [vmem:[#allocation5 + $0x108] sm:$0xff] }
  0x77   :  { %12446 = vst [vmem:[#allocation22_spill] sm:$0xff] %v9349_v18  ;;  %12447 = vst [vmem:[#allocation23_spill] sm:$0xff] %v9352_v22  ;;  %6193 = vmatprep.subr.bf16.mxu1 %v9349_v18  ;;  %v9358_v27 = vpack.c.bf16 %v136_v25, %v130_v24  ;;  %v132_v28 = vld [vmem:[#allocation5 + $0xd8] sm:$0xff]  ;;  %v129_v30 = vld [vmem:[#allocation5 + $0xc0] sm:$0xff] }
  0x78   :  { %12448 = vst [vmem:[#allocation24_spill] sm:$0xff] %v9356_v26  ;;  %v9360_v31 = vpack.c.bf16 %v138_v29, %v132_v28  ;;  %v135_v32 = vld [vmem:[#allocation5 + $0xf0] sm:$0xff]  ;;  %v137_v34 = vld [vmem:[#allocation5 + $0x100] sm:$0xff]  ;;  %v142_v36 = vld [vmem:[#allocation5 + $0x128] sm:$0xff] }
  0x79   :  { %12449 = vst [vmem:[#allocation25_spill] sm:$0xff] %v9358_v27  ;;  %v131_v33 = vld [vmem:[#allocation5 + $0xd0] sm:$0xff]  ;;  %5971 = vmatpush1.bf16.msra.mxu0 %v9352_v22  ;;  %v9363_v35 = vpack.c.bf16 %v135_v32, %v129_v30  ;;  %v148_v37 = vld [vmem:[#allocation5 + $0x158] sm:$0xff]  ;;  %v150_v41 = vld [vmem:[#allocation5 + $0x168] sm:$0xff] }
  0x7a   :  { %12450 = vst [vmem:[#allocation26_spill] sm:$0xff] %v9360_v31  ;;  %v144_v38 = vld [vmem:[#allocation5 + $0x138] sm:$0xff]  ;;  %6195 = vmatpush1.bf16.msra.mxu1 %v9356_v26  ;;  %5973 = vmatprep.subr.bf16.mxu0 %v9358_v27  ;;  %v9367_v39 = vpack.c.bf16 %v137_v34, %v131_v33  ;;  %v9369_v40 = vpack.c.bf16 %v148_v37, %v142_v36  ;;  %v141_v42 = vld [vmem:[#allocation5 + $0x120] sm:$0xff]  ;;  %v147_v43 = vld [vmem:[#allocation5 + $0x150] sm:$0xff] }
  0x7b   :  { %12451 = vst [vmem:[#allocation27_spill] sm:$0xff] %v9363_v35  ;;  %6197 = vmatprep.subr.bf16.mxu1 %v9360_v31  ;;  %v9372_v44 = vpack.c.bf16 %v150_v41, %v144_v38  ;;  %v143_v45 = vld [vmem:[#allocation5 + $0x130] sm:$0xff]  ;;  %v149_v46 = vld [vmem:[#allocation5 + $0x160] sm:$0xff]  ;;  %v154_v47 = vld [vmem:[#allocation5 + $0x188] sm:$0xff]  ;;  %v9375_v51 = vpack.c.bf16 %v147_v43, %v141_v42 }
  0x7c   :  { %12452 = vst [vmem:[#allocation28_spill] sm:$0xff] %v9367_v39  ;;  %12453 = vst [vmem:[#allocation29_spill] sm:$0xff] %v9369_v40  ;;  %v160_v48 = vld [vmem:[#allocation5 + $0x1b8] sm:$0xff]  ;;  %v162_v50 = vld [vmem:[#allocation5 + $0x1c8] sm:$0xff]  ;;  %v9379_v52 = vpack.c.bf16 %v149_v46, %v143_v45 }
  0x7d   :  { %12454 = vst [vmem:[#allocation30_spill] sm:$0xff] %v9372_v44  ;;  %v156_v49 = vld [vmem:[#allocation5 + $0x198] sm:$0xff]  ;;  %5975 = vmatpush1.bf16.msra.mxu0 %v9363_v35  ;;  %12455 = vst [vmem:[#allocation31_spill] sm:$0xff] %v9375_v51  ;;  %v9381_v53 = vpack.c.bf16 %v160_v48, %v154_v47  ;;  %v153_v54 = vld [vmem:[#allocation5 + $0x180] sm:$0xff] }
  0x7e   :  { %6199 = vmatpush1.bf16.msra.mxu1 %v9367_v39  ;;  %5977 = vmatprep.subr.bf16.mxu0 %v9369_v40  ;;  %12456 = vst [vmem:[#allocation32_spill] sm:$0xff] %v9379_v52  ;;  %v159_v55 = vld [vmem:[#allocation5 + $0x1b0] sm:$0xff]  ;;  %v9384_v57 = vpack.c.bf16 %v162_v50, %v156_v49  ;;  %v161_v58 = vld [vmem:[#allocation5 + $0x1c0] sm:$0xff]  ;;  %v166_v59 = vld [vmem:[#allocation5 + $0x1e8] sm:$0xff] }
  0x7f   :  { %12457 = vst [vmem:[#allocation33_spill] sm:$0xff] %v9381_v53  ;;  %v155_v56 = vld [vmem:[#allocation5 + $0x190] sm:$0xff]  ;;  %6201 = vmatprep.subr.bf16.mxu1 %v9372_v44  ;;  %v172_v60 = vld [vmem:[#allocation5 + $0x218] sm:$0xff]  ;;  %v174_v62 = vld [vmem:[#allocation5 + $0x228] sm:$0xff]  ;;  %v9387_v63 = vpack.c.bf16 %v159_v55, %v153_v54 }
  0x80   :  { %12458 = vst [vmem:[#allocation34_spill] sm:$0xff] %v9384_v57  ;;  %v168_v61 = vld [vmem:[#allocation5 + $0x1f8] sm:$0xff]  ;;  %v9391_v0 = vpack.c.bf16 %v161_v58, %v155_v56  ;;  %v9393_v1 = vpack.c.bf16 %v172_v60, %v166_v59  ;;  %v165_v2 = vld [vmem:[#allocation5 + $0x1e0] sm:$0xff]  ;;  %v171_v3 = vld [vmem:[#allocation5 + $0x210] sm:$0xff] }
  0x81   :  { %5979 = vmatpush1.bf16.msra.mxu0 %v9375_v51  ;;  %12459 = vst [vmem:[#allocation35_spill] sm:$0xff] %v9387_v63  ;;  %v167_v5 = vld [vmem:[#allocation5 + $0x1f0] sm:$0xff]  ;;  %v9396_v6 = vpack.c.bf16 %v174_v62, %v168_v61  ;;  %v173_v7 = vld [vmem:[#allocation5 + $0x220] sm:$0xff]  ;;  %v178_v10 = vld [vmem:[#allocation5 + $0x248] sm:$0xff]  ;;  %v9399_v15 = vpack.c.bf16 %v171_v3, %v165_v2 }
  0x82   :  { %6203 = vmatpush1.bf16.msra.mxu1 %v9379_v52  ;;  %5981 = vmatprep.subr.bf16.mxu0 %v9381_v53  ;;  %12460 = vst [vmem:[#allocation36_spill] sm:$0xff] %v9391_v0  ;;  %12461 = vst [vmem:[#allocation37_spill] sm:$0xff] %v9393_v1  ;;  %v184_v11 = vld [vmem:[#allocation5 + $0x278] sm:$0xff]  ;;  %v186_v14 = vld [vmem:[#allocation5 + $0x288] sm:$0xff]  ;;  %v9403_v16 = vpack.c.bf16 %v173_v7, %v167_v5 }
  0x83   :  { %6205 = vmatprep.subr.bf16.mxu1 %v9384_v57  ;;  %12462 = vst [vmem:[#allocation38_spill] sm:$0xff] %v9396_v6  ;;  %v180_v12 = vld [vmem:[#allocation5 + $0x258] sm:$0xff]  ;;  %12463 = vst [vmem:[#allocation39_spill] sm:$0xff] %v9399_v15  ;;  %v9405_v19 = vpack.c.bf16 %v184_v11, %v178_v10  ;;  %v177_v20 = vld [vmem:[#allocation5 + $0x240] sm:$0xff] }
  0x84   :  { %12464 = vst [vmem:[#allocation40_spill] sm:$0xff] %v9403_v16  ;;  %v183_v21 = vld [vmem:[#allocation5 + $0x270] sm:$0xff]  ;;  %v9408_v24 = vpack.c.bf16 %v186_v14, %v180_v12  ;;  %v185_v25 = vld [vmem:[#allocation5 + $0x280] sm:$0xff]  ;;  %v190_v28 = vld [vmem:[#allocation5 + $0x2a8] sm:$0xff] }
  0x85   :  { %5983 = vmatpush1.bf16.msra.mxu0 %v9387_v63  ;;  %12465 = vst [vmem:[#allocation41_spill] sm:$0xff] %v9405_v19  ;;  %v179_v23 = vld [vmem:[#allocation5 + $0x250] sm:$0xff]  ;;  %v196_v29 = vld [vmem:[#allocation5 + $0x2d8] sm:$0xff]  ;;  %v198_v32 = vld [vmem:[#allocation5 + $0x2e8] sm:$0xff]  ;;  %v9411_v33 = vpack.c.bf16 %v183_v21, %v177_v20 }
  0x86   :  { %6207 = vmatpush1.bf16.msra.mxu1 %v9391_v0  ;;  %5985 = vmatprep.subr.bf16.mxu0 %v9393_v1  ;;  %12466 = vst [vmem:[#allocation42_spill] sm:$0xff] %v9408_v24  ;;  %v192_v30 = vld [vmem:[#allocation5 + $0x2b8] sm:$0xff]  ;;  %v9415_v34 = vpack.c.bf16 %v185_v25, %v179_v23  ;;  %v9417_v36 = vpack.c.bf16 %v196_v29, %v190_v28  ;;  %v189_v37 = vld [vmem:[#allocation5 + $0x2a0] sm:$0xff]  ;;  %v195_v38 = vld [vmem:[#allocation5 + $0x2d0] sm:$0xff] }
  0x87   :  { %6209 = vmatprep.subr.bf16.mxu1 %v9396_v6  ;;  %12467 = vst [vmem:[#allocation43_spill] sm:$0xff] %v9411_v33  ;;  %v191_v41 = vld [vmem:[#allocation5 + $0x2b0] sm:$0xff]  ;;  %v9420_v42 = vpack.c.bf16 %v198_v32, %v192_v30  ;;  %v197_v43 = vld [vmem:[#allocation5 + $0x2e0] sm:$0xff]  ;;  %v202_v45 = vld [vmem:[#allocation5 + $0x308] sm:$0xff]  ;;  %v9423_v49 = vpack.c.bf16 %v195_v38, %v189_v37 }
  0x88   :  { %12468 = vst [vmem:[#allocation44_spill] sm:$0xff] %v9415_v34  ;;  %12469 = vst [vmem:[#allocation45_spill] sm:$0xff] %v9417_v36  ;;  %v208_v46 = vld [vmem:[#allocation5 + $0x338] sm:$0xff]  ;;  %v210_v48 = vld [vmem:[#allocation5 + $0x348] sm:$0xff]  ;;  %v9427_v50 = vpack.c.bf16 %v197_v43, %v191_v41 }
  0x89   :  { %5987 = vmatpush1.bf16.msra.mxu0 %v9399_v15  ;;  %12470 = vst [vmem:[#allocation46_spill] sm:$0xff] %v9420_v42  ;;  %v204_v47 = vld [vmem:[#allocation5 + $0x318] sm:$0xff]  ;;  %12471 = vst [vmem:[#allocation47_spill] sm:$0xff] %v9423_v49  ;;  %v9429_v54 = vpack.c.bf16 %v208_v46, %v202_v45  ;;  %v201_v55 = vld [vmem:[#allocation5 + $0x300] sm:$0xff] }
  0x8a   :  { %6211 = vmatpush1.bf16.msra.mxu1 %v9403_v16  ;;  %5989 = vmatprep.subr.bf16.mxu0 %v9405_v19  ;;  %12472 = vst [vmem:[#allocation48_spill] sm:$0xff] %v9427_v50  ;;  %v207_v56 = vld [vmem:[#allocation5 + $0x330] sm:$0xff]  ;;  %v9432_v59 = vpack.c.bf16 %v210_v48, %v204_v47  ;;  %v209_v60 = vld [vmem:[#allocation5 + $0x340] sm:$0xff]  ;;  %v214_v61 = vld [vmem:[#allocation5 + $0x368] sm:$0xff] }
  0x8b   :  { %6213 = vmatprep.subr.bf16.mxu1 %v9408_v24  ;;  %12473 = vst [vmem:[#allocation49_spill] sm:$0xff] %v9429_v54  ;;  %v203_v58 = vld [vmem:[#allocation5 + $0x310] sm:$0xff]  ;;  %v220_v62 = vld [vmem:[#allocation5 + $0x398] sm:$0xff]  ;;  %v222_v3 = vld [vmem:[#allocation5 + $0x3a8] sm:$0xff]  ;;  %v9435_v5 = vpack.c.bf16 %v207_v56, %v201_v55 }
  0x8c   :  { %12474 = vst [vmem:[#allocation50_spill] sm:$0xff] %v9432_v59  ;;  %v216_v2 = vld [vmem:[#allocation5 + $0x378] sm:$0xff]  ;;  %v9439_v7 = vpack.c.bf16 %v209_v60, %v203_v58  ;;  %v9441_v10 = vpack.c.bf16 %v220_v62, %v214_v61  ;;  %v213_v11 = vld [vmem:[#allocation5 + $0x360] sm:$0xff]  ;;  %v219_v12 = vld [vmem:[#allocation5 + $0x390] sm:$0xff] }
  0x8d   :  { %5991 = vmatpush1.bf16.msra.mxu0 %v9411_v33  ;;  %12475 = vst [vmem:[#allocation51_spill] sm:$0xff] %v9435_v5  ;;  %v215_v14 = vld [vmem:[#allocation5 + $0x370] sm:$0xff]  ;;  %v9444_v20 = vpack.c.bf16 %v222_v3, %v216_v2  ;;  %v221_v21 = vld [vmem:[#allocation5 + $0x3a0] sm:$0xff]  ;;  %v226_v23 = vld [vmem:[#allocation5 + $0x3c8] sm:$0xff]  ;;  %v9447_v30 = vpack.c.bf16 %v219_v12, %v213_v11 }
  0x8e   :  { %6215 = vmatpush1.bf16.msra.mxu1 %v9415_v34  ;;  %5993 = vmatprep.subr.bf16.mxu0 %v9417_v36  ;;  %12476 = vst [vmem:[#allocation52_spill] sm:$0xff] %v9439_v7  ;;  %12477 = vst [vmem:[#allocation53_spill] sm:$0xff] %v9441_v10  ;;  %v232_v25 = vld [vmem:[#allocation5 + $0x3f8] sm:$0xff]  ;;  %v234_v29 = vld [vmem:[#allocation5 + $0x408] sm:$0xff]  ;;  %v9451_v32 = vpack.c.bf16 %v221_v21, %v215_v14 }
  0x8f   :  { %6217 = vmatprep.subr.bf16.mxu1 %v9420_v42  ;;  %12478 = vst [vmem:[#allocation54_spill] sm:$0xff] %v9444_v20  ;;  %v228_v28 = vld [vmem:[#allocation5 + $0x3d8] sm:$0xff]  ;;  %12479 = vst [vmem:[#allocation55_spill] sm:$0xff] %v9447_v30  ;;  %v9453_v37 = vpack.c.bf16 %v232_v25, %v226_v23  ;;  %v225_v38 = vld [vmem:[#allocation5 + $0x3c0] sm:$0xff] }
  0x90   :  { %12480 = vst [vmem:[#allocation56_spill] sm:$0xff] %v9451_v32  ;;  %v231_v41 = vld [vmem:[#allocation5 + $0x3f0] sm:$0xff]  ;;  %v9456_v45 = vpack.c.bf16 %v234_v29, %v228_v28  ;;  %v233_v46 = vld [vmem:[#allocation5 + $0x400] sm:$0xff]  ;;  %v238_v47 = vld [vmem:[#allocation5 + $0x428] sm:$0xff] }
  0x91   :  { %5995 = vmatpush1.bf16.msra.mxu0 %v9423_v49  ;;  %12481 = vst [vmem:[#allocation57_spill] sm:$0xff] %v9453_v37  ;;  %v227_v43 = vld [vmem:[#allocation5 + $0x3d0] sm:$0xff]  ;;  %v244_v48 = vld [vmem:[#allocation5 + $0x458] sm:$0xff]  ;;  %v246_v56 = vld [vmem:[#allocation5 + $0x468] sm:$0xff]  ;;  %v9459_v58 = vpack.c.bf16 %v231_v41, %v225_v38 }
  0x92   :  { %6219 = vmatpush1.bf16.msra.mxu1 %v9427_v50  ;;  %5997 = vmatprep.subr.bf16.mxu0 %v9429_v54  ;;  %12482 = vst [vmem:[#allocation58_spill] sm:$0xff] %v9456_v45  ;;  %v240_v55 = vld [vmem:[#allocation5 + $0x438] sm:$0xff]  ;;  %v237_v60 = vld [vmem:[#allocation5 + $0x420] sm:$0xff]  ;;  %v9463_v61 = vpack.c.bf16 %v233_v46, %v227_v43  ;;  %v9465_v62 = vpack.c.bf16 %v244_v48, %v238_v47  ;;  %v243_v2 = vld [vmem:[#allocation5 + $0x450] sm:$0xff] }
  0x93   :  { %6221 = vmatprep.subr.bf16.mxu1 %v9432_v59  ;;  %12483 = vst [vmem:[#allocation59_spill] sm:$0xff] %v9459_v58  ;;  %v239_v3 = vld [vmem:[#allocation5 + $0x430] sm:$0xff]  ;;  %v245_v11 = vld [vmem:[#allocation5 + $0x460] sm:$0xff]  ;;  %v9468_v12 = vpack.c.bf16 %v246_v56, %v240_v55  ;;  %v250_v14 = vld [vmem:[#allocation5 + $0x488] sm:$0xff]  ;;  %v9471_v29 = vpack.c.bf16 %v243_v2, %v237_v60 }
  0x94   :  { %12484 = vst [vmem:[#allocation60_spill] sm:$0xff] %v9463_v61  ;;  %12485 = vst [vmem:[#allocation61_spill] sm:$0xff] %v9465_v62  ;;  %v256_v21 = vld [vmem:[#allocation5 + $0x4b8] sm:$0xff]  ;;  %v785_v23 = vld [vmem:[#allocation3 + $0x8] sm:$0xff]  ;;  %v9475_v38 = vpack.c.bf16 %v245_v11, %v239_v3 }
  0x95   :  { %5999 = vmatpush1.bf16.msra.mxu0 %v9435_v5  ;;  %12486 = vst [vmem:[#allocation62_spill] sm:$0xff] %v9468_v12  ;;  %v252_v25 = vld [vmem:[#allocation5 + $0x498] sm:$0xff]  ;;  %v258_v28 = vld [vmem:[#allocation5 + $0x4c8] sm:$0xff]  ;;  %910 = vmatprep.mubr.f32.mxu0 %v785_v23  ;;  %12487 = vst [vmem:[#allocation63_spill] sm:$0xff] %v9471_v29  ;;  %v9477_v41 = vpack.c.bf16 %v256_v21, %v250_v14 }
  0x96   :  { %6223 = vmatpush1.bf16.msra.mxu1 %v9439_v7  ;;  %6001 = vmatprep.subr.bf16.mxu0 %v9441_v10  ;;  %12488 = vst [vmem:[#allocation64_spill] sm:$0xff] %v9475_v38  ;;  %v249_v43 = vld [vmem:[#allocation5 + $0x480] sm:$0xff]  ;;  %v255_v46 = vld [vmem:[#allocation5 + $0x4b0] sm:$0xff]  ;;  %v9480_v48 = vpack.c.bf16 %v258_v28, %v252_v25  ;;  %v262_v56 = vld [vmem:[#allocation5 + $0x4e8] sm:$0xff] }
  0x97   :  { %6225 = vmatprep.subr.bf16.mxu1 %v9444_v20  ;;  %1194 = vmatprep.mubr.f32.mxu1 %v785_v23  ;;  %12489 = vst [vmem:[#allocation65_spill] sm:$0xff] %v9477_v41  ;;  %v251_v47 = vld [vmem:[#allocation5 + $0x490] sm:$0xff]  ;;  %v257_v55 = vld [vmem:[#allocation5 + $0x4c0] sm:$0xff]  ;;  %v268_v23 = vld [vmem:[#allocation5 + $0x518] sm:$0xff] }
  0x98   :  { %12490 = vst [vmem:[#allocation66_spill] sm:$0xff] %v9480_v48  ;;  %v264_v60 = vld [vmem:[#allocation5 + $0x4f8] sm:$0xff]  ;;  %v270_v2 = vld [vmem:[#allocation5 + $0x528] sm:$0xff]  ;;  %v9487_v3 = vpack.c.bf16 %v257_v55, %v251_v47  ;;  %v9489_v11 = vpack.c.bf16 %v268_v23, %v262_v56  ;;  %v261_v14 = vld [vmem:[#allocation5 + $0x4e0] sm:$0xff] }
  0x99   :  { %6003 = vmatpush1.bf16.msra.mxu0 %v9447_v30  ;;  %v267_v21 = vld [vmem:[#allocation5 + $0x510] sm:$0xff]  ;;  %v9492_v28 = vpack.c.bf16 %v270_v2, %v264_v60  ;;  %v273_v56 = vld [vmem:[#allocation5 + $0x540] sm:$0xff]  ;;  %v286_v20 = vld [vmem:[#allocation5 + $0x5a8] sm:$0xff] }
  0x9a   :  { %6227 = vmatpush1.bf16.msra.mxu1 %v9451_v32  ;;  %6005 = vmatprep.subr.bf16.mxu0 %v9453_v37  ;;  %12492 = vst [vmem:[#allocation68_spill] sm:$0xff] %v9487_v3  ;;  %12493 = vst [vmem:[#allocation69_spill] sm:$0xff] %v9489_v11  ;;  %v263_v25 = vld [vmem:[#allocation5 + $0x4f0] sm:$0xff]  ;;  %v280_v32 = vld [vmem:[#allocation5 + $0x578] sm:$0xff] }
  0x9b   :  { %6229 = vmatprep.subr.bf16.mxu1 %v9456_v45  ;;  %12494 = vst [vmem:[#allocation70_spill] sm:$0xff] %v9492_v28  ;;  %v274_v45 = vld [vmem:[#allocation5 + $0x548] sm:$0xff]  ;;  %v279_v23 = vld [vmem:[#allocation5 + $0x570] sm:$0xff]  ;;  %v292_v7 = vld [vmem:[#allocation5 + $0x5d8] sm:$0xff] }
  0x9c   :  { %v9501_v55 = vpack.c.bf16 %v280_v32, %v274_v45  ;;  %v275_v60 = vld [vmem:[#allocation5 + $0x550] sm:$0xff]  ;;  %v9513_v45 = vpack.c.bf16 %v292_v7, %v286_v20  ;;  %v298_v59 = vld [vmem:[#allocation5 + $0x608] sm:$0xff]  ;;  %v304_v50 = vld [vmem:[#allocation5 + $0x638] sm:$0xff] }
  0x9d   :  { %6007 = vmatpush1.bf16.msra.mxu0 %v9459_v58  ;;  %v9525_v20 = vpack.c.bf16 %v304_v50, %v298_v59  ;;  %v310_v42 = vld [vmem:[#allocation5 + $0x668] sm:$0xff]  ;;  %v316_v34 = vld [vmem:[#allocation5 + $0x698] sm:$0xff] }
  0x9e   :  { %6231 = vmatpush1.bf16.msra.mxu1 %v9463_v61  ;;  %6009 = vmatprep.subr.bf16.mxu0 %v9465_v62  ;;  %v9483_v61 = vpack.c.bf16 %v255_v46, %v249_v43  ;;  %v276_v43 = vld [vmem:[#allocation5 + $0x558] sm:$0xff]  ;;  %v282_v46 = vld [vmem:[#allocation5 + $0x588] sm:$0xff]  ;;  %12497 = vst [vmem:[#allocation73_spill] sm:$0xff] %v9501_v55  ;;  %12501 = vst [vmem:[#allocation77_spill] sm:$0xff] %v9513_v45  ;;  %v9537_v59 = vpack.c.bf16 %v316_v34, %v310_v42 }
  0x9f   :  { %6233 = vmatprep.subr.bf16.mxu1 %v9468_v12  ;;  %v269_v12 = vld [vmem:[#allocation5 + $0x520] sm:$0xff]  ;;  %v9504_v2 = vpack.c.bf16 %v282_v46, %v276_v43  ;;  %v287_v43 = vld [vmem:[#allocation5 + $0x5b0] sm:$0xff]  ;;  %12505 = vst [vmem:[#allocation81_spill] sm:$0xff] %v9525_v20  ;;  %v322_v16 = vld [vmem:[#allocation5 + $0x6c8] sm:$0xff] }
  0xa0   :  { %12491 = vst [vmem:[#allocation67_spill] sm:$0xff] %v9483_v61  ;;  %v9499_v47 = vpack.c.bf16 %v269_v12, %v263_v25  ;;  %v285_v12 = vld [vmem:[#allocation5 + $0x5a0] sm:$0xff]  ;;  %v291_v25 = vld [vmem:[#allocation5 + $0x5d0] sm:$0xff]  ;;  %12509 = vst [vmem:[#allocation85_spill] sm:$0xff] %v9537_v59 }
  0xa1   :  { %6011 = vmatpush1.bf16.msra.mxu0 %v9471_v29  ;;  %12498 = vst [vmem:[#allocation74_spill] sm:$0xff] %v9504_v2  ;;  %v328_v6 = vld [vmem:[#allocation5 + $0x6f8] sm:$0xff]  ;;  %v334_v0 = vld [vmem:[#allocation5 + $0x728] sm:$0xff] }
  0xa2   :  { %6235 = vmatpush1.bf16.msra.mxu1 %v9475_v38  ;;  %6013 = vmatprep.subr.bf16.mxu0 %v9477_v41  ;;  %v9495_v38 = vpack.c.bf16 %v267_v21, %v261_v14  ;;  %12496 = vst [vmem:[#allocation72_spill] sm:$0xff] %v9499_v47  ;;  %v288_v14 = vld [vmem:[#allocation5 + $0x5b8] sm:$0xff]  ;;  %v294_v21 = vld [vmem:[#allocation5 + $0x5e8] sm:$0xff]  ;;  %v9549_v42 = vpack.c.bf16 %v328_v6, %v322_v16 }
  0xa3   :  { %6237 = vmatprep.subr.bf16.mxu1 %v9480_v48  ;;  %v281_v48 = vld [vmem:[#allocation5 + $0x580] sm:$0xff]  ;;  %v9516_v46 = vpack.c.bf16 %v294_v21, %v288_v14  ;;  %v299_v14 = vld [vmem:[#allocation5 + $0x610] sm:$0xff]  ;;  %v346_v57 = vld [vmem:[#allocation5 + $0x788] sm:$0xff] }
  0xa4   :  { %12495 = vst [vmem:[#allocation71_spill] sm:$0xff] %v9495_v38  ;;  %v9511_v32 = vpack.c.bf16 %v281_v48, %v275_v60  ;;  %v297_v48 = vld [vmem:[#allocation5 + $0x600] sm:$0xff]  ;;  %v303_v60 = vld [vmem:[#allocation5 + $0x630] sm:$0xff]  ;;  %12513 = vst [vmem:[#allocation89_spill] sm:$0xff] %v9549_v42 }
  0xa5   :  { %6015 = vmatpush1.bf16.msra.mxu0 %v9483_v61  ;;  %12502 = vst [vmem:[#allocation78_spill] sm:$0xff] %v9516_v46  ;;  %v9531_v24 = vpack.c.bf16 %v303_v60, %v297_v48  ;;  %v324_v48 = vld [vmem:[#allocation5 + $0x6d8] sm:$0xff]  ;;  %v330_v60 = vld [vmem:[#allocation5 + $0x708] sm:$0xff] }
  0xa6   :  { %6239 = vmatpush1.bf16.msra.mxu1 %v9487_v3  ;;  %6017 = vmatprep.subr.bf16.mxu0 %v9489_v11  ;;  %v9507_v3 = vpack.c.bf16 %v279_v23, %v273_v56  ;;  %12500 = vst [vmem:[#allocation76_spill] sm:$0xff] %v9511_v32  ;;  %v300_v56 = vld [vmem:[#allocation5 + $0x618] sm:$0xff]  ;;  %v306_v23 = vld [vmem:[#allocation5 + $0x648] sm:$0xff] }
  0xa7   :  { %6241 = vmatprep.subr.bf16.mxu1 %v9492_v28  ;;  %v293_v28 = vld [vmem:[#allocation5 + $0x5e0] sm:$0xff]  ;;  %v9528_v21 = vpack.c.bf16 %v306_v23, %v300_v56  ;;  %12507 = vst [vmem:[#allocation83_spill] sm:$0xff] %v9531_v24  ;;  %v311_v56 = vld [vmem:[#allocation5 + $0x670] sm:$0xff]  ;;  %v352_v52 = vld [vmem:[#allocation5 + $0x7b8] sm:$0xff] }
  0xa8   :  { %12499 = vst [vmem:[#allocation75_spill] sm:$0xff] %v9507_v3  ;;  %v9523_v7 = vpack.c.bf16 %v293_v28, %v287_v43  ;;  %v309_v28 = vld [vmem:[#allocation5 + $0x660] sm:$0xff]  ;;  %v315_v43 = vld [vmem:[#allocation5 + $0x690] sm:$0xff]  ;;  %v358_v44 = vld [vmem:[#allocation5 + $0x7e8] sm:$0xff] }
  0xa9   :  { %6019 = vmatpush1.bf16.msra.mxu0 %v9495_v38  ;;  %12506 = vst [vmem:[#allocation82_spill] sm:$0xff] %v9528_v21  ;;  %v364_v39 = vld [vmem:[#allocation5 + $0x818] sm:$0xff]  ;;  %v370_v31 = vld [vmem:[#allocation5 + $0x848] sm:$0xff] }
  0xaa   :  { %6243 = vmatpush1.bf16.msra.mxu1 %v9499_v47  ;;  %6021 = vmatprep.subr.bf16.mxu0 %v9501_v55  ;;  %v9519_v47 = vpack.c.bf16 %v291_v25, %v285_v12  ;;  %12504 = vst [vmem:[#allocation80_spill] sm:$0xff] %v9523_v7  ;;  %v312_v12 = vld [vmem:[#allocation5 + $0x678] sm:$0xff]  ;;  %v318_v25 = vld [vmem:[#allocation5 + $0x6a8] sm:$0xff] }
  0xab   :  { %6245 = vmatprep.subr.bf16.mxu1 %v9504_v2  ;;  %v305_v2 = vld [vmem:[#allocation5 + $0x640] sm:$0xff]  ;;  %v9540_v23 = vpack.c.bf16 %v318_v25, %v312_v12  ;;  %v327_v12 = vld [vmem:[#allocation5 + $0x6f0] sm:$0xff]  ;;  %v376_v26 = vld [vmem:[#allocation5 + $0x878] sm:$0xff] }
  0xac   :  { %12503 = vst [vmem:[#allocation79_spill] sm:$0xff] %v9519_v47  ;;  %v9535_v50 = vpack.c.bf16 %v305_v2, %v299_v14  ;;  %v9543_v2 = vpack.c.bf16 %v315_v43, %v309_v28  ;;  %v321_v14 = vld [vmem:[#allocation5 + $0x6c0] sm:$0xff]  ;;  %v323_v25 = vld [vmem:[#allocation5 + $0x6d0] sm:$0xff]  ;;  %v336_v28 = vld [vmem:[#allocation5 + $0x738] sm:$0xff] }
  0xad   :  { %6023 = vmatpush1.bf16.msra.mxu0 %v9507_v3  ;;  %12510 = vst [vmem:[#allocation86_spill] sm:$0xff] %v9540_v23  ;;  %v342_v43 = vld [vmem:[#allocation5 + $0x768] sm:$0xff]  ;;  %v388_v13 = vld [vmem:[#allocation5 + $0x8d8] sm:$0xff] }
  0xae   :  { %6247 = vmatpush1.bf16.msra.mxu1 %v9511_v32  ;;  %6025 = vmatprep.subr.bf16.mxu0 %v9513_v45  ;;  %v784_v32 = vld [vmem:[#allocation3] sm:$0xff]  ;;  %12508 = vst [vmem:[#allocation84_spill] sm:$0xff] %v9535_v50  ;;  %12511 = vst [vmem:[#allocation87_spill] sm:$0xff] %v9543_v2  ;;  %v382_v18 = vld [vmem:[#allocation5 + $0x8a8] sm:$0xff] }
  0xaf   :  { %6249 = vmatprep.subr.bf16.mxu1 %v9516_v46  ;;  %v317_v46 = vld [vmem:[#allocation5 + $0x6a0] sm:$0xff]  ;;  %v390_v8 = vld [vmem:[#allocation5 + $0x8e8] sm:$0xff] }
  0xb0   :  { %v9547_v34 = vpack.c.bf16 %v317_v46, %v311_v56  ;;  %v333_v46 = vld [vmem:[#allocation5 + $0x720] sm:$0xff]  ;;  %v339_v56 = vld [vmem:[#allocation5 + $0x750] sm:$0xff] }
  0xb1   :  { %6027 = vmatpush1.bf16.msra.mxu0 %v9519_v47 }
  0xb2   :  { %6251 = vmatpush1.bf16.msra.mxu1 %v9523_v7  ;;  %6029 = vmatprep.subr.bf16.mxu0 %v9525_v20  ;;  %12512 = vst [vmem:[#allocation88_spill] sm:$0xff] %v9547_v34  ;;  %v329_v7 = vld [vmem:[#allocation5 + $0x700] sm:$0xff] }
  0xb3   :  { %6253 = vmatprep.subr.bf16.mxu1 %v9528_v21  ;;  %v9552_v21 = vpack.c.bf16 %v330_v60, %v324_v48  ;;  %v9559_v6 = vpack.c.bf16 %v329_v7, %v323_v25  ;;  %v335_v48 = vld [vmem:[#allocation5 + $0x730] sm:$0xff]  ;;  %v9564_v60 = vpack.c.bf16 %v342_v43, %v336_v28  ;;  %v9573_v7 = vpack.c.bf16 %v352_v52, %v346_v57  ;;  %v345_v25 = vld [vmem:[#allocation5 + $0x780] sm:$0xff] }
  0xb4   :  { %911 = vmatmul.mubr.f32.vlgmr.msra.gmra.mrb[0].mxu0 %v784_v32  ;;  %v347_v28 = vld [vmem:[#allocation5 + $0x790] sm:$0xff]  ;;  %v9585_v57 = vpack.c.bf16 %v364_v39, %v358_v44  ;;  %v9597_v44 = vpack.c.bf16 %v376_v26, %v370_v31  ;;  %v9609_v31 = vpack.c.bf16 %v388_v13, %v382_v18 }
  0xb5   :  { %6031 = vmatpush1.bf16.msra.mxu0 %v9531_v24  ;;  %1195 = vmatmul.mubr.f32.vlgmr.msra.gmra.mrb[0].mxu1 %v784_v32  ;;  %12514 = vst [vmem:[#allocation90_spill] sm:$0xff] %v9552_v21  ;;  %v340_v32 = vld [vmem:[#allocation5 + $0x758] sm:$0xff]  ;;  %12516 = vst [vmem:[#allocation92_spill] sm:$0xff] %v9559_v6 }
  0xb6   :  { %6255 = vmatpush1.bf16.msra.mxu1 %v9535_v50  ;;  %6033 = vmatprep.subr.bf16.mxu0 %v9537_v59  ;;  %v9555_v50 = vpack.c.bf16 %v327_v12, %v321_v14  ;;  %v9561_v16 = vpack.c.bf16 %v340_v32, %v334_v0  ;;  %12518 = vst [vmem:[#allocation94_spill] sm:$0xff] %v9564_v60  ;;  %v348_v14 = vld [vmem:[#allocation5 + $0x798] sm:$0xff]  ;;  %v354_v12 = vld [vmem:[#allocation5 + $0x7c8] sm:$0xff]  ;;  %12521 = vst [vmem:[#allocation97_spill] sm:$0xff] %v9573_v7 }
  0xb7   :  { %6257 = vmatprep.subr.bf16.mxu1 %v9540_v23  ;;  %v341_v23 = vld [vmem:[#allocation5 + $0x760] sm:$0xff]  ;;  %v351_v32 = vld [vmem:[#allocation5 + $0x7b0] sm:$0xff]  ;;  %v9576_v43 = vpack.c.bf16 %v354_v12, %v348_v14  ;;  %12525 = vst [vmem:[#allocation101_spill] sm:$0xff] %v9585_v57  ;;  %12529 = vst [vmem:[#allocation105_spill] sm:$0xff] %v9597_v44 }
  0xb8   :  { %12515 = vst [vmem:[#allocation91_spill] sm:$0xff] %v9555_v50  ;;  %12517 = vst [vmem:[#allocation93_spill] sm:$0xff] %v9561_v16  ;;  %v9571_v0 = vpack.c.bf16 %v341_v23, %v335_v48  ;;  %v357_v23 = vld [vmem:[#allocation5 + $0x7e0] sm:$0xff]  ;;  %v363_v48 = vld [vmem:[#allocation5 + $0x810] sm:$0xff] }
  0xb9   :  { %6035 = vmatpush1.bf16.msra.mxu0 %v9543_v2  ;;  %12522 = vst [vmem:[#allocation98_spill] sm:$0xff] %v9576_v43  ;;  %v359_v14 = vld [vmem:[#allocation5 + $0x7f0] sm:$0xff]  ;;  %12533 = vst [vmem:[#allocation109_spill] sm:$0xff] %v9609_v31 }
  0xba   :  { %6259 = vmatpush1.bf16.msra.mxu1 %v9547_v34  ;;  %6037 = vmatprep.subr.bf16.mxu0 %v9549_v42  ;;  %v9567_v34 = vpack.c.bf16 %v339_v56, %v333_v46  ;;  %12520 = vst [vmem:[#allocation96_spill] sm:$0xff] %v9571_v0  ;;  %v360_v46 = vld [vmem:[#allocation5 + $0x7f8] sm:$0xff]  ;;  %v366_v56 = vld [vmem:[#allocation5 + $0x828] sm:$0xff] }
  0xbb   :  { %6261 = vmatprep.subr.bf16.mxu1 %v9552_v21  ;;  %v353_v21 = vld [vmem:[#allocation5 + $0x7c0] sm:$0xff]  ;;  %v9588_v12 = vpack.c.bf16 %v366_v56, %v360_v46  ;;  %v371_v46 = vld [vmem:[#allocation5 + $0x850] sm:$0xff] }
  0xbc   :  { %12519 = vst [vmem:[#allocation95_spill] sm:$0xff] %v9567_v34  ;;  %v9583_v52 = vpack.c.bf16 %v353_v21, %v347_v28  ;;  %v369_v21 = vld [vmem:[#allocation5 + $0x840] sm:$0xff]  ;;  %v375_v28 = vld [vmem:[#allocation5 + $0x870] sm:$0xff] }
  0xbd   :  { %6039 = vmatpush1.bf16.msra.mxu0 %v9555_v50  ;;  %12526 = vst [vmem:[#allocation102_spill] sm:$0xff] %v9588_v12  ;;  %v377_v56 = vld [vmem:[#allocation5 + $0x880] sm:$0xff] }
  0xbe   :  { %6263 = vmatpush1.bf16.msra.mxu1 %v9559_v6  ;;  %6041 = vmatprep.subr.bf16.mxu0 %v9561_v16  ;;  %v9579_v6 = vpack.c.bf16 %v351_v32, %v345_v25  ;;  %12524 = vst [vmem:[#allocation100_spill] sm:$0xff] %v9583_v52  ;;  %v372_v25 = vld [vmem:[#allocation5 + $0x858] sm:$0xff]  ;;  %v378_v32 = vld [vmem:[#allocation5 + $0x888] sm:$0xff]  ;;  %v9607_v26 = vpack.c.bf16 %v377_v56, %v371_v46  ;;  %v393_v46 = vld [vmem:[#allocation5 + $0x900] sm:$0xff] }
  0xbf   :  { %6265 = vmatprep.subr.bf16.mxu1 %v9564_v60  ;;  %v365_v60 = vld [vmem:[#allocation5 + $0x820] sm:$0xff]  ;;  %v395_v56 = vld [vmem:[#allocation5 + $0x910] sm:$0xff]  ;;  %v694_v16 = vld [vmem:[#allocation5 + $0x1268] sm:$0xff] }
  0xc0   :  { %12523 = vst [vmem:[#allocation99_spill] sm:$0xff] %v9579_v6  ;;  %v9595_v39 = vpack.c.bf16 %v365_v60, %v359_v14  ;;  %v9603_v60 = vpack.c.bf16 %v375_v28, %v369_v21  ;;  %12532 = vst [vmem:[#allocation108_spill] sm:$0xff] %v9607_v26  ;;  %v381_v14 = vld [vmem:[#allocation5 + $0x8a0] sm:$0xff]  ;;  %v396_v21 = vld [vmem:[#allocation5 + $0x918] sm:$0xff] }
  0xc1   :  { %6043 = vmatpush1.bf16.msra.mxu0 %v9567_v34  ;;  %v402_v28 = vld [vmem:[#allocation5 + $0x948] sm:$0xff]  ;;  %v677_v34 = vld [vmem:[#allocation5 + $0x11e0] sm:$0xff] }
  0xc2   :  { %6267 = vmatpush1.bf16.msra.mxu1 %v9571_v0  ;;  %6045 = vmatprep.subr.bf16.mxu0 %v9573_v7  ;;  %v9591_v0 = vpack.c.bf16 %v363_v48, %v357_v23  ;;  %12528 = vst [vmem:[#allocation104_spill] sm:$0xff] %v9595_v39  ;;  %v787_v23 = vld [vmem:[#allocation3 + $0x18] sm:$0xff]  ;;  %12531 = vst [vmem:[#allocation107_spill] sm:$0xff] %v9603_v60 }
  0xc3   :  { %6269 = vmatprep.subr.bf16.mxu1 %v9576_v43  ;;  %v9600_v43 = vpack.c.bf16 %v378_v32, %v372_v25  ;;  %v384_v48 = vld [vmem:[#allocation5 + $0x8b8] sm:$0xff]  ;;  %981 = vmatprep.mubr.f32.mxu0 %v787_v23  ;;  %v387_v25 = vld [vmem:[#allocation5 + $0x8d0] sm:$0xff] }
  0xc4   :  { %12527 = vst [vmem:[#allocation103_spill] sm:$0xff] %v9591_v0  ;;  %1265 = vmatprep.mubr.f32.mxu1 %v787_v23  ;;  %v383_v32 = vld [vmem:[#allocation5 + $0x8b0] sm:$0xff]  ;;  %v389_v23 = vld [vmem:[#allocation5 + $0x8e0] sm:$0xff] }
  0xc5   :  { %6047 = vmatpush1.bf16.msra.mxu0 %v9579_v6  ;;  %12530 = vst [vmem:[#allocation106_spill] sm:$0xff] %v9600_v43  ;;  %v9619_v13 = vpack.c.bf16 %v389_v23, %v383_v32  ;;  %v405_v32 = vld [vmem:[#allocation5 + $0x960] sm:$0xff]  ;;  %v411_v23 = vld [vmem:[#allocation5 + $0x990] sm:$0xff] }
  0xc6   :  { %6271 = vmatpush1.bf16.msra.mxu1 %v9583_v52  ;;  %6049 = vmatprep.subr.bf16.mxu0 %v9585_v57  ;;  %v394_v52 = vld [vmem:[#allocation5 + $0x908] sm:$0xff]  ;;  %v520_v57 = vld [vmem:[#allocation5 + $0xcf8] sm:$0xff]  ;;  %v663_v6 = vld [vmem:[#allocation5 + $0x1170] sm:$0xff] }
  0xc7   :  { %6273 = vmatprep.subr.bf16.mxu1 %v9588_v12  ;;  %v9612_v12 = vpack.c.bf16 %v390_v8, %v384_v48  ;;  %12536 = vst [vmem:[#allocation112_spill] sm:$0xff] %v9619_v13  ;;  %v399_v8 = vld [vmem:[#allocation5 + $0x930] sm:$0xff]  ;;  %v9624_v48 = vpack.c.bf16 %v402_v28, %v396_v21 }
  0xc8   :  { %v407_v21 = vld [vmem:[#allocation5 + $0x970] sm:$0xff] }
  0xc9   :  { %6051 = vmatpush1.bf16.msra.mxu0 %v9591_v0  ;;  %12534 = vst [vmem:[#allocation110_spill] sm:$0xff] %v9612_v12  ;;  %v400_v0 = vld [vmem:[#allocation5 + $0x938] sm:$0xff]  ;;  %12538 = vst [vmem:[#allocation114_spill] sm:$0xff] %v9624_v48 }
  0xca   :  { %6275 = vmatpush1.bf16.msra.mxu1 %v9595_v39  ;;  %6053 = vmatprep.subr.bf16.mxu0 %v9597_v44  ;;  %v9615_v39 = vpack.c.bf16 %v387_v25, %v381_v14  ;;  %v9621_v18 = vpack.c.bf16 %v400_v0, %v394_v52  ;;  %v406_v44 = vld [vmem:[#allocation5 + $0x968] sm:$0xff]  ;;  %v408_v14 = vld [vmem:[#allocation5 + $0x978] sm:$0xff] }
  0xcb   :  { %6277 = vmatprep.subr.bf16.mxu1 %v9600_v43  ;;  %v401_v43 = vld [vmem:[#allocation5 + $0x940] sm:$0xff]  ;;  %v414_v25 = vld [vmem:[#allocation5 + $0x9a8] sm:$0xff] }
  0xcc   :  { %12535 = vst [vmem:[#allocation111_spill] sm:$0xff] %v9615_v39  ;;  %12537 = vst [vmem:[#allocation113_spill] sm:$0xff] %v9621_v18  ;;  %v9631_v0 = vpack.c.bf16 %v401_v43, %v395_v56  ;;  %v9636_v28 = vpack.c.bf16 %v414_v25, %v408_v14  ;;  %v423_v56 = vld [vmem:[#allocation5 + $0x9f0] sm:$0xff] }
  0xcd   :  { %6055 = vmatpush1.bf16.msra.mxu0 %v9603_v60  ;;  %v412_v60 = vld [vmem:[#allocation5 + $0x998] sm:$0xff]  ;;  %v419_v14 = vld [vmem:[#allocation5 + $0x9d0] sm:$0xff] }
  0xce   :  { %6279 = vmatpush1.bf16.msra.mxu1 %v9607_v26  ;;  %6057 = vmatprep.subr.bf16.mxu0 %v9609_v31  ;;  %v9627_v26 = vpack.c.bf16 %v399_v8, %v393_v46  ;;  %12540 = vst [vmem:[#allocation116_spill] sm:$0xff] %v9631_v0  ;;  %v9633_v52 = vpack.c.bf16 %v412_v60, %v406_v44  ;;  %12542 = vst [vmem:[#allocation118_spill] sm:$0xff] %v9636_v28  ;;  %v418_v31 = vld [vmem:[#allocation5 + $0x9c8] sm:$0xff]  ;;  %v420_v46 = vld [vmem:[#allocation5 + $0x9d8] sm:$0xff] }
  0xcf   :  { %6281 = vmatprep.subr.bf16.mxu1 %v9612_v12  ;;  %v413_v12 = vld [vmem:[#allocation5 + $0x9a0] sm:$0xff]  ;;  %v426_v8 = vld [vmem:[#allocation5 + $0xa08] sm:$0xff] }
  0xd0   :  { %12539 = vst [vmem:[#allocation115_spill] sm:$0xff] %v9627_v26  ;;  %12541 = vst [vmem:[#allocation117_spill] sm:$0xff] %v9633_v52  ;;  %v9643_v43 = vpack.c.bf16 %v413_v12, %v407_v21  ;;  %v417_v60 = vld [vmem:[#allocation5 + $0x9c0] sm:$0xff]  ;;  %v9648_v25 = vpack.c.bf16 %v426_v8, %v420_v46  ;;  %v435_v21 = vld [vmem:[#allocation5 + $0xa50] sm:$0xff] }
  0xd1   :  { %6059 = vmatpush1.bf16.msra.mxu0 %v9615_v39  ;;  %v424_v39 = vld [vmem:[#allocation5 + $0x9f8] sm:$0xff]  ;;  %v431_v46 = vld [vmem:[#allocation5 + $0xa30] sm:$0xff] }
  0xd2   :  { %6283 = vmatpush1.bf16.msra.mxu1 %v9619_v13  ;;  %6061 = vmatprep.subr.bf16.mxu0 %v9621_v18  ;;  %v9639_v13 = vpack.c.bf16 %v411_v23, %v405_v32  ;;  %12544 = vst [vmem:[#allocation120_spill] sm:$0xff] %v9643_v43  ;;  %v9645_v44 = vpack.c.bf16 %v424_v39, %v418_v31  ;;  %12546 = vst [vmem:[#allocation122_spill] sm:$0xff] %v9648_v25  ;;  %v430_v18 = vld [vmem:[#allocation5 + $0xa28] sm:$0xff]  ;;  %v432_v32 = vld [vmem:[#allocation5 + $0xa38] sm:$0xff] }
  0xd3   :  { %6285 = vmatprep.subr.bf16.mxu1 %v9624_v48  ;;  %v425_v48 = vld [vmem:[#allocation5 + $0xa00] sm:$0xff]  ;;  %v438_v23 = vld [vmem:[#allocation5 + $0xa68] sm:$0xff] }
  0xd4   :  { %12543 = vst [vmem:[#allocation119_spill] sm:$0xff] %v9639_v13  ;;  %12545 = vst [vmem:[#allocation121_spill] sm:$0xff] %v9645_v44  ;;  %v9655_v12 = vpack.c.bf16 %v425_v48, %v419_v14  ;;  %v429_v31 = vld [vmem:[#allocation5 + $0xa20] sm:$0xff]  ;;  %v9660_v8 = vpack.c.bf16 %v438_v23, %v432_v32  ;;  %v447_v14 = vld [vmem:[#allocation5 + $0xab0] sm:$0xff] }
  0xd5   :  { %6063 = vmatpush1.bf16.msra.mxu0 %v9627_v26  ;;  %v436_v26 = vld [vmem:[#allocation5 + $0xa58] sm:$0xff]  ;;  %v441_v48 = vld [vmem:[#allocation5 + $0xa80] sm:$0xff]  ;;  %v443_v32 = vld [vmem:[#allocation5 + $0xa90] sm:$0xff] }
  0xd6   :  { %6287 = vmatpush1.bf16.msra.mxu1 %v9631_v0  ;;  %6065 = vmatprep.subr.bf16.mxu0 %v9633_v52  ;;  %v9651_v0 = vpack.c.bf16 %v423_v56, %v417_v60  ;;  %12548 = vst [vmem:[#allocation124_spill] sm:$0xff] %v9655_v12  ;;  %v9657_v39 = vpack.c.bf16 %v436_v26, %v430_v18  ;;  %12550 = vst [vmem:[#allocation126_spill] sm:$0xff] %v9660_v8  ;;  %v442_v52 = vld [vmem:[#allocation5 + $0xa88] sm:$0xff]  ;;  %v444_v60 = vld [vmem:[#allocation5 + $0xa98] sm:$0xff] }
  0xd7   :  { %6289 = vmatprep.subr.bf16.mxu1 %v9636_v28  ;;  %v437_v28 = vld [vmem:[#allocation5 + $0xa60] sm:$0xff]  ;;  %v450_v56 = vld [vmem:[#allocation5 + $0xac8] sm:$0xff] }
  0xd8   :  { %12547 = vst [vmem:[#allocation123_spill] sm:$0xff] %v9651_v0  ;;  %12549 = vst [vmem:[#allocation125_spill] sm:$0xff] %v9657_v39  ;;  %v9667_v26 = vpack.c.bf16 %v437_v28, %v431_v46  ;;  %v9672_v23 = vpack.c.bf16 %v450_v56, %v444_v60  ;;  %v453_v28 = vld [vmem:[#allocation5 + $0xae0] sm:$0xff]  ;;  %v459_v46 = vld [vmem:[#allocation5 + $0xb10] sm:$0xff] }
  0xd9   :  { %6067 = vmatpush1.bf16.msra.mxu0 %v9639_v13  ;;  %v448_v13 = vld [vmem:[#allocation5 + $0xab8] sm:$0xff]  ;;  %v455_v60 = vld [vmem:[#allocation5 + $0xaf0] sm:$0xff] }
  0xda   :  { %6291 = vmatpush1.bf16.msra.mxu1 %v9643_v43  ;;  %6069 = vmatprep.subr.bf16.mxu0 %v9645_v44  ;;  %v9663_v43 = vpack.c.bf16 %v435_v21, %v429_v31  ;;  %12552 = vst [vmem:[#allocation128_spill] sm:$0xff] %v9667_v26  ;;  %v9669_v18 = vpack.c.bf16 %v448_v13, %v442_v52  ;;  %12554 = vst [vmem:[#allocation130_spill] sm:$0xff] %v9672_v23  ;;  %v454_v44 = vld [vmem:[#allocation5 + $0xae8] sm:$0xff]  ;;  %v456_v31 = vld [vmem:[#allocation5 + $0xaf8] sm:$0xff] }
  0xdb   :  { %6293 = vmatprep.subr.bf16.mxu1 %v9648_v25  ;;  %v449_v25 = vld [vmem:[#allocation5 + $0xac0] sm:$0xff]  ;;  %v462_v21 = vld [vmem:[#allocation5 + $0xb28] sm:$0xff] }
  0xdc   :  { %12551 = vst [vmem:[#allocation127_spill] sm:$0xff] %v9663_v43  ;;  %12553 = vst [vmem:[#allocation129_spill] sm:$0xff] %v9669_v18  ;;  %v9679_v13 = vpack.c.bf16 %v449_v25, %v443_v32  ;;  %v9684_v56 = vpack.c.bf16 %v462_v21, %v456_v31  ;;  %v465_v25 = vld [vmem:[#allocation5 + $0xb40] sm:$0xff]  ;;  %v471_v32 = vld [vmem:[#allocation5 + $0xb70] sm:$0xff] }
  0xdd   :  { %6071 = vmatpush1.bf16.msra.mxu0 %v9651_v0  ;;  %v460_v0 = vld [vmem:[#allocation5 + $0xb18] sm:$0xff]  ;;  %v467_v31 = vld [vmem:[#allocation5 + $0xb50] sm:$0xff] }
  0xde   :  { %6295 = vmatpush1.bf16.msra.mxu1 %v9655_v12  ;;  %6073 = vmatprep.subr.bf16.mxu0 %v9657_v39  ;;  %v9675_v12 = vpack.c.bf16 %v447_v14, %v441_v48  ;;  %12556 = vst [vmem:[#allocation132_spill] sm:$0xff] %v9679_v13  ;;  %v9681_v52 = vpack.c.bf16 %v460_v0, %v454_v44  ;;  %12558 = vst [vmem:[#allocation134_spill] sm:$0xff] %v9684_v56  ;;  %v466_v39 = vld [vmem:[#allocation5 + $0xb48] sm:$0xff]  ;;  %v468_v48 = vld [vmem:[#allocation5 + $0xb58] sm:$0xff] }
  0xdf   :  { %6297 = vmatprep.subr.bf16.mxu1 %v9660_v8  ;;  %v461_v8 = vld [vmem:[#allocation5 + $0xb20] sm:$0xff]  ;;  %v474_v14 = vld [vmem:[#allocation5 + $0xb88] sm:$0xff] }
  0xe0   :  { %12555 = vst [vmem:[#allocation131_spill] sm:$0xff] %v9675_v12  ;;  %12557 = vst [vmem:[#allocation133_spill] sm:$0xff] %v9681_v52  ;;  %v9691_v0 = vpack.c.bf16 %v461_v8, %v455_v60  ;;  %v9696_v21 = vpack.c.bf16 %v474_v14, %v468_v48  ;;  %v477_v8 = vld [vmem:[#allocation5 + $0xba0] sm:$0xff]  ;;  %v483_v60 = vld [vmem:[#allocation5 + $0xbd0] sm:$0xff] }
  0xe1   :  { %6075 = vmatpush1.bf16.msra.mxu0 %v9663_v43  ;;  %v472_v43 = vld [vmem:[#allocation5 + $0xb78] sm:$0xff]  ;;  %v479_v48 = vld [vmem:[#allocation5 + $0xbb0] sm:$0xff] }
  0xe2   :  { %6299 = vmatpush1.bf16.msra.mxu1 %v9667_v26  ;;  %6077 = vmatprep.subr.bf16.mxu0 %v9669_v18  ;;  %v9687_v26 = vpack.c.bf16 %v459_v46, %v453_v28  ;;  %12560 = vst [vmem:[#allocation136_spill] sm:$0xff] %v9691_v0  ;;  %v9693_v44 = vpack.c.bf16 %v472_v43, %v466_v39  ;;  %12562 = vst [vmem:[#allocation138_spill] sm:$0xff] %v9696_v21  ;;  %v478_v18 = vld [vmem:[#allocation5 + $0xba8] sm:$0xff]  ;;  %v480_v28 = vld [vmem:[#allocation5 + $0xbb8] sm:$0xff] }
  0xe3   :  { %6301 = vmatprep.subr.bf16.mxu1 %v9672_v23  ;;  %v473_v23 = vld [vmem:[#allocation5 + $0xb80] sm:$0xff]  ;;  %v486_v46 = vld [vmem:[#allocation5 + $0xbe8] sm:$0xff] }
  0xe4   :  { %12559 = vst [vmem:[#allocation135_spill] sm:$0xff] %v9687_v26  ;;  %12561 = vst [vmem:[#allocation137_spill] sm:$0xff] %v9693_v44  ;;  %v9703_v43 = vpack.c.bf16 %v473_v23, %v467_v31  ;;  %v9708_v14 = vpack.c.bf16 %v486_v46, %v480_v28  ;;  %v489_v23 = vld [vmem:[#allocation5 + $0xc00] sm:$0xff]  ;;  %v495_v31 = vld [vmem:[#allocation5 + $0xc30] sm:$0xff] }
  0xe5   :  { %6079 = vmatpush1.bf16.msra.mxu0 %v9675_v12  ;;  %v484_v12 = vld [vmem:[#allocation5 + $0xbd8] sm:$0xff]  ;;  %v491_v28 = vld [vmem:[#allocation5 + $0xc10] sm:$0xff] }
  0xe6   :  { %6303 = vmatpush1.bf16.msra.mxu1 %v9679_v13  ;;  %6081 = vmatprep.subr.bf16.mxu0 %v9681_v52  ;;  %v9699_v13 = vpack.c.bf16 %v471_v32, %v465_v25  ;;  %12564 = vst [vmem:[#allocation140_spill] sm:$0xff] %v9703_v43  ;;  %v9705_v39 = vpack.c.bf16 %v484_v12, %v478_v18  ;;  %12566 = vst [vmem:[#allocation142_spill] sm:$0xff] %v9708_v14  ;;  %v490_v52 = vld [vmem:[#allocation5 + $0xc08] sm:$0xff]  ;;  %v492_v25 = vld [vmem:[#allocation5 + $0xc18] sm:$0xff] }
  0xe7   :  { %6305 = vmatprep.subr.bf16.mxu1 %v9684_v56  ;;  %v485_v56 = vld [vmem:[#allocation5 + $0xbe0] sm:$0xff]  ;;  %v498_v32 = vld [vmem:[#allocation5 + $0xc48] sm:$0xff] }
  0xe8   :  { %12563 = vst [vmem:[#allocation139_spill] sm:$0xff] %v9699_v13  ;;  %12565 = vst [vmem:[#allocation141_spill] sm:$0xff] %v9705_v39  ;;  %v9715_v12 = vpack.c.bf16 %v485_v56, %v479_v48  ;;  %v9720_v46 = vpack.c.bf16 %v498_v32, %v492_v25  ;;  %v501_v56 = vld [vmem:[#allocation5 + $0xc60] sm:$0xff]  ;;  %v507_v48 = vld [vmem:[#allocation5 + $0xc90] sm:$0xff] }
  0xe9   :  { %6083 = vmatpush1.bf16.msra.mxu0 %v9687_v26  ;;  %v496_v26 = vld [vmem:[#allocation5 + $0xc38] sm:$0xff]  ;;  %v503_v25 = vld [vmem:[#allocation5 + $0xc70] sm:$0xff] }
  0xea   :  { %6307 = vmatpush1.bf16.msra.mxu1 %v9691_v0  ;;  %6085 = vmatprep.subr.bf16.mxu0 %v9693_v44  ;;  %v9711_v0 = vpack.c.bf16 %v483_v60, %v477_v8  ;;  %12568 = vst [vmem:[#allocation144_spill] sm:$0xff] %v9715_v12  ;;  %v9717_v18 = vpack.c.bf16 %v496_v26, %v490_v52  ;;  %12570 = vst [vmem:[#allocation146_spill] sm:$0xff] %v9720_v46  ;;  %v502_v44 = vld [vmem:[#allocation5 + $0xc68] sm:$0xff]  ;;  %v504_v8 = vld [vmem:[#allocation5 + $0xc78] sm:$0xff] }
  0xeb   :  { %6309 = vmatprep.subr.bf16.mxu1 %v9696_v21  ;;  %v497_v21 = vld [vmem:[#allocation5 + $0xc40] sm:$0xff]  ;;  %v510_v60 = vld [vmem:[#allocation5 + $0xca8] sm:$0xff] }
  0xec   :  { %12567 = vst [vmem:[#allocation143_spill] sm:$0xff] %v9711_v0  ;;  %12569 = vst [vmem:[#allocation145_spill] sm:$0xff] %v9717_v18  ;;  %v9727_v26 = vpack.c.bf16 %v497_v21, %v491_v28  ;;  %v9732_v32 = vpack.c.bf16 %v510_v60, %v504_v8  ;;  %v9735_v21 = vpack.c.bf16 %v507_v48, %v501_v56  ;;  %v513_v28 = vld [vmem:[#allocation5 + $0xcc0] sm:$0xff]  ;;  %v519_v8 = vld [vmem:[#allocation5 + $0xcf0] sm:$0xff] }
  0xed   :  { %6087 = vmatpush1.bf16.msra.mxu0 %v9699_v13  ;;  %v508_v13 = vld [vmem:[#allocation5 + $0xc98] sm:$0xff]  ;;  %v515_v60 = vld [vmem:[#allocation5 + $0xcd0] sm:$0xff]  ;;  %v534_v48 = vld [vmem:[#allocation5 + $0xd68] sm:$0xff] }
  0xee   :  { %6311 = vmatpush1.bf16.msra.mxu1 %v9703_v43  ;;  %6089 = vmatprep.subr.bf16.mxu0 %v9705_v39  ;;  %v786_v43 = vld [vmem:[#allocation3 + $0x10] sm:$0xff]  ;;  %v9723_v39 = vpack.c.bf16 %v495_v31, %v489_v23  ;;  %12572 = vst [vmem:[#allocation148_spill] sm:$0xff] %v9727_v26  ;;  %v9729_v52 = vpack.c.bf16 %v508_v13, %v502_v44  ;;  %12574 = vst [vmem:[#allocation150_spill] sm:$0xff] %v9732_v32  ;;  %v516_v23 = vld [vmem:[#allocation5 + $0xcd8] sm:$0xff] }
  0xef   :  { %6313 = vmatprep.subr.bf16.mxu1 %v9708_v14  ;;  %v509_v14 = vld [vmem:[#allocation5 + $0xca0] sm:$0xff]  ;;  %v522_v31 = vld [vmem:[#allocation5 + $0xd08] sm:$0xff]  ;;  %12575 = vst [vmem:[#allocation151_spill] sm:$0xff] %v9735_v21  ;;  %v528_v56 = vld [vmem:[#allocation5 + $0xd38] sm:$0xff] }
  0xf0   :  { %12571 = vst [vmem:[#allocation147_spill] sm:$0xff] %v9723_v39  ;;  %12573 = vst [vmem:[#allocation149_spill] sm:$0xff] %v9729_v52  ;;  %v9739_v13 = vpack.c.bf16 %v509_v14, %v503_v25  ;;  %v9747_v14 = vpack.c.bf16 %v519_v8, %v513_v28  ;;  %v525_v25 = vld [vmem:[#allocation5 + $0xd20] sm:$0xff]  ;;  %v540_v28 = vld [vmem:[#allocation5 + $0xd98] sm:$0xff] }
  0xf1   :  { %6091 = vmatpush1.bf16.msra.mxu0 %v9711_v0  ;;  %v514_v0 = vld [vmem:[#allocation5 + $0xcc8] sm:$0xff] }
  0xf2   :  { %6315 = vmatpush1.bf16.msra.mxu1 %v9715_v12  ;;  %6093 = vmatprep.subr.bf16.mxu0 %v9717_v18  ;;  %v789_v12 = vld [vmem:[#allocation3 + $0x28] sm:$0xff]  ;;  %12576 = vst [vmem:[#allocation152_spill] sm:$0xff] %v9739_v13  ;;  %v9741_v44 = vpack.c.bf16 %v520_v57, %v514_v0  ;;  %v521_v18 = vld [vmem:[#allocation5 + $0xd00] sm:$0xff]  ;;  %12579 = vst [vmem:[#allocation155_spill] sm:$0xff] %v9747_v14 }
  0xf3   :  { %6317 = vmatprep.subr.bf16.mxu1 %v9720_v46  ;;  %v9744_v46 = vpack.c.bf16 %v522_v31, %v516_v23  ;;  %v9751_v57 = vpack.c.bf16 %v521_v18, %v515_v60  ;;  %v531_v23 = vld [vmem:[#allocation5 + $0xd50] sm:$0xff]  ;;  %v546_v8 = vld [vmem:[#allocation5 + $0xdc8] sm:$0xff]  ;;  %v537_v60 = vld [vmem:[#allocation5 + $0xd80] sm:$0xff] }
  0xf4   :  { %982 = vmatmul.mubr.f32.vlgmr.msra.gmra.mrb[0].mxu0 %v786_v43  ;;  %12577 = vst [vmem:[#allocation153_spill] sm:$0xff] %v9741_v44  ;;  %v527_v31 = vld [vmem:[#allocation5 + $0xd30] sm:$0xff] }
  0xf5   :  { %6095 = vmatpush1.bf16.msra.mxu0 %v9723_v39  ;;  %1266 = vmatmul.mubr.f32.vlgmr.msra.gmra.mrb[0].mxu1 %v786_v43  ;;  %12578 = vst [vmem:[#allocation154_spill] sm:$0xff] %v9744_v46  ;;  %v526_v39 = vld [vmem:[#allocation5 + $0xd28] sm:$0xff]  ;;  %v532_v43 = vld [vmem:[#allocation5 + $0xd58] sm:$0xff]  ;;  %12580 = vst [vmem:[#allocation156_spill] sm:$0xff] %v9751_v57 }
  0xf6   :  { %6319 = vmatpush1.bf16.msra.mxu1 %v9727_v26  ;;  %6097 = vmatprep.subr.bf16.mxu0 %v9729_v52  ;;  %v9753_v0 = vpack.c.bf16 %v532_v43, %v526_v39  ;;  %v538_v26 = vld [vmem:[#allocation5 + $0xd88] sm:$0xff]  ;;  %v543_v43 = vld [vmem:[#allocation5 + $0xdb0] sm:$0xff]  ;;  %v657_v52 = vld [vmem:[#allocation5 + $0x1140] sm:$0xff] }
  0xf7   :  { %6321 = vmatprep.subr.bf16.mxu1 %v9732_v32  ;;  %1052 = vmatprep.mubr.f32.mxu0 %v789_v12  ;;  %v9756_v32 = vpack.c.bf16 %v534_v48, %v528_v56  ;;  %v539_v56 = vld [vmem:[#allocation5 + $0xd90] sm:$0xff]  ;;  %v9768_v48 = vpack.c.bf16 %v546_v8, %v540_v28 }
  0xf8   :  { %1336 = vmatprep.mubr.f32.mxu1 %v789_v12  ;;  %12581 = vst [vmem:[#allocation157_spill] sm:$0xff] %v9753_v0  ;;  %v533_v12 = vld [vmem:[#allocation5 + $0xd60] sm:$0xff]  ;;  %v551_v28 = vld [vmem:[#allocation5 + $0xdf0] sm:$0xff] }
  0xf9   :  { %6099 = vmatpush1.bf16.msra.mxu0 %v9735_v21  ;;  %12582 = vst [vmem:[#allocation158_spill] sm:$0xff] %v9756_v32  ;;  %v544_v21 = vld [vmem:[#allocation5 + $0xdb8] sm:$0xff]  ;;  %v9763_v39 = vpack.c.bf16 %v533_v12, %v527_v31  ;;  %12586 = vst [vmem:[#allocation162_spill] sm:$0xff] %v9768_v48  ;;  %v549_v31 = vld [vmem:[#allocation5 + $0xde0] sm:$0xff] }
  0xfa   :  { %6323 = vmatpush1.bf16.msra.mxu1 %v9739_v13  ;;  %6101 = vmatprep.subr.bf16.mxu0 %v9741_v44  ;;  %v9759_v13 = vpack.c.bf16 %v531_v23, %v525_v25  ;;  %v9765_v18 = vpack.c.bf16 %v544_v21, %v538_v26  ;;  %v550_v44 = vld [vmem:[#allocation5 + $0xde8] sm:$0xff]  ;;  %v552_v25 = vld [vmem:[#allocation5 + $0xdf8] sm:$0xff]  ;;  %v555_v12 = vld [vmem:[#allocation5 + $0xe10] sm:$0xff] }
  0xfb   :  { %6325 = vmatprep.subr.bf16.mxu1 %v9744_v46  ;;  %12584 = vst [vmem:[#allocation160_spill] sm:$0xff] %v9763_v39  ;;  %v545_v46 = vld [vmem:[#allocation5 + $0xdc0] sm:$0xff]  ;;  %v558_v23 = vld [vmem:[#allocation5 + $0xe28] sm:$0xff] }
  0xfc   :  { %12583 = vst [vmem:[#allocation159_spill] sm:$0xff] %v9759_v13  ;;  %12585 = vst [vmem:[#allocation161_spill] sm:$0xff] %v9765_v18  ;;  %v9775_v26 = vpack.c.bf16 %v545_v46, %v539_v56  ;;  %v9780_v8 = vpack.c.bf16 %v558_v23, %v552_v25  ;;  %v567_v56 = vld [vmem:[#allocation5 + $0xe70] sm:$0xff] }
  0xfd   :  { %6103 = vmatpush1.bf16.msra.mxu0 %v9747_v14  ;;  %v556_v14 = vld [vmem:[#allocation5 + $0xe18] sm:$0xff]  ;;  %v563_v25 = vld [vmem:[#allocation5 + $0xe50] sm:$0xff] }
  0xfe   :  { %6327 = vmatpush1.bf16.msra.mxu1 %v9751_v57  ;;  %6105 = vmatprep.subr.bf16.mxu0 %v9753_v0  ;;  %v9771_v57 = vpack.c.bf16 %v543_v43, %v537_v60  ;;  %12588 = vst [vmem:[#allocation164_spill] sm:$0xff] %v9775_v26  ;;  %v9777_v21 = vpack.c.bf16 %v556_v14, %v550_v44  ;;  %12590 = vst [vmem:[#allocation166_spill] sm:$0xff] %v9780_v8  ;;  %v562_v0 = vld [vmem:[#allocation5 + $0xe48] sm:$0xff]  ;;  %v564_v60 = vld [vmem:[#allocation5 + $0xe58] sm:$0xff] }
  0xff   :  { %6329 = vmatprep.subr.bf16.mxu1 %v9756_v32  ;;  %v557_v32 = vld [vmem:[#allocation5 + $0xe20] sm:$0xff]  ;;  %v570_v43 = vld [vmem:[#allocation5 + $0xe88] sm:$0xff] }
 0x100   :  { %12587 = vst [vmem:[#allocation163_spill] sm:$0xff] %v9771_v57  ;;  %12589 = vst [vmem:[#allocation165_spill] sm:$0xff] %v9777_v21  ;;  %v9787_v46 = vpack.c.bf16 %v557_v32, %v551_v28  ;;  %v561_v14 = vld [vmem:[#allocation5 + $0xe40] sm:$0xff]  ;;  %v9792_v23 = vpack.c.bf16 %v570_v43, %v564_v60  ;;  %v579_v28 = vld [vmem:[#allocation5 + $0xed0] sm:$0xff] }
 0x101   :  { %6107 = vmatpush1.bf16.msra.mxu0 %v9759_v13  ;;  %v568_v13 = vld [vmem:[#allocation5 + $0xe78] sm:$0xff]  ;;  %v575_v60 = vld [vmem:[#allocation5 + $0xeb0] sm:$0xff] }
 0x102   :  { %6331 = vmatpush1.bf16.msra.mxu1 %v9763_v39  ;;  %6109 = vmatprep.subr.bf16.mxu0 %v9765_v18  ;;  %v9783_v39 = vpack.c.bf16 %v555_v12, %v549_v31  ;;  %12592 = vst [vmem:[#allocation168_spill] sm:$0xff] %v9787_v46  ;;  %v9789_v44 = vpack.c.bf16 %v568_v13, %v562_v0  ;;  %12594 = vst [vmem:[#allocation170_spill] sm:$0xff] %v9792_v23  ;;  %v574_v18 = vld [vmem:[#allocation5 + $0xea8] sm:$0xff]  ;;  %v576_v31 = vld [vmem:[#allocation5 + $0xeb8] sm:$0xff] }
 0x103   :  { %6333 = vmatprep.subr.bf16.mxu1 %v9768_v48  ;;  %v569_v48 = vld [vmem:[#allocation5 + $0xe80] sm:$0xff]  ;;  %v582_v12 = vld [vmem:[#allocation5 + $0xee8] sm:$0xff] }
 0x104   :  { %12591 = vst [vmem:[#allocation167_spill] sm:$0xff] %v9783_v39  ;;  %12593 = vst [vmem:[#allocation169_spill] sm:$0xff] %v9789_v44  ;;  %v9799_v32 = vpack.c.bf16 %v569_v48, %v563_v25  ;;  %v573_v0 = vld [vmem:[#allocation5 + $0xea0] sm:$0xff]  ;;  %v9804_v43 = vpack.c.bf16 %v582_v12, %v576_v31  ;;  %v591_v25 = vld [vmem:[#allocation5 + $0xf30] sm:$0xff] }
 0x105   :  { %6111 = vmatpush1.bf16.msra.mxu0 %v9771_v57  ;;  %v580_v57 = vld [vmem:[#allocation5 + $0xed8] sm:$0xff]  ;;  %v585_v48 = vld [vmem:[#allocation5 + $0xf00] sm:$0xff]  ;;  %v587_v31 = vld [vmem:[#allocation5 + $0xf10] sm:$0xff] }
 0x106   :  { %6335 = vmatpush1.bf16.msra.mxu1 %v9775_v26  ;;  %6113 = vmatprep.subr.bf16.mxu0 %v9777_v21  ;;  %v9795_v26 = vpack.c.bf16 %v567_v56, %v561_v14  ;;  %12596 = vst [vmem:[#allocation172_spill] sm:$0xff] %v9799_v32  ;;  %v9801_v13 = vpack.c.bf16 %v580_v57, %v574_v18  ;;  %12598 = vst [vmem:[#allocation174_spill] sm:$0xff] %v9804_v43  ;;  %v586_v21 = vld [vmem:[#allocation5 + $0xf08] sm:$0xff]  ;;  %v588_v14 = vld [vmem:[#allocation5 + $0xf18] sm:$0xff] }
 0x107   :  { %6337 = vmatprep.subr.bf16.mxu1 %v9780_v8  ;;  %v581_v8 = vld [vmem:[#allocation5 + $0xee0] sm:$0xff]  ;;  %v594_v56 = vld [vmem:[#allocation5 + $0xf48] sm:$0xff] }
 0x108   :  { %12595 = vst [vmem:[#allocation171_spill] sm:$0xff] %v9795_v26  ;;  %12597 = vst [vmem:[#allocation173_spill] sm:$0xff] %v9801_v13  ;;  %v9811_v57 = vpack.c.bf16 %v581_v8, %v575_v60  ;;  %v9816_v12 = vpack.c.bf16 %v594_v56, %v588_v14  ;;  %v597_v8 = vld [vmem:[#allocation5 + $0xf60] sm:$0xff]  ;;  %v603_v60 = vld [vmem:[#allocation5 + $0xf90] sm:$0xff] }
 0x109   :  { %6115 = vmatpush1.bf16.msra.mxu0 %v9783_v39  ;;  %v592_v39 = vld [vmem:[#allocation5 + $0xf38] sm:$0xff]  ;;  %v599_v14 = vld [vmem:[#allocation5 + $0xf70] sm:$0xff] }
 0x10a   :  { %6339 = vmatpush1.bf16.msra.mxu1 %v9787_v46  ;;  %6117 = vmatprep.subr.bf16.mxu0 %v9789_v44  ;;  %v9807_v46 = vpack.c.bf16 %v579_v28, %v573_v0  ;;  %12600 = vst [vmem:[#allocation176_spill] sm:$0xff] %v9811_v57  ;;  %v9813_v18 = vpack.c.bf16 %v592_v39, %v586_v21  ;;  %12602 = vst [vmem:[#allocation178_spill] sm:$0xff] %v9816_v12  ;;  %v598_v44 = vld [vmem:[#allocation5 + $0xf68] sm:$0xff]  ;;  %v600_v0 = vld [vmem:[#allocation5 + $0xf78] sm:$0xff] }
 0x10b   :  { %6341 = vmatprep.subr.bf16.mxu1 %v9792_v23  ;;  %v593_v23 = vld [vmem:[#allocation5 + $0xf40] sm:$0xff]  ;;  %v606_v28 = vld [vmem:[#allocation5 + $0xfa8] sm:$0xff] }
 0x10c   :  { %12599 = vst [vmem:[#allocation175_spill] sm:$0xff] %v9807_v46  ;;  %12601 = vst [vmem:[#allocation177_spill] sm:$0xff] %v9813_v18  ;;  %v9823_v39 = vpack.c.bf16 %v593_v23, %v587_v31  ;;  %v9828_v56 = vpack.c.bf16 %v606_v28, %v600_v0  ;;  %v609_v23 = vld [vmem:[#allocation5 + $0xfc0] sm:$0xff]  ;;  %v615_v31 = vld [vmem:[#allocation5 + $0xff0] sm:$0xff] }
 0x10d   :  { %6119 = vmatpush1.bf16.msra.mxu0 %v9795_v26  ;;  %v604_v26 = vld [vmem:[#allocation5 + $0xf98] sm:$0xff]  ;;  %v611_v0 = vld [vmem:[#allocation5 + $0xfd0] sm:$0xff] }
 0x10e   :  { %6343 = vmatpush1.bf16.msra.mxu1 %v9799_v32  ;;  %6121 = vmatprep.subr.bf16.mxu0 %v9801_v13  ;;  %v9819_v32 = vpack.c.bf16 %v591_v25, %v585_v48  ;;  %12604 = vst [vmem:[#allocation180_spill] sm:$0xff] %v9823_v39  ;;  %v9825_v21 = vpack.c.bf16 %v604_v26, %v598_v44  ;;  %12606 = vst [vmem:[#allocation182_spill] sm:$0xff] %v9828_v56  ;;  %v610_v13 = vld [vmem:[#allocation5 + $0xfc8] sm:$0xff]  ;;  %v612_v48 = vld [vmem:[#allocation5 + $0xfd8] sm:$0xff] }
 0x10f   :  { %6345 = vmatprep.subr.bf16.mxu1 %v9804_v43  ;;  %v605_v43 = vld [vmem:[#allocation5 + $0xfa0] sm:$0xff]  ;;  %v618_v25 = vld [vmem:[#allocation5 + $0x1008] sm:$0xff] }
 0x110   :  { %12603 = vst [vmem:[#allocation179_spill] sm:$0xff] %v9819_v32  ;;  %12605 = vst [vmem:[#allocation181_spill] sm:$0xff] %v9825_v21  ;;  %v9835_v26 = vpack.c.bf16 %v605_v43, %v599_v14  ;;  %v9840_v28 = vpack.c.bf16 %v618_v25, %v612_v48  ;;  %v621_v43 = vld [vmem:[#allocation5 + $0x1020] sm:$0xff]  ;;  %v627_v14 = vld [vmem:[#allocation5 + $0x1050] sm:$0xff] }
 0x111   :  { %6123 = vmatpush1.bf16.msra.mxu0 %v9807_v46  ;;  %v616_v46 = vld [vmem:[#allocation5 + $0xff8] sm:$0xff]  ;;  %v623_v48 = vld [vmem:[#allocation5 + $0x1030] sm:$0xff] }
 0x112   :  { %6347 = vmatpush1.bf16.msra.mxu1 %v9811_v57  ;;  %6125 = vmatprep.subr.bf16.mxu0 %v9813_v18  ;;  %v9831_v57 = vpack.c.bf16 %v603_v60, %v597_v8  ;;  %12608 = vst [vmem:[#allocation184_spill] sm:$0xff] %v9835_v26  ;;  %v9837_v44 = vpack.c.bf16 %v616_v46, %v610_v13  ;;  %12610 = vst [vmem:[#allocation186_spill] sm:$0xff] %v9840_v28  ;;  %v622_v18 = vld [vmem:[#allocation5 + $0x1028] sm:$0xff]  ;;  %v624_v8 = vld [vmem:[#allocation5 + $0x1038] sm:$0xff] }
 0x113   :  { %6349 = vmatprep.subr.bf16.mxu1 %v9816_v12  ;;  %v617_v12 = vld [vmem:[#allocation5 + $0x1000] sm:$0xff]  ;;  %v630_v60 = vld [vmem:[#allocation5 + $0x1068] sm:$0xff] }
 0x114   :  { %12607 = vst [vmem:[#allocation183_spill] sm:$0xff] %v9831_v57  ;;  %12609 = vst [vmem:[#allocation185_spill] sm:$0xff] %v9837_v44  ;;  %v9847_v46 = vpack.c.bf16 %v617_v12, %v611_v0  ;;  %v9852_v25 = vpack.c.bf16 %v630_v60, %v624_v8  ;;  %v633_v12 = vld [vmem:[#allocation5 + $0x1080] sm:$0xff]  ;;  %v639_v0 = vld [vmem:[#allocation5 + $0x10b0] sm:$0xff] }
 0x115   :  { %6127 = vmatpush1.bf16.msra.mxu0 %v9819_v32  ;;  %v628_v32 = vld [vmem:[#allocation5 + $0x1058] sm:$0xff]  ;;  %v635_v8 = vld [vmem:[#allocation5 + $0x1090] sm:$0xff] }
 0x116   :  { %6351 = vmatpush1.bf16.msra.mxu1 %v9823_v39  ;;  %6129 = vmatprep.subr.bf16.mxu0 %v9825_v21  ;;  %v9843_v39 = vpack.c.bf16 %v615_v31, %v609_v23  ;;  %12612 = vst [vmem:[#allocation188_spill] sm:$0xff] %v9847_v46  ;;  %v9849_v13 = vpack.c.bf16 %v628_v32, %v622_v18  ;;  %12614 = vst [vmem:[#allocation190_spill] sm:$0xff] %v9852_v25  ;;  %v634_v21 = vld [vmem:[#allocation5 + $0x1088] sm:$0xff]  ;;  %v636_v23 = vld [vmem:[#allocation5 + $0x1098] sm:$0xff] }
 0x117   :  { %6353 = vmatprep.subr.bf16.mxu1 %v9828_v56  ;;  %v629_v56 = vld [vmem:[#allocation5 + $0x1060] sm:$0xff]  ;;  %v642_v31 = vld [vmem:[#allocation5 + $0x10c8] sm:$0xff] }
 0x118   :  { %12611 = vst [vmem:[#allocation187_spill] sm:$0xff] %v9843_v39  ;;  %12613 = vst [vmem:[#allocation189_spill] sm:$0xff] %v9849_v13  ;;  %v9859_v32 = vpack.c.bf16 %v629_v56, %v623_v48  ;;  %v9864_v60 = vpack.c.bf16 %v642_v31, %v636_v23  ;;  %v645_v56 = vld [vmem:[#allocation5 + $0x10e0] sm:$0xff]  ;;  %v651_v48 = vld [vmem:[#allocation5 + $0x1110] sm:$0xff] }
 0x119   :  { %6131 = vmatpush1.bf16.msra.mxu0 %v9831_v57  ;;  %v640_v57 = vld [vmem:[#allocation5 + $0x10b8] sm:$0xff]  ;;  %v647_v23 = vld [vmem:[#allocation5 + $0x10f0] sm:$0xff]  ;;  %v653_v31 = vld [vmem:[#allocation5 + $0x1120] sm:$0xff] }
 0x11a   :  { %6355 = vmatpush1.bf16.msra.mxu1 %v9835_v26  ;;  %6133 = vmatprep.subr.bf16.mxu0 %v9837_v44  ;;  %v9855_v26 = vpack.c.bf16 %v627_v14, %v621_v43  ;;  %12616 = vst [vmem:[#allocation192_spill] sm:$0xff] %v9859_v32  ;;  %v9861_v18 = vpack.c.bf16 %v640_v57, %v634_v21  ;;  %12618 = vst [vmem:[#allocation194_spill] sm:$0xff] %v9864_v60  ;;  %v646_v44 = vld [vmem:[#allocation5 + $0x10e8] sm:$0xff]  ;;  %v648_v43 = vld [vmem:[#allocation5 + $0x10f8] sm:$0xff] }
 0x11b   :  { %6357 = vmatprep.subr.bf16.mxu1 %v9840_v28  ;;  %v641_v28 = vld [vmem:[#allocation5 + $0x10c0] sm:$0xff]  ;;  %v654_v14 = vld [vmem:[#allocation5 + $0x1128] sm:$0xff] }
 0x11c   :  { %12615 = vst [vmem:[#allocation191_spill] sm:$0xff] %v9855_v26  ;;  %12617 = vst [vmem:[#allocation193_spill] sm:$0xff] %v9861_v18  ;;  %v9871_v57 = vpack.c.bf16 %v641_v28, %v635_v8  ;;  %v659_v28 = vld [vmem:[#allocation5 + $0x1150] sm:$0xff]  ;;  %v9883_v8 = vpack.c.bf16 %v653_v31, %v647_v23  ;;  %v688_v23 = vld [vmem:[#allocation5 + $0x1238] sm:$0xff] }
 0x11d   :  { %6135 = vmatpush1.bf16.msra.mxu0 %v9843_v39  ;;  %v652_v39 = vld [vmem:[#allocation5 + $0x1118] sm:$0xff] }
 0x11e   :  { %6359 = vmatpush1.bf16.msra.mxu1 %v9847_v46  ;;  %6137 = vmatprep.subr.bf16.mxu0 %v9849_v13  ;;  %v9867_v46 = vpack.c.bf16 %v639_v0, %v633_v12  ;;  %12620 = vst [vmem:[#allocation196_spill] sm:$0xff] %v9871_v57  ;;  %v9873_v21 = vpack.c.bf16 %v652_v39, %v646_v44  ;;  %v658_v13 = vld [vmem:[#allocation5 + $0x1148] sm:$0xff]  ;;  %v660_v12 = vld [vmem:[#allocation5 + $0x1158] sm:$0xff]  ;;  %v665_v39 = vld [vmem:[#allocation5 + $0x1180] sm:$0xff] }
 0x11f   :  { %6361 = vmatprep.subr.bf16.mxu1 %v9852_v25  ;;  %v9876_v25 = vpack.c.bf16 %v654_v14, %v648_v43  ;;  %v666_v0 = vld [vmem:[#allocation5 + $0x1188] sm:$0xff]  ;;  %12624 = vst [vmem:[#allocation200_spill] sm:$0xff] %v9883_v8  ;;  %v676_v14 = vld [vmem:[#allocation5 + $0x11d8] sm:$0xff] }
 0x120   :  { %12619 = vst [vmem:[#allocation195_spill] sm:$0xff] %v9867_v46  ;;  %12621 = vst [vmem:[#allocation197_spill] sm:$0xff] %v9873_v21  ;;  %v670_v44 = vld [vmem:[#allocation5 + $0x11a8] sm:$0xff]  ;;  %v9888_v7 = vpack.c.bf16 %v666_v0, %v660_v12  ;;  %v684_v31 = vld [vmem:[#allocation5 + $0x1218] sm:$0xff] }
 0x121   :  { %6139 = vmatpush1.bf16.msra.mxu0 %v9855_v26  ;;  %12622 = vst [vmem:[#allocation198_spill] sm:$0xff] %v9876_v25  ;;  %v664_v26 = vld [vmem:[#allocation5 + $0x1178] sm:$0xff]  ;;  %v690_v12 = vld [vmem:[#allocation5 + $0x1248] sm:$0xff] }
 0x122   :  { %6363 = vmatpush1.bf16.msra.mxu1 %v9859_v32  ;;  %6141 = vmatprep.subr.bf16.mxu0 %v9861_v18  ;;  %v9879_v32 = vpack.c.bf16 %v651_v48, %v645_v56  ;;  %v9885_v43 = vpack.c.bf16 %v664_v26, %v658_v13  ;;  %v678_v18 = vld [vmem:[#allocation5 + $0x11e8] sm:$0xff]  ;;  %12626 = vst [vmem:[#allocation202_spill] sm:$0xff] %v9888_v7  ;;  %v669_v56 = vld [vmem:[#allocation5 + $0x11a0] sm:$0xff]  ;;  %v675_v48 = vld [vmem:[#allocation5 + $0x11d0] sm:$0xff] }
 0x123   :  { %6365 = vmatprep.subr.bf16.mxu1 %v9864_v60  ;;  %v672_v60 = vld [vmem:[#allocation5 + $0x11b8] sm:$0xff]  ;;  %v9895_v26 = vpack.c.bf16 %v665_v39, %v659_v28  ;;  %v9897_v13 = vpack.c.bf16 %v676_v14, %v670_v44  ;;  %v9912_v44 = vpack.c.bf16 %v690_v12, %v684_v31  ;;  %v788_v14 = vld [vmem:[#allocation3 + $0x20] sm:$0xff]  ;;  %v714_v31 = vld [vmem:[#allocation5 + $0x1308] sm:$0xff] }
 0x124   :  { %12623 = vst [vmem:[#allocation199_spill] sm:$0xff] %v9879_v32  ;;  %12625 = vst [vmem:[#allocation201_spill] sm:$0xff] %v9885_v43  ;;  %v9900_v0 = vpack.c.bf16 %v678_v18, %v672_v60  ;;  %v696_v18 = vld [vmem:[#allocation5 + $0x1278] sm:$0xff]  ;;  %v702_v60 = vld [vmem:[#allocation5 + $0x12a8] sm:$0xff] }
 0x125   :  { %6143 = vmatpush1.bf16.msra.mxu0 %v9867_v46  ;;  %v9891_v46 = vpack.c.bf16 %v663_v6, %v657_v52  ;;  %12628 = vst [vmem:[#allocation204_spill] sm:$0xff] %v9895_v26  ;;  %12629 = vst [vmem:[#allocation205_spill] sm:$0xff] %v9897_v13  ;;  %v681_v6 = vld [vmem:[#allocation5 + $0x1200] sm:$0xff]  ;;  %v687_v52 = vld [vmem:[#allocation5 + $0x1230] sm:$0xff] }
 0x126   :  { %6367 = vmatpush1.bf16.msra.mxu1 %v9871_v57  ;;  %6145 = vmatprep.subr.bf16.mxu0 %v9873_v21  ;;  %v671_v57 = vld [vmem:[#allocation5 + $0x11b0] sm:$0xff]  ;;  %v682_v21 = vld [vmem:[#allocation5 + $0x1208] sm:$0xff]  ;;  %12630 = vst [vmem:[#allocation206_spill] sm:$0xff] %v9900_v0  ;;  %12634 = vst [vmem:[#allocation210_spill] sm:$0xff] %v9912_v44 }
 0x127   :  { %6369 = vmatprep.subr.bf16.mxu1 %v9876_v25  ;;  %12627 = vst [vmem:[#allocation203_spill] sm:$0xff] %v9891_v46  ;;  %v9903_v25 = vpack.c.bf16 %v675_v48, %v669_v56  ;;  %v9907_v28 = vpack.c.bf16 %v677_v34, %v671_v57  ;;  %v9909_v39 = vpack.c.bf16 %v688_v23, %v682_v21  ;;  %v693_v56 = vld [vmem:[#allocation5 + $0x1260] sm:$0xff]  ;;  %v699_v48 = vld [vmem:[#allocation5 + $0x1290] sm:$0xff]  ;;  %v712_v34 = vld [vmem:[#allocation5 + $0x12f8] sm:$0xff] }
 0x128   :  { %v708_v23 = vld [vmem:[#allocation5 + $0x12d8] sm:$0xff] }
 0x129   :  { %6147 = vmatpush1.bf16.msra.mxu0 %v9879_v32  ;;  %12631 = vst [vmem:[#allocation207_spill] sm:$0xff] %v9903_v25  ;;  %v683_v32 = vld [vmem:[#allocation5 + $0x1210] sm:$0xff]  ;;  %12632 = vst [vmem:[#allocation208_spill] sm:$0xff] %v9907_v28  ;;  %v791_v12 = vld [vmem:[#allocation3 + $0x38] sm:$0xff] }
 0x12a   :  { %6371 = vmatpush1.bf16.msra.mxu1 %v9883_v8  ;;  %6149 = vmatprep.subr.bf16.mxu0 %v9885_v43  ;;  %v689_v8 = vld [vmem:[#allocation5 + $0x1240] sm:$0xff]  ;;  %v700_v43 = vld [vmem:[#allocation5 + $0x1298] sm:$0xff]  ;;  %12633 = vst [vmem:[#allocation209_spill] sm:$0xff] %v9909_v39 }
 0x12b   :  { %6373 = vmatprep.subr.bf16.mxu1 %v9888_v7  ;;  %v9915_v7 = vpack.c.bf16 %v687_v52, %v681_v6  ;;  %v9919_v57 = vpack.c.bf16 %v689_v8, %v683_v32  ;;  %v9921_v21 = vpack.c.bf16 %v700_v43, %v694_v16  ;;  %v705_v6 = vld [vmem:[#allocation5 + $0x12c0] sm:$0xff]  ;;  %v711_v52 = vld [vmem:[#allocation5 + $0x12f0] sm:$0xff]  ;;  %v718_v16 = vld [vmem:[#allocation5 + $0x1328] sm:$0xff] }
 0x12c   :  { %v707_v32 = vld [vmem:[#allocation5 + $0x12d0] sm:$0xff]  ;;  %v713_v8 = vld [vmem:[#allocation5 + $0x1300] sm:$0xff]  ;;  %v724_v43 = vld [vmem:[#allocation5 + $0x1358] sm:$0xff] }
 0x12d   :  { %6151 = vmatpush1.bf16.msra.mxu0 %v9891_v46  ;;  %12635 = vst [vmem:[#allocation211_spill] sm:$0xff] %v9915_v7  ;;  %v701_v46 = vld [vmem:[#allocation5 + $0x12a0] sm:$0xff]  ;;  %12636 = vst [vmem:[#allocation212_spill] sm:$0xff] %v9919_v57 }
 0x12e   :  { %6375 = vmatpush1.bf16.msra.mxu1 %v9895_v26  ;;  %6153 = vmatprep.subr.bf16.mxu0 %v9897_v13  ;;  %v695_v26 = vld [vmem:[#allocation5 + $0x1270] sm:$0xff]  ;;  %v706_v13 = vld [vmem:[#allocation5 + $0x12c8] sm:$0xff]  ;;  %12637 = vst [vmem:[#allocation213_spill] sm:$0xff] %v9921_v21 }
 0x12f   :  { %6377 = vmatprep.subr.bf16.mxu1 %v9900_v0  ;;  %v9924_v0 = vpack.c.bf16 %v702_v60, %v696_v18  ;;  %v9933_v18 = vpack.c.bf16 %v712_v34, %v706_v13  ;;  %v720_v60 = vld [vmem:[#allocation5 + $0x1338] sm:$0xff]  ;;  %v730_v13 = vld [vmem:[#allocation5 + $0x1388] sm:$0xff] }
 0x130   :  { %v736_v34 = vld [vmem:[#allocation5 + $0x13b8] sm:$0xff] }
 0x131   :  { %6155 = vmatpush1.bf16.msra.mxu0 %v9903_v25  ;;  %12638 = vst [vmem:[#allocation214_spill] sm:$0xff] %v9924_v0  ;;  %12641 = vst [vmem:[#allocation217_spill] sm:$0xff] %v9933_v18  ;;  %v742_v25 = vld [vmem:[#allocation5 + $0x13e8] sm:$0xff] }
 0x132   :  { %6379 = vmatpush1.bf16.msra.mxu1 %v9907_v28  ;;  %6157 = vmatprep.subr.bf16.mxu0 %v9909_v39  ;;  %v9927_v28 = vpack.c.bf16 %v699_v48, %v693_v56  ;;  %v726_v39 = vld [vmem:[#allocation5 + $0x1368] sm:$0xff]  ;;  %v723_v56 = vld [vmem:[#allocation5 + $0x1350] sm:$0xff]  ;;  %v9941_v48 = vpack.c.bf16 %v711_v52, %v705_v6  ;;  %v729_v6 = vld [vmem:[#allocation5 + $0x1380] sm:$0xff] }
 0x133   :  { %6381 = vmatprep.subr.bf16.mxu1 %v9912_v44  ;;  %v9931_v44 = vpack.c.bf16 %v701_v46, %v695_v26  ;;  %v719_v46 = vld [vmem:[#allocation5 + $0x1330] sm:$0xff]  ;;  %v725_v26 = vld [vmem:[#allocation5 + $0x1360] sm:$0xff] }
 0x134   :  { %1053 = vmatmul.mubr.f32.vlgmr.msra.gmra.mrb[0].mxu0 %v788_v14  ;;  %12639 = vst [vmem:[#allocation215_spill] sm:$0xff] %v9927_v28  ;;  %12643 = vst [vmem:[#allocation219_spill] sm:$0xff] %v9941_v48  ;;  %v735_v52 = vld [vmem:[#allocation5 + $0x13b0] sm:$0xff] }
 0x135   :  { %6159 = vmatpush1.bf16.msra.mxu0 %v9915_v7  ;;  %1337 = vmatmul.mubr.f32.vlgmr.msra.gmra.mrb[0].mxu1 %v788_v14  ;;  %12640 = vst [vmem:[#allocation216_spill] sm:$0xff] %v9931_v44  ;;  %v9936_v7 = vpack.c.bf16 %v714_v31, %v708_v23  ;;  %v717_v14 = vld [vmem:[#allocation5 + $0x1320] sm:$0xff]  ;;  %v9945_v23 = vpack.c.bf16 %v713_v8, %v707_v32 }
 0x136   :  { %6383 = vmatpush1.bf16.msra.mxu1 %v9919_v57  ;;  %6161 = vmatprep.subr.bf16.mxu0 %v9921_v21  ;;  %v9947_v31 = vpack.c.bf16 %v724_v43, %v718_v16  ;;  %v738_v57 = vld [vmem:[#allocation5 + $0x13c8] sm:$0xff]  ;;  %v731_v21 = vld [vmem:[#allocation5 + $0x1390] sm:$0xff]  ;;  %v9957_v32 = vpack.c.bf16 %v725_v26, %v719_v46  ;;  %v9959_v8 = vpack.c.bf16 %v736_v34, %v730_v13  ;;  %v753_v34 = vld [vmem:[#allocation5 + $0x1440] sm:$0xff] }
 0x137   :  { %6385 = vmatprep.subr.bf16.mxu1 %v9924_v0  ;;  %12642 = vst [vmem:[#allocation218_spill] sm:$0xff] %v9936_v7  ;;  %5747 = vmatprep.mubr.msk.f32.mxu0 %vm823_vm0, %v791_v12  ;;  %12644 = vst [vmem:[#allocation220_spill] sm:$0xff] %v9945_v23  ;;  %v732_v0 = vld [vmem:[#allocation5 + $0x1398] sm:$0xff]  ;;  %v750_v16 = vld [vmem:[#allocation5 + $0x1428] sm:$0xff] }
 0x138   :  { %5750 = vmatprep.mubr.msk.f32.mxu1 %vm823_vm0, %v791_v12  ;;  %12645 = vst [vmem:[#allocation221_spill] sm:$0xff] %v9947_v31  ;;  %v9950_v12 = vpack.c.bf16 %v726_v39, %v720_v60  ;;  %12648 = vst [vmem:[#allocation224_spill] sm:$0xff] %v9957_v32  ;;  %v744_v39 = vld [vmem:[#allocation5 + $0x13f8] sm:$0xff]  ;;  %v9962_v43 = vpack.c.bf16 %v738_v57, %v732_v0  ;;  %v741_v60 = vld [vmem:[#allocation5 + $0x13e0] sm:$0xff] }
 0x139   :  { %6163 = vmatpush1.bf16.msra.mxu0 %v9927_v28  ;;  %v9953_v28 = vpack.c.bf16 %v723_v56, %v717_v14  ;;  %12649 = vst [vmem:[#allocation225_spill] sm:$0xff] %v9959_v8  ;;  %v747_v14 = vld [vmem:[#allocation5 + $0x1410] sm:$0xff]  ;;  %v9965_v56 = vpack.c.bf16 %v735_v52, %v729_v6  ;;  %v756_v0 = vld [vmem:[#allocation5 + $0x1458] sm:$0xff]  ;;  %v762_v57 = vld [vmem:[#allocation5 + $0x1488] sm:$0xff]  ;;  %v9974_v13 = vpack.c.bf16 %v750_v16, %v744_v39 }
 0x13a   :  { %6387 = vmatpush1.bf16.msra.mxu1 %v9931_v44  ;;  %6165 = vmatprep.subr.bf16.mxu0 %v9933_v18  ;;  %12646 = vst [vmem:[#allocation222_spill] sm:$0xff] %v9950_v12  ;;  %v737_v44 = vld [vmem:[#allocation5 + $0x13c0] sm:$0xff]  ;;  %v748_v18 = vld [vmem:[#allocation5 + $0x1418] sm:$0xff]  ;;  %12650 = vst [vmem:[#allocation226_spill] sm:$0xff] %v9962_v43  ;;  %v9977_v52 = vpack.c.bf16 %v747_v14, %v741_v60  ;;  %v9986_v39 = vpack.c.bf16 %v762_v57, %v756_v0 }
 0x13b   :  { %6389 = vmatprep.subr.bf16.mxu1 %v9936_v7  ;;  %12647 = vst [vmem:[#allocation223_spill] sm:$0xff] %v9953_v28  ;;  %12651 = vst [vmem:[#allocation227_spill] sm:$0xff] %v9965_v56  ;;  %v743_v7 = vld [vmem:[#allocation5 + $0x13f0] sm:$0xff]  ;;  %v9969_v46 = vpack.c.bf16 %v737_v44, %v731_v21  ;;  %v9971_v26 = vpack.c.bf16 %v748_v18, %v742_v25  ;;  %v768_v21 = vld [vmem:[#allocation5 + $0x14b8] sm:$0xff] }
 0x13c   :  { %12654 = vst [vmem:[#allocation230_spill] sm:$0xff] %v9974_v13  ;;  %v759_v6 = vld [vmem:[#allocation5 + $0x1470] sm:$0xff]  ;;  %12655 = vst [vmem:[#allocation231_spill] sm:$0xff] %v9977_v52  ;;  %v774_v18 = vld [vmem:[#allocation5 + $0x14e8] sm:$0xff] }
 0x13d   :  { %6167 = vmatpush1.bf16.msra.mxu0 %v9941_v48  ;;  %v754_v48 = vld [vmem:[#allocation5 + $0x1448] sm:$0xff]  ;;  %12652 = vst [vmem:[#allocation228_spill] sm:$0xff] %v9969_v46  ;;  %12653 = vst [vmem:[#allocation229_spill] sm:$0xff] %v9971_v26  ;;  %v9989_v16 = vpack.c.bf16 %v759_v6, %v753_v34  ;;  %v765_v60 = vld [vmem:[#allocation5 + $0x14a0] sm:$0xff]  ;;  %v9998_v0 = vpack.c.bf16 %v774_v18, %v768_v21 }
 0x13e   :  { %6391 = vmatpush1.bf16.msra.mxu1 %v9945_v23  ;;  %6169 = vmatprep.subr.bf16.mxu0 %v9947_v31  ;;  %v749_v23 = vld [vmem:[#allocation5 + $0x1420] sm:$0xff]  ;;  %v760_v31 = vld [vmem:[#allocation5 + $0x1478] sm:$0xff]  ;;  %12658 = vst [vmem:[#allocation234_spill] sm:$0xff] %v9986_v39  ;;  %v771_v14 = vld [vmem:[#allocation5 + $0x14d0] sm:$0xff] }
 0x13f   :  { %6393 = vmatprep.subr.bf16.mxu1 %v9950_v12  ;;  %v755_v12 = vld [vmem:[#allocation5 + $0x1450] sm:$0xff]  ;;  %v9981_v25 = vpack.c.bf16 %v749_v23, %v743_v7  ;;  %v9983_v44 = vpack.c.bf16 %v760_v31, %v754_v48  ;;  %12659 = vst [vmem:[#allocation235_spill] sm:$0xff] %v9989_v16  ;;  %v773_v31 = vld [vmem:[#allocation5 + $0x14e0] sm:$0xff]  ;;  %12662 = vst [vmem:[#allocation238_spill] sm:$0xff] %v9998_v0  ;;  %v10001_v57 = vpack.c.bf16 %v771_v14, %v765_v60 }
 0x140   :  { %v767_v23 = vld [vmem:[#allocation5 + $0x14b0] sm:$0xff]  ;;  %v778_v34 = vld [vmem:[#allocation5 + $0x1508] sm:$0xf]  ;;  %v109_v60 = vld [vmem:[#allocation5 + $0x20] sm:$0xff] }
 0x141   :  { %6171 = vmatpush1.bf16.msra.mxu0 %v9953_v28  ;;  %v766_v28 = vld [vmem:[#allocation5 + $0x14a8] sm:$0xff]  ;;  %12656 = vst [vmem:[#allocation232_spill] sm:$0xff] %v9981_v25  ;;  %12657 = vst [vmem:[#allocation233_spill] sm:$0xff] %v9983_v44  ;;  %v10005_v6 = vpack.c.bf16 %v773_v31, %v767_v23  ;;  %v779_v21 = vld [vmem:[#allocation5 + $0x1510] sm:$0xf] }
 0x142   :  { %6395 = vmatpush1.bf16.msra.mxu1 %v9957_v32  ;;  %6173 = vmatprep.subr.bf16.mxu0 %v9959_v8  ;;  %v761_v32 = vld [vmem:[#allocation5 + $0x1480] sm:$0xff]  ;;  %v772_v8 = vld [vmem:[#allocation5 + $0x14d8] sm:$0xff]  ;;  %12663 = vst [vmem:[#allocation239_spill] sm:$0xff] %v10001_v57  ;;  %v790_v18 = vld [vmem:[#allocation3 + $0x30] sm:$0xff] }
 0x143   :  { %6397 = vmatprep.subr.bf16.mxu1 %v9962_v43  ;;  %v9993_v7 = vpack.c.bf16 %v761_v32, %v755_v12  ;;  %v9995_v48 = vpack.c.bf16 %v772_v8, %v766_v28  ;;  %12664 = vst [vmem:[#allocation240_spill] sm:$0xff] %v10005_v6  ;;  %v780_v12 = vld [vmem:[#allocation5 + $0x1518] sm:$0xf]  ;;  %v110_v28 = vld [vmem:[#allocation5 + $0x28] sm:$0xff]  ;;  %v777_v8 = vld [vmem:[#allocation5 + $0x1500] sm:$0xf] }
 0x144   :  { %v116_v32 = vld [vmem:[#allocation5 + $0x58] sm:$0xff]  ;;  %v115_v14 = vld [vmem:[#allocation5 + $0x50] sm:$0xff] }
 0x145   :  { %6175 = vmatpush1.bf16.msra.mxu0 %v9965_v56  ;;  %12660 = vst [vmem:[#allocation236_spill] sm:$0xff] %v9993_v7  ;;  %12661 = vst [vmem:[#allocation237_spill] sm:$0xff] %v9995_v48  ;;  %v128_v23 = vld [vmem:[#allocation5 + $0xb8] sm:$0xff]  ;;  %v10012_v31 = vpack.c.bf16 %v116_v32, %v110_v28  ;;  %v133_v28 = vld [vmem:[#allocation5 + $0xe0] sm:$0xff] }
 0x146   :  { %6399 = vmatpush1.bf16.msra.mxu1 %v9969_v46  ;;  %6177 = vmatprep.subr.bf16.mxu0 %v9971_v26  ;;  %v140_v46 = vld [vmem:[#allocation5 + $0x118] sm:$0xff]  ;;  %v139_v32 = vld [vmem:[#allocation5 + $0x110] sm:$0xff] }
 0x147   :  { %6401 = vmatprep.subr.bf16.mxu1 %v9974_v13  ;;  %12665 = vst [vmem:[#allocation241_spill] sm:$0xff] %v10012_v31  ;;  %v127_v13 = vld [vmem:[#allocation5 + $0xb0] sm:$0xff] }
 0x148   :  { %v12712_v43 = vld [vmem:[#allocation99_spill] sm:$0xff] }
 0x149   :  { %6179 = vmatpush1.bf16.msra.mxu0 %v9977_v52 }
 0x14a   :  { %6403 = vmatpush1.bf16.msra.mxu1 %v9981_v25  ;;  %6181 = vmatprep.subr.bf16.mxu0 %v9983_v44  ;;  %v121_v25 = vld [vmem:[#allocation5 + $0x80] sm:$0xff] }
 0x14b   :  { %6405 = vmatprep.subr.bf16.mxu1 %v9986_v39  ;;  %v10014_v39 = vpack.c.bf16 %v115_v14, %v109_v60  ;;  %v158_v60 = vld [vmem:[#allocation5 + $0x1a8] sm:$0xff]  ;;  %v164_v14 = vld [vmem:[#allocation5 + $0x1d8] sm:$0xff] }
 0x14d   :  { %6183 = vmatpush1.bf16.msra.mxu0 %v9989_v16  ;;  %12666 = vst [vmem:[#allocation242_spill] sm:$0xff] %v10014_v39 }
 0x14e   :  { %6407 = vmatpush1.bf16.msra.mxu1 %v9993_v7  ;;  %6185 = vmatprep.subr.bf16.mxu0 %v9995_v48  ;;  %v122_v7 = vld [vmem:[#allocation5 + $0x88] sm:$0xff] }
 0x14f   :  { %6409 = vmatprep.subr.bf16.mxu1 %v9998_v0  ;;  %v10017_v0 = vpack.c.bf16 %v128_v23, %v122_v7 }
 0x151   :  { %6187 = vmatpush1.bf16.msra.mxu0 %v10001_v57  ;;  %12667 = vst [vmem:[#allocation243_spill] sm:$0xff] %v10017_v0 }
 0x152   :  { %6411 = vmatpush1.bf16.msra.mxu1 %v10005_v6  ;;  %5745 = vmatprep.subr.msk.mxu0 %vm827_vm1, %v778_v34  ;;  %v134_v6 = vld [vmem:[#allocation5 + $0xe8] sm:$0xff]  ;;  %v10023_v34 = vpack.c.bf16 %v127_v13, %v121_v25  ;;  %v10031_v13 = vpack.c.bf16 %v139_v32, %v133_v28  ;;  %v157_v28 = vld [vmem:[#allocation5 + $0x1a0] sm:$0xff]  ;;  %v163_v32 = vld [vmem:[#allocation5 + $0x1d0] sm:$0xff] }
 0x153   :  { %5748 = vmatprep.subr.msk.mxu1 %vm827_vm1, %v780_v12  ;;  %v1706_v12 = vld [vmem:[#allocation3 + $0x48] sm:$0xff]  ;;  %v10027_v7 = vpack.c.bf16 %v140_v46, %v134_v6  ;;  %v145_v46 = vld [vmem:[#allocation5 + $0x140] sm:$0xff]  ;;  %v151_v6 = vld [vmem:[#allocation5 + $0x170] sm:$0xff] }
 0x154   :  { %12668 = vst [vmem:[#allocation244_spill] sm:$0xff] %v10023_v34  ;;  %12670 = vst [vmem:[#allocation246_spill] sm:$0xff] %v10031_v13  ;;  %v10039_v23 = vpack.c.bf16 %v151_v6, %v145_v46  ;;  %v169_v6 = vld [vmem:[#allocation5 + $0x200] sm:$0xff] }
 0x155   :  { %5746 = vmatpush1.msk.msra.mxu0 %vm827_vm1, %v777_v8  ;;  %12669 = vst [vmem:[#allocation245_spill] sm:$0xff] %v10027_v7  ;;  %v146_v8 = vld [vmem:[#allocation5 + $0x148] sm:$0xff] }
 0x156   :  { %5749 = vmatpush1.msk.msra.mxu1 %vm827_vm1, %v779_v21  ;;  %1124 = vmatmul.mubr.f32.vlgmr.msra.gmra.mrb[0].mxu0 %v790_v18  ;;  %v152_v21 = vld [vmem:[#allocation5 + $0x178] sm:$0xff]  ;;  %12672 = vst [vmem:[#allocation248_spill] sm:$0xff] %v10039_v23 }
 0x157   :  { %1408 = vmatmul.mubr.f32.vlgmr.msra.gmra.mrb[0].mxu1 %v790_v18  ;;  %6413 = vmatprep.subr.bf16.mxu0 %v10012_v31  ;;  %v9050_v18 = vld [vmem:[#allocation3 + $0x8] sm:$0xff]  ;;  %v10035_v25 = vpack.c.bf16 %v152_v21, %v146_v8  ;;  %v176_v21 = vld [vmem:[#allocation5 + $0x238] sm:$0xff] }
 0x158   :  { %6637 = vmatprep.subr.bf16.mxu1 %v9336_v4  ;;  %6415 = vmatpush1.bf16.msra.mxu0 %v10014_v39  ;;  %v170_v8 = vld [vmem:[#allocation5 + $0x208] sm:$0xff]  ;;  %v380_v4 = vld [vmem:[#allocation5 + $0x898] sm:$0xff] }
 0x159   :  { %6639 = vmatpush1.bf16.msra.mxu1 %v9340_v9  ;;  %6417 = vmatprep.subr.bf16.mxu0 %v10017_v0  ;;  %12671 = vst [vmem:[#allocation247_spill] sm:$0xff] %v10035_v25  ;;  %v10051_v46 = vpack.c.bf16 %v176_v21, %v170_v8  ;;  %v194_v8 = vld [vmem:[#allocation5 + $0x2c8] sm:$0xff]  ;;  %v200_v21 = vld [vmem:[#allocation5 + $0x2f8] sm:$0xff] }
 0x15a   :  { %6641 = vmatprep.subr.bf16.mxu1 %v9347_v17  ;;  %1478 = vmatprep.mubr.f32.mxu0 %v9050_v18  ;;  %v10047_v18 = vpack.c.bf16 %v163_v32, %v157_v28  ;;  %v181_v32 = vld [vmem:[#allocation5 + $0x260] sm:$0xff]  ;;  %v368_v17 = vld [vmem:[#allocation5 + $0x838] sm:$0xff]  ;;  %v12708_v9 = vld [vmem:[#allocation95_spill] sm:$0xff] }
 0x15b   :  { %1780 = vmatprep.mubr.f32.mxu1 %v1706_v12  ;;  %v10043_v12 = vpack.c.bf16 %v164_v14, %v158_v60  ;;  %12675 = vst [vmem:[#allocation251_spill] sm:$0xff] %v10051_v46  ;;  %v182_v60 = vld [vmem:[#allocation5 + $0x268] sm:$0xff]  ;;  %v188_v14 = vld [vmem:[#allocation5 + $0x298] sm:$0xff] }
 0x15c   :  { %6419 = vmatpush1.bf16.msra.mxu0 %v10023_v34  ;;  %12674 = vst [vmem:[#allocation250_spill] sm:$0xff] %v10047_v18  ;;  %v10059_v28 = vpack.c.bf16 %v188_v14, %v182_v60  ;;  %v206_v60 = vld [vmem:[#allocation5 + $0x328] sm:$0xff]  ;;  %v212_v14 = vld [vmem:[#allocation5 + $0x358] sm:$0xff] }
 0x15d   :  { %6643 = vmatpush1.bf16.msra.mxu1 %v9352_v22  ;;  %6421 = vmatprep.subr.bf16.mxu0 %v10027_v7  ;;  %12673 = vst [vmem:[#allocation249_spill] sm:$0xff] %v10043_v12  ;;  %v9052_v22 = vld [vmem:[#allocation3 + $0x18] sm:$0xff] }
 0x15e   :  { %6645 = vmatprep.subr.bf16.mxu1 %v9358_v27  ;;  %12677 = vst [vmem:[#allocation253_spill] sm:$0xff] %v10059_v28  ;;  %v9051_v27 = vld [vmem:[#allocation3] sm:$0xff] }
 0x160   :  { %6423 = vmatpush1.bf16.msra.mxu0 %v10031_v13 }
 0x161   :  { %6647 = vmatpush1.bf16.msra.mxu1 %v9363_v35  ;;  %6425 = vmatprep.subr.bf16.mxu0 %v10035_v25  ;;  %v175_v35 = vld [vmem:[#allocation5 + $0x230] sm:$0xff] }
 0x162   :  { %6649 = vmatprep.subr.bf16.mxu1 %v9369_v40  ;;  %v10055_v40 = vpack.c.bf16 %v175_v35, %v169_v6  ;;  %v10067_v35 = vpack.c.bf16 %v200_v21, %v194_v8  ;;  %v193_v6 = vld [vmem:[#allocation5 + $0x2c0] sm:$0xff]  ;;  %v218_v8 = vld [vmem:[#allocation5 + $0x388] sm:$0xff]  ;;  %v224_v21 = vld [vmem:[#allocation5 + $0x3b8] sm:$0xff] }
 0x164   :  { %6427 = vmatpush1.bf16.msra.mxu0 %v10039_v23  ;;  %12676 = vst [vmem:[#allocation252_spill] sm:$0xff] %v10055_v40  ;;  %12679 = vst [vmem:[#allocation255_spill] sm:$0xff] %v10067_v35 }
 0x165   :  { %6651 = vmatpush1.bf16.msra.mxu1 %v9375_v51  ;;  %6429 = vmatprep.subr.bf16.mxu0 %v10043_v12  ;;  %v187_v51 = vld [vmem:[#allocation5 + $0x290] sm:$0xff] }
 0x166   :  { %6653 = vmatprep.subr.bf16.mxu1 %v9381_v53  ;;  %v10063_v53 = vpack.c.bf16 %v187_v51, %v181_v32  ;;  %v10075_v51 = vpack.c.bf16 %v212_v14, %v206_v60  ;;  %v205_v32 = vld [vmem:[#allocation5 + $0x320] sm:$0xff]  ;;  %v230_v60 = vld [vmem:[#allocation5 + $0x3e8] sm:$0xff]  ;;  %v236_v14 = vld [vmem:[#allocation5 + $0x418] sm:$0xff] }
 0x168   :  { %6431 = vmatpush1.bf16.msra.mxu0 %v10047_v18  ;;  %12678 = vst [vmem:[#allocation254_spill] sm:$0xff] %v10063_v53  ;;  %12681 = vst [vmem:[#allocation257_spill] sm:$0xff] %v10075_v51 }
 0x169   :  { %6655 = vmatpush1.bf16.msra.mxu1 %v9387_v63  ;;  %6433 = vmatprep.subr.bf16.mxu0 %v10051_v46  ;;  %v199_v63 = vld [vmem:[#allocation5 + $0x2f0] sm:$0xff] }
 0x16a   :  { %6657 = vmatprep.subr.bf16.mxu1 %v9393_v1  ;;  %v10071_v1 = vpack.c.bf16 %v199_v63, %v193_v6  ;;  %v10083_v63 = vpack.c.bf16 %v224_v21, %v218_v8  ;;  %v217_v6 = vld [vmem:[#allocation5 + $0x380] sm:$0xff]  ;;  %v242_v8 = vld [vmem:[#allocation5 + $0x448] sm:$0xff]  ;;  %v248_v21 = vld [vmem:[#allocation5 + $0x478] sm:$0xff] }
 0x16c   :  { %6435 = vmatpush1.bf16.msra.mxu0 %v10055_v40  ;;  %12680 = vst [vmem:[#allocation256_spill] sm:$0xff] %v10071_v1  ;;  %12683 = vst [vmem:[#allocation259_spill] sm:$0xff] %v10083_v63 }
 0x16d   :  { %6659 = vmatpush1.bf16.msra.mxu1 %v9399_v15  ;;  %6437 = vmatprep.subr.bf16.mxu0 %v10059_v28  ;;  %v211_v15 = vld [vmem:[#allocation5 + $0x350] sm:$0xff] }
 0x16e   :  { %6661 = vmatprep.subr.bf16.mxu1 %v9405_v19  ;;  %v10079_v19 = vpack.c.bf16 %v211_v15, %v205_v32  ;;  %v10091_v15 = vpack.c.bf16 %v236_v14, %v230_v60  ;;  %v229_v32 = vld [vmem:[#allocation5 + $0x3e0] sm:$0xff]  ;;  %v254_v60 = vld [vmem:[#allocation5 + $0x4a8] sm:$0xff]  ;;  %v260_v14 = vld [vmem:[#allocation5 + $0x4d8] sm:$0xff] }
 0x170   :  { %6439 = vmatpush1.bf16.msra.mxu0 %v10063_v53  ;;  %12682 = vst [vmem:[#allocation258_spill] sm:$0xff] %v10079_v19  ;;  %12685 = vst [vmem:[#allocation261_spill] sm:$0xff] %v10091_v15 }
 0x171   :  { %6663 = vmatpush1.bf16.msra.mxu1 %v9411_v33  ;;  %6441 = vmatprep.subr.bf16.mxu0 %v10067_v35  ;;  %v223_v33 = vld [vmem:[#allocation5 + $0x3b0] sm:$0xff] }
 0x172   :  { %6665 = vmatprep.subr.bf16.mxu1 %v9417_v36  ;;  %v10087_v36 = vpack.c.bf16 %v223_v33, %v217_v6  ;;  %v10099_v33 = vpack.c.bf16 %v248_v21, %v242_v8  ;;  %v241_v6 = vld [vmem:[#allocation5 + $0x440] sm:$0xff]  ;;  %v266_v8 = vld [vmem:[#allocation5 + $0x508] sm:$0xff]  ;;  %v272_v21 = vld [vmem:[#allocation5 + $0x538] sm:$0xff] }
 0x174   :  { %6443 = vmatpush1.bf16.msra.mxu0 %v10071_v1  ;;  %12684 = vst [vmem:[#allocation260_spill] sm:$0xff] %v10087_v36  ;;  %12687 = vst [vmem:[#allocation263_spill] sm:$0xff] %v10099_v33 }
 0x175   :  { %6667 = vmatpush1.bf16.msra.mxu1 %v9423_v49  ;;  %6445 = vmatprep.subr.bf16.mxu0 %v10075_v51  ;;  %v235_v49 = vld [vmem:[#allocation5 + $0x410] sm:$0xff] }
 0x176   :  { %6669 = vmatprep.subr.bf16.mxu1 %v9429_v54  ;;  %v10095_v54 = vpack.c.bf16 %v235_v49, %v229_v32  ;;  %v10107_v49 = vpack.c.bf16 %v260_v14, %v254_v60  ;;  %v253_v32 = vld [vmem:[#allocation5 + $0x4a0] sm:$0xff]  ;;  %v278_v60 = vld [vmem:[#allocation5 + $0x568] sm:$0xff]  ;;  %v284_v14 = vld [vmem:[#allocation5 + $0x598] sm:$0xff] }
 0x178   :  { %6447 = vmatpush1.bf16.msra.mxu0 %v10079_v19  ;;  %12686 = vst [vmem:[#allocation262_spill] sm:$0xff] %v10095_v54  ;;  %12689 = vst [vmem:[#allocation265_spill] sm:$0xff] %v10107_v49 }
 0x179   :  { %6671 = vmatpush1.bf16.msra.mxu1 %v9435_v5  ;;  %6449 = vmatprep.subr.bf16.mxu0 %v10083_v63  ;;  %v247_v5 = vld [vmem:[#allocation5 + $0x470] sm:$0xff] }
 0x17a   :  { %6673 = vmatprep.subr.bf16.mxu1 %v9441_v10  ;;  %v10103_v10 = vpack.c.bf16 %v247_v5, %v241_v6  ;;  %v10115_v5 = vpack.c.bf16 %v272_v21, %v266_v8  ;;  %v265_v6 = vld [vmem:[#allocation5 + $0x500] sm:$0xff]  ;;  %v290_v8 = vld [vmem:[#allocation5 + $0x5c8] sm:$0xff]  ;;  %v296_v21 = vld [vmem:[#allocation5 + $0x5f8] sm:$0xff] }
 0x17c   :  { %6451 = vmatpush1.bf16.msra.mxu0 %v10087_v36  ;;  %12688 = vst [vmem:[#allocation264_spill] sm:$0xff] %v10103_v10  ;;  %12691 = vst [vmem:[#allocation267_spill] sm:$0xff] %v10115_v5 }
 0x17d   :  { %6675 = vmatpush1.bf16.msra.mxu1 %v9447_v30  ;;  %6453 = vmatprep.subr.bf16.mxu0 %v10091_v15  ;;  %v259_v30 = vld [vmem:[#allocation5 + $0x4d0] sm:$0xff] }
 0x17e   :  { %6677 = vmatprep.subr.bf16.mxu1 %v9453_v37  ;;  %v10111_v37 = vpack.c.bf16 %v259_v30, %v253_v32  ;;  %v10123_v30 = vpack.c.bf16 %v284_v14, %v278_v60  ;;  %v277_v32 = vld [vmem:[#allocation5 + $0x560] sm:$0xff]  ;;  %v302_v60 = vld [vmem:[#allocation5 + $0x628] sm:$0xff]  ;;  %v308_v14 = vld [vmem:[#allocation5 + $0x658] sm:$0xff] }
 0x180   :  { %6455 = vmatpush1.bf16.msra.mxu0 %v10095_v54  ;;  %12690 = vst [vmem:[#allocation266_spill] sm:$0xff] %v10111_v37  ;;  %12693 = vst [vmem:[#allocation269_spill] sm:$0xff] %v10123_v30 }
 0x181   :  { %6679 = vmatpush1.bf16.msra.mxu1 %v9459_v58  ;;  %6457 = vmatprep.subr.bf16.mxu0 %v10099_v33  ;;  %v271_v58 = vld [vmem:[#allocation5 + $0x530] sm:$0xff] }
 0x182   :  { %6681 = vmatprep.subr.bf16.mxu1 %v9465_v62  ;;  %v10119_v62 = vpack.c.bf16 %v271_v58, %v265_v6  ;;  %v10131_v58 = vpack.c.bf16 %v296_v21, %v290_v8  ;;  %v289_v6 = vld [vmem:[#allocation5 + $0x5c0] sm:$0xff]  ;;  %v314_v8 = vld [vmem:[#allocation5 + $0x688] sm:$0xff]  ;;  %v320_v21 = vld [vmem:[#allocation5 + $0x6b8] sm:$0xff] }
 0x184   :  { %6459 = vmatpush1.bf16.msra.mxu0 %v10103_v10  ;;  %12692 = vst [vmem:[#allocation268_spill] sm:$0xff] %v10119_v62  ;;  %12695 = vst [vmem:[#allocation271_spill] sm:$0xff] %v10131_v58 }
 0x185   :  { %6683 = vmatpush1.bf16.msra.mxu1 %v9471_v29  ;;  %6461 = vmatprep.subr.bf16.mxu0 %v10107_v49  ;;  %v283_v29 = vld [vmem:[#allocation5 + $0x590] sm:$0xff] }
 0x186   :  { %6685 = vmatprep.subr.bf16.mxu1 %v9477_v41  ;;  %v10127_v41 = vpack.c.bf16 %v283_v29, %v277_v32  ;;  %v10139_v29 = vpack.c.bf16 %v308_v14, %v302_v60  ;;  %v301_v32 = vld [vmem:[#allocation5 + $0x620] sm:$0xff]  ;;  %v319_v14 = vld [vmem:[#allocation5 + $0x6b0] sm:$0xff] }
 0x187   :  { %v313_v60 = vld [vmem:[#allocation5 + $0x680] sm:$0xff] }
 0x188   :  { %6463 = vmatpush1.bf16.msra.mxu0 %v10111_v37  ;;  %12694 = vst [vmem:[#allocation270_spill] sm:$0xff] %v10127_v41  ;;  %12697 = vst [vmem:[#allocation273_spill] sm:$0xff] %v10139_v29 }
 0x189   :  { %6687 = vmatpush1.bf16.msra.mxu1 %v9483_v61  ;;  %6465 = vmatprep.subr.bf16.mxu0 %v10115_v5  ;;  %v295_v61 = vld [vmem:[#allocation5 + $0x5f0] sm:$0xff] }
 0x18a   :  { %6689 = vmatprep.subr.bf16.mxu1 %v9489_v11  ;;  %v10135_v11 = vpack.c.bf16 %v295_v61, %v289_v6  ;;  %v10147_v61 = vld [vmem:[#allocation3 + $0x40] sm:$0xff]  ;;  %v10149_v6 = vpack.c.bf16 %v320_v21, %v314_v8 }
 0x18b   :  { %v325_v21 = vld [vmem:[#allocation5 + $0x6e0] sm:$0xff] }
 0x18c   :  { %6467 = vmatpush1.bf16.msra.mxu0 %v10119_v62  ;;  %12696 = vst [vmem:[#allocation272_spill] sm:$0xff] %v10135_v11  ;;  %12699 = vst [vmem:[#allocation275_spill] sm:$0xff] %v10149_v6 }
 0x18d   :  { %6691 = vmatpush1.bf16.msra.mxu1 %v9495_v38  ;;  %6469 = vmatprep.subr.bf16.mxu0 %v10123_v30  ;;  %v307_v38 = vld [vmem:[#allocation5 + $0x650] sm:$0xff] }
 0x18e   :  { %6693 = vmatprep.subr.bf16.mxu1 %v9501_v55  ;;  %v10143_v55 = vpack.c.bf16 %v307_v38, %v301_v32  ;;  %v10154_v38 = vpack.c.bf16 %v319_v14, %v313_v60  ;;  %v10156_v32 = vld [vmem:[#allocation3 + $0x58] sm:$0xff]  ;;  %v343_v14 = vld [vmem:[#allocation5 + $0x770] sm:$0xff] }
 0x190   :  { %6471 = vmatpush1.bf16.msra.mxu0 %v10127_v41  ;;  %12698 = vst [vmem:[#allocation274_spill] sm:$0xff] %v10143_v55  ;;  %12700 = vst [vmem:[#allocation276_spill] sm:$0xff] %v10154_v38 }
 0x191   :  { %6695 = vmatpush1.bf16.msra.mxu1 %v9507_v3  ;;  %6473 = vmatprep.subr.bf16.mxu0 %v10131_v58  ;;  %v326_v3 = vld [vmem:[#allocation5 + $0x6e8] sm:$0xff] }
 0x192   :  { %6697 = vmatprep.subr.bf16.mxu1 %v9513_v45  ;;  %v332_v45 = vld [vmem:[#allocation5 + $0x718] sm:$0xff] }
 0x193   :  { %v10160_v8 = vpack.c.bf16 %v332_v45, %v326_v3  ;;  %v337_v45 = vld [vmem:[#allocation5 + $0x740] sm:$0xff] }
 0x194   :  { %6475 = vmatpush1.bf16.msra.mxu0 %v10135_v11 }
 0x195   :  { %6699 = vmatpush1.bf16.msra.mxu1 %v9519_v47  ;;  %6477 = vmatprep.subr.bf16.mxu0 %v10139_v29  ;;  %12701 = vst [vmem:[#allocation277_spill] sm:$0xff] %v10160_v8  ;;  %v338_v47 = vld [vmem:[#allocation5 + $0x748] sm:$0xff] }
 0x196   :  { %6701 = vmatprep.subr.bf16.mxu1 %v9525_v20  ;;  %v331_v20 = vld [vmem:[#allocation5 + $0x710] sm:$0xff] }
 0x197   :  { %1479 = vmatmul.mubr.f32.vlgmr.msra.gmra.mrb[2].mxu0 %v9051_v27  ;;  %v344_v27 = vld [vmem:[#allocation5 + $0x778] sm:$0xff]  ;;  %v10165_v60 = vpack.c.bf16 %v331_v20, %v325_v21  ;;  %v349_v21 = vld [vmem:[#allocation5 + $0x7a0] sm:$0xff] }
 0x198   :  { %6479 = vmatpush1.bf16.msra.mxu0 %v10143_v55  ;;  %1781 = vmatmul.mubr.f32.vlgmr.msra.gmra.mrb[2].mxu1 %v10147_v61  ;;  %v10169_v3 = vpack.c.bf16 %v344_v27, %v338_v47  ;;  %v12706_v47 = vld [vmem:[#allocation93_spill] sm:$0xff]  ;;  %v362_v27 = vld [vmem:[#allocation5 + $0x808] sm:$0xff] }
 0x199   :  { %6703 = vmatpush1.bf16.msra.mxu1 %v9531_v24  ;;  %6481 = vmatprep.subr.bf16.mxu0 %v10149_v6  ;;  %12702 = vst [vmem:[#allocation278_spill] sm:$0xff] %v10165_v60  ;;  %v356_v24 = vld [vmem:[#allocation5 + $0x7d8] sm:$0xff] }
 0x19a   :  { %6705 = vmatprep.subr.bf16.mxu1 %v9537_v59  ;;  %1549 = vmatprep.mubr.f32.mxu0 %v9052_v22  ;;  %12703 = vst [vmem:[#allocation279_spill] sm:$0xff] %v10169_v3  ;;  %v350_v59 = vld [vmem:[#allocation5 + $0x7a8] sm:$0xff]  ;;  %v10173_v22 = vpack.c.bf16 %v343_v14, %v337_v45  ;;  %v10185_v45 = vpack.c.bf16 %v368_v17, %v362_v27  ;;  %v361_v14 = vld [vmem:[#allocation5 + $0x800] sm:$0xff] }
 0x19b   :  { %1851 = vmatprep.mubr.f32.mxu1 %v10156_v32  ;;  %v10177_v20 = vpack.c.bf16 %v356_v24, %v350_v59  ;;  %v12710_v24 = vld [vmem:[#allocation97_spill] sm:$0xff]  ;;  %v374_v59 = vld [vmem:[#allocation5 + $0x868] sm:$0xff] }
 0x19c   :  { %6483 = vmatpush1.bf16.msra.mxu0 %v10154_v38  ;;  %12704 = vst [vmem:[#allocation280_spill] sm:$0xff] %v10173_v22  ;;  %12709 = vst [vmem:[#allocation283_spill] sm:$0xff] %v10185_v45  ;;  %v12714_v17 = vld [vmem:[#allocation101_spill] sm:$0xff]  ;;  %v386_v27 = vld [vmem:[#allocation5 + $0x8c8] sm:$0xff] }
 0x19d   :  { %6707 = vmatpush1.bf16.msra.mxu1 %v9543_v2  ;;  %6485 = vmatprep.subr.bf16.mxu0 %v10160_v8  ;;  %12705 = vst [vmem:[#allocation281_spill] sm:$0xff] %v10177_v20  ;;  %v355_v2 = vld [vmem:[#allocation5 + $0x7d0] sm:$0xff] }
 0x19e   :  { %6709 = vmatprep.subr.bf16.mxu1 %v9549_v42  ;;  %v10181_v42 = vpack.c.bf16 %v355_v2, %v349_v21  ;;  %v10193_v2 = vpack.c.bf16 %v380_v4, %v374_v59  ;;  %v373_v21 = vld [vmem:[#allocation5 + $0x860] sm:$0xff]  ;;  %v398_v59 = vld [vmem:[#allocation5 + $0x928] sm:$0xff] }
 0x19f   :  { %v12718_v4 = vld [vmem:[#allocation105_spill] sm:$0xff] }
 0x1a0   :  { %6487 = vmatpush1.bf16.msra.mxu0 %v10165_v60  ;;  %12707 = vst [vmem:[#allocation282_spill] sm:$0xff] %v10181_v42  ;;  %12713 = vst [vmem:[#allocation285_spill] sm:$0xff] %v10193_v2 }
 0x1a1   :  { %6711 = vmatpush1.bf16.msra.mxu1 %v9555_v50  ;;  %6489 = vmatprep.subr.bf16.mxu0 %v10169_v3  ;;  %v367_v50 = vld [vmem:[#allocation5 + $0x830] sm:$0xff]  ;;  %v9054_v3 = vld [vmem:[#allocation3 + $0x28] sm:$0xff] }
 0x1a2   :  { %6713 = vmatprep.subr.bf16.mxu1 %v12706_v47  ;;  %v10189_v47 = vpack.c.bf16 %v367_v50, %v361_v14  ;;  %v385_v14 = vld [vmem:[#allocation5 + $0x8c0] sm:$0xff] }
 0x1a4   :  { %6491 = vmatpush1.bf16.msra.mxu0 %v10173_v22  ;;  %12711 = vst [vmem:[#allocation284_spill] sm:$0xff] %v10189_v47  ;;  %v12716_v22 = vld [vmem:[#allocation103_spill] sm:$0xff] }
 0x1a5   :  { %6715 = vmatpush1.bf16.msra.mxu1 %v12708_v9  ;;  %6493 = vmatprep.subr.bf16.mxu0 %v10177_v20  ;;  %v379_v9 = vld [vmem:[#allocation5 + $0x890] sm:$0xff]  ;;  %v392_v20 = vld [vmem:[#allocation5 + $0x8f8] sm:$0xff] }
 0x1a6   :  { %6717 = vmatprep.subr.bf16.mxu1 %v12710_v24  ;;  %v10197_v24 = vpack.c.bf16 %v379_v9, %v373_v21  ;;  %v10201_v50 = vpack.c.bf16 %v392_v20, %v386_v27  ;;  %v397_v21 = vld [vmem:[#allocation5 + $0x920] sm:$0xff]  ;;  %v410_v27 = vld [vmem:[#allocation5 + $0x988] sm:$0xff] }
 0x1a7   :  { %v12722_v20 = vld [vmem:[#allocation109_spill] sm:$0xff] }
 0x1a8   :  { %6495 = vmatpush1.bf16.msra.mxu0 %v10181_v42  ;;  %12715 = vst [vmem:[#allocation286_spill] sm:$0xff] %v10197_v24  ;;  %12717 = vst [vmem:[#allocation287_spill] sm:$0xff] %v10201_v50  ;;  %v12720_v42 = vld [vmem:[#allocation107_spill] sm:$0xff] }
 0x1a9   :  { %6719 = vmatpush1.bf16.msra.mxu1 %v12712_v43  ;;  %6497 = vmatprep.subr.bf16.mxu0 %v10185_v45  ;;  %v391_v43 = vld [vmem:[#allocation5 + $0x8f0] sm:$0xff]  ;;  %v404_v45 = vld [vmem:[#allocation5 + $0x958] sm:$0xff] }
 0x1aa   :  { %6721 = vmatprep.subr.bf16.mxu1 %v12714_v17  ;;  %v10205_v17 = vpack.c.bf16 %v391_v43, %v385_v14  ;;  %v10209_v9 = vpack.c.bf16 %v404_v45, %v398_v59  ;;  %v409_v14 = vld [vmem:[#allocation5 + $0x980] sm:$0xff]  ;;  %v422_v59 = vld [vmem:[#allocation5 + $0x9e8] sm:$0xff] }
 0x1ab   :  { %v12726_v45 = vld [vmem:[#allocation113_spill] sm:$0xff] }
 0x1ac   :  { %6499 = vmatpush1.bf16.msra.mxu0 %v10189_v47  ;;  %12719 = vst [vmem:[#allocation288_spill] sm:$0xff] %v10205_v17  ;;  %12721 = vst [vmem:[#allocation289_spill] sm:$0xff] %v10209_v9  ;;  %v12724_v47 = vld [vmem:[#allocation111_spill] sm:$0xff] }
 0x1ad   :  { %6723 = vmatpush1.bf16.msra.mxu1 %v12716_v22  ;;  %6501 = vmatprep.subr.bf16.mxu0 %v10193_v2  ;;  %v403_v22 = vld [vmem:[#allocation5 + $0x950] sm:$0xff]  ;;  %v416_v2 = vld [vmem:[#allocation5 + $0x9b8] sm:$0xff] }
 0x1ae   :  { %6725 = vmatprep.subr.bf16.mxu1 %v12718_v4  ;;  %v10213_v4 = vpack.c.bf16 %v403_v22, %v397_v21  ;;  %v10217_v43 = vpack.c.bf16 %v416_v2, %v410_v27  ;;  %v421_v21 = vld [vmem:[#allocation5 + $0x9e0] sm:$0xff]  ;;  %v434_v27 = vld [vmem:[#allocation5 + $0xa48] sm:$0xff] }
 0x1af   :  { %v12730_v2 = vld [vmem:[#allocation117_spill] sm:$0xff] }
 0x1b0   :  { %6503 = vmatpush1.bf16.msra.mxu0 %v10197_v24  ;;  %12723 = vst [vmem:[#allocation290_spill] sm:$0xff] %v10213_v4  ;;  %12725 = vst [vmem:[#allocation291_spill] sm:$0xff] %v10217_v43  ;;  %v12728_v24 = vld [vmem:[#allocation115_spill] sm:$0xff] }
 0x1b1   :  { %6727 = vmatpush1.bf16.msra.mxu1 %v12720_v42  ;;  %6505 = vmatprep.subr.bf16.mxu0 %v10201_v50  ;;  %v415_v42 = vld [vmem:[#allocation5 + $0x9b0] sm:$0xff]  ;;  %v428_v50 = vld [vmem:[#allocation5 + $0xa18] sm:$0xff] }
 0x1b2   :  { %6729 = vmatprep.subr.bf16.mxu1 %v12722_v20  ;;  %v10221_v20 = vpack.c.bf16 %v415_v42, %v409_v14  ;;  %v10225_v22 = vpack.c.bf16 %v428_v50, %v422_v59  ;;  %v433_v14 = vld [vmem:[#allocation5 + $0xa40] sm:$0xff]  ;;  %v446_v59 = vld [vmem:[#allocation5 + $0xaa8] sm:$0xff] }
 0x1b3   :  { %v12734_v50 = vld [vmem:[#allocation121_spill] sm:$0xff] }
 0x1b4   :  { %6507 = vmatpush1.bf16.msra.mxu0 %v10205_v17  ;;  %12727 = vst [vmem:[#allocation292_spill] sm:$0xff] %v10221_v20  ;;  %12729 = vst [vmem:[#allocation293_spill] sm:$0xff] %v10225_v22  ;;  %v12732_v17 = vld [vmem:[#allocation119_spill] sm:$0xff] }
 0x1b5   :  { %6731 = vmatpush1.bf16.msra.mxu1 %v12724_v47  ;;  %6509 = vmatprep.subr.bf16.mxu0 %v10209_v9  ;;  %v427_v47 = vld [vmem:[#allocation5 + $0xa10] sm:$0xff]  ;;  %v440_v9 = vld [vmem:[#allocation5 + $0xa78] sm:$0xff] }
 0x1b6   :  { %6733 = vmatprep.subr.bf16.mxu1 %v12726_v45  ;;  %v10229_v45 = vpack.c.bf16 %v427_v47, %v421_v21  ;;  %v10233_v42 = vpack.c.bf16 %v440_v9, %v434_v27  ;;  %v445_v21 = vld [vmem:[#allocation5 + $0xaa0] sm:$0xff]  ;;  %v458_v27 = vld [vmem:[#allocation5 + $0xb08] sm:$0xff] }
 0x1b7   :  { %v12738_v9 = vld [vmem:[#allocation125_spill] sm:$0xff] }
 0x1b8   :  { %6511 = vmatpush1.bf16.msra.mxu0 %v10213_v4  ;;  %12731 = vst [vmem:[#allocation294_spill] sm:$0xff] %v10229_v45  ;;  %12733 = vst [vmem:[#allocation295_spill] sm:$0xff] %v10233_v42  ;;  %v12736_v4 = vld [vmem:[#allocation123_spill] sm:$0xff] }
 0x1b9   :  { %6735 = vmatpush1.bf16.msra.mxu1 %v12728_v24  ;;  %6513 = vmatprep.subr.bf16.mxu0 %v10217_v43  ;;  %v439_v24 = vld [vmem:[#allocation5 + $0xa70] sm:$0xff]  ;;  %v452_v43 = vld [vmem:[#allocation5 + $0xad8] sm:$0xff] }
 0x1ba   :  { %6737 = vmatprep.subr.bf16.mxu1 %v12730_v2  ;;  %v10237_v2 = vpack.c.bf16 %v439_v24, %v433_v14  ;;  %v10241_v47 = vpack.c.bf16 %v452_v43, %v446_v59  ;;  %v457_v14 = vld [vmem:[#allocation5 + $0xb00] sm:$0xff]  ;;  %v470_v59 = vld [vmem:[#allocation5 + $0xb68] sm:$0xff] }
 0x1bb   :  { %v12742_v43 = vld [vmem:[#allocation129_spill] sm:$0xff] }
 0x1bc   :  { %6515 = vmatpush1.bf16.msra.mxu0 %v10221_v20  ;;  %12735 = vst [vmem:[#allocation296_spill] sm:$0xff] %v10237_v2  ;;  %12737 = vst [vmem:[#allocation297_spill] sm:$0xff] %v10241_v47  ;;  %v12740_v20 = vld [vmem:[#allocation127_spill] sm:$0xff] }
 0x1bd   :  { %6739 = vmatpush1.bf16.msra.mxu1 %v12732_v17  ;;  %6517 = vmatprep.subr.bf16.mxu0 %v10225_v22  ;;  %v451_v17 = vld [vmem:[#allocation5 + $0xad0] sm:$0xff]  ;;  %v464_v22 = vld [vmem:[#allocation5 + $0xb38] sm:$0xff] }
 0x1be   :  { %6741 = vmatprep.subr.bf16.mxu1 %v12734_v50  ;;  %v10245_v50 = vpack.c.bf16 %v451_v17, %v445_v21  ;;  %v10249_v24 = vpack.c.bf16 %v464_v22, %v458_v27  ;;  %v469_v21 = vld [vmem:[#allocation5 + $0xb60] sm:$0xff]  ;;  %v482_v27 = vld [vmem:[#allocation5 + $0xbc8] sm:$0xff] }
 0x1bf   :  { %v12746_v22 = vld [vmem:[#allocation133_spill] sm:$0xff] }
 0x1c0   :  { %6519 = vmatpush1.bf16.msra.mxu0 %v10229_v45  ;;  %12739 = vst [vmem:[#allocation298_spill] sm:$0xff] %v10245_v50  ;;  %12741 = vst [vmem:[#allocation299_spill] sm:$0xff] %v10249_v24  ;;  %v12744_v45 = vld [vmem:[#allocation131_spill] sm:$0xff] }
 0x1c1   :  { %6743 = vmatpush1.bf16.msra.mxu1 %v12736_v4  ;;  %6521 = vmatprep.subr.bf16.mxu0 %v10233_v42  ;;  %v463_v4 = vld [vmem:[#allocation5 + $0xb30] sm:$0xff]  ;;  %v476_v42 = vld [vmem:[#allocation5 + $0xb98] sm:$0xff] }
 0x1c2   :  { %6745 = vmatprep.subr.bf16.mxu1 %v12738_v9  ;;  %v10253_v9 = vpack.c.bf16 %v463_v4, %v457_v14  ;;  %v10257_v17 = vpack.c.bf16 %v476_v42, %v470_v59  ;;  %v481_v14 = vld [vmem:[#allocation5 + $0xbc0] sm:$0xff]  ;;  %v494_v59 = vld [vmem:[#allocation5 + $0xc28] sm:$0xff] }
 0x1c3   :  { %v12750_v42 = vld [vmem:[#allocation137_spill] sm:$0xff] }
 0x1c4   :  { %6523 = vmatpush1.bf16.msra.mxu0 %v10237_v2  ;;  %12743 = vst [vmem:[#allocation300_spill] sm:$0xff] %v10253_v9  ;;  %12745 = vst [vmem:[#allocation301_spill] sm:$0xff] %v10257_v17  ;;  %v12748_v2 = vld [vmem:[#allocation135_spill] sm:$0xff] }
 0x1c5   :  { %6747 = vmatpush1.bf16.msra.mxu1 %v12740_v20  ;;  %6525 = vmatprep.subr.bf16.mxu0 %v10241_v47  ;;  %v475_v20 = vld [vmem:[#allocation5 + $0xb90] sm:$0xff]  ;;  %v488_v47 = vld [vmem:[#allocation5 + $0xbf8] sm:$0xff] }
 0x1c6   :  { %6749 = vmatprep.subr.bf16.mxu1 %v12742_v43  ;;  %v10261_v43 = vpack.c.bf16 %v475_v20, %v469_v21  ;;  %v10265_v4 = vpack.c.bf16 %v488_v47, %v482_v27  ;;  %v493_v21 = vld [vmem:[#allocation5 + $0xc20] sm:$0xff]  ;;  %v506_v27 = vld [vmem:[#allocation5 + $0xc88] sm:$0xff] }
 0x1c7   :  { %v12754_v47 = vld [vmem:[#allocation141_spill] sm:$0xff] }
 0x1c8   :  { %6527 = vmatpush1.bf16.msra.mxu0 %v10245_v50  ;;  %12747 = vst [vmem:[#allocation302_spill] sm:$0xff] %v10261_v43  ;;  %12749 = vst [vmem:[#allocation303_spill] sm:$0xff] %v10265_v4  ;;  %v12752_v50 = vld [vmem:[#allocation139_spill] sm:$0xff] }
 0x1c9   :  { %6751 = vmatpush1.bf16.msra.mxu1 %v12744_v45  ;;  %6529 = vmatprep.subr.bf16.mxu0 %v10249_v24  ;;  %v487_v45 = vld [vmem:[#allocation5 + $0xbf0] sm:$0xff]  ;;  %v500_v24 = vld [vmem:[#allocation5 + $0xc58] sm:$0xff] }
 0x1ca   :  { %6753 = vmatprep.subr.bf16.mxu1 %v12746_v22  ;;  %v10269_v22 = vpack.c.bf16 %v487_v45, %v481_v14  ;;  %v10273_v20 = vpack.c.bf16 %v500_v24, %v494_v59  ;;  %v10281_v45 = vld [vmem:[#allocation3 + $0x50] sm:$0xff]  ;;  %v505_v24 = vld [vmem:[#allocation5 + $0xc80] sm:$0xff] }
 0x1cb   :  { %12757 = vst [vmem:[#allocation307_spill] sm:$0xff] %v10281_v45  ;;  %v511_v59 = vld [vmem:[#allocation5 + $0xcb0] sm:$0xff] }
 0x1cc   :  { %6531 = vmatpush1.bf16.msra.mxu0 %v10253_v9  ;;  %12751 = vst [vmem:[#allocation304_spill] sm:$0xff] %v10269_v22  ;;  %12753 = vst [vmem:[#allocation305_spill] sm:$0xff] %v10273_v20  ;;  %v12756_v9 = vld [vmem:[#allocation143_spill] sm:$0xff] }
 0x1cd   :  { %6755 = vmatpush1.bf16.msra.mxu1 %v12748_v2  ;;  %6533 = vmatprep.subr.bf16.mxu0 %v10257_v17  ;;  %v499_v2 = vld [vmem:[#allocation5 + $0xc50] sm:$0xff]  ;;  %v512_v17 = vld [vmem:[#allocation5 + $0xcb8] sm:$0xff] }
 0x1ce   :  { %6757 = vmatprep.subr.bf16.mxu1 %v12750_v42  ;;  %v10277_v42 = vpack.c.bf16 %v499_v2, %v493_v21  ;;  %v10283_v14 = vpack.c.bf16 %v512_v17, %v506_v27  ;;  %v10288_v2 = vpack.c.bf16 %v511_v59, %v505_v24  ;;  %v10290_v21 = vld [vmem:[#allocation3 + $0x68] sm:$0xff]  ;;  %v517_v27 = vld [vmem:[#allocation5 + $0xce0] sm:$0xff] }
 0x1cf   :  { %12761 = vst [vmem:[#allocation310_spill] sm:$0xff] %v10290_v21  ;;  %v12766_v59 = vld [vmem:[#allocation151_spill] sm:$0xff] }
 0x1d0   :  { %6535 = vmatpush1.bf16.msra.mxu0 %v10261_v43  ;;  %12755 = vst [vmem:[#allocation306_spill] sm:$0xff] %v10277_v42  ;;  %12758 = vst [vmem:[#allocation308_spill] sm:$0xff] %v10283_v14  ;;  %v9053_v43 = vld [vmem:[#allocation3 + $0x10] sm:$0xff] }
 0x1d1   :  { %6759 = vmatpush1.bf16.msra.mxu1 %v12752_v50  ;;  %6537 = vmatprep.subr.bf16.mxu0 %v10265_v4  ;;  %v12759_v50 = vld [vmem:[#allocation145_spill] sm:$0xff]  ;;  %v518_v4 = vld [vmem:[#allocation5 + $0xce8] sm:$0xff]  ;;  %12760 = vst [vmem:[#allocation309_spill] sm:$0xff] %v10288_v2 }
 0x1d2   :  { %6761 = vmatprep.subr.bf16.mxu1 %v12754_v47  ;;  %v524_v47 = vld [vmem:[#allocation5 + $0xd18] sm:$0xff] }
 0x1d3   :  { %v10294_v17 = vpack.c.bf16 %v524_v47, %v518_v4  ;;  %v529_v47 = vld [vmem:[#allocation5 + $0xd40] sm:$0xff] }
 0x1d4   :  { %6539 = vmatpush1.bf16.msra.mxu0 %v10269_v22  ;;  %v530_v22 = vld [vmem:[#allocation5 + $0xd48] sm:$0xff] }
 0x1d5   :  { %6763 = vmatpush1.bf16.msra.mxu1 %v12756_v9  ;;  %6541 = vmatprep.subr.bf16.mxu0 %v10273_v20  ;;  %v12762_v9 = vld [vmem:[#allocation147_spill] sm:$0xff]  ;;  %12763 = vst [vmem:[#allocation311_spill] sm:$0xff] %v10294_v17  ;;  %v12764_v20 = vld [vmem:[#allocation149_spill] sm:$0xff] }
 0x1d6   :  { %6765 = vmatprep.subr.bf16.mxu1 %v12759_v50  ;;  %v523_v50 = vld [vmem:[#allocation5 + $0xd10] sm:$0xff] }
 0x1d7   :  { %1550 = vmatmul.mubr.f32.vlgmr.msra.gmra.mrb[2].mxu0 %v9053_v43  ;;  %v536_v43 = vld [vmem:[#allocation5 + $0xd78] sm:$0xff]  ;;  %v10299_v24 = vpack.c.bf16 %v523_v50, %v517_v27  ;;  %v541_v27 = vld [vmem:[#allocation5 + $0xda0] sm:$0xff] }
 0x1d8   :  { %6543 = vmatpush1.bf16.msra.mxu0 %v10277_v42  ;;  %1852 = vmatmul.mubr.f32.vlgmr.msra.gmra.mrb[2].mxu1 %v10281_v45  ;;  %v10303_v4 = vpack.c.bf16 %v536_v43, %v530_v22  ;;  %v548_v42 = vld [vmem:[#allocation5 + $0xdd8] sm:$0xff]  ;;  %v554_v43 = vld [vmem:[#allocation5 + $0xe08] sm:$0xff] }
 0x1d9   :  { %6767 = vmatpush1.bf16.msra.mxu1 %v12762_v9  ;;  %6545 = vmatprep.subr.bf16.mxu0 %v10283_v14  ;;  %12765 = vst [vmem:[#allocation312_spill] sm:$0xff] %v10299_v24  ;;  %v535_v9 = vld [vmem:[#allocation5 + $0xd70] sm:$0xff]  ;;  %v12768_v14 = vld [vmem:[#allocation153_spill] sm:$0xff] }
 0x1da   :  { %6769 = vmatprep.subr.bf16.mxu1 %v12764_v20  ;;  %1620 = vmatprep.mubr.f32.mxu0 %v9054_v3  ;;  %12767 = vst [vmem:[#allocation313_spill] sm:$0xff] %v10303_v4  ;;  %v542_v20 = vld [vmem:[#allocation5 + $0xda8] sm:$0xff]  ;;  %v10307_v3 = vpack.c.bf16 %v535_v9, %v529_v47  ;;  %v12772_v22 = vld [vmem:[#allocation157_spill] sm:$0xff] }
 0x1db   :  { %1922 = vmatprep.mubr.f32.mxu1 %v10290_v21  ;;  %v12770_v21 = vld [vmem:[#allocation155_spill] sm:$0xff]  ;;  %v10311_v50 = vpack.c.bf16 %v548_v42, %v542_v20  ;;  %v553_v47 = vld [vmem:[#allocation5 + $0xe00] sm:$0xff]  ;;  %v9056_v45 = vld [vmem:[#allocation3 + $0x38] sm:$0xff] }
 0x1dc   :  { %6547 = vmatpush1.bf16.msra.mxu0 %v10288_v2  ;;  %12769 = vst [vmem:[#allocation314_spill] sm:$0xff] %v10307_v3  ;;  %v12774_v2 = vld [vmem:[#allocation159_spill] sm:$0xff]  ;;  %v12776_v42 = vld [vmem:[#allocation161_spill] sm:$0xff] }
 0x1dd   :  { %6771 = vmatpush1.bf16.msra.mxu1 %v12766_v59  ;;  %6549 = vmatprep.subr.bf16.mxu0 %v10294_v17  ;;  %12771 = vst [vmem:[#allocation315_spill] sm:$0xff] %v10311_v50  ;;  %v547_v59 = vld [vmem:[#allocation5 + $0xdd0] sm:$0xff]  ;;  %v560_v17 = vld [vmem:[#allocation5 + $0xe38] sm:$0xff]  ;;  %v566_v20 = vld [vmem:[#allocation5 + $0xe68] sm:$0xff] }
 0x1de   :  { %6773 = vmatprep.subr.bf16.mxu1 %v12768_v14  ;;  %v10315_v14 = vpack.c.bf16 %v547_v59, %v541_v27  ;;  %v10319_v9 = vpack.c.bf16 %v560_v17, %v554_v43  ;;  %v565_v27 = vld [vmem:[#allocation5 + $0xe60] sm:$0xff]  ;;  %v578_v43 = vld [vmem:[#allocation5 + $0xec8] sm:$0xff] }
 0x1df   :  { %v12780_v17 = vld [vmem:[#allocation165_spill] sm:$0xff] }
 0x1e0   :  { %6551 = vmatpush1.bf16.msra.mxu0 %v10299_v24  ;;  %12773 = vst [vmem:[#allocation316_spill] sm:$0xff] %v10315_v14  ;;  %12775 = vst [vmem:[#allocation317_spill] sm:$0xff] %v10319_v9  ;;  %v12778_v24 = vld [vmem:[#allocation163_spill] sm:$0xff] }
 0x1e1   :  { %6775 = vmatpush1.bf16.msra.mxu1 %v12770_v21  ;;  %6553 = vmatprep.subr.bf16.mxu0 %v10303_v4  ;;  %v559_v21 = vld [vmem:[#allocation5 + $0xe30] sm:$0xff]  ;;  %v572_v4 = vld [vmem:[#allocation5 + $0xe98] sm:$0xff] }
 0x1e2   :  { %6777 = vmatprep.subr.bf16.mxu1 %v12772_v22  ;;  %v10323_v22 = vpack.c.bf16 %v559_v21, %v553_v47  ;;  %v10327_v59 = vpack.c.bf16 %v572_v4, %v566_v20  ;;  %v577_v47 = vld [vmem:[#allocation5 + $0xec0] sm:$0xff]  ;;  %v590_v20 = vld [vmem:[#allocation5 + $0xf28] sm:$0xff] }
 0x1e3   :  { %v12784_v4 = vld [vmem:[#allocation169_spill] sm:$0xff] }
 0x1e4   :  { %6555 = vmatpush1.bf16.msra.mxu0 %v10307_v3  ;;  %12777 = vst [vmem:[#allocation318_spill] sm:$0xff] %v10323_v22  ;;  %12779 = vst [vmem:[#allocation319_spill] sm:$0xff] %v10327_v59  ;;  %v12782_v3 = vld [vmem:[#allocation167_spill] sm:$0xff] }
 0x1e5   :  { %6779 = vmatpush1.bf16.msra.mxu1 %v12774_v2  ;;  %6557 = vmatprep.subr.bf16.mxu0 %v10311_v50  ;;  %v571_v2 = vld [vmem:[#allocation5 + $0xe90] sm:$0xff]  ;;  %v584_v50 = vld [vmem:[#allocation5 + $0xef8] sm:$0xff] }
 0x1e6   :  { %6781 = vmatprep.subr.bf16.mxu1 %v12776_v42  ;;  %v10331_v42 = vpack.c.bf16 %v571_v2, %v565_v27  ;;  %v10335_v21 = vpack.c.bf16 %v584_v50, %v578_v43  ;;  %v589_v27 = vld [vmem:[#allocation5 + $0xf20] sm:$0xff]  ;;  %v602_v43 = vld [vmem:[#allocation5 + $0xf88] sm:$0xff] }
 0x1e7   :  { %v12788_v50 = vld [vmem:[#allocation173_spill] sm:$0xff] }
 0x1e8   :  { %6559 = vmatpush1.bf16.msra.mxu0 %v10315_v14  ;;  %12781 = vst [vmem:[#allocation320_spill] sm:$0xff] %v10331_v42  ;;  %12783 = vst [vmem:[#allocation321_spill] sm:$0xff] %v10335_v21  ;;  %v12786_v14 = vld [vmem:[#allocation171_spill] sm:$0xff] }
 0x1e9   :  { %6783 = vmatpush1.bf16.msra.mxu1 %v12778_v24  ;;  %6561 = vmatprep.subr.bf16.mxu0 %v10319_v9  ;;  %v583_v24 = vld [vmem:[#allocation5 + $0xef0] sm:$0xff]  ;;  %v596_v9 = vld [vmem:[#allocation5 + $0xf58] sm:$0xff] }
 0x1ea   :  { %6785 = vmatprep.subr.bf16.mxu1 %v12780_v17  ;;  %v10339_v17 = vpack.c.bf16 %v583_v24, %v577_v47  ;;  %v10343_v2 = vpack.c.bf16 %v596_v9, %v590_v20  ;;  %v601_v47 = vld [vmem:[#allocation5 + $0xf80] sm:$0xff]  ;;  %v614_v20 = vld [vmem:[#allocation5 + $0xfe8] sm:$0xff] }
 0x1eb   :  { %v12792_v9 = vld [vmem:[#allocation177_spill] sm:$0xff] }
 0x1ec   :  { %6563 = vmatpush1.bf16.msra.mxu0 %v10323_v22  ;;  %12785 = vst [vmem:[#allocation322_spill] sm:$0xff] %v10339_v17  ;;  %12787 = vst [vmem:[#allocation323_spill] sm:$0xff] %v10343_v2  ;;  %v12790_v22 = vld [vmem:[#allocation175_spill] sm:$0xff] }
 0x1ed   :  { %6787 = vmatpush1.bf16.msra.mxu1 %v12782_v3  ;;  %6565 = vmatprep.subr.bf16.mxu0 %v10327_v59  ;;  %v595_v3 = vld [vmem:[#allocation5 + $0xf50] sm:$0xff]  ;;  %v608_v59 = vld [vmem:[#allocation5 + $0xfb8] sm:$0xff] }
 0x1ee   :  { %6789 = vmatprep.subr.bf16.mxu1 %v12784_v4  ;;  %v10347_v4 = vpack.c.bf16 %v595_v3, %v589_v27  ;;  %v10351_v24 = vpack.c.bf16 %v608_v59, %v602_v43  ;;  %v613_v27 = vld [vmem:[#allocation5 + $0xfe0] sm:$0xff]  ;;  %v626_v43 = vld [vmem:[#allocation5 + $0x1048] sm:$0xff] }
 0x1ef   :  { %v12796_v59 = vld [vmem:[#allocation181_spill] sm:$0xff] }
 0x1f0   :  { %6567 = vmatpush1.bf16.msra.mxu0 %v10331_v42  ;;  %12789 = vst [vmem:[#allocation324_spill] sm:$0xff] %v10347_v4  ;;  %12791 = vst [vmem:[#allocation325_spill] sm:$0xff] %v10351_v24  ;;  %v12794_v42 = vld [vmem:[#allocation179_spill] sm:$0xff] }
 0x1f1   :  { %6791 = vmatpush1.bf16.msra.mxu1 %v12786_v14  ;;  %6569 = vmatprep.subr.bf16.mxu0 %v10335_v21  ;;  %v607_v14 = vld [vmem:[#allocation5 + $0xfb0] sm:$0xff]  ;;  %v620_v21 = vld [vmem:[#allocation5 + $0x1018] sm:$0xff] }
 0x1f2   :  { %6793 = vmatprep.subr.bf16.mxu1 %v12788_v50  ;;  %v10355_v50 = vpack.c.bf16 %v607_v14, %v601_v47  ;;  %v10359_v3 = vpack.c.bf16 %v620_v21, %v614_v20  ;;  %v625_v47 = vld [vmem:[#allocation5 + $0x1040] sm:$0xff]  ;;  %v638_v20 = vld [vmem:[#allocation5 + $0x10a8] sm:$0xff] }
 0x1f3   :  { %v12800_v21 = vld [vmem:[#allocation185_spill] sm:$0xff] }
 0x1f4   :  { %6571 = vmatpush1.bf16.msra.mxu0 %v10339_v17  ;;  %12793 = vst [vmem:[#allocation326_spill] sm:$0xff] %v10355_v50  ;;  %12795 = vst [vmem:[#allocation327_spill] sm:$0xff] %v10359_v3  ;;  %v12798_v17 = vld [vmem:[#allocation183_spill] sm:$0xff] }
 0x1f5   :  { %6795 = vmatpush1.bf16.msra.mxu1 %v12790_v22  ;;  %6573 = vmatprep.subr.bf16.mxu0 %v10343_v2  ;;  %v619_v22 = vld [vmem:[#allocation5 + $0x1010] sm:$0xff]  ;;  %v632_v2 = vld [vmem:[#allocation5 + $0x1078] sm:$0xff] }
 0x1f6   :  { %6797 = vmatprep.subr.bf16.mxu1 %v12792_v9  ;;  %v10363_v9 = vpack.c.bf16 %v619_v22, %v613_v27  ;;  %v10367_v14 = vpack.c.bf16 %v632_v2, %v626_v43  ;;  %v637_v27 = vld [vmem:[#allocation5 + $0x10a0] sm:$0xff]  ;;  %v650_v43 = vld [vmem:[#allocation5 + $0x1108] sm:$0xff] }
 0x1f7   :  { %v12804_v2 = vld [vmem:[#allocation189_spill] sm:$0xff] }
 0x1f8   :  { %6575 = vmatpush1.bf16.msra.mxu0 %v10347_v4  ;;  %12797 = vst [vmem:[#allocation328_spill] sm:$0xff] %v10363_v9  ;;  %12799 = vst [vmem:[#allocation329_spill] sm:$0xff] %v10367_v14  ;;  %v12802_v4 = vld [vmem:[#allocation187_spill] sm:$0xff] }
 0x1f9   :  { %6799 = vmatpush1.bf16.msra.mxu1 %v12794_v42  ;;  %6577 = vmatprep.subr.bf16.mxu0 %v10351_v24  ;;  %v631_v42 = vld [vmem:[#allocation5 + $0x1070] sm:$0xff]  ;;  %v644_v24 = vld [vmem:[#allocation5 + $0x10d8] sm:$0xff] }
 0x1fa   :  { %6801 = vmatprep.subr.bf16.mxu1 %v12796_v59  ;;  %v10371_v59 = vpack.c.bf16 %v631_v42, %v625_v47  ;;  %v10375_v22 = vpack.c.bf16 %v644_v24, %v638_v20  ;;  %v649_v47 = vld [vmem:[#allocation5 + $0x1100] sm:$0xff]  ;;  %v662_v20 = vld [vmem:[#allocation5 + $0x1168] sm:$0xff] }
 0x1fb   :  { %v12808_v24 = vld [vmem:[#allocation193_spill] sm:$0xff] }
 0x1fc   :  { %6579 = vmatpush1.bf16.msra.mxu0 %v10355_v50  ;;  %12801 = vst [vmem:[#allocation330_spill] sm:$0xff] %v10371_v59  ;;  %12803 = vst [vmem:[#allocation331_spill] sm:$0xff] %v10375_v22  ;;  %v12806_v50 = vld [vmem:[#allocation191_spill] sm:$0xff] }
 0x1fd   :  { %6803 = vmatpush1.bf16.msra.mxu1 %v12798_v17  ;;  %6581 = vmatprep.subr.bf16.mxu0 %v10359_v3  ;;  %v643_v17 = vld [vmem:[#allocation5 + $0x10d0] sm:$0xff]  ;;  %v656_v3 = vld [vmem:[#allocation5 + $0x1138] sm:$0xff] }
 0x1fe   :  { %6805 = vmatprep.subr.bf16.mxu1 %v12800_v21  ;;  %v10379_v21 = vpack.c.bf16 %v643_v17, %v637_v27  ;;  %v10383_v42 = vpack.c.bf16 %v656_v3, %v650_v43  ;;  %v661_v27 = vld [vmem:[#allocation5 + $0x1160] sm:$0xff]  ;;  %v674_v43 = vld [vmem:[#allocation5 + $0x11c8] sm:$0xff] }
 0x1ff   :  { %v12812_v3 = vld [vmem:[#allocation197_spill] sm:$0xff] }
 0x200   :  { %6583 = vmatpush1.bf16.msra.mxu0 %v10363_v9  ;;  %12805 = vst [vmem:[#allocation332_spill] sm:$0xff] %v10379_v21  ;;  %12807 = vst [vmem:[#allocation333_spill] sm:$0xff] %v10383_v42  ;;  %v12810_v9 = vld [vmem:[#allocation195_spill] sm:$0xff] }
 0x201   :  { %6807 = vmatpush1.bf16.msra.mxu1 %v12802_v4  ;;  %6585 = vmatprep.subr.bf16.mxu0 %v10367_v14  ;;  %v655_v4 = vld [vmem:[#allocation5 + $0x1130] sm:$0xff]  ;;  %v668_v14 = vld [vmem:[#allocation5 + $0x1198] sm:$0xff] }
 0x202   :  { %6809 = vmatprep.subr.bf16.mxu1 %v12804_v2  ;;  %v10387_v2 = vpack.c.bf16 %v655_v4, %v649_v47  ;;  %v10391_v17 = vpack.c.bf16 %v668_v14, %v662_v20  ;;  %v673_v47 = vld [vmem:[#allocation5 + $0x11c0] sm:$0xff]  ;;  %v686_v20 = vld [vmem:[#allocation5 + $0x1228] sm:$0xff] }
 0x203   :  { %v12816_v14 = vld [vmem:[#allocation201_spill] sm:$0xff] }
 0x204   :  { %6587 = vmatpush1.bf16.msra.mxu0 %v10371_v59  ;;  %12809 = vst [vmem:[#allocation334_spill] sm:$0xff] %v10387_v2  ;;  %12811 = vst [vmem:[#allocation335_spill] sm:$0xff] %v10391_v17  ;;  %v12814_v59 = vld [vmem:[#allocation199_spill] sm:$0xff] }
 0x205   :  { %6811 = vmatpush1.bf16.msra.mxu1 %v12806_v50  ;;  %6589 = vmatprep.subr.bf16.mxu0 %v10375_v22  ;;  %v667_v50 = vld [vmem:[#allocation5 + $0x1190] sm:$0xff]  ;;  %v680_v22 = vld [vmem:[#allocation5 + $0x11f8] sm:$0xff] }
 0x206   :  { %6813 = vmatprep.subr.bf16.mxu1 %v12808_v24  ;;  %v10395_v24 = vpack.c.bf16 %v667_v50, %v661_v27  ;;  %v10399_v4 = vpack.c.bf16 %v680_v22, %v674_v43  ;;  %v685_v27 = vld [vmem:[#allocation5 + $0x1220] sm:$0xff]  ;;  %v698_v43 = vld [vmem:[#allocation5 + $0x1288] sm:$0xff] }
 0x207   :  { %v12820_v22 = vld [vmem:[#allocation205_spill] sm:$0xff] }
 0x208   :  { %6591 = vmatpush1.bf16.msra.mxu0 %v10379_v21  ;;  %12813 = vst [vmem:[#allocation336_spill] sm:$0xff] %v10395_v24  ;;  %12815 = vst [vmem:[#allocation337_spill] sm:$0xff] %v10399_v4  ;;  %v12818_v21 = vld [vmem:[#allocation203_spill] sm:$0xff] }
 0x209   :  { %6815 = vmatpush1.bf16.msra.mxu1 %v12810_v9  ;;  %6593 = vmatprep.subr.bf16.mxu0 %v10383_v42  ;;  %v679_v9 = vld [vmem:[#allocation5 + $0x11f0] sm:$0xff]  ;;  %v692_v42 = vld [vmem:[#allocation5 + $0x1258] sm:$0xff] }
 0x20a   :  { %6817 = vmatprep.subr.bf16.mxu1 %v12812_v3  ;;  %v10403_v3 = vpack.c.bf16 %v679_v9, %v673_v47  ;;  %v10407_v50 = vpack.c.bf16 %v692_v42, %v686_v20  ;;  %v10415_v9 = vld [vmem:[#allocation3 + $0x60] sm:$0xff]  ;;  %v703_v20 = vld [vmem:[#allocation5 + $0x12b0] sm:$0xff] }
 0x20b   :  { %v697_v42 = vld [vmem:[#allocation5 + $0x1280] sm:$0xff] }
 0x20c   :  { %6595 = vmatpush1.bf16.msra.mxu0 %v10387_v2  ;;  %12817 = vst [vmem:[#allocation338_spill] sm:$0xff] %v10403_v3  ;;  %12819 = vst [vmem:[#allocation339_spill] sm:$0xff] %v10407_v50  ;;  %v12822_v2 = vld [vmem:[#allocation207_spill] sm:$0xff] }
 0x20d   :  { %6819 = vmatpush1.bf16.msra.mxu1 %v12814_v59  ;;  %6597 = vmatprep.subr.bf16.mxu0 %v10391_v17  ;;  %v691_v59 = vld [vmem:[#allocation5 + $0x1250] sm:$0xff]  ;;  %v704_v17 = vld [vmem:[#allocation5 + $0x12b8] sm:$0xff] }
 0x20e   :  { %6821 = vmatprep.subr.bf16.mxu1 %v12816_v14  ;;  %v10411_v14 = vpack.c.bf16 %v691_v59, %v685_v27  ;;  %v10417_v47 = vpack.c.bf16 %v704_v17, %v698_v43  ;;  %v10422_v59 = vpack.c.bf16 %v703_v20, %v697_v42  ;;  %v10424_v27 = vld [vmem:[#allocation3 + $0x78] sm:$0xff]  ;;  %v709_v43 = vld [vmem:[#allocation5 + $0x12e0] sm:$0xff]  ;;  %v12831_v20 = vld [vmem:[#allocation215_spill] sm:$0xff] }
 0x20f   :  { %12826 = vst [vmem:[#allocation343_spill] sm:$0xff] %v10424_v27 }
 0x210   :  { %6599 = vmatpush1.bf16.msra.mxu0 %v10395_v24  ;;  %12821 = vst [vmem:[#allocation340_spill] sm:$0xff] %v10411_v14  ;;  %12823 = vst [vmem:[#allocation341_spill] sm:$0xff] %v10417_v47  ;;  %v9055_v24 = vld [vmem:[#allocation3 + $0x20] sm:$0xff] }
 0x211   :  { %6823 = vmatpush1.bf16.msra.mxu1 %v12818_v21  ;;  %6601 = vmatprep.subr.bf16.mxu0 %v10399_v4  ;;  %v12824_v21 = vld [vmem:[#allocation209_spill] sm:$0xff]  ;;  %v710_v4 = vld [vmem:[#allocation5 + $0x12e8] sm:$0xff]  ;;  %12825 = vst [vmem:[#allocation342_spill] sm:$0xff] %v10422_v59 }
 0x212   :  { %6825 = vmatprep.subr.bf16.mxu1 %v12820_v22  ;;  %v716_v22 = vld [vmem:[#allocation5 + $0x1318] sm:$0xff] }
 0x213   :  { %v10428_v17 = vpack.c.bf16 %v716_v22, %v710_v4  ;;  %v721_v22 = vld [vmem:[#allocation5 + $0x1340] sm:$0xff] }
 0x214   :  { %6603 = vmatpush1.bf16.msra.mxu0 %v10403_v3  ;;  %v722_v3 = vld [vmem:[#allocation5 + $0x1348] sm:$0xff] }
 0x215   :  { %6827 = vmatpush1.bf16.msra.mxu1 %v12822_v2  ;;  %6605 = vmatprep.subr.bf16.mxu0 %v10407_v50  ;;  %v12827_v2 = vld [vmem:[#allocation211_spill] sm:$0xff]  ;;  %12828 = vst [vmem:[#allocation344_spill] sm:$0xff] %v10428_v17  ;;  %v12829_v50 = vld [vmem:[#allocation213_spill] sm:$0xff] }
 0x216   :  { %6829 = vmatprep.subr.bf16.mxu1 %v12824_v21  ;;  %v715_v21 = vld [vmem:[#allocation5 + $0x1310] sm:$0xff] }
 0x217   :  { %1621 = vmatmul.mubr.f32.vlgmr.msra.gmra.mrb[2].mxu0 %v9055_v24  ;;  %v728_v24 = vld [vmem:[#allocation5 + $0x1378] sm:$0xff]  ;;  %v10435_v42 = vpack.c.bf16 %v715_v21, %v709_v43  ;;  %v733_v43 = vld [vmem:[#allocation5 + $0x13a0] sm:$0xff] }
 0x218   :  { %6607 = vmatpush1.bf16.msra.mxu0 %v10411_v14  ;;  %1923 = vmatmul.mubr.f32.vlgmr.msra.gmra.mrb[2].mxu1 %v10415_v9  ;;  %v10439_v4 = vpack.c.bf16 %v728_v24, %v722_v3  ;;  %v740_v14 = vld [vmem:[#allocation5 + $0x13d8] sm:$0xff]  ;;  %v746_v24 = vld [vmem:[#allocation5 + $0x1408] sm:$0xff] }
 0x219   :  { %6831 = vmatpush1.bf16.msra.mxu1 %v12827_v2  ;;  %6609 = vmatprep.subr.bf16.mxu0 %v10417_v47  ;;  %12830 = vst [vmem:[#allocation345_spill] sm:$0xff] %v10435_v42  ;;  %v12833_v2 = vld [vmem:[#allocation217_spill] sm:$0xff]  ;;  %v734_v47 = vld [vmem:[#allocation5 + $0x13a8] sm:$0xff] }
 0x21a   :  { %6833 = vmatprep.subr.bf16.mxu1 %v12829_v50  ;;  %5753 = vmatprep.mubr.msk.f32.mxu0 %vm823_vm0, %v9056_v45  ;;  %12832 = vst [vmem:[#allocation346_spill] sm:$0xff] %v10439_v4  ;;  %v727_v50 = vld [vmem:[#allocation5 + $0x1370] sm:$0xff]  ;;  %v10447_v21 = vpack.c.bf16 %v740_v14, %v734_v47  ;;  %v12837_v3 = vld [vmem:[#allocation221_spill] sm:$0xff]  ;;  %v758_v47 = vld [vmem:[#allocation5 + $0x1468] sm:$0xff] }
 0x21b   :  { %5756 = vmatprep.mubr.msk.f32.mxu1 %vm823_vm0, %v10424_v27  ;;  %v10443_v45 = vpack.c.bf16 %v727_v50, %v721_v22  ;;  %v12835_v27 = vld [vmem:[#allocation219_spill] sm:$0xff]  ;;  %v745_v22 = vld [vmem:[#allocation5 + $0x1400] sm:$0xff] }
 0x21c   :  { %6611 = vmatpush1.bf16.msra.mxu0 %v10422_v59  ;;  %12836 = vst [vmem:[#allocation348_spill] sm:$0xff] %v10447_v21  ;;  %v12839_v59 = vld [vmem:[#allocation223_spill] sm:$0xff]  ;;  %v12841_v14 = vld [vmem:[#allocation225_spill] sm:$0xff] }
 0x21d   :  { %6835 = vmatpush1.bf16.msra.mxu1 %v12831_v20  ;;  %6613 = vmatprep.subr.bf16.mxu0 %v10428_v17  ;;  %12834 = vst [vmem:[#allocation347_spill] sm:$0xff] %v10443_v45  ;;  %v739_v20 = vld [vmem:[#allocation5 + $0x13d0] sm:$0xff]  ;;  %v752_v17 = vld [vmem:[#allocation5 + $0x1438] sm:$0xff] }
 0x21e   :  { %6837 = vmatprep.subr.bf16.mxu1 %v12833_v2  ;;  %v10451_v2 = vpack.c.bf16 %v739_v20, %v733_v43  ;;  %v10455_v50 = vpack.c.bf16 %v752_v17, %v746_v24  ;;  %v757_v17 = vld [vmem:[#allocation5 + $0x1460] sm:$0xff]  ;;  %v763_v24 = vld [vmem:[#allocation5 + $0x1490] sm:$0xff] }
 0x220   :  { %6615 = vmatpush1.bf16.msra.mxu0 %v10435_v42  ;;  %12838 = vst [vmem:[#allocation349_spill] sm:$0xff] %v10451_v2  ;;  %12840 = vst [vmem:[#allocation350_spill] sm:$0xff] %v10455_v50 }
 0x221   :  { %6839 = vmatpush1.bf16.msra.mxu1 %v12835_v27  ;;  %6617 = vmatprep.subr.bf16.mxu0 %v10439_v4  ;;  %v751_v27 = vld [vmem:[#allocation5 + $0x1430] sm:$0xff]  ;;  %v764_v4 = vld [vmem:[#allocation5 + $0x1498] sm:$0xff] }
 0x222   :  { %6841 = vmatprep.subr.bf16.mxu1 %v12837_v3  ;;  %v10459_v3 = vpack.c.bf16 %v751_v27, %v745_v22  ;;  %v10465_v43 = vpack.c.bf16 %v764_v4, %v758_v47  ;;  %v10475_v22 = vpack.c.bf16 %v763_v24, %v757_v17  ;;  %v769_v47 = vld [vmem:[#allocation5 + $0x14c0] sm:$0xff]  ;;  %v10488_v17 = vld [vmem:[#allocation5 + $0x1528] sm:$0xf] }
 0x223   :  { %v9058_v24 = vld [vmem:[#allocation5 + $0x1500] sm:$0xf] }
 0x224   :  { %6619 = vmatpush1.bf16.msra.mxu0 %v10443_v45  ;;  %12842 = vst [vmem:[#allocation351_spill] sm:$0xff] %v10459_v3  ;;  %12843 = vst [vmem:[#allocation352_spill] sm:$0xff] %v10465_v43 }
 0x225   :  { %6843 = vmatpush1.bf16.msra.mxu1 %v12839_v59  ;;  %6621 = vmatprep.subr.bf16.mxu0 %v10447_v21  ;;  %12846 = vst [vmem:[#allocation355_spill] sm:$0xff] %v10475_v22 }
 0x226   :  { %6845 = vmatprep.subr.bf16.mxu1 %v12841_v14  ;;  %v770_v14 = vld [vmem:[#allocation5 + $0x14c8] sm:$0xff] }
 0x228   :  { %6623 = vmatpush1.bf16.msra.mxu0 %v10451_v2  ;;  %v776_v2 = vld [vmem:[#allocation5 + $0x14f8] sm:$0xff] }
 0x229   :  { %6847 = vmatpush1.bf16.msra.mxu1 %v9965_v56  ;;  %v10462_v20 = vpop.f32.mrb[0].mxu0  ;;  %6625 = vmatprep.subr.bf16.mxu0 %v10455_v50  ;;  %v10479_v4 = vpack.c.bf16 %v776_v2, %v770_v14  ;;  %v775_v56 = vld [vmem:[#allocation5 + $0x14f0] sm:$0xff]  ;;  %v10494_v2 = vld [vmem:[#allocation5 + $0x1520] sm:$0xf]  ;;  %v9057_v14 = vld [vmem:[#allocation5 + $0x1508] sm:$0xf] }
 0x22a   :  { %v10467_v59 = vpop.f32.mrb[0].mxu1  ;;  %v10469_v21 = vpop.f32.mrb[1].mxu0  ;;  %6849 = vmatprep.subr.bf16.mxu1 %v9971_v26  ;;  %v10483_v26 = vpack.c.bf16 %v775_v56, %v769_v47  ;;  %v10497_v56 = vld [vmem:[#allocation3 + $0x70] sm:$0xff] }
 0x22b   :  { %12844 = vst [vmem:[#allocation353_spill] sm:$0xff] %v10467_v59  ;;  %v10472_v27 = vpop.f32.mrb[1].mxu1  ;;  %12847 = vst [vmem:[#allocation356_spill] sm:$0xff] %v10479_v4  ;;  %v9059_v47 = vld [vmem:[#allocation3 + $0x30] sm:$0xff] }
 0x22c   :  { %12845 = vst [vmem:[#allocation354_spill] sm:$0xff] %v10472_v27  ;;  %6627 = vmatpush1.bf16.msra.mxu0 %v10459_v3  ;;  %12848 = vst [vmem:[#allocation357_spill] sm:$0xff] %v10483_v26  ;;  %v12896_v27 = vld [vmem:[#allocation283_spill] sm:$0xff]  ;;  %v12898_v59 = vld [vmem:[#allocation284_spill] sm:$0xff] }
 0x22d   :  { %6851 = vmatpush1.bf16.msra.mxu1 %v9977_v52  ;;  %6629 = vmatprep.subr.bf16.mxu0 %v10465_v43  ;;  %v12894_v52 = vld [vmem:[#allocation282_spill] sm:$0xff] }
 0x22e   :  { %6853 = vmatprep.subr.bf16.mxu1 %v9983_v44  ;;  %v12892_v44 = vld [vmem:[#allocation281_spill] sm:$0xff] }
 0x230   :  { %6631 = vmatpush1.bf16.msra.mxu0 %v10475_v22 }
 0x231   :  { %6855 = vmatpush1.bf16.msra.mxu1 %v9989_v16  ;;  %6633 = vmatprep.subr.bf16.mxu0 %v10479_v4  ;;  %v9060_v16 = vld [vmem:[#allocation3 + $0x48] sm:$0xff] }
 0x232   :  { %6857 = vmatprep.subr.bf16.mxu1 %v9995_v48  ;;  %v12850_v48 = vld [vmem:[#allocation20_spill] sm:$0xff] }
 0x234   :  { %6635 = vmatpush1.bf16.msra.mxu0 %v10483_v26 }
 0x235   :  { %6859 = vmatpush1.bf16.msra.mxu1 %v10001_v57  ;;  %5751 = vmatprep.subr.msk.mxu0 %vm827_vm1, %v10488_v17  ;;  %v12849_v57 = vld [vmem:[#allocation18_spill] sm:$0xff] }
 0x236   :  { %5754 = vmatprep.subr.msk.mxu1 %vm827_vm1, %v9057_v14  ;;  %v12851_v14 = vld [vmem:[#allocation22_spill] sm:$0xff] }
 0x238   :  { %5752 = vmatpush1.msk.msra.mxu0 %vm827_vm1, %v10494_v2 }
 0x239   :  { %5755 = vmatpush1.msk.msra.mxu1 %vm827_vm1, %v9058_v24  ;;  %1692 = vmatmul.mubr.f32.vlgmr.msra.gmra.mrb[2].mxu0 %v9059_v47  ;;  %v12852_v24 = vld [vmem:[#allocation24_spill] sm:$0xff]  ;;  %v12853_v47 = vld [vmem:[#allocation26_spill] sm:$0xff] }
 0x23a   :  { %1994 = vmatmul.mubr.f32.vlgmr.msra.gmra.mrb[2].mxu1 %v10497_v56  ;;  %6861 = vmatprep.subr.bf16.mxu0 %v12849_v57 }
 0x23b   :  { %7085 = vmatprep.subr.bf16.mxu1 %v10012_v31  ;;  %6863 = vmatpush1.bf16.msra.mxu0 %v12850_v48  ;;  %v12854_v31 = vld [vmem:[#allocation28_spill] sm:$0xff] }
 0x23c   :  { %7087 = vmatpush1.bf16.msra.mxu1 %v10014_v39  ;;  %6865 = vmatprep.subr.bf16.mxu0 %v12851_v14  ;;  %v12855_v39 = vld [vmem:[#allocation30_spill] sm:$0xff] }
 0x23d   :  { %7089 = vmatprep.subr.bf16.mxu1 %v10017_v0  ;;  %2064 = vmatprep.mubr.f32.mxu0 %v9060_v16  ;;  %v12856_v0 = vld [vmem:[#allocation32_spill] sm:$0xff] }
 0x23e   :  { %2348 = vmatprep.mubr.f32.mxu1 %v9060_v16  ;;  %v12857_v16 = vld [vmem:[#allocation34_spill] sm:$0xff] }
 0x23f   :  { %6867 = vmatpush1.bf16.msra.mxu0 %v12852_v24 }
 0x240   :  { %7091 = vmatpush1.bf16.msra.mxu1 %v10023_v34  ;;  %6869 = vmatprep.subr.bf16.mxu0 %v12853_v47  ;;  %v12858_v34 = vld [vmem:[#allocation36_spill] sm:$0xff] }
 0x241   :  { %7093 = vmatprep.subr.bf16.mxu1 %v10027_v7  ;;  %v12859_v7 = vld [vmem:[#allocation38_spill] sm:$0xff] }
 0x243   :  { %6871 = vmatpush1.bf16.msra.mxu0 %v12854_v31 }
 0x244   :  { %7095 = vmatpush1.bf16.msra.mxu1 %v10031_v13  ;;  %6873 = vmatprep.subr.bf16.mxu0 %v12855_v39  ;;  %v12860_v13 = vld [vmem:[#allocation40_spill] sm:$0xff] }
 0x245   :  { %7097 = vmatprep.subr.bf16.mxu1 %v10035_v25  ;;  %v12861_v25 = vld [vmem:[#allocation42_spill] sm:$0xff] }
 0x247   :  { %6875 = vmatpush1.bf16.msra.mxu0 %v12856_v0 }
 0x248   :  { %7099 = vmatpush1.bf16.msra.mxu1 %v10039_v23  ;;  %6877 = vmatprep.subr.bf16.mxu0 %v12857_v16  ;;  %v12862_v23 = vld [vmem:[#allocation44_spill] sm:$0xff] }
 0x249   :  { %7101 = vmatprep.subr.bf16.mxu1 %v10043_v12  ;;  %v12863_v12 = vld [vmem:[#allocation46_spill] sm:$0xff] }
 0x24b   :  { %6879 = vmatpush1.bf16.msra.mxu0 %v12858_v34 }
 0x24c   :  { %7103 = vmatpush1.bf16.msra.mxu1 %v10047_v18  ;;  %6881 = vmatprep.subr.bf16.mxu0 %v12859_v7  ;;  %v12864_v18 = vld [vmem:[#allocation48_spill] sm:$0xff] }
 0x24d   :  { %7105 = vmatprep.subr.bf16.mxu1 %v10051_v46  ;;  %v12865_v46 = vld [vmem:[#allocation50_spill] sm:$0xff] }
 0x24f   :  { %6883 = vmatpush1.bf16.msra.mxu0 %v12860_v13 }
 0x250   :  { %7107 = vmatpush1.bf16.msra.mxu1 %v10055_v40  ;;  %6885 = vmatprep.subr.bf16.mxu0 %v12861_v25  ;;  %v12866_v40 = vld [vmem:[#allocation52_spill] sm:$0xff] }
 0x251   :  { %7109 = vmatprep.subr.bf16.mxu1 %v10059_v28  ;;  %v12867_v28 = vld [vmem:[#allocation54_spill] sm:$0xff] }
 0x253   :  { %6887 = vmatpush1.bf16.msra.mxu0 %v12862_v23 }
 0x254   :  { %7111 = vmatpush1.bf16.msra.mxu1 %v10063_v53  ;;  %6889 = vmatprep.subr.bf16.mxu0 %v12863_v12  ;;  %v12868_v53 = vld [vmem:[#allocation56_spill] sm:$0xff] }
 0x255   :  { %7113 = vmatprep.subr.bf16.mxu1 %v10067_v35  ;;  %v12869_v35 = vld [vmem:[#allocation58_spill] sm:$0xff] }
 0x257   :  { %6891 = vmatpush1.bf16.msra.mxu0 %v12864_v18 }
 0x258   :  { %7115 = vmatpush1.bf16.msra.mxu1 %v10071_v1  ;;  %6893 = vmatprep.subr.bf16.mxu0 %v12865_v46  ;;  %v12870_v1 = vld [vmem:[#allocation60_spill] sm:$0xff] }
 0x259   :  { %7117 = vmatprep.subr.bf16.mxu1 %v10075_v51  ;;  %v12871_v51 = vld [vmem:[#allocation62_spill] sm:$0xff] }
 0x25b   :  { %6895 = vmatpush1.bf16.msra.mxu0 %v12866_v40 }
 0x25c   :  { %7119 = vmatpush1.bf16.msra.mxu1 %v10079_v19  ;;  %6897 = vmatprep.subr.bf16.mxu0 %v12867_v28  ;;  %v12872_v19 = vld [vmem:[#allocation64_spill] sm:$0xff] }
 0x25d   :  { %7121 = vmatprep.subr.bf16.mxu1 %v10083_v63  ;;  %v12873_v63 = vld [vmem:[#allocation66_spill] sm:$0xff] }
 0x25f   :  { %6899 = vmatpush1.bf16.msra.mxu0 %v12868_v53 }
 0x260   :  { %7123 = vmatpush1.bf16.msra.mxu1 %v10087_v36  ;;  %6901 = vmatprep.subr.bf16.mxu0 %v12869_v35  ;;  %v12874_v36 = vld [vmem:[#allocation68_spill] sm:$0xff] }
 0x261   :  { %7125 = vmatprep.subr.bf16.mxu1 %v10091_v15  ;;  %v12875_v15 = vld [vmem:[#allocation70_spill] sm:$0xff] }
 0x263   :  { %6903 = vmatpush1.bf16.msra.mxu0 %v12870_v1 }
 0x264   :  { %7127 = vmatpush1.bf16.msra.mxu1 %v10095_v54  ;;  %6905 = vmatprep.subr.bf16.mxu0 %v12871_v51  ;;  %v12876_v54 = vld [vmem:[#allocation72_spill] sm:$0xff] }
 0x265   :  { %7129 = vmatprep.subr.bf16.mxu1 %v10099_v33  ;;  %v12877_v33 = vld [vmem:[#allocation74_spill] sm:$0xff] }
 0x267   :  { %6907 = vmatpush1.bf16.msra.mxu0 %v12872_v19 }
 0x268   :  { %7131 = vmatpush1.bf16.msra.mxu1 %v10103_v10  ;;  %6909 = vmatprep.subr.bf16.mxu0 %v12873_v63  ;;  %v12878_v10 = vld [vmem:[#allocation76_spill] sm:$0xff] }
 0x269   :  { %7133 = vmatprep.subr.bf16.mxu1 %v10107_v49  ;;  %v12879_v49 = vld [vmem:[#allocation78_spill] sm:$0xff] }
 0x26b   :  { %6911 = vmatpush1.bf16.msra.mxu0 %v12874_v36 }
 0x26c   :  { %7135 = vmatpush1.bf16.msra.mxu1 %v10111_v37  ;;  %6913 = vmatprep.subr.bf16.mxu0 %v12875_v15  ;;  %v12880_v37 = vld [vmem:[#allocation80_spill] sm:$0xff] }
 0x26d   :  { %7137 = vmatprep.subr.bf16.mxu1 %v10115_v5  ;;  %v12881_v5 = vld [vmem:[#allocation82_spill] sm:$0xff] }
 0x26f   :  { %6915 = vmatpush1.bf16.msra.mxu0 %v12876_v54 }
 0x270   :  { %7139 = vmatpush1.bf16.msra.mxu1 %v10119_v62  ;;  %6917 = vmatprep.subr.bf16.mxu0 %v12877_v33  ;;  %v12882_v62 = vld [vmem:[#allocation84_spill] sm:$0xff] }
 0x271   :  { %7141 = vmatprep.subr.bf16.mxu1 %v10123_v30  ;;  %v12890_v30 = vld [vmem:[#allocation280_spill] sm:$0xff] }
 0x273   :  { %6919 = vmatpush1.bf16.msra.mxu0 %v12878_v10 }
 0x274   :  { %7143 = vmatpush1.bf16.msra.mxu1 %v10127_v41  ;;  %6921 = vmatprep.subr.bf16.mxu0 %v12879_v49  ;;  %v12883_v41 = vld [vmem:[#allocation86_spill] sm:$0xff] }
 0x275   :  { %7145 = vmatprep.subr.bf16.mxu1 %v10131_v58  ;;  %v12886_v58 = vld [vmem:[#allocation92_spill] sm:$0xff] }
 0x277   :  { %6923 = vmatpush1.bf16.msra.mxu0 %v12880_v37 }
 0x278   :  { %7147 = vmatpush1.bf16.msra.mxu1 %v10135_v11  ;;  %6925 = vmatprep.subr.bf16.mxu0 %v12881_v5  ;;  %v12884_v11 = vld [vmem:[#allocation88_spill] sm:$0xff] }
 0x279   :  { %7149 = vmatprep.subr.bf16.mxu1 %v10139_v29  ;;  %v12885_v29 = vld [vmem:[#allocation90_spill] sm:$0xff] }
 0x27a   :  { %2065 = vmatmul.mubr.f32.vlgmr.msra.gmra.mrb[4].mxu0 %v10147_v61 }
 0x27b   :  { %6927 = vmatpush1.bf16.msra.mxu0 %v12882_v62  ;;  %2349 = vmatmul.mubr.f32.vlgmr.msra.gmra.mrb[4].mxu1 %v10147_v61  ;;  %v12887_v61 = vld [vmem:[#allocation94_spill] sm:$0xff] }
 0x27c   :  { %7151 = vmatpush1.bf16.msra.mxu1 %v10143_v55  ;;  %6929 = vmatprep.subr.bf16.mxu0 %v12883_v41  ;;  %v12888_v55 = vld [vmem:[#allocation279_spill] sm:$0xff] }
 0x27d   :  { %7153 = vmatprep.subr.bf16.mxu1 %v10149_v6  ;;  %2135 = vmatprep.mubr.f32.mxu0 %v10156_v32  ;;  %v12889_v6 = vld [vmem:[#allocation96_spill] sm:$0xff] }
 0x27e   :  { %2419 = vmatprep.mubr.f32.mxu1 %v10156_v32  ;;  %v12891_v32 = vld [vmem:[#allocation98_spill] sm:$0xff] }
 0x27f   :  { %6931 = vmatpush1.bf16.msra.mxu0 %v12884_v11 }
 0x280   :  { %7155 = vmatpush1.bf16.msra.mxu1 %v10154_v38  ;;  %6933 = vmatprep.subr.bf16.mxu0 %v12885_v29  ;;  %v12893_v38 = vld [vmem:[#allocation100_spill] sm:$0xff] }
 0x281   :  { %7157 = vmatprep.subr.bf16.mxu1 %v10160_v8  ;;  %v12895_v8 = vld [vmem:[#allocation102_spill] sm:$0xff] }
 0x283   :  { %6935 = vmatpush1.bf16.msra.mxu0 %v12886_v58 }
 0x284   :  { %7159 = vmatpush1.bf16.msra.mxu1 %v10165_v60  ;;  %6937 = vmatprep.subr.bf16.mxu0 %v12887_v61  ;;  %v12897_v60 = vld [vmem:[#allocation104_spill] sm:$0xff] }
 0x285   :  { %7161 = vmatprep.subr.bf16.mxu1 %v12888_v55  ;;  %v12899_v55 = vld [vmem:[#allocation106_spill] sm:$0xff] }
 0x287   :  { %6939 = vmatpush1.bf16.msra.mxu0 %v12889_v6  ;;  %v12900_v6 = vld [vmem:[#allocation285_spill] sm:$0xff] }
 0x288   :  { %7163 = vmatpush1.bf16.msra.mxu1 %v12890_v30  ;;  %6941 = vmatprep.subr.bf16.mxu0 %v12891_v32  ;;  %v12901_v30 = vld [vmem:[#allocation108_spill] sm:$0xff]  ;;  %v12902_v32 = vld [vmem:[#allocation286_spill] sm:$0xff] }
 0x289   :  { %7165 = vmatprep.subr.bf16.mxu1 %v12892_v44  ;;  %v12903_v44 = vld [vmem:[#allocation110_spill] sm:$0xff] }
 0x28b   :  { %6943 = vmatpush1.bf16.msra.mxu0 %v12893_v38  ;;  %v12904_v38 = vld [vmem:[#allocation287_spill] sm:$0xff] }
 0x28c   :  { %7167 = vmatpush1.bf16.msra.mxu1 %v12894_v52  ;;  %6945 = vmatprep.subr.bf16.mxu0 %v12895_v8  ;;  %v12905_v52 = vld [vmem:[#allocation112_spill] sm:$0xff] }
 0x28d   :  { %7169 = vmatprep.subr.bf16.mxu1 %v12896_v27  ;;  %v12906_v8 = vld [vmem:[#allocation288_spill] sm:$0xff]  ;;  %v12907_v27 = vld [vmem:[#allocation114_spill] sm:$0xff] }
 0x28f   :  { %6947 = vmatpush1.bf16.msra.mxu0 %v12897_v60  ;;  %v12908_v60 = vld [vmem:[#allocation289_spill] sm:$0xff] }
 0x290   :  { %7171 = vmatpush1.bf16.msra.mxu1 %v12898_v59  ;;  %6949 = vmatprep.subr.bf16.mxu0 %v12899_v55  ;;  %v12909_v59 = vld [vmem:[#allocation116_spill] sm:$0xff]  ;;  %v12910_v55 = vld [vmem:[#allocation290_spill] sm:$0xff] }
 0x291   :  { %7173 = vmatprep.subr.bf16.mxu1 %v12900_v6  ;;  %v12911_v6 = vld [vmem:[#allocation118_spill] sm:$0xff] }
 0x293   :  { %6951 = vmatpush1.bf16.msra.mxu0 %v12901_v30  ;;  %v12912_v30 = vld [vmem:[#allocation291_spill] sm:$0xff] }
 0x294   :  { %7175 = vmatpush1.bf16.msra.mxu1 %v12902_v32  ;;  %6953 = vmatprep.subr.bf16.mxu0 %v12903_v44  ;;  %v12913_v32 = vld [vmem:[#allocation120_spill] sm:$0xff] }
 0x295   :  { %7177 = vmatprep.subr.bf16.mxu1 %v12904_v38  ;;  %v12914_v44 = vld [vmem:[#allocation292_spill] sm:$0xff]  ;;  %v12915_v38 = vld [vmem:[#allocation122_spill] sm:$0xff] }
 0x297   :  { %6955 = vmatpush1.bf16.msra.mxu0 %v12905_v52  ;;  %v12916_v52 = vld [vmem:[#allocation293_spill] sm:$0xff] }
 0x298   :  { %7179 = vmatpush1.bf16.msra.mxu1 %v12906_v8  ;;  %6957 = vmatprep.subr.bf16.mxu0 %v12907_v27  ;;  %v12917_v8 = vld [vmem:[#allocation124_spill] sm:$0xff]  ;;  %v12918_v27 = vld [vmem:[#allocation294_spill] sm:$0xff] }
 0x299   :  { %7181 = vmatprep.subr.bf16.mxu1 %v12908_v60  ;;  %v12919_v60 = vld [vmem:[#allocation126_spill] sm:$0xff] }
 0x29b   :  { %6959 = vmatpush1.bf16.msra.mxu0 %v12909_v59  ;;  %v12920_v59 = vld [vmem:[#allocation295_spill] sm:$0xff] }
 0x29c   :  { %7183 = vmatpush1.bf16.msra.mxu1 %v12910_v55  ;;  %6961 = vmatprep.subr.bf16.mxu0 %v12911_v6  ;;  %v12921_v55 = vld [vmem:[#allocation128_spill] sm:$0xff] }
 0x29d   :  { %7185 = vmatprep.subr.bf16.mxu1 %v12912_v30  ;;  %v12922_v6 = vld [vmem:[#allocation296_spill] sm:$0xff]  ;;  %v12923_v30 = vld [vmem:[#allocation130_spill] sm:$0xff] }
 0x29f   :  { %6963 = vmatpush1.bf16.msra.mxu0 %v12913_v32  ;;  %v12924_v32 = vld [vmem:[#allocation297_spill] sm:$0xff] }
 0x2a0   :  { %7187 = vmatpush1.bf16.msra.mxu1 %v12914_v44  ;;  %6965 = vmatprep.subr.bf16.mxu0 %v12915_v38  ;;  %v12925_v44 = vld [vmem:[#allocation132_spill] sm:$0xff]  ;;  %v12926_v38 = vld [vmem:[#allocation298_spill] sm:$0xff] }
 0x2a1   :  { %7189 = vmatprep.subr.bf16.mxu1 %v12916_v52  ;;  %v12927_v52 = vld [vmem:[#allocation134_spill] sm:$0xff] }
 0x2a3   :  { %6967 = vmatpush1.bf16.msra.mxu0 %v12917_v8  ;;  %v12928_v8 = vld [vmem:[#allocation299_spill] sm:$0xff] }
 0x2a4   :  { %7191 = vmatpush1.bf16.msra.mxu1 %v12918_v27  ;;  %6969 = vmatprep.subr.bf16.mxu0 %v12919_v60  ;;  %v12929_v27 = vld [vmem:[#allocation136_spill] sm:$0xff] }
 0x2a5   :  { %7193 = vmatprep.subr.bf16.mxu1 %v12920_v59  ;;  %v12930_v60 = vld [vmem:[#allocation300_spill] sm:$0xff]  ;;  %v12931_v59 = vld [vmem:[#allocation138_spill] sm:$0xff] }
 0x2a7   :  { %6971 = vmatpush1.bf16.msra.mxu0 %v12921_v55  ;;  %v12932_v55 = vld [vmem:[#allocation301_spill] sm:$0xff] }
 0x2a8   :  { %7195 = vmatpush1.bf16.msra.mxu1 %v12922_v6  ;;  %6973 = vmatprep.subr.bf16.mxu0 %v12923_v30  ;;  %v12933_v6 = vld [vmem:[#allocation140_spill] sm:$0xff]  ;;  %v12934_v30 = vld [vmem:[#allocation302_spill] sm:$0xff] }
 0x2a9   :  { %7197 = vmatprep.subr.bf16.mxu1 %v12924_v32  ;;  %v12935_v32 = vld [vmem:[#allocation142_spill] sm:$0xff] }
 0x2ab   :  { %6975 = vmatpush1.bf16.msra.mxu0 %v12925_v44  ;;  %v12936_v44 = vld [vmem:[#allocation303_spill] sm:$0xff] }
 0x2ac   :  { %7199 = vmatpush1.bf16.msra.mxu1 %v12926_v38  ;;  %6977 = vmatprep.subr.bf16.mxu0 %v12927_v52  ;;  %v12937_v38 = vld [vmem:[#allocation144_spill] sm:$0xff] }
 0x2ad   :  { %7201 = vmatprep.subr.bf16.mxu1 %v12928_v8  ;;  %v12938_v52 = vld [vmem:[#allocation304_spill] sm:$0xff]  ;;  %v12939_v8 = vld [vmem:[#allocation146_spill] sm:$0xff] }
 0x2af   :  { %6979 = vmatpush1.bf16.msra.mxu0 %v12929_v27  ;;  %v12940_v27 = vld [vmem:[#allocation305_spill] sm:$0xff] }
 0x2b0   :  { %7203 = vmatpush1.bf16.msra.mxu1 %v12930_v60  ;;  %6981 = vmatprep.subr.bf16.mxu0 %v12931_v59  ;;  %v12941_v60 = vld [vmem:[#allocation307_spill] sm:$0xff]  ;;  %v12942_v59 = vld [vmem:[#allocation148_spill] sm:$0xff] }
 0x2b1   :  { %7205 = vmatprep.subr.bf16.mxu1 %v12932_v55  ;;  %v12943_v55 = vld [vmem:[#allocation306_spill] sm:$0xff] }
 0x2b3   :  { %6983 = vmatpush1.bf16.msra.mxu0 %v12933_v6  ;;  %v12956_v6 = vld [vmem:[#allocation314_spill] sm:$0xff] }
 0x2b4   :  { %7207 = vmatpush1.bf16.msra.mxu1 %v12934_v30  ;;  %6985 = vmatprep.subr.bf16.mxu0 %v12935_v32  ;;  %v12944_v30 = vld [vmem:[#allocation150_spill] sm:$0xff]  ;;  %v12945_v32 = vld [vmem:[#allocation308_spill] sm:$0xff] }
 0x2b5   :  { %7209 = vmatprep.subr.bf16.mxu1 %v12936_v44  ;;  %v12946_v44 = vld [vmem:[#allocation310_spill] sm:$0xff] }
 0x2b7   :  { %6987 = vmatpush1.bf16.msra.mxu0 %v12937_v38  ;;  %v12950_v38 = vld [vmem:[#allocation311_spill] sm:$0xff] }
 0x2b8   :  { %7211 = vmatpush1.bf16.msra.mxu1 %v12938_v52  ;;  %6989 = vmatprep.subr.bf16.mxu0 %v12939_v8  ;;  %v12947_v52 = vld [vmem:[#allocation152_spill] sm:$0xff]  ;;  %v12948_v8 = vld [vmem:[#allocation309_spill] sm:$0xff] }
 0x2b9   :  { %7213 = vmatprep.subr.bf16.mxu1 %v12940_v27  ;;  %v12949_v27 = vld [vmem:[#allocation154_spill] sm:$0xff] }
 0x2ba   :  { %2136 = vmatmul.mubr.f32.vlgmr.msra.gmra.mrb[4].mxu0 %v12941_v60 }
 0x2bb   :  { %6991 = vmatpush1.bf16.msra.mxu0 %v12942_v59  ;;  %2420 = vmatmul.mubr.f32.vlgmr.msra.gmra.mrb[4].mxu1 %v12941_v60  ;;  %v12951_v59 = vld [vmem:[#allocation156_spill] sm:$0xff] }
 0x2bc   :  { %7215 = vmatpush1.bf16.msra.mxu1 %v12943_v55  ;;  %6993 = vmatprep.subr.bf16.mxu0 %v12944_v30  ;;  %v12952_v60 = vld [vmem:[#allocation312_spill] sm:$0xff]  ;;  %v12953_v55 = vld [vmem:[#allocation158_spill] sm:$0xff]  ;;  %v12954_v30 = vld [vmem:[#allocation313_spill] sm:$0xff] }
 0x2bd   :  { %7217 = vmatprep.subr.bf16.mxu1 %v12945_v32  ;;  %2206 = vmatprep.mubr.f32.mxu0 %v12946_v44  ;;  %v12955_v32 = vld [vmem:[#allocation160_spill] sm:$0xff] }
 0x2be   :  { %2490 = vmatprep.mubr.f32.mxu1 %v12946_v44  ;;  %v12957_v44 = vld [vmem:[#allocation162_spill] sm:$0xff] }
 0x2bf   :  { %6995 = vmatpush1.bf16.msra.mxu0 %v12947_v52  ;;  %v12958_v52 = vld [vmem:[#allocation315_spill] sm:$0xff] }
 0x2c0   :  { %7219 = vmatpush1.bf16.msra.mxu1 %v12948_v8  ;;  %6997 = vmatprep.subr.bf16.mxu0 %v12949_v27  ;;  %v12959_v8 = vld [vmem:[#allocation164_spill] sm:$0xff] }
 0x2c1   :  { %7221 = vmatprep.subr.bf16.mxu1 %v12950_v38  ;;  %v12960_v27 = vld [vmem:[#allocation316_spill] sm:$0xff]  ;;  %v12961_v38 = vld [vmem:[#allocation166_spill] sm:$0xff] }
 0x2c3   :  { %6999 = vmatpush1.bf16.msra.mxu0 %v12951_v59  ;;  %v12962_v59 = vld [vmem:[#allocation317_spill] sm:$0xff] }
 0x2c4   :  { %7223 = vmatpush1.bf16.msra.mxu1 %v12952_v60  ;;  %7001 = vmatprep.subr.bf16.mxu0 %v12953_v55  ;;  %v12963_v60 = vld [vmem:[#allocation168_spill] sm:$0xff]  ;;  %v12964_v55 = vld [vmem:[#allocation318_spill] sm:$0xff] }
 0x2c5   :  { %7225 = vmatprep.subr.bf16.mxu1 %v12954_v30  ;;  %v12965_v30 = vld [vmem:[#allocation170_spill] sm:$0xff] }
 0x2c7   :  { %7003 = vmatpush1.bf16.msra.mxu0 %v12955_v32  ;;  %v12966_v32 = vld [vmem:[#allocation319_spill] sm:$0xff] }
 0x2c8   :  { %7227 = vmatpush1.bf16.msra.mxu1 %v12956_v6  ;;  %7005 = vmatprep.subr.bf16.mxu0 %v12957_v44  ;;  %v12967_v6 = vld [vmem:[#allocation172_spill] sm:$0xff] }
 0x2c9   :  { %7229 = vmatprep.subr.bf16.mxu1 %v12958_v52  ;;  %v12968_v44 = vld [vmem:[#allocation320_spill] sm:$0xff]  ;;  %v12969_v52 = vld [vmem:[#allocation174_spill] sm:$0xff] }
 0x2cb   :  { %7007 = vmatpush1.bf16.msra.mxu0 %v12959_v8  ;;  %v12970_v8 = vld [vmem:[#allocation321_spill] sm:$0xff] }
 0x2cc   :  { %7231 = vmatpush1.bf16.msra.mxu1 %v12960_v27  ;;  %7009 = vmatprep.subr.bf16.mxu0 %v12961_v38  ;;  %v12971_v27 = vld [vmem:[#allocation176_spill] sm:$0xff]  ;;  %v12972_v38 = vld [vmem:[#allocation322_spill] sm:$0xff] }
 0x2cd   :  { %7233 = vmatprep.subr.bf16.mxu1 %v12962_v59  ;;  %v12973_v59 = vld [vmem:[#allocation178_spill] sm:$0xff] }
 0x2cf   :  { %7011 = vmatpush1.bf16.msra.mxu0 %v12963_v60  ;;  %v12974_v60 = vld [vmem:[#allocation323_spill] sm:$0xff] }
 0x2d0   :  { %7235 = vmatpush1.bf16.msra.mxu1 %v12964_v55  ;;  %7013 = vmatprep.subr.bf16.mxu0 %v12965_v30  ;;  %v12975_v55 = vld [vmem:[#allocation180_spill] sm:$0xff] }
 0x2d1   :  { %7237 = vmatprep.subr.bf16.mxu1 %v12966_v32  ;;  %v12976_v30 = vld [vmem:[#allocation324_spill] sm:$0xff]  ;;  %v12977_v32 = vld [vmem:[#allocation182_spill] sm:$0xff] }
 0x2d3   :  { %7015 = vmatpush1.bf16.msra.mxu0 %v12967_v6  ;;  %v12978_v6 = vld [vmem:[#allocation325_spill] sm:$0xff] }
 0x2d4   :  { %7239 = vmatpush1.bf16.msra.mxu1 %v12968_v44  ;;  %7017 = vmatprep.subr.bf16.mxu0 %v12969_v52  ;;  %v12979_v44 = vld [vmem:[#allocation184_spill] sm:$0xff]  ;;  %v12980_v52 = vld [vmem:[#allocation326_spill] sm:$0xff] }
 0x2d5   :  { %7241 = vmatprep.subr.bf16.mxu1 %v12970_v8  ;;  %v12981_v8 = vld [vmem:[#allocation186_spill] sm:$0xff] }
 0x2d7   :  { %7019 = vmatpush1.bf16.msra.mxu0 %v12971_v27  ;;  %v12982_v27 = vld [vmem:[#allocation327_spill] sm:$0xff] }
 0x2d8   :  { %7243 = vmatpush1.bf16.msra.mxu1 %v12972_v38  ;;  %7021 = vmatprep.subr.bf16.mxu0 %v12973_v59  ;;  %v12983_v38 = vld [vmem:[#allocation188_spill] sm:$0xff] }
 0x2d9   :  { %7245 = vmatprep.subr.bf16.mxu1 %v12974_v60  ;;  %v12984_v59 = vld [vmem:[#allocation328_spill] sm:$0xff]  ;;  %v12985_v60 = vld [vmem:[#allocation190_spill] sm:$0xff] }
 0x2db   :  { %7023 = vmatpush1.bf16.msra.mxu0 %v12975_v55  ;;  %v12986_v55 = vld [vmem:[#allocation329_spill] sm:$0xff] }
 0x2dc   :  { %7247 = vmatpush1.bf16.msra.mxu1 %v12976_v30  ;;  %7025 = vmatprep.subr.bf16.mxu0 %v12977_v32  ;;  %v12987_v30 = vld [vmem:[#allocation192_spill] sm:$0xff]  ;;  %v12988_v32 = vld [vmem:[#allocation330_spill] sm:$0xff] }
 0x2dd   :  { %7249 = vmatprep.subr.bf16.mxu1 %v12978_v6  ;;  %v12989_v6 = vld [vmem:[#allocation194_spill] sm:$0xff] }
 0x2df   :  { %7027 = vmatpush1.bf16.msra.mxu0 %v12979_v44  ;;  %v12990_v44 = vld [vmem:[#allocation331_spill] sm:$0xff] }
 0x2e0   :  { %7251 = vmatpush1.bf16.msra.mxu1 %v12980_v52  ;;  %7029 = vmatprep.subr.bf16.mxu0 %v12981_v8  ;;  %v12991_v52 = vld [vmem:[#allocation196_spill] sm:$0xff] }
 0x2e1   :  { %7253 = vmatprep.subr.bf16.mxu1 %v12982_v27  ;;  %v12992_v8 = vld [vmem:[#allocation332_spill] sm:$0xff]  ;;  %v12993_v27 = vld [vmem:[#allocation198_spill] sm:$0xff] }
 0x2e3   :  { %7031 = vmatpush1.bf16.msra.mxu0 %v12983_v38  ;;  %v12994_v38 = vld [vmem:[#allocation333_spill] sm:$0xff] }
 0x2e4   :  { %7255 = vmatpush1.bf16.msra.mxu1 %v12984_v59  ;;  %7033 = vmatprep.subr.bf16.mxu0 %v12985_v60  ;;  %v12995_v59 = vld [vmem:[#allocation200_spill] sm:$0xff]  ;;  %v12996_v60 = vld [vmem:[#allocation334_spill] sm:$0xff] }
 0x2e5   :  { %7257 = vmatprep.subr.bf16.mxu1 %v12986_v55  ;;  %v12997_v55 = vld [vmem:[#allocation202_spill] sm:$0xff] }
 0x2e7   :  { %7035 = vmatpush1.bf16.msra.mxu0 %v12987_v30  ;;  %v12998_v30 = vld [vmem:[#allocation335_spill] sm:$0xff] }
 0x2e8   :  { %7259 = vmatpush1.bf16.msra.mxu1 %v12988_v32  ;;  %7037 = vmatprep.subr.bf16.mxu0 %v12989_v6  ;;  %v12999_v32 = vld [vmem:[#allocation204_spill] sm:$0xff] }
 0x2e9   :  { %7261 = vmatprep.subr.bf16.mxu1 %v12990_v44  ;;  %v13000_v6 = vld [vmem:[#allocation336_spill] sm:$0xff]  ;;  %v13001_v44 = vld [vmem:[#allocation206_spill] sm:$0xff] }
 0x2eb   :  { %7039 = vmatpush1.bf16.msra.mxu0 %v12991_v52  ;;  %v13002_v52 = vld [vmem:[#allocation337_spill] sm:$0xff] }
 0x2ec   :  { %7263 = vmatpush1.bf16.msra.mxu1 %v12992_v8  ;;  %7041 = vmatprep.subr.bf16.mxu0 %v12993_v27  ;;  %v13003_v8 = vld [vmem:[#allocation208_spill] sm:$0xff]  ;;  %v13004_v27 = vld [vmem:[#allocation338_spill] sm:$0xff] }
 0x2ed   :  { %7265 = vmatprep.subr.bf16.mxu1 %v12994_v38  ;;  %v13005_v38 = vld [vmem:[#allocation210_spill] sm:$0xff] }
 0x2ef   :  { %7043 = vmatpush1.bf16.msra.mxu0 %v12995_v59  ;;  %v13006_v59 = vld [vmem:[#allocation339_spill] sm:$0xff] }
 0x2f0   :  { %7267 = vmatpush1.bf16.msra.mxu1 %v12996_v60  ;;  %7045 = vmatprep.subr.bf16.mxu0 %v12997_v55  ;;  %v13007_v60 = vld [vmem:[#allocation212_spill] sm:$0xff] }
 0x2f1   :  { %7269 = vmatprep.subr.bf16.mxu1 %v12998_v30  ;;  %v793_v30 = vlaneseq }
 0x2f3   :  { %7047 = vmatpush1.bf16.msra.mxu0 %v12999_v32 }
 0x2f4   :  { %7271 = vmatpush1.bf16.msra.mxu1 %v13000_v6  ;;  %7049 = vmatprep.subr.bf16.mxu0 %v13001_v44  ;;  %v13008_v6 = vld [vmem:[#allocation340_spill] sm:$0xff]  ;;  %v13009_v44 = vld [vmem:[#allocation214_spill] sm:$0xff] }
 0x2f5   :  { %7273 = vmatprep.subr.bf16.mxu1 %v13002_v52  ;;  %v13010_v52 = vld [vmem:[#allocation341_spill] sm:$0xff] }
 0x2f7   :  { %7051 = vmatpush1.bf16.msra.mxu0 %v13003_v8  ;;  %v13011_v8 = vld [vmem:[#allocation343_spill] sm:$0xff] }
 0x2f8   :  { %7275 = vmatpush1.bf16.msra.mxu1 %v13004_v27  ;;  %7053 = vmatprep.subr.bf16.mxu0 %v13005_v38  ;;  %v10716_v27 = vshrl.u32 %v793_v30, 7  ;;  %v13016_v38 = vld [vmem:[#allocation344_spill] sm:$0xff] }
 0x2f9   :  { %7277 = vmatprep.subr.bf16.mxu1 %v13006_v59  ;;  %v13012_v59 = vld [vmem:[#allocation216_spill] sm:$0xff] }
 0x2fa   :  { %2207 = vmatmul.mubr.f32.vlgmr.msra.gmra.mrb[4].mxu0 %v10415_v9  ;;  %13013 = vst [vmem:[#allocation307_spill] sm:$0xff] %v10716_v27  ;;  %v10730_v30 = vsub.s32 1, %v10716_v27 }
 0x2fb   :  { %7055 = vmatpush1.bf16.msra.mxu0 %v13007_v60  ;;  %2491 = vmatmul.mubr.f32.vlgmr.msra.gmra.mrb[4].mxu1 %v10415_v9  ;;  %v13014_v60 = vld [vmem:[#allocation342_spill] sm:$0xff] }
 0x2fc   :  { %7279 = vmatpush1.bf16.msra.mxu1 %v13008_v6  ;;  %7057 = vmatprep.subr.bf16.mxu0 %v13009_v44  ;;  %v13015_v9 = vld [vmem:[#allocation218_spill] sm:$0xff]  ;;  %v13017_v6 = vld [vmem:[#allocation220_spill] sm:$0xff]  ;;  %13021 = vst [vmem:[#allocation358_spill] sm:$0xff] %v10730_v30 }
 0x2fd   :  { %7281 = vmatprep.subr.bf16.mxu1 %v13010_v52  ;;  %5759 = vmatprep.mubr.msk.f32.mxu0 %vm823_vm0, %v13011_v8  ;;  %v10723_v52 = vsub.s32 0, %v10716_v27  ;;  %v13019_v44 = vld [vmem:[#allocation222_spill] sm:$0xff]  ;;  %v13028_v27 = vld [vmem:[#allocation228_spill] sm:$0xff] }
 0x2fe   :  { %5762 = vmatprep.mubr.msk.f32.mxu1 %vm823_vm0, %v13011_v8  ;;  %v10727_v8 = vld [vmem:[#allocation7] sm:$0x3f] }
 0x2ff   :  { %7059 = vmatpush1.bf16.msra.mxu0 %v13012_v59  ;;  %13018 = vst [vmem:[#allocation310_spill] sm:$0xff] %v10723_v52  ;;  %13020 = vst [vmem:[#allocation343_spill] sm:$0xff] %v10727_v8  ;;  %v13022_v59 = vld [vmem:[#allocation346_spill] sm:$0xff] }
 0x300   :  { %7283 = vmatpush1.bf16.msra.mxu1 %v13014_v60  ;;  %7061 = vmatprep.subr.bf16.mxu0 %v13015_v9  ;;  %v13023_v60 = vld [vmem:[#allocation224_spill] sm:$0xff] }
 0x301   :  { %7285 = vmatprep.subr.bf16.mxu1 %v13016_v38  ;;  %v10736_v38 = vrot.slane %v10727_v8, %v10723_v52  ;;  %v13031_v52 = vld [vmem:[#allocation230_spill] sm:$0xff] }
 0x303   :  { %7063 = vmatpush1.bf16.msra.mxu0 %v13017_v6  ;;  %13024 = vst [vmem:[#allocation359_spill] sm:$0xff] %v10736_v38  ;;  %v13025_v6 = vld [vmem:[#allocation226_spill] sm:$0xff] }
 0x304   :  { %7287 = vmatpush1.bf16.msra.mxu1 %v10435_v42  ;;  %7065 = vmatprep.subr.bf16.mxu0 %v13019_v44  ;;  %v10742_v42 = vrot.slane %v10727_v8, %v10730_v30  ;;  %v13027_v44 = vld [vmem:[#allocation348_spill] sm:$0xff] }
 0x305   :  { %7289 = vmatprep.subr.bf16.mxu1 %v13022_v59  ;;  %v8652_v59 = vadd.f32 %v10462_v20, %v10736_v38  ;;  %v13033_v20 = vld [vmem:[#allocation232_spill] sm:$0xff] }
 0x306   :  { %13026 = vst [vmem:[#allocation360_spill] sm:$0xff] %v10742_v42 }
 0x307   :  { %7067 = vmatpush1.bf16.msra.mxu0 %v13023_v60  ;;  %v13029_v60 = vld [vmem:[#allocation349_spill] sm:$0xff] }
 0x308   :  { %7291 = vmatpush1.bf16.msra.mxu1 %v10443_v45  ;;  %7069 = vmatprep.subr.bf16.mxu0 %v13025_v6  ;;  %v8653_v45 = vadd.f32 %v10469_v21, %v10742_v42 }
 0x309   :  { %7293 = vmatprep.subr.bf16.mxu1 %v13027_v44 }
 0x30b   :  { %7071 = vmatpush1.bf16.msra.mxu0 %v13028_v27 }
 0x30c   :  { %7295 = vmatpush1.bf16.msra.mxu1 %v13029_v60  ;;  %v10749_v9 = vpop.f32.mrb[2].mxu0  ;;  %7073 = vmatprep.subr.bf16.mxu0 %v13031_v52  ;;  %v1698_v60 = vmax.f32 %v8652_v59, 0.0  ;;  %v13034_v52 = vld [vmem:[#allocation234_spill] sm:$0xff]  ;;  %v13039_v59 = vld [vmem:[#allocation240_spill] sm:$0xff] }
 0x30d   :  { %13030 = vst [vmem:[#allocation361_spill] sm:$0xff] %v10749_v9  ;;  %v1995_v6 = vpop.f32.mrb[2].mxu1  ;;  %v10754_v32 = vpop.f32.mrb[3].mxu0  ;;  %7297 = vmatprep.subr.bf16.mxu1 %v10455_v50  ;;  %v1699_v9 = vmax.f32 %v8653_v45, 0.0  ;;  %v10773_v45 = vld [vmem:[#allocation5 + $0x1518] sm:$0xf] }
 0x30e   :  { %13032 = vst [vmem:[#allocation362_spill] sm:$0xff] %v10754_v32  ;;  %v8658_v30 = vadd.f32 %v1995_v6, %v10736_v38  ;;  %v1997_v44 = vpop.f32.mrb[3].mxu1  ;;  %v13037_v6 = vld [vmem:[#allocation236_spill] sm:$0xff]  ;;  %v13096_v38 = vld [vmem:[#allocation110_spill] sm:$0xff] }
 0x30f   :  { %v8659_v27 = vadd.f32 %v1997_v44, %v10742_v42  ;;  %7075 = vmatpush1.bf16.msra.mxu0 %v13033_v20  ;;  %v13038_v44 = vld [vmem:[#allocation238_spill] sm:$0xff]  ;;  %v13094_v42 = vld [vmem:[#allocation108_spill] sm:$0xff] }
 0x310   :  { %v2568_v8 = vmax.f32 %v8658_v30, 0.0  ;;  %7299 = vmatpush1.bf16.msra.mxu1 %v10459_v3  ;;  %7077 = vmatprep.subr.bf16.mxu0 %v13034_v52  ;;  %v13045_v30 = vld [vmem:[#allocation27_spill] sm:$0xff]  ;;  %v13092_v3 = vld [vmem:[#allocation106_spill] sm:$0xff] }
 0x311   :  { %v2569_v21 = vmax.f32 %v8659_v27, 0.0  ;;  %7301 = vmatprep.subr.bf16.mxu1 %v10465_v43  ;;  %v10779_v27 = vld [vmem:[#allocation5 + $0x1510] sm:$0xf]  ;;  %v13090_v43 = vld [vmem:[#allocation104_spill] sm:$0xff] }
 0x312   :  { %v10763_v32 = vmax.f32 %v1698_v60, %v2568_v8  ;;  %v13040_v60 = vld [vmem:[#allocation17_spill] sm:$0xff]  ;;  %v13041_v8 = vld [vmem:[#allocation19_spill] sm:$0xff] }
 0x313   :  { %v10765_v50 = vmax.f32 %v1699_v9, %v2569_v21  ;;  %7079 = vmatpush1.bf16.msra.mxu0 %v13037_v6  ;;  %v10788_v9 = vld [vmem:[#allocation3 + $0x88] sm:$0xff]  ;;  %v13046_v21 = vld [vmem:[#allocation29_spill] sm:$0xff] }
 0x314   :  { %13035 = vst [vmem:[#allocation363_spill] sm:$0xff] %v10763_v32  ;;  %7303 = vmatpush1.bf16.msra.mxu1 %v10475_v22  ;;  %7081 = vmatprep.subr.bf16.mxu0 %v13038_v44  ;;  %v13084_v22 = vld [vmem:[#allocation98_spill] sm:$0xff] }
 0x315   :  { %13036 = vst [vmem:[#allocation364_spill] sm:$0xff] %v10765_v50  ;;  %7305 = vmatprep.subr.bf16.mxu1 %v10479_v4  ;;  %v13083_v4 = vld [vmem:[#allocation97_spill] sm:$0xff]  ;;  %v13086_v50 = vld [vmem:[#allocation100_spill] sm:$0xff]  ;;  %v13088_v32 = vld [vmem:[#allocation102_spill] sm:$0xff] }
 0x317   :  { %7083 = vmatpush1.bf16.msra.mxu0 %v13039_v59 }
 0x318   :  { %7307 = vmatpush1.bf16.msra.mxu1 %v10483_v26  ;;  %5757 = vmatprep.subr.msk.mxu0 %vm827_vm1, %v10773_v45  ;;  %v13082_v26 = vld [vmem:[#allocation96_spill] sm:$0xff] }
 0x319   :  { %5760 = vmatprep.subr.msk.mxu1 %vm827_vm1, %v10488_v17  ;;  %v13042_v17 = vld [vmem:[#allocation21_spill] sm:$0xff] }
 0x31b   :  { %5758 = vmatpush1.msk.msra.mxu0 %vm827_vm1, %v10779_v27 }
 0x31c   :  { %5761 = vmatpush1.msk.msra.mxu1 %vm827_vm1, %v10494_v2  ;;  %2278 = vmatmul.mubr.f32.vlgmr.msra.gmra.mrb[4].mxu0 %v10497_v56  ;;  %v13043_v2 = vld [vmem:[#allocation23_spill] sm:$0xff] }
 0x31d   :  { %2562 = vmatmul.mubr.f32.vlgmr.msra.gmra.mrb[4].mxu1 %v10497_v56  ;;  %7309 = vmatprep.subr.bf16.mxu0 %v13040_v60  ;;  %v13044_v56 = vld [vmem:[#allocation25_spill] sm:$0xff] }
 0x31e   :  { %7533 = vmatprep.subr.bf16.mxu1 %v12849_v57  ;;  %7311 = vmatpush1.bf16.msra.mxu0 %v13041_v8  ;;  %v10854_v57 = vld [vmem:[#allocation3 + $0x80] sm:$0xff] }
 0x31f   :  { %7535 = vmatpush1.bf16.msra.mxu1 %v12850_v48  ;;  %7313 = vmatprep.subr.bf16.mxu0 %v13042_v17  ;;  %v13048_v48 = vld [vmem:[#allocation33_spill] sm:$0xff]  ;;  %13072 = vst [vmem:[#allocation17_spill] sm:$0xff] %v10854_v57 }
 0x320   :  { %7537 = vmatprep.subr.bf16.mxu1 %v12851_v14  ;;  %2656 = vmatprep.mubr.f32.mxu0 %v10788_v9  ;;  %v13047_v14 = vld [vmem:[#allocation31_spill] sm:$0xff] }
 0x321   :  { %2940 = vmatprep.mubr.f32.mxu1 %v10788_v9 }
 0x322   :  { %7315 = vmatpush1.bf16.msra.mxu0 %v13043_v2 }
 0x323   :  { %7539 = vmatpush1.bf16.msra.mxu1 %v12852_v24  ;;  %7317 = vmatprep.subr.bf16.mxu0 %v13044_v56  ;;  %v13049_v24 = vld [vmem:[#allocation35_spill] sm:$0xff] }
 0x324   :  { %7541 = vmatprep.subr.bf16.mxu1 %v12853_v47  ;;  %v13050_v47 = vld [vmem:[#allocation37_spill] sm:$0xff] }
 0x326   :  { %7319 = vmatpush1.bf16.msra.mxu0 %v13045_v30 }
 0x327   :  { %7543 = vmatpush1.bf16.msra.mxu1 %v12854_v31  ;;  %7321 = vmatprep.subr.bf16.mxu0 %v13046_v21  ;;  %v13051_v31 = vld [vmem:[#allocation39_spill] sm:$0xff] }
 0x328   :  { %7545 = vmatprep.subr.bf16.mxu1 %v12855_v39  ;;  %v13052_v39 = vld [vmem:[#allocation41_spill] sm:$0xff] }
 0x32a   :  { %7323 = vmatpush1.bf16.msra.mxu0 %v13047_v14 }
 0x32b   :  { %7547 = vmatpush1.bf16.msra.mxu1 %v12856_v0  ;;  %7325 = vmatprep.subr.bf16.mxu0 %v13048_v48  ;;  %v13053_v0 = vld [vmem:[#allocation43_spill] sm:$0xff] }
 0x32c   :  { %7549 = vmatprep.subr.bf16.mxu1 %v12857_v16  ;;  %v13054_v16 = vld [vmem:[#allocation45_spill] sm:$0xff] }
 0x32e   :  { %7327 = vmatpush1.bf16.msra.mxu0 %v13049_v24 }
 0x32f   :  { %7551 = vmatpush1.bf16.msra.mxu1 %v12858_v34  ;;  %7329 = vmatprep.subr.bf16.mxu0 %v13050_v47  ;;  %v13055_v34 = vld [vmem:[#allocation47_spill] sm:$0xff] }
 0x330   :  { %7553 = vmatprep.subr.bf16.mxu1 %v12859_v7  ;;  %v13056_v7 = vld [vmem:[#allocation49_spill] sm:$0xff] }
 0x332   :  { %7331 = vmatpush1.bf16.msra.mxu0 %v13051_v31 }
 0x333   :  { %7555 = vmatpush1.bf16.msra.mxu1 %v12860_v13  ;;  %7333 = vmatprep.subr.bf16.mxu0 %v13052_v39  ;;  %v13057_v13 = vld [vmem:[#allocation51_spill] sm:$0xff] }
 0x334   :  { %7557 = vmatprep.subr.bf16.mxu1 %v12861_v25  ;;  %v13058_v25 = vld [vmem:[#allocation53_spill] sm:$0xff] }
 0x336   :  { %7335 = vmatpush1.bf16.msra.mxu0 %v13053_v0 }
 0x337   :  { %7559 = vmatpush1.bf16.msra.mxu1 %v12862_v23  ;;  %7337 = vmatprep.subr.bf16.mxu0 %v13054_v16  ;;  %v13059_v23 = vld [vmem:[#allocation55_spill] sm:$0xff] }
 0x338   :  { %7561 = vmatprep.subr.bf16.mxu1 %v12863_v12  ;;  %v13060_v12 = vld [vmem:[#allocation57_spill] sm:$0xff] }
 0x33a   :  { %7339 = vmatpush1.bf16.msra.mxu0 %v13055_v34 }
 0x33b   :  { %7563 = vmatpush1.bf16.msra.mxu1 %v12864_v18  ;;  %7341 = vmatprep.subr.bf16.mxu0 %v13056_v7  ;;  %v13061_v18 = vld [vmem:[#allocation59_spill] sm:$0xff] }
 0x33c   :  { %7565 = vmatprep.subr.bf16.mxu1 %v12865_v46  ;;  %v13062_v46 = vld [vmem:[#allocation61_spill] sm:$0xff] }
 0x33e   :  { %7343 = vmatpush1.bf16.msra.mxu0 %v13057_v13 }
 0x33f   :  { %7567 = vmatpush1.bf16.msra.mxu1 %v12866_v40  ;;  %7345 = vmatprep.subr.bf16.mxu0 %v13058_v25  ;;  %v13063_v40 = vld [vmem:[#allocation63_spill] sm:$0xff] }
 0x340   :  { %7569 = vmatprep.subr.bf16.mxu1 %v12867_v28  ;;  %v13064_v28 = vld [vmem:[#allocation65_spill] sm:$0xff] }
 0x342   :  { %7347 = vmatpush1.bf16.msra.mxu0 %v13059_v23 }
 0x343   :  { %7571 = vmatpush1.bf16.msra.mxu1 %v12868_v53  ;;  %7349 = vmatprep.subr.bf16.mxu0 %v13060_v12  ;;  %v13065_v53 = vld [vmem:[#allocation67_spill] sm:$0xff] }
 0x344   :  { %7573 = vmatprep.subr.bf16.mxu1 %v12869_v35  ;;  %v13066_v35 = vld [vmem:[#allocation69_spill] sm:$0xff] }
 0x346   :  { %7351 = vmatpush1.bf16.msra.mxu0 %v13061_v18 }
 0x347   :  { %7575 = vmatpush1.bf16.msra.mxu1 %v12870_v1  ;;  %7353 = vmatprep.subr.bf16.mxu0 %v13062_v46  ;;  %v13067_v1 = vld [vmem:[#allocation71_spill] sm:$0xff] }
 0x348   :  { %7577 = vmatprep.subr.bf16.mxu1 %v12871_v51  ;;  %v13068_v51 = vld [vmem:[#allocation73_spill] sm:$0xff] }
 0x34a   :  { %7355 = vmatpush1.bf16.msra.mxu0 %v13063_v40 }
 0x34b   :  { %7579 = vmatpush1.bf16.msra.mxu1 %v12872_v19  ;;  %7357 = vmatprep.subr.bf16.mxu0 %v13064_v28  ;;  %v13069_v19 = vld [vmem:[#allocation75_spill] sm:$0xff] }
 0x34c   :  { %7581 = vmatprep.subr.bf16.mxu1 %v12873_v63  ;;  %v13070_v63 = vld [vmem:[#allocation77_spill] sm:$0xff] }
 0x34e   :  { %7359 = vmatpush1.bf16.msra.mxu0 %v13065_v53 }
 0x34f   :  { %7583 = vmatpush1.bf16.msra.mxu1 %v12874_v36  ;;  %7361 = vmatprep.subr.bf16.mxu0 %v13066_v35  ;;  %v13071_v36 = vld [vmem:[#allocation79_spill] sm:$0xff] }
 0x350   :  { %7585 = vmatprep.subr.bf16.mxu1 %v12875_v15  ;;  %v13073_v15 = vld [vmem:[#allocation81_spill] sm:$0xff] }
 0x352   :  { %7363 = vmatpush1.bf16.msra.mxu0 %v13067_v1 }
 0x353   :  { %7587 = vmatpush1.bf16.msra.mxu1 %v12876_v54  ;;  %7365 = vmatprep.subr.bf16.mxu0 %v13068_v51  ;;  %v13075_v54 = vld [vmem:[#allocation83_spill] sm:$0xff] }
 0x354   :  { %7589 = vmatprep.subr.bf16.mxu1 %v12877_v33  ;;  %v10860_v33 = vld [vmem:[#allocation3 + $0x98] sm:$0xff] }
 0x355   :  { %13074 = vst [vmem:[#allocation19_spill] sm:$0xff] %v10860_v33 }
 0x356   :  { %7367 = vmatpush1.bf16.msra.mxu0 %v13069_v19 }
 0x357   :  { %7591 = vmatpush1.bf16.msra.mxu1 %v12878_v10  ;;  %7369 = vmatprep.subr.bf16.mxu0 %v13070_v63  ;;  %v13079_v10 = vld [vmem:[#allocation91_spill] sm:$0xff] }
 0x358   :  { %7593 = vmatprep.subr.bf16.mxu1 %v12879_v49  ;;  %v13076_v49 = vld [vmem:[#allocation85_spill] sm:$0xff] }
 0x35a   :  { %7371 = vmatpush1.bf16.msra.mxu0 %v13071_v36 }
 0x35b   :  { %7595 = vmatpush1.bf16.msra.mxu1 %v12880_v37  ;;  %7373 = vmatprep.subr.bf16.mxu0 %v13073_v15  ;;  %v13077_v37 = vld [vmem:[#allocation87_spill] sm:$0xff] }
 0x35c   :  { %7597 = vmatprep.subr.bf16.mxu1 %v12881_v5  ;;  %v13078_v5 = vld [vmem:[#allocation89_spill] sm:$0xff] }
 0x35d   :  { %2657 = vmatmul.mubr.f32.vlgmr.msra.gmra.mrb[6].mxu0 %v10854_v57 }
 0x35e   :  { %7375 = vmatpush1.bf16.msra.mxu0 %v13075_v54  ;;  %2941 = vmatmul.mubr.f32.vlgmr.msra.gmra.mrb[6].mxu1 %v10854_v57  ;;  %v13231_v54 = vld [vmem:[#allocation231_spill] sm:$0xff] }
 0x35f   :  { %7599 = vmatpush1.bf16.msra.mxu1 %v12882_v62  ;;  %7377 = vmatprep.subr.bf16.mxu0 %v13076_v49  ;;  %v13080_v62 = vld [vmem:[#allocation93_spill] sm:$0xff] }
 0x360   :  { %7601 = vmatprep.subr.bf16.mxu1 %v12883_v41  ;;  %2727 = vmatprep.mubr.f32.mxu0 %v10860_v33  ;;  %v13081_v41 = vld [vmem:[#allocation95_spill] sm:$0xff] }
 0x361   :  { %3011 = vmatprep.mubr.f32.mxu1 %v10860_v33 }
 0x362   :  { %7379 = vmatpush1.bf16.msra.mxu0 %v13077_v37  ;;  %v13230_v37 = vld [vmem:[#allocation230_spill] sm:$0xff] }
 0x363   :  { %7603 = vmatpush1.bf16.msra.mxu1 %v12884_v11  ;;  %7381 = vmatprep.subr.bf16.mxu0 %v13078_v5  ;;  %v13085_v11 = vld [vmem:[#allocation99_spill] sm:$0xff] }
 0x364   :  { %7605 = vmatprep.subr.bf16.mxu1 %v12885_v29  ;;  %v13087_v29 = vld [vmem:[#allocation101_spill] sm:$0xff] }
 0x366   :  { %7383 = vmatpush1.bf16.msra.mxu0 %v13079_v10  ;;  %v13227_v10 = vld [vmem:[#allocation228_spill] sm:$0xff] }
 0x367   :  { %7607 = vmatpush1.bf16.msra.mxu1 %v12886_v58  ;;  %7385 = vmatprep.subr.bf16.mxu0 %v13080_v62  ;;  %v13089_v58 = vld [vmem:[#allocation103_spill] sm:$0xff] }
 0x368   :  { %7609 = vmatprep.subr.bf16.mxu1 %v12887_v61  ;;  %v13091_v61 = vld [vmem:[#allocation105_spill] sm:$0xff] }
 0x36a   :  { %7387 = vmatpush1.bf16.msra.mxu0 %v13081_v41 }
 0x36b   :  { %7611 = vmatpush1.bf16.msra.mxu1 %v13082_v26  ;;  %7389 = vmatprep.subr.bf16.mxu0 %v13083_v4  ;;  %v13093_v26 = vld [vmem:[#allocation107_spill] sm:$0xff] }
 0x36c   :  { %7613 = vmatprep.subr.bf16.mxu1 %v13084_v22  ;;  %v13095_v22 = vld [vmem:[#allocation109_spill] sm:$0xff] }
 0x36e   :  { %7391 = vmatpush1.bf16.msra.mxu0 %v13085_v11 }
 0x36f   :  { %7615 = vmatpush1.bf16.msra.mxu1 %v13086_v50  ;;  %7393 = vmatprep.subr.bf16.mxu0 %v13087_v29  ;;  %v13097_v50 = vld [vmem:[#allocation111_spill] sm:$0xff]  ;;  %v13098_v29 = vld [vmem:[#allocation112_spill] sm:$0xff] }
 0x370   :  { %7617 = vmatprep.subr.bf16.mxu1 %v13088_v32  ;;  %v13099_v32 = vld [vmem:[#allocation113_spill] sm:$0xff] }
 0x372   :  { %7395 = vmatpush1.bf16.msra.mxu0 %v13089_v58  ;;  %v13100_v58 = vld [vmem:[#allocation114_spill] sm:$0xff] }
 0x373   :  { %7619 = vmatpush1.bf16.msra.mxu1 %v13090_v43  ;;  %7397 = vmatprep.subr.bf16.mxu0 %v13091_v61  ;;  %v13101_v43 = vld [vmem:[#allocation115_spill] sm:$0xff]  ;;  %v13102_v61 = vld [vmem:[#allocation116_spill] sm:$0xff] }
 0x374   :  { %7621 = vmatprep.subr.bf16.mxu1 %v13092_v3  ;;  %v13103_v3 = vld [vmem:[#allocation117_spill] sm:$0xff] }
 0x376   :  { %7399 = vmatpush1.bf16.msra.mxu0 %v13093_v26  ;;  %v13104_v26 = vld [vmem:[#allocation118_spill] sm:$0xff] }
 0x377   :  { %7623 = vmatpush1.bf16.msra.mxu1 %v13094_v42  ;;  %7401 = vmatprep.subr.bf16.mxu0 %v13095_v22  ;;  %v13105_v42 = vld [vmem:[#allocation119_spill] sm:$0xff]  ;;  %v13106_v22 = vld [vmem:[#allocation120_spill] sm:$0xff] }
 0x378   :  { %7625 = vmatprep.subr.bf16.mxu1 %v13096_v38  ;;  %v13107_v38 = vld [vmem:[#allocation121_spill] sm:$0xff] }
 0x37a   :  { %7403 = vmatpush1.bf16.msra.mxu0 %v13097_v50  ;;  %v13108_v50 = vld [vmem:[#allocation122_spill] sm:$0xff] }
 0x37b   :  { %7627 = vmatpush1.bf16.msra.mxu1 %v13098_v29  ;;  %7405 = vmatprep.subr.bf16.mxu0 %v13099_v32  ;;  %v13109_v29 = vld [vmem:[#allocation123_spill] sm:$0xff]  ;;  %v13110_v32 = vld [vmem:[#allocation124_spill] sm:$0xff] }
 0x37c   :  { %7629 = vmatprep.subr.bf16.mxu1 %v13100_v58  ;;  %v13111_v58 = vld [vmem:[#allocation125_spill] sm:$0xff] }
 0x37e   :  { %7407 = vmatpush1.bf16.msra.mxu0 %v13101_v43  ;;  %v13112_v43 = vld [vmem:[#allocation126_spill] sm:$0xff] }
 0x37f   :  { %7631 = vmatpush1.bf16.msra.mxu1 %v13102_v61  ;;  %7409 = vmatprep.subr.bf16.mxu0 %v13103_v3  ;;  %v13113_v61 = vld [vmem:[#allocation127_spill] sm:$0xff]  ;;  %v13114_v3 = vld [vmem:[#allocation128_spill] sm:$0xff] }
 0x380   :  { %7633 = vmatprep.subr.bf16.mxu1 %v13104_v26  ;;  %v13115_v26 = vld [vmem:[#allocation129_spill] sm:$0xff] }
 0x382   :  { %7411 = vmatpush1.bf16.msra.mxu0 %v13105_v42  ;;  %v13116_v42 = vld [vmem:[#allocation130_spill] sm:$0xff] }
 0x383   :  { %7635 = vmatpush1.bf16.msra.mxu1 %v13106_v22  ;;  %7413 = vmatprep.subr.bf16.mxu0 %v13107_v38  ;;  %v13117_v22 = vld [vmem:[#allocation131_spill] sm:$0xff]  ;;  %v13118_v38 = vld [vmem:[#allocation132_spill] sm:$0xff] }
 0x384   :  { %7637 = vmatprep.subr.bf16.mxu1 %v13108_v50  ;;  %v13119_v50 = vld [vmem:[#allocation133_spill] sm:$0xff] }
 0x386   :  { %7415 = vmatpush1.bf16.msra.mxu0 %v13109_v29  ;;  %v13120_v29 = vld [vmem:[#allocation134_spill] sm:$0xff] }
 0x387   :  { %7639 = vmatpush1.bf16.msra.mxu1 %v13110_v32  ;;  %7417 = vmatprep.subr.bf16.mxu0 %v13111_v58  ;;  %v13121_v32 = vld [vmem:[#allocation135_spill] sm:$0xff]  ;;  %v13122_v58 = vld [vmem:[#allocation136_spill] sm:$0xff] }
 0x388   :  { %7641 = vmatprep.subr.bf16.mxu1 %v13112_v43  ;;  %v13123_v43 = vld [vmem:[#allocation137_spill] sm:$0xff] }
 0x38a   :  { %7419 = vmatpush1.bf16.msra.mxu0 %v13113_v61  ;;  %v13124_v61 = vld [vmem:[#allocation138_spill] sm:$0xff] }
 0x38b   :  { %7643 = vmatpush1.bf16.msra.mxu1 %v13114_v3  ;;  %7421 = vmatprep.subr.bf16.mxu0 %v13115_v26  ;;  %v13125_v3 = vld [vmem:[#allocation139_spill] sm:$0xff]  ;;  %v13126_v26 = vld [vmem:[#allocation140_spill] sm:$0xff] }
 0x38c   :  { %7645 = vmatprep.subr.bf16.mxu1 %v13116_v42  ;;  %v13127_v42 = vld [vmem:[#allocation141_spill] sm:$0xff] }
 0x38e   :  { %7423 = vmatpush1.bf16.msra.mxu0 %v13117_v22  ;;  %v13128_v22 = vld [vmem:[#allocation142_spill] sm:$0xff] }
 0x38f   :  { %7647 = vmatpush1.bf16.msra.mxu1 %v13118_v38  ;;  %7425 = vmatprep.subr.bf16.mxu0 %v13119_v50  ;;  %v13129_v38 = vld [vmem:[#allocation143_spill] sm:$0xff] }
 0x390   :  { %7649 = vmatprep.subr.bf16.mxu1 %v13120_v29  ;;  %v10926_v50 = vld [vmem:[#allocation3 + $0x90] sm:$0xff] }
 0x391   :  { %13130 = vst [vmem:[#allocation21_spill] sm:$0xff] %v10926_v50  ;;  %v13131_v29 = vld [vmem:[#allocation144_spill] sm:$0xff] }
 0x392   :  { %7427 = vmatpush1.bf16.msra.mxu0 %v13121_v32  ;;  %v13132_v32 = vld [vmem:[#allocation145_spill] sm:$0xff] }
 0x393   :  { %7651 = vmatpush1.bf16.msra.mxu1 %v13122_v58  ;;  %7429 = vmatprep.subr.bf16.mxu0 %v13123_v43  ;;  %v13133_v58 = vld [vmem:[#allocation146_spill] sm:$0xff]  ;;  %v13148_v43 = vld [vmem:[#allocation160_spill] sm:$0xff] }
 0x394   :  { %7653 = vmatprep.subr.bf16.mxu1 %v13124_v61  ;;  %v10932_v61 = vld [vmem:[#allocation3 + $0xa8] sm:$0xff] }
 0x395   :  { %13134 = vst [vmem:[#allocation23_spill] sm:$0xff] %v10932_v61 }
 0x396   :  { %7431 = vmatpush1.bf16.msra.mxu0 %v13125_v3  ;;  %v13135_v3 = vld [vmem:[#allocation147_spill] sm:$0xff] }
 0x397   :  { %7655 = vmatpush1.bf16.msra.mxu1 %v13126_v26  ;;  %7433 = vmatprep.subr.bf16.mxu0 %v13127_v42  ;;  %v13136_v26 = vld [vmem:[#allocation148_spill] sm:$0xff]  ;;  %v13142_v42 = vld [vmem:[#allocation154_spill] sm:$0xff] }
 0x398   :  { %7657 = vmatprep.subr.bf16.mxu1 %v13128_v22  ;;  %v13137_v22 = vld [vmem:[#allocation149_spill] sm:$0xff] }
 0x39a   :  { %7435 = vmatpush1.bf16.msra.mxu0 %v13129_v38  ;;  %v13138_v38 = vld [vmem:[#allocation150_spill] sm:$0xff] }
 0x39b   :  { %7659 = vmatpush1.bf16.msra.mxu1 %v13131_v29  ;;  %7437 = vmatprep.subr.bf16.mxu0 %v13132_v32  ;;  %v13139_v29 = vld [vmem:[#allocation151_spill] sm:$0xff]  ;;  %v13141_v32 = vld [vmem:[#allocation153_spill] sm:$0xff] }
 0x39c   :  { %7661 = vmatprep.subr.bf16.mxu1 %v13133_v58  ;;  %v13140_v58 = vld [vmem:[#allocation152_spill] sm:$0xff] }
 0x39d   :  { %2728 = vmatmul.mubr.f32.vlgmr.msra.gmra.mrb[6].mxu0 %v10926_v50 }
 0x39e   :  { %7439 = vmatpush1.bf16.msra.mxu0 %v13135_v3  ;;  %3012 = vmatmul.mubr.f32.vlgmr.msra.gmra.mrb[6].mxu1 %v10926_v50  ;;  %v13143_v3 = vld [vmem:[#allocation155_spill] sm:$0xff]  ;;  %v13144_v50 = vld [vmem:[#allocation156_spill] sm:$0xff] }
 0x39f   :  { %7663 = vmatpush1.bf16.msra.mxu1 %v13136_v26  ;;  %7441 = vmatprep.subr.bf16.mxu0 %v13137_v22  ;;  %v13145_v26 = vld [vmem:[#allocation157_spill] sm:$0xff]  ;;  %v13146_v22 = vld [vmem:[#allocation158_spill] sm:$0xff] }
 0x3a0   :  { %7665 = vmatprep.subr.bf16.mxu1 %v13138_v38  ;;  %2798 = vmatprep.mubr.f32.mxu0 %v10932_v61  ;;  %v13147_v38 = vld [vmem:[#allocation159_spill] sm:$0xff] }
 0x3a1   :  { %3082 = vmatprep.mubr.f32.mxu1 %v10932_v61  ;;  %v13149_v61 = vld [vmem:[#allocation161_spill] sm:$0xff] }
 0x3a2   :  { %7443 = vmatpush1.bf16.msra.mxu0 %v13139_v29  ;;  %v13150_v29 = vld [vmem:[#allocation162_spill] sm:$0xff] }
 0x3a3   :  { %7667 = vmatpush1.bf16.msra.mxu1 %v13140_v58  ;;  %7445 = vmatprep.subr.bf16.mxu0 %v13141_v32  ;;  %v13151_v58 = vld [vmem:[#allocation163_spill] sm:$0xff]  ;;  %v13152_v32 = vld [vmem:[#allocation164_spill] sm:$0xff] }
 0x3a4   :  { %7669 = vmatprep.subr.bf16.mxu1 %v13142_v42  ;;  %v13153_v42 = vld [vmem:[#allocation165_spill] sm:$0xff] }
 0x3a6   :  { %7447 = vmatpush1.bf16.msra.mxu0 %v13143_v3  ;;  %v13154_v3 = vld [vmem:[#allocation166_spill] sm:$0xff] }
 0x3a7   :  { %7671 = vmatpush1.bf16.msra.mxu1 %v13144_v50  ;;  %7449 = vmatprep.subr.bf16.mxu0 %v13145_v26  ;;  %v13155_v50 = vld [vmem:[#allocation167_spill] sm:$0xff]  ;;  %v13156_v26 = vld [vmem:[#allocation168_spill] sm:$0xff] }
 0x3a8   :  { %7673 = vmatprep.subr.bf16.mxu1 %v13146_v22  ;;  %v13157_v22 = vld [vmem:[#allocation169_spill] sm:$0xff] }
 0x3aa   :  { %7451 = vmatpush1.bf16.msra.mxu0 %v13147_v38  ;;  %v13158_v38 = vld [vmem:[#allocation170_spill] sm:$0xff] }
 0x3ab   :  { %7675 = vmatpush1.bf16.msra.mxu1 %v13148_v43  ;;  %7453 = vmatprep.subr.bf16.mxu0 %v13149_v61  ;;  %v13159_v43 = vld [vmem:[#allocation171_spill] sm:$0xff]  ;;  %v13160_v61 = vld [vmem:[#allocation172_spill] sm:$0xff] }
 0x3ac   :  { %7677 = vmatprep.subr.bf16.mxu1 %v13150_v29  ;;  %v13161_v29 = vld [vmem:[#allocation173_spill] sm:$0xff] }
 0x3ae   :  { %7455 = vmatpush1.bf16.msra.mxu0 %v13151_v58  ;;  %v13162_v58 = vld [vmem:[#allocation174_spill] sm:$0xff] }
 0x3af   :  { %7679 = vmatpush1.bf16.msra.mxu1 %v13152_v32  ;;  %7457 = vmatprep.subr.bf16.mxu0 %v13153_v42  ;;  %v13163_v32 = vld [vmem:[#allocation175_spill] sm:$0xff]  ;;  %v13164_v42 = vld [vmem:[#allocation176_spill] sm:$0xff] }
 0x3b0   :  { %7681 = vmatprep.subr.bf16.mxu1 %v13154_v3  ;;  %v13165_v3 = vld [vmem:[#allocation177_spill] sm:$0xff] }
 0x3b2   :  { %7459 = vmatpush1.bf16.msra.mxu0 %v13155_v50  ;;  %v13166_v50 = vld [vmem:[#allocation178_spill] sm:$0xff] }
 0x3b3   :  { %7683 = vmatpush1.bf16.msra.mxu1 %v13156_v26  ;;  %7461 = vmatprep.subr.bf16.mxu0 %v13157_v22  ;;  %v13167_v26 = vld [vmem:[#allocation179_spill] sm:$0xff]  ;;  %v13168_v22 = vld [vmem:[#allocation180_spill] sm:$0xff] }
 0x3b4   :  { %7685 = vmatprep.subr.bf16.mxu1 %v13158_v38  ;;  %v13169_v38 = vld [vmem:[#allocation181_spill] sm:$0xff] }
 0x3b6   :  { %7463 = vmatpush1.bf16.msra.mxu0 %v13159_v43  ;;  %v13170_v43 = vld [vmem:[#allocation182_spill] sm:$0xff] }
 0x3b7   :  { %7687 = vmatpush1.bf16.msra.mxu1 %v13160_v61  ;;  %7465 = vmatprep.subr.bf16.mxu0 %v13161_v29  ;;  %v13171_v61 = vld [vmem:[#allocation183_spill] sm:$0xff]  ;;  %v13172_v29 = vld [vmem:[#allocation184_spill] sm:$0xff] }
 0x3b8   :  { %7689 = vmatprep.subr.bf16.mxu1 %v13162_v58  ;;  %v13173_v58 = vld [vmem:[#allocation185_spill] sm:$0xff] }
 0x3ba   :  { %7467 = vmatpush1.bf16.msra.mxu0 %v13163_v32  ;;  %v13174_v32 = vld [vmem:[#allocation186_spill] sm:$0xff] }
 0x3bb   :  { %7691 = vmatpush1.bf16.msra.mxu1 %v13164_v42  ;;  %7469 = vmatprep.subr.bf16.mxu0 %v13165_v3  ;;  %v13175_v42 = vld [vmem:[#allocation187_spill] sm:$0xff]  ;;  %v13176_v3 = vld [vmem:[#allocation188_spill] sm:$0xff] }
 0x3bc   :  { %7693 = vmatprep.subr.bf16.mxu1 %v13166_v50  ;;  %v13177_v50 = vld [vmem:[#allocation189_spill] sm:$0xff] }
 0x3be   :  { %7471 = vmatpush1.bf16.msra.mxu0 %v13167_v26  ;;  %v13178_v26 = vld [vmem:[#allocation190_spill] sm:$0xff] }
 0x3bf   :  { %7695 = vmatpush1.bf16.msra.mxu1 %v13168_v22  ;;  %7473 = vmatprep.subr.bf16.mxu0 %v13169_v38  ;;  %v13179_v22 = vld [vmem:[#allocation191_spill] sm:$0xff]  ;;  %v13180_v38 = vld [vmem:[#allocation192_spill] sm:$0xff] }
 0x3c0   :  { %7697 = vmatprep.subr.bf16.mxu1 %v13170_v43  ;;  %v13181_v43 = vld [vmem:[#allocation193_spill] sm:$0xff] }
 0x3c2   :  { %7475 = vmatpush1.bf16.msra.mxu0 %v13171_v61  ;;  %v13182_v61 = vld [vmem:[#allocation194_spill] sm:$0xff] }
 0x3c3   :  { %7699 = vmatpush1.bf16.msra.mxu1 %v13172_v29  ;;  %7477 = vmatprep.subr.bf16.mxu0 %v13173_v58  ;;  %v13183_v29 = vld [vmem:[#allocation195_spill] sm:$0xff]  ;;  %v13184_v58 = vld [vmem:[#allocation196_spill] sm:$0xff] }
 0x3c4   :  { %7701 = vmatprep.subr.bf16.mxu1 %v13174_v32  ;;  %v13185_v32 = vld [vmem:[#allocation197_spill] sm:$0xff] }
 0x3c6   :  { %7479 = vmatpush1.bf16.msra.mxu0 %v13175_v42  ;;  %v13186_v42 = vld [vmem:[#allocation198_spill] sm:$0xff] }
 0x3c7   :  { %7703 = vmatpush1.bf16.msra.mxu1 %v13176_v3  ;;  %7481 = vmatprep.subr.bf16.mxu0 %v13177_v50  ;;  %v13187_v3 = vld [vmem:[#allocation199_spill] sm:$0xff]  ;;  %v13188_v50 = vld [vmem:[#allocation200_spill] sm:$0xff] }
 0x3c8   :  { %7705 = vmatprep.subr.bf16.mxu1 %v13178_v26  ;;  %v13189_v26 = vld [vmem:[#allocation201_spill] sm:$0xff] }
 0x3ca   :  { %7483 = vmatpush1.bf16.msra.mxu0 %v13179_v22  ;;  %v13217_v22 = vld [vmem:[#allocation223_spill] sm:$0xff] }
 0x3cb   :  { %7707 = vmatpush1.bf16.msra.mxu1 %v13180_v38  ;;  %7485 = vmatprep.subr.bf16.mxu0 %v13181_v43  ;;  %v13190_v38 = vld [vmem:[#allocation203_spill] sm:$0xff]  ;;  %v13191_v43 = vld [vmem:[#allocation204_spill] sm:$0xff] }
 0x3cc   :  { %7709 = vmatprep.subr.bf16.mxu1 %v13182_v61  ;;  %v13192_v61 = vld [vmem:[#allocation205_spill] sm:$0xff] }
 0x3ce   :  { %7487 = vmatpush1.bf16.msra.mxu0 %v13183_v29  ;;  %v13193_v29 = vld [vmem:[#allocation206_spill] sm:$0xff] }
 0x3cf   :  { %7711 = vmatpush1.bf16.msra.mxu1 %v13184_v58  ;;  %7489 = vmatprep.subr.bf16.mxu0 %v13185_v32  ;;  %v13194_v58 = vld [vmem:[#allocation207_spill] sm:$0xff]  ;;  %v10998_v32 = vld [vmem:[#allocation3 + $0xa0] sm:$0xff] }
 0x3d0   :  { %7713 = vmatprep.subr.bf16.mxu1 %v13186_v42  ;;  %13195 = vst [vmem:[#allocation25_spill] sm:$0xff] %v10998_v32  ;;  %v13196_v42 = vld [vmem:[#allocation208_spill] sm:$0xff] }
 0x3d2   :  { %7491 = vmatpush1.bf16.msra.mxu0 %v13187_v3  ;;  %v13197_v3 = vld [vmem:[#allocation209_spill] sm:$0xff] }
 0x3d3   :  { %7715 = vmatpush1.bf16.msra.mxu1 %v13188_v50  ;;  %7493 = vmatprep.subr.bf16.mxu0 %v13189_v26  ;;  %v13198_v50 = vld [vmem:[#allocation210_spill] sm:$0xff]  ;;  %v13212_v26 = vld [vmem:[#allocation220_spill] sm:$0xff] }
 0x3d4   :  { %7717 = vmatprep.subr.bf16.mxu1 %v12997_v55  ;;  %v11004_v55 = vld [vmem:[#allocation3 + $0xb8] sm:$0xff] }
 0x3d5   :  { %13199 = vst [vmem:[#allocation27_spill] sm:$0xff] %v11004_v55 }
 0x3d6   :  { %7495 = vmatpush1.bf16.msra.mxu0 %v13190_v38  ;;  %v13200_v38 = vld [vmem:[#allocation211_spill] sm:$0xff] }
 0x3d7   :  { %7719 = vmatpush1.bf16.msra.mxu1 %v13191_v43  ;;  %7497 = vmatprep.subr.bf16.mxu0 %v13192_v61  ;;  %v13201_v43 = vld [vmem:[#allocation212_spill] sm:$0xff] }
 0x3d8   :  { %7721 = vmatprep.subr.bf16.mxu1 %v13193_v29  ;;  %v13202_v29 = vld [vmem:[#allocation213_spill] sm:$0xff] }
 0x3da   :  { %7499 = vmatpush1.bf16.msra.mxu0 %v13194_v58  ;;  %v13203_v58 = vld [vmem:[#allocation214_spill] sm:$0xff] }
 0x3db   :  { %7723 = vmatpush1.bf16.msra.mxu1 %v13196_v42  ;;  %7501 = vmatprep.subr.bf16.mxu0 %v13197_v3  ;;  %v13205_v42 = vld [vmem:[#allocation216_spill] sm:$0xff]  ;;  %v13206_v3 = vld [vmem:[#allocation217_spill] sm:$0xff] }
 0x3dc   :  { %7725 = vmatprep.subr.bf16.mxu1 %v13198_v50  ;;  %v13204_v50 = vld [vmem:[#allocation215_spill] sm:$0xff] }
 0x3dd   :  { %2799 = vmatmul.mubr.f32.vlgmr.msra.gmra.mrb[6].mxu0 %v10998_v32 }
 0x3de   :  { %7503 = vmatpush1.bf16.msra.mxu0 %v13200_v38  ;;  %3083 = vmatmul.mubr.f32.vlgmr.msra.gmra.mrb[6].mxu1 %v10998_v32  ;;  %v13207_v38 = vld [vmem:[#allocation218_spill] sm:$0xff]  ;;  %v13208_v32 = vld [vmem:[#allocation307_spill] sm:$0xff] }
 0x3df   :  { %7727 = vmatpush1.bf16.msra.mxu1 %v13201_v43  ;;  %7505 = vmatprep.subr.bf16.mxu0 %v13202_v29  ;;  %v11020_v43 = vsub.s32 2, %v13208_v32  ;;  %v13210_v29 = vld [vmem:[#allocation219_spill] sm:$0xff]  ;;  %v811_v61 = vsub.s32 4, %v13208_v32 }
 0x3e0   :  { %7729 = vmatprep.subr.bf16.mxu1 %v13203_v58  ;;  %5765 = vmatprep.mubr.msk.f32.mxu0 %vm823_vm0, %v11004_v55  ;;  %v11024_v58 = vsub.s32 3, %v13208_v32 }
 0x3e1   :  { %5768 = vmatprep.mubr.msk.f32.mxu1 %vm823_vm0, %v11004_v55  ;;  %13209 = vst [vmem:[#allocation29_spill] sm:$0xff] %v11020_v43  ;;  %v13213_v55 = vld [vmem:[#allocation221_spill] sm:$0xff] }
 0x3e2   :  { %7507 = vmatpush1.bf16.msra.mxu0 %v13204_v50  ;;  %13211 = vst [vmem:[#allocation31_spill] sm:$0xff] %v11024_v58  ;;  %v13214_v50 = vld [vmem:[#allocation222_spill] sm:$0xff] }
 0x3e3   :  { %7731 = vmatpush1.bf16.msra.mxu1 %v13205_v42  ;;  %7509 = vmatprep.subr.bf16.mxu0 %v13206_v3  ;;  %v815_v42 = vsub.s32 5, %v13208_v32 }
 0x3e4   :  { %7733 = vmatprep.subr.bf16.mxu1 %v13207_v38  ;;  %v13215_v38 = vld [vmem:[#allocation343_spill] sm:$0xff] }
 0x3e5   :  { %v11033_v3 = vrot.slane %v13215_v38, %v11020_v43  ;;  %v11041_v11 = vrot.slane %v13215_v38, %v811_v61  ;;  %v11046_v32 = vrot.slane %v13215_v38, %v815_v42  ;;  %v13223_v43 = vld [vmem:[#allocation353_spill] sm:$0xff] }
 0x3e6   :  { %7511 = vmatpush1.bf16.msra.mxu0 %v13210_v29  ;;  %v11038_v29 = vrot.slane %v13215_v38, %v11024_v58  ;;  %v13225_v58 = vld [vmem:[#allocation354_spill] sm:$0xff]  ;;  %v13226_v61 = vld [vmem:[#allocation361_spill] sm:$0xff] }
 0x3e7   :  { %7735 = vmatpush1.bf16.msra.mxu1 %v13212_v26  ;;  %7513 = vmatprep.subr.bf16.mxu0 %v13213_v55  ;;  %13216 = vst [vmem:[#allocation33_spill] sm:$0xff] %v11033_v3  ;;  %13218 = vst [vmem:[#allocation35_spill] sm:$0xff] %v11041_v11  ;;  %v13219_v26 = vld [vmem:[#allocation224_spill] sm:$0xff]  ;;  %v13220_v55 = vld [vmem:[#allocation225_spill] sm:$0xff]  ;;  %v8654_v4 = vadd.f32 %v13223_v43, %v11033_v3  ;;  %v8656_v62 = vadd.f32 %v13226_v61, %v11041_v11 }
 0x3e8   :  { %7737 = vmatprep.subr.bf16.mxu1 %v13214_v50  ;;  %13221 = vst [vmem:[#allocation37_spill] sm:$0xff] %v11046_v32  ;;  %v13222_v50 = vld [vmem:[#allocation226_spill] sm:$0xff]  ;;  %v8655_v41 = vadd.f32 %v13225_v58, %v11038_v29 }
 0x3e9   :  { %v13229_v38 = vld [vmem:[#allocation362_spill] sm:$0xff]  ;;  %v1700_v61 = vmax.f32 %v8654_v4, 0.0  ;;  %v1702_v57 = vmax.f32 %v8656_v62, 0.0  ;;  %v13236_v62 = vld [vmem:[#allocation237_spill] sm:$0xff] }
 0x3ea   :  { %7515 = vmatpush1.bf16.msra.mxu0 %v13217_v22  ;;  %v13224_v22 = vld [vmem:[#allocation227_spill] sm:$0xff]  ;;  %v8657_v42 = vadd.f32 %v13229_v38, %v11046_v32 }
 0x3eb   :  { %7739 = vmatpush1.bf16.msra.mxu1 %v13219_v26  ;;  %7517 = vmatprep.subr.bf16.mxu0 %v13220_v55  ;;  %v13228_v55 = vld [vmem:[#allocation229_spill] sm:$0xff] }
 0x3ec   :  { %7741 = vmatprep.subr.bf16.mxu1 %v13222_v50 }
 0x3ee   :  { %7519 = vmatpush1.bf16.msra.mxu0 %v13224_v22 }
 0x3ef   :  { %7743 = vmatpush1.bf16.msra.mxu1 %v13227_v10  ;;  %v2279_v26 = vpop.f32.mrb[4].mxu0  ;;  %7521 = vmatprep.subr.bf16.mxu0 %v13228_v55  ;;  %v1701_v55 = vmax.f32 %v8655_v41, 0.0  ;;  %v13235_v41 = vld [vmem:[#allocation235_spill] sm:$0xff] }
 0x3f0   :  { %v8660_v50 = vadd.f32 %v2279_v26, %v11033_v3  ;;  %v2563_v5 = vpop.f32.mrb[4].mxu1  ;;  %v2281_v43 = vpop.f32.mrb[5].mxu0  ;;  %7745 = vmatprep.subr.bf16.mxu1 %v13230_v37  ;;  %v13232_v26 = vld [vmem:[#allocation233_spill] sm:$0xff]  ;;  %v1703_v37 = vmax.f32 %v8657_v42, 0.0 }
 0x3f1   :  { %v8662_v22 = vadd.f32 %v2563_v5, %v11041_v11  ;;  %v8661_v58 = vadd.f32 %v2281_v43, %v11038_v29  ;;  %v2565_v33 = vpop.f32.mrb[5].mxu1  ;;  %v13242_v42 = vld [vmem:[#allocation245_spill] sm:$0xff]  ;;  %v13296_v11 = vld [vmem:[#allocation103_spill] sm:$0xff] }
 0x3f2   :  { %v2570_v49 = vmax.f32 %v8660_v50, 0.0  ;;  %v8663_v10 = vadd.f32 %v2565_v33, %v11046_v32  ;;  %7523 = vmatpush1.bf16.msra.mxu0 %v13231_v54  ;;  %v11168_v43 = vld [vmem:[#allocation3 + $0xc0] sm:$0xff] }
 0x3f3   :  { %v2572_v38 = vmax.f32 %v8662_v22, 0.0  ;;  %v2571_v15 = vmax.f32 %v8661_v58, 0.0  ;;  %7747 = vmatpush1.bf16.msra.mxu1 %v13033_v20  ;;  %7525 = vmatprep.subr.bf16.mxu0 %v13232_v26  ;;  %v13237_v22 = vld [vmem:[#allocation239_spill] sm:$0xff]  ;;  %v13272_v58 = vld [vmem:[#allocation17_spill] sm:$0xff] }
 0x3f4   :  { %v11068_v3 = vmax.f32 %v1700_v61, %v2570_v49  ;;  %v2573_v5 = vmax.f32 %v8663_v10, 0.0  ;;  %7749 = vmatprep.subr.bf16.mxu1 %v13034_v52  ;;  %v11083_v10 = vld [vmem:[#allocation5 + $0x1508] sm:$0xf]  ;;  %v13275_v61 = vld [vmem:[#allocation83_spill] sm:$0xff]  ;;  %v13290_v52 = vld [vmem:[#allocation97_spill] sm:$0xff] }
 0x3f5   :  { %v11071_v4 = vmax.f32 %v1702_v57, %v2572_v38  ;;  %v11073_v50 = vmax.f32 %v1701_v55, %v2571_v15  ;;  %v11091_v55 = vld [vmem:[#allocation5 + $0x1500] sm:$0xf]  ;;  %v13239_v15 = vld [vmem:[#allocation242_spill] sm:$0xff]  ;;  %v13292_v20 = vld [vmem:[#allocation99_spill] sm:$0xff] }
 0x3f6   :  { %v11075_v33 = vmax.f32 %v1703_v37, %v2573_v5  ;;  %7527 = vmatpush1.bf16.msra.mxu0 %v13235_v41  ;;  %v11089_v37 = vld [vmem:[#allocation3 + $0xb0] sm:$0xff]  ;;  %v13238_v57 = vld [vmem:[#allocation241_spill] sm:$0xff]  ;;  %v11102_v49 = vld [vmem:[#allocation3 + $0xc8] sm:$0xff] }
 0x3f7   :  { %13233 = vst [vmem:[#allocation39_spill] sm:$0xff] %v11071_v4  ;;  %7751 = vmatpush1.bf16.msra.mxu1 %v13037_v6  ;;  %7529 = vmatprep.subr.bf16.mxu0 %v13236_v62  ;;  %v13277_v38 = vld [vmem:[#allocation85_spill] sm:$0xff]  ;;  %v13279_v5 = vld [vmem:[#allocation276_spill] sm:$0xff]  ;;  %v13284_v6 = vld [vmem:[#allocation91_spill] sm:$0xff] }
 0x3f8   :  { %13234 = vst [vmem:[#allocation41_spill] sm:$0xff] %v11075_v33  ;;  %7753 = vmatprep.subr.bf16.mxu1 %v13038_v44  ;;  %v13283_v44 = vld [vmem:[#allocation278_spill] sm:$0xff]  ;;  %v13286_v33 = vld [vmem:[#allocation93_spill] sm:$0xff] }
 0x3f9   :  { %v13289_v4 = vld [vmem:[#allocation281_spill] sm:$0xff] }
 0x3fa   :  { %7531 = vmatpush1.bf16.msra.mxu0 %v13237_v22  ;;  %v13294_v32 = vld [vmem:[#allocation101_spill] sm:$0xff] }
 0x3fb   :  { %7755 = vmatpush1.bf16.msra.mxu1 %v13039_v59  ;;  %5763 = vmatprep.subr.msk.mxu0 %vm827_vm1, %v11083_v10  ;;  %v13282_v59 = vld [vmem:[#allocation89_spill] sm:$0xff] }
 0x3fc   :  { %5766 = vmatprep.subr.msk.mxu1 %vm827_vm1, %v10773_v45  ;;  %v13240_v45 = vld [vmem:[#allocation243_spill] sm:$0xff] }
 0x3fe   :  { %5764 = vmatpush1.msk.msra.mxu0 %vm827_vm1, %v11091_v55 }
 0x3ff   :  { %5767 = vmatpush1.msk.msra.mxu1 %vm827_vm1, %v10779_v27  ;;  %2870 = vmatmul.mubr.f32.vlgmr.msra.gmra.mrb[6].mxu0 %v11089_v37  ;;  %v13241_v27 = vld [vmem:[#allocation244_spill] sm:$0xff] }
 0x400   :  { %3154 = vmatmul.mubr.f32.vlgmr.msra.gmra.mrb[6].mxu1 %v11089_v37  ;;  %7757 = vmatprep.subr.bf16.mxu0 %v13238_v57 }
 0x401   :  { %7981 = vmatprep.subr.bf16.mxu1 %v13040_v60  ;;  %7759 = vmatpush1.bf16.msra.mxu0 %v13239_v15  ;;  %v13243_v60 = vld [vmem:[#allocation246_spill] sm:$0xff] }
 0x402   :  { %7983 = vmatpush1.bf16.msra.mxu1 %v13041_v8  ;;  %7761 = vmatprep.subr.bf16.mxu0 %v13240_v45  ;;  %v13244_v8 = vld [vmem:[#allocation247_spill] sm:$0xff] }
 0x403   :  { %7985 = vmatprep.subr.bf16.mxu1 %v13042_v17  ;;  %3224 = vmatprep.mubr.f32.mxu0 %v10788_v9  ;;  %v13245_v17 = vld [vmem:[#allocation248_spill] sm:$0xff]  ;;  %v13246_v9 = vld [vmem:[#allocation249_spill] sm:$0xff] }
 0x404   :  { %3532 = vmatprep.mubr.f32.mxu1 %v11102_v49 }
 0x405   :  { %7763 = vmatpush1.bf16.msra.mxu0 %v13241_v27 }
 0x406   :  { %7987 = vmatpush1.bf16.msra.mxu1 %v13043_v2  ;;  %7765 = vmatprep.subr.bf16.mxu0 %v13242_v42  ;;  %v13247_v2 = vld [vmem:[#allocation250_spill] sm:$0xff] }
 0x407   :  { %7989 = vmatprep.subr.bf16.mxu1 %v13044_v56  ;;  %v13248_v56 = vld [vmem:[#allocation251_spill] sm:$0xff] }
 0x409   :  { %7767 = vmatpush1.bf16.msra.mxu0 %v13243_v60 }
 0x40a   :  { %7991 = vmatpush1.bf16.msra.mxu1 %v13045_v30  ;;  %7769 = vmatprep.subr.bf16.mxu0 %v13244_v8  ;;  %v13249_v30 = vld [vmem:[#allocation252_spill] sm:$0xff] }
 0x40b   :  { %7993 = vmatprep.subr.bf16.mxu1 %v13046_v21  ;;  %v13250_v21 = vld [vmem:[#allocation253_spill] sm:$0xff] }
 0x40d   :  { %7771 = vmatpush1.bf16.msra.mxu0 %v13245_v17 }
 0x40e   :  { %7995 = vmatpush1.bf16.msra.mxu1 %v13047_v14  ;;  %7773 = vmatprep.subr.bf16.mxu0 %v13246_v9  ;;  %v13251_v14 = vld [vmem:[#allocation254_spill] sm:$0xff] }
 0x40f   :  { %7997 = vmatprep.subr.bf16.mxu1 %v13048_v48  ;;  %v13252_v48 = vld [vmem:[#allocation255_spill] sm:$0xff] }
 0x411   :  { %7775 = vmatpush1.bf16.msra.mxu0 %v13247_v2 }
 0x412   :  { %7999 = vmatpush1.bf16.msra.mxu1 %v13049_v24  ;;  %7777 = vmatprep.subr.bf16.mxu0 %v13248_v56  ;;  %v13253_v24 = vld [vmem:[#allocation256_spill] sm:$0xff] }
 0x413   :  { %8001 = vmatprep.subr.bf16.mxu1 %v13050_v47  ;;  %v13254_v47 = vld [vmem:[#allocation257_spill] sm:$0xff] }
 0x415   :  { %7779 = vmatpush1.bf16.msra.mxu0 %v13249_v30 }
 0x416   :  { %8003 = vmatpush1.bf16.msra.mxu1 %v13051_v31  ;;  %7781 = vmatprep.subr.bf16.mxu0 %v13250_v21  ;;  %v13255_v31 = vld [vmem:[#allocation258_spill] sm:$0xff] }
 0x417   :  { %8005 = vmatprep.subr.bf16.mxu1 %v13052_v39  ;;  %v13256_v39 = vld [vmem:[#allocation259_spill] sm:$0xff] }
 0x419   :  { %7783 = vmatpush1.bf16.msra.mxu0 %v13251_v14 }
 0x41a   :  { %8007 = vmatpush1.bf16.msra.mxu1 %v13053_v0  ;;  %7785 = vmatprep.subr.bf16.mxu0 %v13252_v48  ;;  %v13257_v0 = vld [vmem:[#allocation260_spill] sm:$0xff] }
 0x41b   :  { %8009 = vmatprep.subr.bf16.mxu1 %v13054_v16  ;;  %v13258_v16 = vld [vmem:[#allocation261_spill] sm:$0xff] }
 0x41d   :  { %7787 = vmatpush1.bf16.msra.mxu0 %v13253_v24 }
 0x41e   :  { %8011 = vmatpush1.bf16.msra.mxu1 %v13055_v34  ;;  %7789 = vmatprep.subr.bf16.mxu0 %v13254_v47  ;;  %v13259_v34 = vld [vmem:[#allocation262_spill] sm:$0xff] }
 0x41f   :  { %8013 = vmatprep.subr.bf16.mxu1 %v13056_v7  ;;  %v13260_v7 = vld [vmem:[#allocation263_spill] sm:$0xff] }
 0x421   :  { %7791 = vmatpush1.bf16.msra.mxu0 %v13255_v31 }
 0x422   :  { %8015 = vmatpush1.bf16.msra.mxu1 %v13057_v13  ;;  %7793 = vmatprep.subr.bf16.mxu0 %v13256_v39  ;;  %v13261_v13 = vld [vmem:[#allocation264_spill] sm:$0xff] }
 0x423   :  { %8017 = vmatprep.subr.bf16.mxu1 %v13058_v25  ;;  %v13262_v25 = vld [vmem:[#allocation265_spill] sm:$0xff] }
 0x425   :  { %7795 = vmatpush1.bf16.msra.mxu0 %v13257_v0 }
 0x426   :  { %8019 = vmatpush1.bf16.msra.mxu1 %v13059_v23  ;;  %7797 = vmatprep.subr.bf16.mxu0 %v13258_v16  ;;  %v13263_v23 = vld [vmem:[#allocation266_spill] sm:$0xff] }
 0x427   :  { %8021 = vmatprep.subr.bf16.mxu1 %v13060_v12  ;;  %v13264_v12 = vld [vmem:[#allocation267_spill] sm:$0xff] }
 0x429   :  { %7799 = vmatpush1.bf16.msra.mxu0 %v13259_v34 }
 0x42a   :  { %8023 = vmatpush1.bf16.msra.mxu1 %v13061_v18  ;;  %7801 = vmatprep.subr.bf16.mxu0 %v13260_v7  ;;  %v13265_v18 = vld [vmem:[#allocation268_spill] sm:$0xff] }
 0x42b   :  { %8025 = vmatprep.subr.bf16.mxu1 %v13062_v46  ;;  %v13266_v46 = vld [vmem:[#allocation269_spill] sm:$0xff] }
 0x42d   :  { %7803 = vmatpush1.bf16.msra.mxu0 %v13261_v13 }
 0x42e   :  { %8027 = vmatpush1.bf16.msra.mxu1 %v13063_v40  ;;  %7805 = vmatprep.subr.bf16.mxu0 %v13262_v25  ;;  %v13267_v40 = vld [vmem:[#allocation270_spill] sm:$0xff] }
 0x42f   :  { %8029 = vmatprep.subr.bf16.mxu1 %v13064_v28  ;;  %v13268_v28 = vld [vmem:[#allocation271_spill] sm:$0xff] }
 0x431   :  { %7807 = vmatpush1.bf16.msra.mxu0 %v13263_v23 }
 0x432   :  { %8031 = vmatpush1.bf16.msra.mxu1 %v13065_v53  ;;  %7809 = vmatprep.subr.bf16.mxu0 %v13264_v12  ;;  %v13269_v53 = vld [vmem:[#allocation272_spill] sm:$0xff] }
 0x433   :  { %8033 = vmatprep.subr.bf16.mxu1 %v13066_v35  ;;  %v13270_v35 = vld [vmem:[#allocation273_spill] sm:$0xff] }
 0x435   :  { %7811 = vmatpush1.bf16.msra.mxu0 %v13265_v18 }
 0x436   :  { %8035 = vmatpush1.bf16.msra.mxu1 %v13067_v1  ;;  %7813 = vmatprep.subr.bf16.mxu0 %v13266_v46  ;;  %v13271_v1 = vld [vmem:[#allocation81_spill] sm:$0xff] }
 0x437   :  { %8037 = vmatprep.subr.bf16.mxu1 %v13068_v51  ;;  %v13273_v51 = vld [vmem:[#allocation274_spill] sm:$0xff] }
 0x439   :  { %7815 = vmatpush1.bf16.msra.mxu0 %v13267_v40 }
 0x43a   :  { %8039 = vmatpush1.bf16.msra.mxu1 %v13069_v19  ;;  %7817 = vmatprep.subr.bf16.mxu0 %v13268_v28  ;;  %v11174_v19 = vld [vmem:[#allocation3 + $0xd8] sm:$0xff] }
 0x43b   :  { %8041 = vmatprep.subr.bf16.mxu1 %v13070_v63  ;;  %13274 = vst [vmem:[#allocation43_spill] sm:$0xff] %v11174_v19  ;;  %v13276_v63 = vld [vmem:[#allocation275_spill] sm:$0xff] }
 0x43d   :  { %7819 = vmatpush1.bf16.msra.mxu0 %v13269_v53 }
 0x43e   :  { %8043 = vmatpush1.bf16.msra.mxu1 %v13071_v36  ;;  %7821 = vmatprep.subr.bf16.mxu0 %v13270_v35  ;;  %v13278_v36 = vld [vmem:[#allocation19_spill] sm:$0xff] }
 0x43f   :  { %8045 = vmatprep.subr.bf16.mxu1 %v13271_v1  ;;  %v13280_v1 = vld [vmem:[#allocation87_spill] sm:$0xff] }
 0x440   :  { %3225 = vmatmul.mubr.f32.vlgmr.msra.gmra.mrb[8].mxu0 %v13272_v58  ;;  %v13281_v58 = vld [vmem:[#allocation277_spill] sm:$0xff] }
 0x441   :  { %7823 = vmatpush1.bf16.msra.mxu0 %v13273_v51  ;;  %3533 = vmatmul.mubr.f32.vlgmr.msra.gmra.mrb[8].mxu1 %v11168_v43 }
 0x442   :  { %8047 = vmatpush1.bf16.msra.mxu1 %v13275_v61  ;;  %7825 = vmatprep.subr.bf16.mxu0 %v13276_v63  ;;  %v13285_v61 = vld [vmem:[#allocation279_spill] sm:$0xff] }
 0x443   :  { %8049 = vmatprep.subr.bf16.mxu1 %v13277_v38  ;;  %3295 = vmatprep.mubr.f32.mxu0 %v13278_v36  ;;  %v13287_v38 = vld [vmem:[#allocation280_spill] sm:$0xff]  ;;  %v13288_v36 = vld [vmem:[#allocation95_spill] sm:$0xff] }
 0x444   :  { %3603 = vmatprep.mubr.f32.mxu1 %v11174_v19 }
 0x445   :  { %7827 = vmatpush1.bf16.msra.mxu0 %v13279_v5 }
 0x446   :  { %8051 = vmatpush1.bf16.msra.mxu1 %v13280_v1  ;;  %7829 = vmatprep.subr.bf16.mxu0 %v13281_v58  ;;  %v13291_v1 = vld [vmem:[#allocation282_spill] sm:$0xff] }
 0x447   :  { %8053 = vmatprep.subr.bf16.mxu1 %v13282_v59  ;;  %v13293_v59 = vld [vmem:[#allocation283_spill] sm:$0xff] }
 0x449   :  { %7831 = vmatpush1.bf16.msra.mxu0 %v13283_v44 }
 0x44a   :  { %8055 = vmatpush1.bf16.msra.mxu1 %v13284_v6  ;;  %7833 = vmatprep.subr.bf16.mxu0 %v13285_v61  ;;  %v13295_v6 = vld [vmem:[#allocation284_spill] sm:$0xff] }
 0x44b   :  { %8057 = vmatprep.subr.bf16.mxu1 %v13286_v33  ;;  %v13297_v33 = vld [vmem:[#allocation285_spill] sm:$0xff] }
 0x44d   :  { %7835 = vmatpush1.bf16.msra.mxu0 %v13287_v38  ;;  %v13298_v38 = vld [vmem:[#allocation105_spill] sm:$0xff] }
 0x44e   :  { %8059 = vmatpush1.bf16.msra.mxu1 %v13288_v36  ;;  %7837 = vmatprep.subr.bf16.mxu0 %v13289_v4  ;;  %v13299_v36 = vld [vmem:[#allocation286_spill] sm:$0xff]  ;;  %v13300_v4 = vld [vmem:[#allocation107_spill] sm:$0xff] }
 0x44f   :  { %8061 = vmatprep.subr.bf16.mxu1 %v13290_v52  ;;  %v13301_v52 = vld [vmem:[#allocation287_spill] sm:$0xff] }
 0x451   :  { %7839 = vmatpush1.bf16.msra.mxu0 %v13291_v1  ;;  %v13302_v1 = vld [vmem:[#allocation109_spill] sm:$0xff] }
 0x452   :  { %8063 = vmatpush1.bf16.msra.mxu1 %v13292_v20  ;;  %7841 = vmatprep.subr.bf16.mxu0 %v13293_v59  ;;  %v13303_v20 = vld [vmem:[#allocation288_spill] sm:$0xff]  ;;  %v13304_v59 = vld [vmem:[#allocation111_spill] sm:$0xff] }
 0x453   :  { %8065 = vmatprep.subr.bf16.mxu1 %v13294_v32  ;;  %v13305_v32 = vld [vmem:[#allocation289_spill] sm:$0xff] }
 0x455   :  { %7843 = vmatpush1.bf16.msra.mxu0 %v13295_v6  ;;  %v13306_v6 = vld [vmem:[#allocation113_spill] sm:$0xff] }
 0x456   :  { %8067 = vmatpush1.bf16.msra.mxu1 %v13296_v11  ;;  %7845 = vmatprep.subr.bf16.mxu0 %v13297_v33  ;;  %v13307_v11 = vld [vmem:[#allocation290_spill] sm:$0xff]  ;;  %v13308_v33 = vld [vmem:[#allocation115_spill] sm:$0xff] }
 0x457   :  { %8069 = vmatprep.subr.bf16.mxu1 %v13298_v38  ;;  %v13309_v38 = vld [vmem:[#allocation291_spill] sm:$0xff] }
 0x459   :  { %7847 = vmatpush1.bf16.msra.mxu0 %v13299_v36  ;;  %v13310_v36 = vld [vmem:[#allocation117_spill] sm:$0xff] }
 0x45a   :  { %8071 = vmatpush1.bf16.msra.mxu1 %v13300_v4  ;;  %7849 = vmatprep.subr.bf16.mxu0 %v13301_v52  ;;  %v13311_v4 = vld [vmem:[#allocation292_spill] sm:$0xff]  ;;  %v13312_v52 = vld [vmem:[#allocation119_spill] sm:$0xff] }
 0x45b   :  { %8073 = vmatprep.subr.bf16.mxu1 %v13302_v1  ;;  %v13313_v1 = vld [vmem:[#allocation293_spill] sm:$0xff] }
 0x45d   :  { %7851 = vmatpush1.bf16.msra.mxu0 %v13303_v20  ;;  %v13314_v20 = vld [vmem:[#allocation121_spill] sm:$0xff] }
 0x45e   :  { %8075 = vmatpush1.bf16.msra.mxu1 %v13304_v59  ;;  %7853 = vmatprep.subr.bf16.mxu0 %v13305_v32  ;;  %v13315_v59 = vld [vmem:[#allocation294_spill] sm:$0xff]  ;;  %v13316_v32 = vld [vmem:[#allocation123_spill] sm:$0xff] }
 0x45f   :  { %8077 = vmatprep.subr.bf16.mxu1 %v13306_v6  ;;  %v13317_v6 = vld [vmem:[#allocation295_spill] sm:$0xff] }
 0x461   :  { %7855 = vmatpush1.bf16.msra.mxu0 %v13307_v11  ;;  %v13318_v11 = vld [vmem:[#allocation125_spill] sm:$0xff] }
 0x462   :  { %8079 = vmatpush1.bf16.msra.mxu1 %v13308_v33  ;;  %7857 = vmatprep.subr.bf16.mxu0 %v13309_v38  ;;  %v13319_v33 = vld [vmem:[#allocation296_spill] sm:$0xff]  ;;  %v13320_v38 = vld [vmem:[#allocation127_spill] sm:$0xff] }
 0x463   :  { %8081 = vmatprep.subr.bf16.mxu1 %v13310_v36  ;;  %v13321_v36 = vld [vmem:[#allocation297_spill] sm:$0xff] }
 0x465   :  { %7859 = vmatpush1.bf16.msra.mxu0 %v13311_v4  ;;  %v13322_v4 = vld [vmem:[#allocation129_spill] sm:$0xff] }
 0x466   :  { %8083 = vmatpush1.bf16.msra.mxu1 %v13312_v52  ;;  %7861 = vmatprep.subr.bf16.mxu0 %v13313_v1  ;;  %v13323_v52 = vld [vmem:[#allocation298_spill] sm:$0xff]  ;;  %v13324_v1 = vld [vmem:[#allocation131_spill] sm:$0xff] }
 0x467   :  { %8085 = vmatprep.subr.bf16.mxu1 %v13314_v20  ;;  %v13325_v20 = vld [vmem:[#allocation299_spill] sm:$0xff] }
 0x469   :  { %7863 = vmatpush1.bf16.msra.mxu0 %v13315_v59  ;;  %v13326_v59 = vld [vmem:[#allocation133_spill] sm:$0xff] }
 0x46a   :  { %8087 = vmatpush1.bf16.msra.mxu1 %v13316_v32  ;;  %7865 = vmatprep.subr.bf16.mxu0 %v13317_v6  ;;  %v13327_v32 = vld [vmem:[#allocation300_spill] sm:$0xff]  ;;  %v13328_v6 = vld [vmem:[#allocation135_spill] sm:$0xff] }
 0x46b   :  { %8089 = vmatprep.subr.bf16.mxu1 %v13318_v11  ;;  %v13329_v11 = vld [vmem:[#allocation301_spill] sm:$0xff] }
 0x46d   :  { %7867 = vmatpush1.bf16.msra.mxu0 %v13319_v33  ;;  %v13330_v33 = vld [vmem:[#allocation137_spill] sm:$0xff] }
 0x46e   :  { %8091 = vmatpush1.bf16.msra.mxu1 %v13320_v38  ;;  %7869 = vmatprep.subr.bf16.mxu0 %v13321_v36  ;;  %v13331_v38 = vld [vmem:[#allocation302_spill] sm:$0xff]  ;;  %v13332_v36 = vld [vmem:[#allocation139_spill] sm:$0xff] }
 0x46f   :  { %8093 = vmatprep.subr.bf16.mxu1 %v13322_v4  ;;  %v13333_v4 = vld [vmem:[#allocation303_spill] sm:$0xff] }
 0x471   :  { %7871 = vmatpush1.bf16.msra.mxu0 %v13323_v52  ;;  %v13334_v52 = vld [vmem:[#allocation141_spill] sm:$0xff] }
 0x472   :  { %8095 = vmatpush1.bf16.msra.mxu1 %v13324_v1  ;;  %7873 = vmatprep.subr.bf16.mxu0 %v13325_v20  ;;  %v13335_v1 = vld [vmem:[#allocation304_spill] sm:$0xff]  ;;  %v13336_v20 = vld [vmem:[#allocation143_spill] sm:$0xff] }
 0x473   :  { %8097 = vmatprep.subr.bf16.mxu1 %v13326_v59  ;;  %v13337_v59 = vld [vmem:[#allocation305_spill] sm:$0xff] }
 0x475   :  { %7875 = vmatpush1.bf16.msra.mxu0 %v13327_v32  ;;  %v11240_v32 = vld [vmem:[#allocation3 + $0xd0] sm:$0xff] }
 0x476   :  { %8099 = vmatpush1.bf16.msra.mxu1 %v13328_v6  ;;  %7877 = vmatprep.subr.bf16.mxu0 %v13329_v11  ;;  %13338 = vst [vmem:[#allocation45_spill] sm:$0xff] %v11240_v32  ;;  %v13339_v6 = vld [vmem:[#allocation145_spill] sm:$0xff] }
 0x477   :  { %8101 = vmatprep.subr.bf16.mxu1 %v13330_v33  ;;  %v13340_v11 = vld [vmem:[#allocation21_spill] sm:$0xff]  ;;  %v13341_v33 = vld [vmem:[#allocation306_spill] sm:$0xff] }
 0x479   :  { %7879 = vmatpush1.bf16.msra.mxu0 %v13331_v38  ;;  %v13352_v38 = vld [vmem:[#allocation155_spill] sm:$0xff] }
 0x47a   :  { %8103 = vmatpush1.bf16.msra.mxu1 %v13332_v36  ;;  %7881 = vmatprep.subr.bf16.mxu0 %v13333_v4  ;;  %v11246_v36 = vld [vmem:[#allocation3 + $0xe8] sm:$0xff] }
 0x47b   :  { %8105 = vmatprep.subr.bf16.mxu1 %v13334_v52  ;;  %13342 = vst [vmem:[#allocation47_spill] sm:$0xff] %v11246_v36  ;;  %v13343_v4 = vld [vmem:[#allocation147_spill] sm:$0xff]  ;;  %v13344_v52 = vld [vmem:[#allocation308_spill] sm:$0xff] }
 0x47d   :  { %7883 = vmatpush1.bf16.msra.mxu0 %v13335_v1  ;;  %v13345_v1 = vld [vmem:[#allocation149_spill] sm:$0xff] }
 0x47e   :  { %8107 = vmatpush1.bf16.msra.mxu1 %v13336_v20  ;;  %7885 = vmatprep.subr.bf16.mxu0 %v13337_v59  ;;  %v13346_v20 = vld [vmem:[#allocation23_spill] sm:$0xff]  ;;  %v13347_v59 = vld [vmem:[#allocation309_spill] sm:$0xff] }
 0x47f   :  { %8109 = vmatprep.subr.bf16.mxu1 %v13339_v6  ;;  %v13348_v6 = vld [vmem:[#allocation151_spill] sm:$0xff] }
 0x480   :  { %3296 = vmatmul.mubr.f32.vlgmr.msra.gmra.mrb[8].mxu0 %v13340_v11  ;;  %v13349_v11 = vld [vmem:[#allocation311_spill] sm:$0xff] }
 0x481   :  { %7887 = vmatpush1.bf16.msra.mxu0 %v13341_v33  ;;  %3604 = vmatmul.mubr.f32.vlgmr.msra.gmra.mrb[8].mxu1 %v11240_v32  ;;  %v13350_v33 = vld [vmem:[#allocation153_spill] sm:$0xff]  ;;  %v13351_v32 = vld [vmem:[#allocation312_spill] sm:$0xff] }
 0x482   :  { %8111 = vmatpush1.bf16.msra.mxu1 %v13343_v4  ;;  %7889 = vmatprep.subr.bf16.mxu0 %v13344_v52  ;;  %v13353_v4 = vld [vmem:[#allocation313_spill] sm:$0xff] }
 0x483   :  { %8113 = vmatprep.subr.bf16.mxu1 %v13345_v1  ;;  %3366 = vmatprep.mubr.f32.mxu0 %v13346_v20  ;;  %v13354_v52 = vld [vmem:[#allocation157_spill] sm:$0xff]  ;;  %v13355_v1 = vld [vmem:[#allocation314_spill] sm:$0xff]  ;;  %v13356_v20 = vld [vmem:[#allocation159_spill] sm:$0xff] }
 0x484   :  { %3674 = vmatprep.mubr.f32.mxu1 %v11246_v36  ;;  %v13357_v36 = vld [vmem:[#allocation315_spill] sm:$0xff] }
 0x485   :  { %7891 = vmatpush1.bf16.msra.mxu0 %v13347_v59  ;;  %v13358_v59 = vld [vmem:[#allocation161_spill] sm:$0xff] }
 0x486   :  { %8115 = vmatpush1.bf16.msra.mxu1 %v13348_v6  ;;  %7893 = vmatprep.subr.bf16.mxu0 %v13349_v11  ;;  %v13359_v6 = vld [vmem:[#allocation316_spill] sm:$0xff]  ;;  %v13360_v11 = vld [vmem:[#allocation163_spill] sm:$0xff] }
 0x487   :  { %8117 = vmatprep.subr.bf16.mxu1 %v13350_v33  ;;  %v13361_v33 = vld [vmem:[#allocation317_spill] sm:$0xff] }
 0x489   :  { %7895 = vmatpush1.bf16.msra.mxu0 %v13351_v32  ;;  %v13362_v32 = vld [vmem:[#allocation165_spill] sm:$0xff] }
 0x48a   :  { %8119 = vmatpush1.bf16.msra.mxu1 %v13352_v38  ;;  %7897 = vmatprep.subr.bf16.mxu0 %v13353_v4  ;;  %v13363_v38 = vld [vmem:[#allocation318_spill] sm:$0xff]  ;;  %v13364_v4 = vld [vmem:[#allocation167_spill] sm:$0xff] }
 0x48b   :  { %8121 = vmatprep.subr.bf16.mxu1 %v13354_v52  ;;  %v13365_v52 = vld [vmem:[#allocation319_spill] sm:$0xff] }
 0x48d   :  { %7899 = vmatpush1.bf16.msra.mxu0 %v13355_v1  ;;  %v13366_v1 = vld [vmem:[#allocation169_spill] sm:$0xff] }
 0x48e   :  { %8123 = vmatpush1.bf16.msra.mxu1 %v13356_v20  ;;  %7901 = vmatprep.subr.bf16.mxu0 %v13357_v36  ;;  %v13367_v20 = vld [vmem:[#allocation320_spill] sm:$0xff]  ;;  %v13368_v36 = vld [vmem:[#allocation171_spill] sm:$0xff] }
 0x48f   :  { %8125 = vmatprep.subr.bf16.mxu1 %v13358_v59  ;;  %v13369_v59 = vld [vmem:[#allocation321_spill] sm:$0xff] }
 0x491   :  { %7903 = vmatpush1.bf16.msra.mxu0 %v13359_v6  ;;  %v13370_v6 = vld [vmem:[#allocation173_spill] sm:$0xff] }
 0x492   :  { %8127 = vmatpush1.bf16.msra.mxu1 %v13360_v11  ;;  %7905 = vmatprep.subr.bf16.mxu0 %v13361_v33  ;;  %v13371_v11 = vld [vmem:[#allocation322_spill] sm:$0xff]  ;;  %v13372_v33 = vld [vmem:[#allocation175_spill] sm:$0xff] }
 0x493   :  { %8129 = vmatprep.subr.bf16.mxu1 %v13362_v32  ;;  %v13373_v32 = vld [vmem:[#allocation323_spill] sm:$0xff] }
 0x495   :  { %7907 = vmatpush1.bf16.msra.mxu0 %v13363_v38  ;;  %v13374_v38 = vld [vmem:[#allocation177_spill] sm:$0xff] }
 0x496   :  { %8131 = vmatpush1.bf16.msra.mxu1 %v13364_v4  ;;  %7909 = vmatprep.subr.bf16.mxu0 %v13365_v52  ;;  %v13375_v4 = vld [vmem:[#allocation324_spill] sm:$0xff]  ;;  %v13376_v52 = vld [vmem:[#allocation179_spill] sm:$0xff] }
 0x497   :  { %8133 = vmatprep.subr.bf16.mxu1 %v13366_v1  ;;  %v13377_v1 = vld [vmem:[#allocation325_spill] sm:$0xff] }
 0x499   :  { %7911 = vmatpush1.bf16.msra.mxu0 %v13367_v20  ;;  %v13378_v20 = vld [vmem:[#allocation181_spill] sm:$0xff] }
 0x49a   :  { %8135 = vmatpush1.bf16.msra.mxu1 %v13368_v36  ;;  %7913 = vmatprep.subr.bf16.mxu0 %v13369_v59  ;;  %v13379_v36 = vld [vmem:[#allocation326_spill] sm:$0xff]  ;;  %v13380_v59 = vld [vmem:[#allocation183_spill] sm:$0xff] }
 0x49b   :  { %8137 = vmatprep.subr.bf16.mxu1 %v13370_v6  ;;  %v13381_v6 = vld [vmem:[#allocation327_spill] sm:$0xff] }
 0x49d   :  { %7915 = vmatpush1.bf16.msra.mxu0 %v13371_v11  ;;  %v13382_v11 = vld [vmem:[#allocation185_spill] sm:$0xff] }
 0x49e   :  { %8139 = vmatpush1.bf16.msra.mxu1 %v13372_v33  ;;  %7917 = vmatprep.subr.bf16.mxu0 %v13373_v32  ;;  %v13383_v33 = vld [vmem:[#allocation328_spill] sm:$0xff]  ;;  %v13384_v32 = vld [vmem:[#allocation187_spill] sm:$0xff] }
 0x49f   :  { %8141 = vmatprep.subr.bf16.mxu1 %v13374_v38  ;;  %v13385_v38 = vld [vmem:[#allocation329_spill] sm:$0xff] }
 0x4a1   :  { %7919 = vmatpush1.bf16.msra.mxu0 %v13375_v4  ;;  %v13386_v4 = vld [vmem:[#allocation189_spill] sm:$0xff] }
 0x4a2   :  { %8143 = vmatpush1.bf16.msra.mxu1 %v13376_v52  ;;  %7921 = vmatprep.subr.bf16.mxu0 %v13377_v1  ;;  %v13387_v52 = vld [vmem:[#allocation330_spill] sm:$0xff]  ;;  %v13388_v1 = vld [vmem:[#allocation191_spill] sm:$0xff] }
 0x4a3   :  { %8145 = vmatprep.subr.bf16.mxu1 %v13378_v20  ;;  %v13389_v20 = vld [vmem:[#allocation331_spill] sm:$0xff] }
 0x4a5   :  { %7923 = vmatpush1.bf16.msra.mxu0 %v13379_v36  ;;  %v13390_v36 = vld [vmem:[#allocation193_spill] sm:$0xff] }
 0x4a6   :  { %8147 = vmatpush1.bf16.msra.mxu1 %v13380_v59  ;;  %7925 = vmatprep.subr.bf16.mxu0 %v13381_v6  ;;  %v13391_v59 = vld [vmem:[#allocation332_spill] sm:$0xff]  ;;  %v13392_v6 = vld [vmem:[#allocation195_spill] sm:$0xff] }
 0x4a7   :  { %8149 = vmatprep.subr.bf16.mxu1 %v13382_v11  ;;  %v13393_v11 = vld [vmem:[#allocation333_spill] sm:$0xff] }
 0x4a9   :  { %7927 = vmatpush1.bf16.msra.mxu0 %v13383_v33  ;;  %v13394_v33 = vld [vmem:[#allocation197_spill] sm:$0xff] }
 0x4aa   :  { %8151 = vmatpush1.bf16.msra.mxu1 %v13384_v32  ;;  %7929 = vmatprep.subr.bf16.mxu0 %v13385_v38  ;;  %v13395_v32 = vld [vmem:[#allocation334_spill] sm:$0xff]  ;;  %v13396_v38 = vld [vmem:[#allocation199_spill] sm:$0xff] }
 0x4ab   :  { %8153 = vmatprep.subr.bf16.mxu1 %v13386_v4  ;;  %v13397_v4 = vld [vmem:[#allocation335_spill] sm:$0xff] }
 0x4ad   :  { %7931 = vmatpush1.bf16.msra.mxu0 %v13387_v52  ;;  %v13398_v52 = vld [vmem:[#allocation201_spill] sm:$0xff] }
 0x4ae   :  { %8155 = vmatpush1.bf16.msra.mxu1 %v13388_v1  ;;  %7933 = vmatprep.subr.bf16.mxu0 %v13389_v20  ;;  %v13399_v1 = vld [vmem:[#allocation336_spill] sm:$0xff]  ;;  %v13400_v20 = vld [vmem:[#allocation203_spill] sm:$0xff] }
 0x4af   :  { %8157 = vmatprep.subr.bf16.mxu1 %v13390_v36  ;;  %v13401_v36 = vld [vmem:[#allocation337_spill] sm:$0xff] }
 0x4b1   :  { %7935 = vmatpush1.bf16.msra.mxu0 %v13391_v59  ;;  %v13402_v59 = vld [vmem:[#allocation205_spill] sm:$0xff] }
 0x4b2   :  { %8159 = vmatpush1.bf16.msra.mxu1 %v13392_v6  ;;  %7937 = vmatprep.subr.bf16.mxu0 %v13393_v11  ;;  %v13403_v6 = vld [vmem:[#allocation338_spill] sm:$0xff]  ;;  %v13404_v11 = vld [vmem:[#allocation207_spill] sm:$0xff] }
 0x4b3   :  { %8161 = vmatprep.subr.bf16.mxu1 %v13394_v33  ;;  %v13405_v33 = vld [vmem:[#allocation339_spill] sm:$0xff] }
 0x4b5   :  { %7939 = vmatpush1.bf16.msra.mxu0 %v13395_v32  ;;  %v11312_v32 = vld [vmem:[#allocation3 + $0xe0] sm:$0xff] }
 0x4b6   :  { %8163 = vmatpush1.bf16.msra.mxu1 %v13396_v38  ;;  %7941 = vmatprep.subr.bf16.mxu0 %v13397_v4  ;;  %13406 = vst [vmem:[#allocation49_spill] sm:$0xff] %v11312_v32  ;;  %v13407_v38 = vld [vmem:[#allocation209_spill] sm:$0xff] }
 0x4b7   :  { %8165 = vmatprep.subr.bf16.mxu1 %v13398_v52  ;;  %v13408_v4 = vld [vmem:[#allocation25_spill] sm:$0xff]  ;;  %v13409_v52 = vld [vmem:[#allocation340_spill] sm:$0xff] }
 0x4b9   :  { %7943 = vmatpush1.bf16.msra.mxu0 %v13399_v1  ;;  %v13424_v1 = vld [vmem:[#allocation223_spill] sm:$0xff] }
 0x4ba   :  { %8167 = vmatpush1.bf16.msra.mxu1 %v13400_v20  ;;  %7945 = vmatprep.subr.bf16.mxu0 %v13401_v36  ;;  %v11318_v20 = vld [vmem:[#allocation3 + $0xf8] sm:$0xff]  ;;  %v13411_v36 = vld [vmem:[#allocation211_spill] sm:$0xff] }
 0x4bb   :  { %8169 = vmatprep.subr.bf16.mxu1 %v13402_v59  ;;  %13410 = vst [vmem:[#allocation51_spill] sm:$0xff] %v11318_v20  ;;  %v13412_v59 = vld [vmem:[#allocation341_spill] sm:$0xff] }
 0x4bd   :  { %7947 = vmatpush1.bf16.msra.mxu0 %v13403_v6  ;;  %v13413_v6 = vld [vmem:[#allocation213_spill] sm:$0xff] }
 0x4be   :  { %8171 = vmatpush1.bf16.msra.mxu1 %v13404_v11  ;;  %7949 = vmatprep.subr.bf16.mxu0 %v13405_v33  ;;  %v13414_v11 = vld [vmem:[#allocation27_spill] sm:$0xff]  ;;  %v13419_v33 = vld [vmem:[#allocation345_spill] sm:$0xff] }
 0x4bf   :  { %8173 = vmatprep.subr.bf16.mxu1 %v13407_v38  ;;  %v13415_v38 = vld [vmem:[#allocation342_spill] sm:$0xff] }
 0x4c0   :  { %3367 = vmatmul.mubr.f32.vlgmr.msra.gmra.mrb[8].mxu0 %v13408_v4  ;;  %v13416_v4 = vld [vmem:[#allocation215_spill] sm:$0xff] }
 0x4c1   :  { %7951 = vmatpush1.bf16.msra.mxu0 %v13409_v52  ;;  %3675 = vmatmul.mubr.f32.vlgmr.msra.gmra.mrb[8].mxu1 %v11312_v32  ;;  %v13417_v52 = vld [vmem:[#allocation344_spill] sm:$0xff]  ;;  %v13418_v32 = vld [vmem:[#allocation217_spill] sm:$0xff] }
 0x4c2   :  { %8175 = vmatpush1.bf16.msra.mxu1 %v13411_v36  ;;  %7953 = vmatprep.subr.bf16.mxu0 %v13412_v59  ;;  %v13420_v36 = vld [vmem:[#allocation219_spill] sm:$0xff]  ;;  %v13421_v59 = vld [vmem:[#allocation346_spill] sm:$0xff] }
 0x4c3   :  { %8177 = vmatprep.subr.bf16.mxu1 %v13413_v6  ;;  %5771 = vmatprep.mubr.msk.f32.mxu0 %vm823_vm0, %v13414_v11  ;;  %v13422_v6 = vld [vmem:[#allocation221_spill] sm:$0xff]  ;;  %v13423_v11 = vld [vmem:[#allocation347_spill] sm:$0xff] }
 0x4c4   :  { %5774 = vmatprep.mubr.msk.f32.mxu1 %vm823_vm0, %v11318_v20  ;;  %v13425_v20 = vld [vmem:[#allocation348_spill] sm:$0xff] }
 0x4c5   :  { %7955 = vmatpush1.bf16.msra.mxu0 %v13415_v38  ;;  %v13426_v38 = vld [vmem:[#allocation225_spill] sm:$0xff] }
 0x4c6   :  { %8179 = vmatpush1.bf16.msra.mxu1 %v13416_v4  ;;  %7957 = vmatprep.subr.bf16.mxu0 %v13417_v52  ;;  %v13427_v4 = vld [vmem:[#allocation349_spill] sm:$0xff]  ;;  %v13428_v52 = vld [vmem:[#allocation227_spill] sm:$0xff] }
 0x4c7   :  { %8181 = vmatprep.subr.bf16.mxu1 %v13418_v32 }
 0x4c9   :  { %7959 = vmatpush1.bf16.msra.mxu0 %v13419_v33  ;;  %v13429_v33 = vld [vmem:[#allocation350_spill] sm:$0xff] }
 0x4ca   :  { %8183 = vmatpush1.bf16.msra.mxu1 %v13420_v36  ;;  %7961 = vmatprep.subr.bf16.mxu0 %v13421_v59  ;;  %v13430_v36 = vld [vmem:[#allocation359_spill] sm:$0xff] }
 0x4cb   :  { %8185 = vmatprep.subr.bf16.mxu1 %v13422_v6  ;;  %v13431_v6 = vld [vmem:[#allocation229_spill] sm:$0xff] }
 0x4cd   :  { %7963 = vmatpush1.bf16.msra.mxu0 %v13423_v11  ;;  %v13432_v11 = vld [vmem:[#allocation33_spill] sm:$0xff] }
 0x4ce   :  { %8187 = vmatpush1.bf16.msra.mxu1 %v13424_v1  ;;  %7965 = vmatprep.subr.bf16.mxu0 %v13425_v20  ;;  %v13433_v1 = vld [vmem:[#allocation360_spill] sm:$0xff] }
 0x4cf   :  { %8189 = vmatprep.subr.bf16.mxu1 %v13426_v38 }
 0x4d1   :  { %7967 = vmatpush1.bf16.msra.mxu0 %v13427_v4  ;;  %v13434_v4 = vld [vmem:[#allocation351_spill] sm:$0xff] }
 0x4d2   :  { %8191 = vmatpush1.bf16.msra.mxu1 %v13428_v52  ;;  %v2871_v32 = vpop.f32.mrb[6].mxu0  ;;  %7969 = vmatprep.subr.bf16.mxu0 %v13429_v33  ;;  %v13435_v33 = vld [vmem:[#allocation352_spill] sm:$0xff] }
 0x4d3   :  { %v8664_v61 = vadd.f32 %v2871_v32, %v13430_v36  ;;  %v3155_v59 = vpop.f32.mrb[6].mxu1  ;;  %v2873_v44 = vpop.f32.mrb[7].mxu0  ;;  %8193 = vmatprep.subr.bf16.mxu1 %v13431_v6  ;;  %v13436_v32 = vld [vmem:[#allocation363_spill] sm:$0xff] }
 0x4d4   :  { %v8666_v58 = vadd.f32 %v3155_v59, %v13432_v11  ;;  %v8665_v5 = vadd.f32 %v2873_v44, %v13433_v1  ;;  %v3157_v20 = vpop.f32.mrb[7].mxu1 }
 0x4d5   :  { %v3444_v19 = vmax.f32 %v8664_v61, 0.0  ;;  %v8667_v38 = vadd.f32 %v3157_v20, %v11038_v29  ;;  %7971 = vmatpush1.bf16.msra.mxu0 %v13434_v4  ;;  %v13437_v61 = vld [vmem:[#allocation364_spill] sm:$0xff] }
 0x4d6   :  { %v3446_v52 = vmax.f32 %v8666_v58, 0.0  ;;  %v3445_v63 = vmax.f32 %v8665_v5, 0.0  ;;  %8195 = vmatpush1.bf16.msra.mxu1 %v13231_v54  ;;  %7973 = vmatprep.subr.bf16.mxu0 %v13435_v33  ;;  %v13438_v5 = vld [vmem:[#allocation355_spill] sm:$0xff]  ;;  %v13439_v54 = vld [vmem:[#allocation356_spill] sm:$0xff] }
 0x4d7   :  { %v11351_v36 = vmax.f32 %v13436_v32, %v3444_v19  ;;  %v3447_v6 = vmax.f32 %v8667_v38, 0.0  ;;  %8197 = vmatprep.subr.bf16.mxu1 %v13232_v26  ;;  %v13440_v19 = vld [vmem:[#allocation357_spill] sm:$0xff]  ;;  %v11375_v26 = vld [vmem:[#allocation3 + $0xf0] sm:$0xff] }
 0x4d8   :  { %v11355_v44 = vmax.f32 %v11068_v3, %v3446_v52  ;;  %v11358_v59 = vmax.f32 %v13437_v61, %v3445_v63  ;;  %v11369_v3 = vld [vmem:[#allocation5 + $0x1528] sm:$0xf]  ;;  %v13481_v63 = vld [vmem:[#allocation277_spill] sm:$0xff]  ;;  %v13482_v58 = vld [vmem:[#allocation92_spill] sm:$0xff] }
 0x4d9   :  { %v11361_v20 = vmax.f32 %v11073_v50, %v3447_v6  ;;  %7975 = vmatpush1.bf16.msra.mxu0 %v13438_v5  ;;  %v11377_v50 = vld [vmem:[#allocation5 + $0x1520] sm:$0xf]  ;;  %v13485_v38 = vld [vmem:[#allocation279_spill] sm:$0xff]  ;;  %v13486_v52 = vld [vmem:[#allocation96_spill] sm:$0xff] }
 0x4da   :  { %8199 = vmatpush1.bf16.msra.mxu1 %v13235_v41  ;;  %7977 = vmatprep.subr.bf16.mxu0 %v13439_v54  ;;  %v13441_v41 = vld [vmem:[#allocation18_spill] sm:$0xff]  ;;  %v13487_v32 = vld [vmem:[#allocation280_spill] sm:$0xff]  ;;  %v13489_v61 = vld [vmem:[#allocation281_spill] sm:$0xff] }
 0x4db   :  { %8201 = vmatprep.subr.bf16.mxu1 %v13236_v62  ;;  %v13442_v62 = vld [vmem:[#allocation20_spill] sm:$0xff]  ;;  %v13488_v6 = vld [vmem:[#allocation98_spill] sm:$0xff] }
 0x4dd   :  { %7979 = vmatpush1.bf16.msra.mxu0 %v13440_v19 }
 0x4de   :  { %8203 = vmatpush1.bf16.msra.mxu1 %v13237_v22  ;;  %5769 = vmatprep.subr.msk.mxu0 %vm827_vm1, %v11369_v3  ;;  %v13443_v22 = vld [vmem:[#allocation22_spill] sm:$0xff] }
 0x4df   :  { %5772 = vmatprep.subr.msk.mxu1 %vm827_vm1, %v11083_v10  ;;  %v13444_v10 = vld [vmem:[#allocation24_spill] sm:$0xff] }
 0x4e1   :  { %5770 = vmatpush1.msk.msra.mxu0 %vm827_vm1, %v11377_v50 }
 0x4e2   :  { %5773 = vmatpush1.msk.msra.mxu1 %vm827_vm1, %v11091_v55  ;;  %3438 = vmatmul.mubr.f32.vlgmr.msra.gmra.mrb[8].mxu0 %v11089_v37  ;;  %v13445_v37 = vld [vmem:[#allocation26_spill] sm:$0xff]  ;;  %v13446_v55 = vld [vmem:[#allocation28_spill] sm:$0xff] }
 0x4e3   :  { %3746 = vmatmul.mubr.f32.vlgmr.msra.gmra.mrb[8].mxu1 %v11375_v26  ;;  %8205 = vmatprep.subr.bf16.mxu0 %v13441_v41  ;;  %v13490_v41 = vld [vmem:[#allocation100_spill] sm:$0xff] }
 0x4e4   :  { %8429 = vmatprep.subr.bf16.mxu1 %v13238_v57  ;;  %8207 = vmatpush1.bf16.msra.mxu0 %v13442_v62  ;;  %v13447_v57 = vld [vmem:[#allocation30_spill] sm:$0xff] }
 0x4e5   :  { %8431 = vmatpush1.bf16.msra.mxu1 %v13239_v15  ;;  %8209 = vmatprep.subr.bf16.mxu0 %v13443_v22  ;;  %v13448_v15 = vld [vmem:[#allocation32_spill] sm:$0xff]  ;;  %v13491_v62 = vld [vmem:[#allocation282_spill] sm:$0xff] }
 0x4e6   :  { %8433 = vmatprep.subr.bf16.mxu1 %v13240_v45  ;;  %3816 = vmatprep.mubr.f32.mxu0 %v11102_v49  ;;  %v13450_v45 = vld [vmem:[#allocation36_spill] sm:$0xff]  ;;  %v13492_v22 = vld [vmem:[#allocation102_spill] sm:$0xff] }
 0x4e7   :  { %4100 = vmatprep.mubr.f32.mxu1 %v11102_v49  ;;  %v13449_v49 = vld [vmem:[#allocation34_spill] sm:$0xff] }
 0x4e8   :  { %8211 = vmatpush1.bf16.msra.mxu0 %v13444_v10  ;;  %v13493_v10 = vld [vmem:[#allocation283_spill] sm:$0xff] }
 0x4e9   :  { %8435 = vmatpush1.bf16.msra.mxu1 %v13241_v27  ;;  %8213 = vmatprep.subr.bf16.mxu0 %v13445_v37  ;;  %v13451_v27 = vld [vmem:[#allocation38_spill] sm:$0xff]  ;;  %v13494_v37 = vld [vmem:[#allocation104_spill] sm:$0xff] }
 0x4ea   :  { %8437 = vmatprep.subr.bf16.mxu1 %v13242_v42  ;;  %v13452_v42 = vld [vmem:[#allocation40_spill] sm:$0xff] }
 0x4ec   :  { %8215 = vmatpush1.bf16.msra.mxu0 %v13446_v55  ;;  %v13495_v55 = vld [vmem:[#allocation284_spill] sm:$0xff] }
 0x4ed   :  { %8439 = vmatpush1.bf16.msra.mxu1 %v13243_v60  ;;  %8217 = vmatprep.subr.bf16.mxu0 %v13447_v57  ;;  %v13453_v60 = vld [vmem:[#allocation42_spill] sm:$0xff] }
 0x4ee   :  { %8441 = vmatprep.subr.bf16.mxu1 %v13244_v8  ;;  %v13454_v8 = vld [vmem:[#allocation44_spill] sm:$0xff]  ;;  %v13496_v57 = vld [vmem:[#allocation106_spill] sm:$0xff] }
 0x4f0   :  { %8219 = vmatpush1.bf16.msra.mxu0 %v13448_v15  ;;  %v13497_v15 = vld [vmem:[#allocation285_spill] sm:$0xff] }
 0x4f1   :  { %8443 = vmatpush1.bf16.msra.mxu1 %v13245_v17  ;;  %8221 = vmatprep.subr.bf16.mxu0 %v13449_v49  ;;  %v13455_v17 = vld [vmem:[#allocation46_spill] sm:$0xff]  ;;  %v13498_v49 = vld [vmem:[#allocation108_spill] sm:$0xff] }
 0x4f2   :  { %8445 = vmatprep.subr.bf16.mxu1 %v13246_v9  ;;  %v13456_v9 = vld [vmem:[#allocation48_spill] sm:$0xff] }
 0x4f4   :  { %8223 = vmatpush1.bf16.msra.mxu0 %v13450_v45  ;;  %v13499_v45 = vld [vmem:[#allocation286_spill] sm:$0xff] }
 0x4f5   :  { %8447 = vmatpush1.bf16.msra.mxu1 %v13247_v2  ;;  %8225 = vmatprep.subr.bf16.mxu0 %v13451_v27  ;;  %v13457_v2 = vld [vmem:[#allocation50_spill] sm:$0xff] }
 0x4f6   :  { %8449 = vmatprep.subr.bf16.mxu1 %v13248_v56  ;;  %v13458_v56 = vld [vmem:[#allocation52_spill] sm:$0xff]  ;;  %v13500_v27 = vld [vmem:[#allocation110_spill] sm:$0xff] }
 0x4f8   :  { %8227 = vmatpush1.bf16.msra.mxu0 %v13452_v42  ;;  %v13501_v42 = vld [vmem:[#allocation287_spill] sm:$0xff] }
 0x4f9   :  { %8451 = vmatpush1.bf16.msra.mxu1 %v13249_v30  ;;  %8229 = vmatprep.subr.bf16.mxu0 %v13453_v60  ;;  %v13459_v30 = vld [vmem:[#allocation54_spill] sm:$0xff]  ;;  %v13502_v60 = vld [vmem:[#allocation112_spill] sm:$0xff] }
 0x4fa   :  { %8453 = vmatprep.subr.bf16.mxu1 %v13250_v21  ;;  %v13460_v21 = vld [vmem:[#allocation56_spill] sm:$0xff] }
 0x4fc   :  { %8231 = vmatpush1.bf16.msra.mxu0 %v13454_v8  ;;  %v13503_v8 = vld [vmem:[#allocation288_spill] sm:$0xff] }
 0x4fd   :  { %8455 = vmatpush1.bf16.msra.mxu1 %v13251_v14  ;;  %8233 = vmatprep.subr.bf16.mxu0 %v13455_v17  ;;  %v13461_v14 = vld [vmem:[#allocation58_spill] sm:$0xff] }
 0x4fe   :  { %8457 = vmatprep.subr.bf16.mxu1 %v13252_v48  ;;  %v13462_v48 = vld [vmem:[#allocation60_spill] sm:$0xff]  ;;  %v13504_v17 = vld [vmem:[#allocation114_spill] sm:$0xff] }
 0x500   :  { %8235 = vmatpush1.bf16.msra.mxu0 %v13456_v9  ;;  %v13505_v9 = vld [vmem:[#allocation289_spill] sm:$0xff] }
 0x501   :  { %8459 = vmatpush1.bf16.msra.mxu1 %v13253_v24  ;;  %8237 = vmatprep.subr.bf16.mxu0 %v13457_v2  ;;  %v13463_v24 = vld [vmem:[#allocation62_spill] sm:$0xff]  ;;  %v13506_v2 = vld [vmem:[#allocation116_spill] sm:$0xff] }
 0x502   :  { %8461 = vmatprep.subr.bf16.mxu1 %v13254_v47  ;;  %v13464_v47 = vld [vmem:[#allocation64_spill] sm:$0xff] }
 0x504   :  { %8239 = vmatpush1.bf16.msra.mxu0 %v13458_v56  ;;  %v13507_v56 = vld [vmem:[#allocation290_spill] sm:$0xff] }
 0x505   :  { %8463 = vmatpush1.bf16.msra.mxu1 %v13255_v31  ;;  %8241 = vmatprep.subr.bf16.mxu0 %v13459_v30  ;;  %v13465_v31 = vld [vmem:[#allocation66_spill] sm:$0xff] }
 0x506   :  { %8465 = vmatprep.subr.bf16.mxu1 %v13256_v39  ;;  %v13466_v39 = vld [vmem:[#allocation68_spill] sm:$0xff]  ;;  %v13508_v30 = vld [vmem:[#allocation118_spill] sm:$0xff] }
 0x508   :  { %8243 = vmatpush1.bf16.msra.mxu0 %v13460_v21  ;;  %v13509_v21 = vld [vmem:[#allocation291_spill] sm:$0xff] }
 0x509   :  { %8467 = vmatpush1.bf16.msra.mxu1 %v13257_v0  ;;  %8245 = vmatprep.subr.bf16.mxu0 %v13461_v14  ;;  %v13467_v0 = vld [vmem:[#allocation70_spill] sm:$0xff]  ;;  %v13510_v14 = vld [vmem:[#allocation120_spill] sm:$0xff] }
 0x50a   :  { %8469 = vmatprep.subr.bf16.mxu1 %v13258_v16  ;;  %v13468_v16 = vld [vmem:[#allocation72_spill] sm:$0xff] }
 0x50c   :  { %8247 = vmatpush1.bf16.msra.mxu0 %v13462_v48  ;;  %v13511_v48 = vld [vmem:[#allocation292_spill] sm:$0xff] }
 0x50d   :  { %8471 = vmatpush1.bf16.msra.mxu1 %v13259_v34  ;;  %8249 = vmatprep.subr.bf16.mxu0 %v13463_v24  ;;  %v13469_v34 = vld [vmem:[#allocation74_spill] sm:$0xff] }
 0x50e   :  { %8473 = vmatprep.subr.bf16.mxu1 %v13260_v7  ;;  %v13470_v7 = vld [vmem:[#allocation76_spill] sm:$0xff]  ;;  %v13512_v24 = vld [vmem:[#allocation122_spill] sm:$0xff] }
 0x510   :  { %8251 = vmatpush1.bf16.msra.mxu0 %v13464_v47  ;;  %v13513_v47 = vld [vmem:[#allocation293_spill] sm:$0xff] }
 0x511   :  { %8475 = vmatpush1.bf16.msra.mxu1 %v13261_v13  ;;  %8253 = vmatprep.subr.bf16.mxu0 %v13465_v31  ;;  %v13471_v13 = vld [vmem:[#allocation78_spill] sm:$0xff]  ;;  %v13514_v31 = vld [vmem:[#allocation124_spill] sm:$0xff] }
 0x512   :  { %8477 = vmatprep.subr.bf16.mxu1 %v13262_v25  ;;  %v13472_v25 = vld [vmem:[#allocation80_spill] sm:$0xff] }
 0x514   :  { %8255 = vmatpush1.bf16.msra.mxu0 %v13466_v39  ;;  %v13515_v39 = vld [vmem:[#allocation294_spill] sm:$0xff] }
 0x515   :  { %8479 = vmatpush1.bf16.msra.mxu1 %v13263_v23  ;;  %8257 = vmatprep.subr.bf16.mxu0 %v13467_v0  ;;  %v13473_v23 = vld [vmem:[#allocation82_spill] sm:$0xff] }
 0x516   :  { %8481 = vmatprep.subr.bf16.mxu1 %v13264_v12  ;;  %v13474_v12 = vld [vmem:[#allocation84_spill] sm:$0xff]  ;;  %v13516_v0 = vld [vmem:[#allocation126_spill] sm:$0xff] }
 0x518   :  { %8259 = vmatpush1.bf16.msra.mxu0 %v13468_v16  ;;  %v13517_v16 = vld [vmem:[#allocation295_spill] sm:$0xff] }
 0x519   :  { %8483 = vmatpush1.bf16.msra.mxu1 %v13265_v18  ;;  %8261 = vmatprep.subr.bf16.mxu0 %v13469_v34  ;;  %v13475_v18 = vld [vmem:[#allocation86_spill] sm:$0xff]  ;;  %v13518_v34 = vld [vmem:[#allocation128_spill] sm:$0xff] }
 0x51a   :  { %8485 = vmatprep.subr.bf16.mxu1 %v13266_v46  ;;  %v13476_v46 = vld [vmem:[#allocation275_spill] sm:$0xff] }
 0x51c   :  { %8263 = vmatpush1.bf16.msra.mxu0 %v13470_v7  ;;  %v13519_v7 = vld [vmem:[#allocation296_spill] sm:$0xff] }
 0x51d   :  { %8487 = vmatpush1.bf16.msra.mxu1 %v13267_v40  ;;  %8265 = vmatprep.subr.bf16.mxu0 %v13471_v13  ;;  %v13477_v40 = vld [vmem:[#allocation43_spill] sm:$0xff]  ;;  %v13520_v13 = vld [vmem:[#allocation130_spill] sm:$0xff] }
 0x51e   :  { %8489 = vmatprep.subr.bf16.mxu1 %v13268_v28  ;;  %v13478_v28 = vld [vmem:[#allocation88_spill] sm:$0xff] }
 0x520   :  { %8267 = vmatpush1.bf16.msra.mxu0 %v13472_v25  ;;  %v13521_v25 = vld [vmem:[#allocation297_spill] sm:$0xff] }
 0x521   :  { %8491 = vmatpush1.bf16.msra.mxu1 %v13269_v53  ;;  %8269 = vmatprep.subr.bf16.mxu0 %v13473_v23  ;;  %v13479_v53 = vld [vmem:[#allocation276_spill] sm:$0xff] }
 0x522   :  { %8493 = vmatprep.subr.bf16.mxu1 %v13270_v35  ;;  %v13480_v35 = vld [vmem:[#allocation90_spill] sm:$0xff]  ;;  %v13522_v23 = vld [vmem:[#allocation132_spill] sm:$0xff] }
 0x523   :  { %3817 = vmatmul.mubr.f32.vlgmr.msra.gmra.mrb[10].mxu0 %v11168_v43 }
 0x524   :  { %8271 = vmatpush1.bf16.msra.mxu0 %v13474_v12  ;;  %4101 = vmatmul.mubr.f32.vlgmr.msra.gmra.mrb[10].mxu1 %v11168_v43  ;;  %v13483_v43 = vld [vmem:[#allocation278_spill] sm:$0xff] }
 0x525   :  { %8495 = vmatpush1.bf16.msra.mxu1 %v13273_v51  ;;  %8273 = vmatprep.subr.bf16.mxu0 %v13475_v18  ;;  %v13484_v51 = vld [vmem:[#allocation94_spill] sm:$0xff] }
 0x526   :  { %8497 = vmatprep.subr.bf16.mxu1 %v13476_v46  ;;  %3887 = vmatprep.mubr.f32.mxu0 %v13477_v40  ;;  %v13523_v12 = vld [vmem:[#allocation298_spill] sm:$0xff]  ;;  %v13525_v46 = vld [vmem:[#allocation299_spill] sm:$0xff] }
 0x527   :  { %4171 = vmatprep.mubr.f32.mxu1 %v13477_v40  ;;  %v13524_v18 = vld [vmem:[#allocation134_spill] sm:$0xff]  ;;  %v13526_v40 = vld [vmem:[#allocation136_spill] sm:$0xff] }
 0x528   :  { %8275 = vmatpush1.bf16.msra.mxu0 %v13478_v28  ;;  %v13527_v28 = vld [vmem:[#allocation300_spill] sm:$0xff] }
 0x529   :  { %8499 = vmatpush1.bf16.msra.mxu1 %v13479_v53  ;;  %8277 = vmatprep.subr.bf16.mxu0 %v13480_v35  ;;  %v13528_v53 = vld [vmem:[#allocation138_spill] sm:$0xff]  ;;  %v13529_v35 = vld [vmem:[#allocation301_spill] sm:$0xff] }
 0x52a   :  { %8501 = vmatprep.subr.bf16.mxu1 %v13481_v63  ;;  %v13530_v63 = vld [vmem:[#allocation140_spill] sm:$0xff] }
 0x52c   :  { %8279 = vmatpush1.bf16.msra.mxu0 %v13482_v58  ;;  %v13531_v58 = vld [vmem:[#allocation302_spill] sm:$0xff] }
 0x52d   :  { %8503 = vmatpush1.bf16.msra.mxu1 %v13483_v43  ;;  %8281 = vmatprep.subr.bf16.mxu0 %v13484_v51  ;;  %v13532_v43 = vld [vmem:[#allocation142_spill] sm:$0xff]  ;;  %v13533_v51 = vld [vmem:[#allocation303_spill] sm:$0xff] }
 0x52e   :  { %8505 = vmatprep.subr.bf16.mxu1 %v13485_v38  ;;  %v13534_v38 = vld [vmem:[#allocation144_spill] sm:$0xff] }
 0x530   :  { %8283 = vmatpush1.bf16.msra.mxu0 %v13486_v52  ;;  %v13535_v52 = vld [vmem:[#allocation304_spill] sm:$0xff] }
 0x531   :  { %8507 = vmatpush1.bf16.msra.mxu1 %v13487_v32  ;;  %8285 = vmatprep.subr.bf16.mxu0 %v13488_v6  ;;  %v13536_v32 = vld [vmem:[#allocation146_spill] sm:$0xff]  ;;  %v13537_v6 = vld [vmem:[#allocation305_spill] sm:$0xff] }
 0x532   :  { %8509 = vmatprep.subr.bf16.mxu1 %v13489_v61  ;;  %v13538_v61 = vld [vmem:[#allocation45_spill] sm:$0xff] }
 0x534   :  { %8287 = vmatpush1.bf16.msra.mxu0 %v13490_v41  ;;  %v13539_v41 = vld [vmem:[#allocation148_spill] sm:$0xff] }
 0x535   :  { %8511 = vmatpush1.bf16.msra.mxu1 %v13491_v62  ;;  %8289 = vmatprep.subr.bf16.mxu0 %v13492_v22  ;;  %v13540_v62 = vld [vmem:[#allocation306_spill] sm:$0xff] }
 0x536   :  { %8513 = vmatprep.subr.bf16.mxu1 %v13493_v10  ;;  %v13541_v22 = vld [vmem:[#allocation150_spill] sm:$0xff]  ;;  %v13542_v10 = vld [vmem:[#allocation308_spill] sm:$0xff] }
 0x538   :  { %8291 = vmatpush1.bf16.msra.mxu0 %v13494_v37  ;;  %v13543_v37 = vld [vmem:[#allocation47_spill] sm:$0xff] }
 0x539   :  { %8515 = vmatpush1.bf16.msra.mxu1 %v13495_v55  ;;  %8293 = vmatprep.subr.bf16.mxu0 %v13496_v57  ;;  %v13544_v55 = vld [vmem:[#allocation152_spill] sm:$0xff]  ;;  %v13545_v57 = vld [vmem:[#allocation309_spill] sm:$0xff] }
 0x53a   :  { %8517 = vmatprep.subr.bf16.mxu1 %v13497_v15  ;;  %v13546_v15 = vld [vmem:[#allocation154_spill] sm:$0xff] }
 0x53c   :  { %8295 = vmatpush1.bf16.msra.mxu0 %v13498_v49  ;;  %v13547_v49 = vld [vmem:[#allocation311_spill] sm:$0xff] }
 0x53d   :  { %8519 = vmatpush1.bf16.msra.mxu1 %v13499_v45  ;;  %8297 = vmatprep.subr.bf16.mxu0 %v13500_v27  ;;  %v13548_v45 = vld [vmem:[#allocation156_spill] sm:$0xff] }
 0x53e   :  { %8521 = vmatprep.subr.bf16.mxu1 %v13501_v42  ;;  %v13549_v27 = vld [vmem:[#allocation312_spill] sm:$0xff]  ;;  %v13550_v42 = vld [vmem:[#allocation158_spill] sm:$0xff] }
 0x540   :  { %8299 = vmatpush1.bf16.msra.mxu0 %v13502_v60  ;;  %v13551_v60 = vld [vmem:[#allocation313_spill] sm:$0xff] }
 0x541   :  { %8523 = vmatpush1.bf16.msra.mxu1 %v13503_v8  ;;  %8301 = vmatprep.subr.bf16.mxu0 %v13504_v17  ;;  %v13552_v8 = vld [vmem:[#allocation160_spill] sm:$0xff]  ;;  %v13553_v17 = vld [vmem:[#allocation314_spill] sm:$0xff] }
 0x542   :  { %8525 = vmatprep.subr.bf16.mxu1 %v13505_v9  ;;  %v13554_v9 = vld [vmem:[#allocation162_spill] sm:$0xff] }
 0x544   :  { %8303 = vmatpush1.bf16.msra.mxu0 %v13506_v2  ;;  %v13555_v2 = vld [vmem:[#allocation315_spill] sm:$0xff] }
 0x545   :  { %8527 = vmatpush1.bf16.msra.mxu1 %v13507_v56  ;;  %8305 = vmatprep.subr.bf16.mxu0 %v13508_v30  ;;  %v13556_v56 = vld [vmem:[#allocation164_spill] sm:$0xff] }
 0x546   :  { %8529 = vmatprep.subr.bf16.mxu1 %v13509_v21  ;;  %v13557_v30 = vld [vmem:[#allocation316_spill] sm:$0xff]  ;;  %v13558_v21 = vld [vmem:[#allocation166_spill] sm:$0xff] }
 0x548   :  { %8307 = vmatpush1.bf16.msra.mxu0 %v13510_v14  ;;  %v13559_v14 = vld [vmem:[#allocation317_spill] sm:$0xff] }
 0x549   :  { %8531 = vmatpush1.bf16.msra.mxu1 %v13511_v48  ;;  %8309 = vmatprep.subr.bf16.mxu0 %v13512_v24  ;;  %v13560_v48 = vld [vmem:[#allocation168_spill] sm:$0xff]  ;;  %v13561_v24 = vld [vmem:[#allocation318_spill] sm:$0xff] }
 0x54a   :  { %8533 = vmatprep.subr.bf16.mxu1 %v13513_v47  ;;  %v13562_v47 = vld [vmem:[#allocation170_spill] sm:$0xff] }
 0x54c   :  { %8311 = vmatpush1.bf16.msra.mxu0 %v13514_v31  ;;  %v13563_v31 = vld [vmem:[#allocation319_spill] sm:$0xff] }
 0x54d   :  { %8535 = vmatpush1.bf16.msra.mxu1 %v13515_v39  ;;  %8313 = vmatprep.subr.bf16.mxu0 %v13516_v0  ;;  %v13564_v39 = vld [vmem:[#allocation172_spill] sm:$0xff] }
 0x54e   :  { %8537 = vmatprep.subr.bf16.mxu1 %v13517_v16  ;;  %v13565_v0 = vld [vmem:[#allocation320_spill] sm:$0xff]  ;;  %v13566_v16 = vld [vmem:[#allocation174_spill] sm:$0xff] }
 0x550   :  { %8315 = vmatpush1.bf16.msra.mxu0 %v13518_v34  ;;  %v13567_v34 = vld [vmem:[#allocation321_spill] sm:$0xff] }
 0x551   :  { %8539 = vmatpush1.bf16.msra.mxu1 %v13519_v7  ;;  %8317 = vmatprep.subr.bf16.mxu0 %v13520_v13  ;;  %v13568_v7 = vld [vmem:[#allocation176_spill] sm:$0xff]  ;;  %v13569_v13 = vld [vmem:[#allocation322_spill] sm:$0xff] }
 0x552   :  { %8541 = vmatprep.subr.bf16.mxu1 %v13521_v25  ;;  %v13570_v25 = vld [vmem:[#allocation178_spill] sm:$0xff] }
 0x554   :  { %8319 = vmatpush1.bf16.msra.mxu0 %v13522_v23  ;;  %v13571_v23 = vld [vmem:[#allocation323_spill] sm:$0xff] }
 0x555   :  { %8543 = vmatpush1.bf16.msra.mxu1 %v13523_v12  ;;  %8321 = vmatprep.subr.bf16.mxu0 %v13524_v18  ;;  %v13572_v12 = vld [vmem:[#allocation180_spill] sm:$0xff] }
 0x556   :  { %8545 = vmatprep.subr.bf16.mxu1 %v13525_v46  ;;  %v13573_v18 = vld [vmem:[#allocation324_spill] sm:$0xff]  ;;  %v13574_v46 = vld [vmem:[#allocation182_spill] sm:$0xff] }
 0x558   :  { %8323 = vmatpush1.bf16.msra.mxu0 %v13526_v40  ;;  %v13575_v40 = vld [vmem:[#allocation325_spill] sm:$0xff] }
 0x559   :  { %8547 = vmatpush1.bf16.msra.mxu1 %v13527_v28  ;;  %8325 = vmatprep.subr.bf16.mxu0 %v13528_v53  ;;  %v13576_v28 = vld [vmem:[#allocation184_spill] sm:$0xff]  ;;  %v13577_v53 = vld [vmem:[#allocation326_spill] sm:$0xff] }
 0x55a   :  { %8549 = vmatprep.subr.bf16.mxu1 %v13529_v35  ;;  %v13578_v35 = vld [vmem:[#allocation186_spill] sm:$0xff] }
 0x55c   :  { %8327 = vmatpush1.bf16.msra.mxu0 %v13530_v63  ;;  %v13579_v63 = vld [vmem:[#allocation327_spill] sm:$0xff] }
 0x55d   :  { %8551 = vmatpush1.bf16.msra.mxu1 %v13531_v58  ;;  %8329 = vmatprep.subr.bf16.mxu0 %v13532_v43  ;;  %v13580_v58 = vld [vmem:[#allocation188_spill] sm:$0xff] }
 0x55e   :  { %8553 = vmatprep.subr.bf16.mxu1 %v13533_v51  ;;  %v13581_v43 = vld [vmem:[#allocation328_spill] sm:$0xff]  ;;  %v13582_v51 = vld [vmem:[#allocation190_spill] sm:$0xff] }
 0x560   :  { %8331 = vmatpush1.bf16.msra.mxu0 %v13534_v38  ;;  %v13583_v38 = vld [vmem:[#allocation329_spill] sm:$0xff] }
 0x561   :  { %8555 = vmatpush1.bf16.msra.mxu1 %v13535_v52  ;;  %8333 = vmatprep.subr.bf16.mxu0 %v13536_v32  ;;  %v13584_v52 = vld [vmem:[#allocation192_spill] sm:$0xff]  ;;  %v13585_v32 = vld [vmem:[#allocation330_spill] sm:$0xff] }
 0x562   :  { %8557 = vmatprep.subr.bf16.mxu1 %v13537_v6  ;;  %v13586_v6 = vld [vmem:[#allocation194_spill] sm:$0xff] }
 0x563   :  { %3888 = vmatmul.mubr.f32.vlgmr.msra.gmra.mrb[10].mxu0 %v13538_v61 }
 0x564   :  { %8335 = vmatpush1.bf16.msra.mxu0 %v13539_v41  ;;  %4172 = vmatmul.mubr.f32.vlgmr.msra.gmra.mrb[10].mxu1 %v13538_v61  ;;  %v13587_v61 = vld [vmem:[#allocation331_spill] sm:$0xff]  ;;  %v13588_v41 = vld [vmem:[#allocation196_spill] sm:$0xff] }
 0x565   :  { %8559 = vmatpush1.bf16.msra.mxu1 %v13540_v62  ;;  %8337 = vmatprep.subr.bf16.mxu0 %v13541_v22  ;;  %v13589_v62 = vld [vmem:[#allocation332_spill] sm:$0xff]  ;;  %v13590_v22 = vld [vmem:[#allocation198_spill] sm:$0xff] }
 0x566   :  { %8561 = vmatprep.subr.bf16.mxu1 %v13542_v10  ;;  %3958 = vmatprep.mubr.f32.mxu0 %v13543_v37  ;;  %v13591_v10 = vld [vmem:[#allocation333_spill] sm:$0xff] }
 0x567   :  { %4242 = vmatprep.mubr.f32.mxu1 %v13543_v37  ;;  %v13592_v37 = vld [vmem:[#allocation200_spill] sm:$0xff] }
 0x568   :  { %8339 = vmatpush1.bf16.msra.mxu0 %v13544_v55  ;;  %v13593_v55 = vld [vmem:[#allocation334_spill] sm:$0xff] }
 0x569   :  { %8563 = vmatpush1.bf16.msra.mxu1 %v13545_v57  ;;  %8341 = vmatprep.subr.bf16.mxu0 %v13546_v15  ;;  %v13594_v57 = vld [vmem:[#allocation202_spill] sm:$0xff]  ;;  %v13595_v15 = vld [vmem:[#allocation335_spill] sm:$0xff] }
 0x56a   :  { %8565 = vmatprep.subr.bf16.mxu1 %v13547_v49  ;;  %v13596_v49 = vld [vmem:[#allocation204_spill] sm:$0xff] }
 0x56c   :  { %8343 = vmatpush1.bf16.msra.mxu0 %v13548_v45  ;;  %v13597_v45 = vld [vmem:[#allocation336_spill] sm:$0xff] }
 0x56d   :  { %8567 = vmatpush1.bf16.msra.mxu1 %v13549_v27  ;;  %8345 = vmatprep.subr.bf16.mxu0 %v13550_v42  ;;  %v13598_v27 = vld [vmem:[#allocation206_spill] sm:$0xff]  ;;  %v13599_v42 = vld [vmem:[#allocation337_spill] sm:$0xff] }
 0x56e   :  { %8569 = vmatprep.subr.bf16.mxu1 %v13551_v60  ;;  %v13600_v60 = vld [vmem:[#allocation208_spill] sm:$0xff] }
 0x570   :  { %8347 = vmatpush1.bf16.msra.mxu0 %v13552_v8  ;;  %v13601_v8 = vld [vmem:[#allocation338_spill] sm:$0xff] }
 0x571   :  { %8571 = vmatpush1.bf16.msra.mxu1 %v13553_v17  ;;  %8349 = vmatprep.subr.bf16.mxu0 %v13554_v9  ;;  %v13602_v17 = vld [vmem:[#allocation210_spill] sm:$0xff]  ;;  %v13603_v9 = vld [vmem:[#allocation339_spill] sm:$0xff] }
 0x572   :  { %8573 = vmatprep.subr.bf16.mxu1 %v13555_v2  ;;  %v13604_v2 = vld [vmem:[#allocation49_spill] sm:$0xff] }
 0x574   :  { %8351 = vmatpush1.bf16.msra.mxu0 %v13556_v56  ;;  %v13605_v56 = vld [vmem:[#allocation212_spill] sm:$0xff] }
 0x575   :  { %8575 = vmatpush1.bf16.msra.mxu1 %v13557_v30  ;;  %8353 = vmatprep.subr.bf16.mxu0 %v13558_v21  ;;  %v13606_v30 = vld [vmem:[#allocation340_spill] sm:$0xff]  ;;  %v13607_v21 = vld [vmem:[#allocation214_spill] sm:$0xff] }
 0x576   :  { %8577 = vmatprep.subr.bf16.mxu1 %v13559_v14  ;;  %v13608_v14 = vld [vmem:[#allocation341_spill] sm:$0xff] }
 0x578   :  { %8355 = vmatpush1.bf16.msra.mxu0 %v13560_v48  ;;  %v13609_v48 = vld [vmem:[#allocation51_spill] sm:$0xff] }
 0x579   :  { %8579 = vmatpush1.bf16.msra.mxu1 %v13561_v24  ;;  %8357 = vmatprep.subr.bf16.mxu0 %v13562_v47  ;;  %v13610_v24 = vld [vmem:[#allocation216_spill] sm:$0xff]  ;;  %v13611_v47 = vld [vmem:[#allocation342_spill] sm:$0xff] }
 0x57a   :  { %8581 = vmatprep.subr.bf16.mxu1 %v13563_v31  ;;  %v13612_v31 = vld [vmem:[#allocation218_spill] sm:$0xff] }
 0x57c   :  { %8359 = vmatpush1.bf16.msra.mxu0 %v13564_v39  ;;  %v13613_v39 = vld [vmem:[#allocation344_spill] sm:$0xff] }
 0x57d   :  { %8583 = vmatpush1.bf16.msra.mxu1 %v13565_v0  ;;  %8361 = vmatprep.subr.bf16.mxu0 %v13566_v16  ;;  %v13614_v0 = vld [vmem:[#allocation220_spill] sm:$0xff]  ;;  %v13615_v16 = vld [vmem:[#allocation345_spill] sm:$0xff] }
 0x57e   :  { %8585 = vmatprep.subr.bf16.mxu1 %v13567_v34  ;;  %v13616_v34 = vld [vmem:[#allocation222_spill] sm:$0xff] }
 0x580   :  { %8363 = vmatpush1.bf16.msra.mxu0 %v13568_v7  ;;  %v13617_v7 = vld [vmem:[#allocation346_spill] sm:$0xff] }
 0x581   :  { %8587 = vmatpush1.bf16.msra.mxu1 %v13569_v13  ;;  %8365 = vmatprep.subr.bf16.mxu0 %v13570_v25  ;;  %v13618_v13 = vld [vmem:[#allocation224_spill] sm:$0xff]  ;;  %v13619_v25 = vld [vmem:[#allocation347_spill] sm:$0xff] }
 0x582   :  { %8589 = vmatprep.subr.bf16.mxu1 %v13571_v23  ;;  %v13620_v23 = vld [vmem:[#allocation226_spill] sm:$0xff] }
 0x584   :  { %8367 = vmatpush1.bf16.msra.mxu0 %v13572_v12  ;;  %v13621_v12 = vld [vmem:[#allocation348_spill] sm:$0xff] }
 0x585   :  { %8591 = vmatpush1.bf16.msra.mxu1 %v13573_v18  ;;  %8369 = vmatprep.subr.bf16.mxu0 %v13574_v46  ;;  %v13622_v18 = vld [vmem:[#allocation228_spill] sm:$0xff]  ;;  %v13623_v46 = vld [vmem:[#allocation349_spill] sm:$0xff] }
 0x586   :  { %8593 = vmatprep.subr.bf16.mxu1 %v13575_v40 }
 0x588   :  { %8371 = vmatpush1.bf16.msra.mxu0 %v13576_v28  ;;  %v13624_v28 = vld [vmem:[#allocation230_spill] sm:$0xff] }
 0x589   :  { %8595 = vmatpush1.bf16.msra.mxu1 %v13577_v53  ;;  %8373 = vmatprep.subr.bf16.mxu0 %v13578_v35  ;;  %v13625_v53 = vld [vmem:[#allocation35_spill] sm:$0xff] }
 0x58a   :  { %8597 = vmatprep.subr.bf16.mxu1 %v13579_v63 }
 0x58c   :  { %8375 = vmatpush1.bf16.msra.mxu0 %v13580_v58 }
 0x58d   :  { %8599 = vmatpush1.bf16.msra.mxu1 %v13581_v43  ;;  %8377 = vmatprep.subr.bf16.mxu0 %v13582_v51  ;;  %v13626_v43 = vld [vmem:[#allocation350_spill] sm:$0xff]  ;;  %v13627_v51 = vld [vmem:[#allocation359_spill] sm:$0xff] }
 0x58e   :  { %8601 = vmatprep.subr.bf16.mxu1 %v13583_v38 }
 0x590   :  { %8379 = vmatpush1.bf16.msra.mxu0 %v13584_v52  ;;  %v13628_v52 = vld [vmem:[#allocation37_spill] sm:$0xff] }
 0x591   :  { %8603 = vmatpush1.bf16.msra.mxu1 %v13585_v32  ;;  %8381 = vmatprep.subr.bf16.mxu0 %v13586_v6 }
 0x592   :  { %8605 = vmatprep.subr.bf16.mxu1 %v13587_v61 }
 0x594   :  { %8383 = vmatpush1.bf16.msra.mxu0 %v13588_v41 }
 0x595   :  { %8607 = vmatpush1.bf16.msra.mxu1 %v13589_v62  ;;  %8385 = vmatprep.subr.bf16.mxu0 %v13590_v22  ;;  %v13629_v62 = vld [vmem:[#allocation232_spill] sm:$0xff] }
 0x596   :  { %8609 = vmatprep.subr.bf16.mxu1 %v13591_v10 }
 0x598   :  { %8387 = vmatpush1.bf16.msra.mxu0 %v13592_v37  ;;  %v13630_v37 = vld [vmem:[#allocation234_spill] sm:$0xff] }
 0x599   :  { %8611 = vmatpush1.bf16.msra.mxu1 %v13593_v55  ;;  %8389 = vmatprep.subr.bf16.mxu0 %v13594_v57  ;;  %v13631_v55 = vld [vmem:[#allocation39_spill] sm:$0xff] }
 0x59a   :  { %8613 = vmatprep.subr.bf16.mxu1 %v13595_v15 }
 0x59c   :  { %8391 = vmatpush1.bf16.msra.mxu0 %v13596_v49 }
 0x59d   :  { %8615 = vmatpush1.bf16.msra.mxu1 %v13597_v45  ;;  %8393 = vmatprep.subr.bf16.mxu0 %v13598_v27  ;;  %v13632_v45 = vld [vmem:[#allocation41_spill] sm:$0xff] }
 0x59e   :  { %8617 = vmatprep.subr.bf16.mxu1 %v13599_v42  ;;  %v13633_v42 = vld [vmem:[#allocation236_spill] sm:$0xff] }
 0x5a0   :  { %8395 = vmatpush1.bf16.msra.mxu0 %v13600_v60  ;;  %v13635_v60 = vld [vmem:[#allocation240_spill] sm:$0xff] }
 0x5a1   :  { %8619 = vmatpush1.bf16.msra.mxu1 %v13601_v8  ;;  %8397 = vmatprep.subr.bf16.mxu0 %v13602_v17  ;;  %v8785_v8 = vld [vmem:[#allocation8 + $0xc] ss:$16 sps:$4 sm:$0xff]  }
 0x5a2   :  { %8621 = vmatprep.subr.bf16.mxu1 %v13603_v9  ;;  %v9068_v17 = vld [vmem:[#allocation5 + $0x1510] sm:$0xf] }
 0x5a3   :  { %3959 = vmatmul.mubr.f32.vlgmr.msra.gmra.mrb[10].mxu0 %v13604_v2  ;;  %v8791_v9 = vld [vmem:[#allocation8 + $0x2c] ss:$16 sps:$4 sm:$0xff]  }
 0x5a4   :  { %8399 = vmatpush1.bf16.msra.mxu0 %v13605_v56  ;;  %4243 = vmatmul.mubr.f32.vlgmr.msra.gmra.mrb[10].mxu1 %v13604_v2  ;;  %v8789_v2 = vld [vmem:[#allocation8 + $0x28] ss:$16 sps:$4 sm:$0xff]   ;;  %v8794_v56 = vld [vmem:[#allocation8 + $0x44] ss:$16 sps:$4 sm:$0xff]  }
 0x5a5   :  { %8623 = vmatpush1.bf16.msra.mxu1 %v13606_v30  ;;  %8401 = vmatprep.subr.bf16.mxu0 %v13607_v21  ;;  %v8797_v30 = vld [vmem:[#allocation8 + $0x4c] ss:$16 sps:$4 sm:$0xff]   ;;  %v8795_v21 = vld [vmem:[#allocation8 + $0x48] ss:$16 sps:$4 sm:$0xff]  }
 0x5a6   :  { %8625 = vmatprep.subr.bf16.mxu1 %v13608_v14  ;;  %5777 = vmatprep.mubr.msk.f32.mxu0 %vm823_vm0, %v13609_v48  ;;  %v8800_v14 = vld [vmem:[#allocation8 + $0x64] ss:$16 sps:$4 sm:$0xff]  }
 0x5a7   :  { %5780 = vmatprep.mubr.msk.f32.mxu1 %vm823_vm0, %v13609_v48  ;;  %v8798_v48 = vld [vmem:[#allocation8 + $0x60] ss:$16 sps:$4 sm:$0xff]  }
 0x5a8   :  { %8403 = vmatpush1.bf16.msra.mxu0 %v13610_v24  ;;  %v8801_v24 = vld [vmem:[#allocation8 + $0x68] ss:$16 sps:$4 sm:$0xff]  }
 0x5a9   :  { %8627 = vmatpush1.bf16.msra.mxu1 %v13611_v47  ;;  %8405 = vmatprep.subr.bf16.mxu0 %v13612_v31  ;;  %v8806_v47 = vld [vmem:[#allocation8 + $0x84] ss:$16 sps:$4 sm:$0xff]   ;;  %v8809_v31 = vld [vmem:[#allocation8 + $0x8c] ss:$16 sps:$4 sm:$0xff]  }
 0x5aa   :  { %8629 = vmatprep.subr.bf16.mxu1 %v13613_v39  ;;  %v8804_v39 = vld [vmem:[#allocation8 + $0x80] ss:$16 sps:$4 sm:$0xff]  }
 0x5ac   :  { %8407 = vmatpush1.bf16.msra.mxu0 %v13614_v0  ;;  %v8807_v0 = vld [vmem:[#allocation8 + $0x88] ss:$16 sps:$4 sm:$0xff]  }
 0x5ad   :  { %8631 = vmatpush1.bf16.msra.mxu1 %v13615_v16  ;;  %8409 = vmatprep.subr.bf16.mxu0 %v13616_v34  ;;  %v8812_v16 = vld [vmem:[#allocation8 + $0xa4] ss:$16 sps:$4 sm:$0xff]   ;;  %v8815_v34 = vld [vmem:[#allocation8 + $0xac] ss:$16 sps:$4 sm:$0xff]  }
 0x5ae   :  { %8633 = vmatprep.subr.bf16.mxu1 %v13617_v7  ;;  %v8810_v7 = vld [vmem:[#allocation8 + $0xa0] ss:$16 sps:$4 sm:$0xff]  }
 0x5b0   :  { %8411 = vmatpush1.bf16.msra.mxu0 %v13618_v13  ;;  %v8813_v13 = vld [vmem:[#allocation8 + $0xa8] ss:$16 sps:$4 sm:$0xff]  }
 0x5b1   :  { %8635 = vmatpush1.bf16.msra.mxu1 %v13619_v25  ;;  %8413 = vmatprep.subr.bf16.mxu0 %v13620_v23  ;;  %v8818_v25 = vld [vmem:[#allocation8 + $0xc4] ss:$16 sps:$4 sm:$0xff]   ;;  %v8821_v23 = vld [vmem:[#allocation8 + $0xcc] ss:$16 sps:$4 sm:$0xff]  }
 0x5b2   :  { %8637 = vmatprep.subr.bf16.mxu1 %v13621_v12  ;;  %v8816_v12 = vld [vmem:[#allocation8 + $0xc0] ss:$16 sps:$4 sm:$0xff]  }
 0x5b4   :  { %8415 = vmatpush1.bf16.msra.mxu0 %v13622_v18  ;;  %v8819_v18 = vld [vmem:[#allocation8 + $0xc8] ss:$16 sps:$4 sm:$0xff]  }
 0x5b5   :  { %8639 = vmatpush1.bf16.msra.mxu1 %v13623_v46  ;;  %v3439_v40 = vpop.f32.mrb[8].mxu0  ;;  %8417 = vmatprep.subr.bf16.mxu0 %v13624_v28  ;;  %v8824_v46 = vld [vmem:[#allocation8 + $0xe4] ss:$16 sps:$4 sm:$0xff]   ;;  %v8822_v28 = vld [vmem:[#allocation8 + $0xe0] ss:$16 sps:$4 sm:$0xff]  }
 0x5b6   :  { %v8668_v35 = vadd.f32 %v3439_v40, %v13625_v53  ;;  %v3747_v63 = vpop.f32.mrb[8].mxu1  ;;  %v3441_v58 = vpop.f32.mrb[9].mxu0  ;;  %8641 = vmatprep.subr.bf16.mxu1 %v13626_v43  ;;  %v8827_v40 = vld [vmem:[#allocation8 + $0xec] ss:$16 sps:$4 sm:$0xff]   ;;  %v8828_v43 = vld [vmem:[#allocation8 + $0x100] ss:$16 sps:$4 sm:$0xff]  }
 0x5b7   :  { %v8670_v38 = vadd.f32 %v3747_v63, %v13627_v51  ;;  %v8669_v32 = vadd.f32 %v3441_v58, %v13628_v52  ;;  %v3749_v6 = vpop.f32.mrb[9].mxu1  ;;  %v8830_v63 = vld [vmem:[#allocation8 + $0x104] ss:$16 sps:$4 sm:$0xff]   ;;  %v8833_v58 = vld [vmem:[#allocation8 + $0x10c] ss:$16 sps:$4 sm:$0xff]  }
 0x5b8   :  { %v3448_v61 = vmax.f32 %v8668_v35, 0.0  ;;  %v8671_v41 = vadd.f32 %v3749_v6, %v13433_v1  ;;  %8419 = vmatpush1.bf16.msra.mxu0 %v13629_v62  ;;  %v8825_v35 = vld [vmem:[#allocation8 + $0xe8] ss:$16 sps:$4 sm:$0xff]   ;;  %v8834_v6 = vld [vmem:[#allocation8 + $0x120] ss:$16 sps:$4 sm:$0xff]  }
 0x5b9   :  { %v4320_v22 = vmax.f32 %v8670_v38, 0.0  ;;  %v3449_v10 = vmax.f32 %v8669_v32, 0.0  ;;  %8643 = vmatpush1.bf16.msra.mxu1 %v13434_v4  ;;  %8421 = vmatprep.subr.bf16.mxu0 %v13630_v37  ;;  %v13634_v4 = vld [vmem:[#allocation238_spill] sm:$0xff]  ;;  %v8831_v51 = vld [vmem:[#allocation8 + $0x108] ss:$16 sps:$4 sm:$0xff]  }
 0x5ba   :  { %v11623_v57 = vmax.f32 %v13631_v55, %v3448_v61  ;;  %v4321_v15 = vmax.f32 %v8671_v41, 0.0  ;;  %8645 = vmatprep.subr.bf16.mxu1 %v13435_v33  ;;  %v9067_v33 = vld [vmem:[#allocation5 + $0x1518] sm:$0xf]  ;;  %v8839_v32 = vld [vmem:[#allocation8 + $0x12c] ss:$16 sps:$4 sm:$0xff]  }
 0x5bb   :  { %v11627_v49 = vmax.f32 %v11351_v36, %v4320_v22  ;;  %v11630_v27 = vmax.f32 %v13632_v45, %v3449_v10  ;;  %v8782_v36 = vld [vmem:[#allocation8 + $0x4] ss:$16 sps:$4 sm:$0xff]   ;;  %v8837_v61 = vld [vmem:[#allocation8 + $0x128] ss:$16 sps:$4 sm:$0xff]   ;;  %v8845_v62 = vld [vmem:[#allocation8 + $0x14c] ss:$16 sps:$4 sm:$0xff]  }
 0x5bc   :  { %v4327_v1 = vmax.f32 %v11358_v59, %v4321_v15  ;;  %8423 = vmatpush1.bf16.msra.mxu0 %v13633_v42  ;;  %v8780_v59 = vld [vmem:[#allocation8] ss:$16 sps:$4 sm:$0xff]   ;;  %v8836_v38 = vld [vmem:[#allocation8 + $0x124] ss:$16 sps:$4 sm:$0xff]   ;;  %v8843_v10 = vld [vmem:[#allocation8 + $0x148] ss:$16 sps:$4 sm:$0xff]  }
 0x5bd   :  { %8647 = vmatpush1.bf16.msra.mxu1 %v13438_v5  ;;  %8425 = vmatprep.subr.bf16.mxu0 %v13634_v4  ;;  %v8783_v5 = vld [vmem:[#allocation8 + $0x8] ss:$16 sps:$4 sm:$0xff]   ;;  %v8842_v41 = vld [vmem:[#allocation8 + $0x144] ss:$16 sps:$4 sm:$0xff]   ;;  %v8840_v22 = vld [vmem:[#allocation8 + $0x140] ss:$16 sps:$4 sm:$0xff]  }
 0x5be   :  { %8649 = vmatprep.subr.bf16.mxu1 %v13439_v54  ;;  %v8788_v54 = vld [vmem:[#allocation8 + $0x24] ss:$16 sps:$4 sm:$0xff]   ;;  %v8851_v55 = vld [vmem:[#allocation8 + $0x16c] ss:$16 sps:$4 sm:$0xff]   ;;  %v8846_v15 = vld [vmem:[#allocation8 + $0x160] ss:$16 sps:$4 sm:$0xff]  }
 0x5bf   :  { %v8848_v37 = vld [vmem:[#allocation8 + $0x164] ss:$16 sps:$4 sm:$0xff]   ;;  %v8849_v45 = vld [vmem:[#allocation8 + $0x168] ss:$16 sps:$4 sm:$0xff]   ;;  %v8857_v42 = vld [vmem:[#allocation8 + $0x18c] ss:$16 sps:$4 sm:$0xff]  }
 0x5c0   :  { %8427 = vmatpush1.bf16.msra.mxu0 %v13635_v60  ;;  %v8852_v4 = vld [vmem:[#allocation8 + $0x180] ss:$16 sps:$4 sm:$0xff]   ;;  %v8855_v60 = vld [vmem:[#allocation8 + $0x188] ss:$16 sps:$4 sm:$0xff]  }
 0x5c1   :  { %8651 = vmatpush1.bf16.msra.mxu1 %v13440_v19  ;;  %5775 = vmatprep.subr.msk.mxu0 %vm827_vm1, %v9067_v33  ;;  %v4333_v19 = vpack.c.bf16 %v4327_v1, %v4327_v1  ;;  %v8854_v1 = vld [vmem:[#allocation8 + $0x184] ss:$16 sps:$4 sm:$0xff]  }
 0x5c2   :  { %5778 = vmatprep.subr.msk.mxu1 %vm827_vm1, %v11369_v3  ;;  %v8786_v3 = vld [vmem:[#allocation8 + $0x20] ss:$16 sps:$4 sm:$0xff]   ;;  %v8860_v33 = vld [vmem:[#allocation8 + $0x1a4] ss:$16 sps:$4 sm:$0xff]  }
 0x5c4   :  { %5776 = vmatpush1.msk.msra.mxu0 %vm827_vm1, %v9068_v17  ;;  %v8866_v17 = vld [vmem:[#allocation8 + $0x1c4] ss:$16 sps:$4 sm:$0xff]  }
 0x5c5   :  { %5779 = vmatpush1.msk.msra.mxu1 %vm827_vm1, %v11377_v50  ;;  %4030 = vmatmul.mubr.f32.vlgmr.msra.gmra.mrb[10].mxu0 %v11375_v26  ;;  %v8792_v50 = vld [vmem:[#allocation8 + $0x40] ss:$16 sps:$4 sm:$0xff]  }
 0x5c6   :  { %4314 = vmatmul.mubr.f32.vlgmr.msra.gmra.mrb[10].mxu1 %v11375_v26  ;;  %5444 = vmatprep.subr.bf16.mxu0 %v8782_v36  ;;  %v8803_v26 = vld [vmem:[#allocation8 + $0x6c] ss:$16 sps:$4 sm:$0xff]  }
 0x5c7   :  { %5567 = vmatprep.subr.bf16.mxu1 %v8785_v8  ;;  %5445 = vmatpush1.bf16.msra.mxu0 %v8780_v59  ;;  %v8863_v36 = vld [vmem:[#allocation8 + $0x1ac] ss:$16 sps:$4 sm:$0xff]   ;;  %v8858_v59 = vld [vmem:[#allocation8 + $0x1a0] ss:$16 sps:$4 sm:$0xff]   ;;  %v8861_v8 = vld [vmem:[#allocation8 + $0x1a8] ss:$16 sps:$4 sm:$0xff]  }
 0x5c8   :  { %5476 = vmatprep.mubr.bf16.mxu0 %v4333_v19  ;;  %5568 = vmatpush1.bf16.msra.mxu1 %v8783_v5  ;;  %v8869_v5 = vld [vmem:[#allocation8 + $0x1cc] ss:$16 sps:$4 sm:$0xff]  }
 0x5c9   :  { %5599 = vmatprep.mubr.bf16.mxu1 %v4333_v19  ;;  %5446 = vmatprep.subr.bf16.mxu0 %v8788_v54  ;;  %v8864_v54 = vld [vmem:[#allocation8 + $0x1c0] ss:$16 sps:$4 sm:$0xff]   ;;  %v8867_v19 = vld [vmem:[#allocation8 + $0x1c8] ss:$16 sps:$4 sm:$0xff]  }
 0x5ca   :  { %5569 = vmatprep.subr.bf16.mxu1 %v8791_v9  ;;  %v8872_v9 = vld [vmem:[#allocation8 + $0x1e4] ss:$16 sps:$4 sm:$0xff]  }
 0x5cb   :  { %5447 = vmatpush1.bf16.msra.mxu0 %v8786_v3  ;;  %v8875_v3 = vld [vmem:[#allocation8 + $0x1ec] ss:$16 sps:$4 sm:$0xff]  }
 0x5cc   :  { %5570 = vmatpush1.bf16.msra.mxu1 %v8789_v2  ;;  %5448 = vmatprep.subr.bf16.mxu0 %v8794_v56  ;;  %v8870_v2 = vld [vmem:[#allocation8 + $0x1e0] ss:$16 sps:$4 sm:$0xff]   ;;  %v8873_v56 = vld [vmem:[#allocation8 + $0x1e8] ss:$16 sps:$4 sm:$0xff]  }
 0x5cd   :  { %5571 = vmatprep.subr.bf16.mxu1 %v8797_v30  ;;  %v8878_v30 = vld [vmem:[#allocation8 + $0x204] ss:$16 sps:$4 sm:$0xff]  }
 0x5cf   :  { %5449 = vmatpush1.bf16.msra.mxu0 %v8792_v50  ;;  %v8881_v50 = vld [vmem:[#allocation8 + $0x20c] ss:$16 sps:$4 sm:$0xff]  }
 0x5d0   :  { %5572 = vmatpush1.bf16.msra.mxu1 %v8795_v21  ;;  %5450 = vmatprep.subr.bf16.mxu0 %v8800_v14  ;;  %v8876_v21 = vld [vmem:[#allocation8 + $0x200] ss:$16 sps:$4 sm:$0xff]   ;;  %v4332_v14 = vpack.c.bf16 %v11627_v49, %v11627_v49  ;;  %v8891_v49 = vld [vmem:[#allocation8 + $0x248] ss:$16 sps:$4 sm:$0xff]  }
 0x5d1   :  { %5573 = vmatprep.subr.bf16.mxu1 %v8803_v26  ;;  %v8879_v26 = vld [vmem:[#allocation8 + $0x208] ss:$16 sps:$4 sm:$0xff]  }
 0x5d3   :  { %5451 = vmatpush1.bf16.msra.mxu0 %v8798_v48  ;;  %v8884_v48 = vld [vmem:[#allocation8 + $0x224] ss:$16 sps:$4 sm:$0xff]  }
 0x5d4   :  { %5574 = vmatpush1.bf16.msra.mxu1 %v8801_v24  ;;  %5452 = vmatprep.subr.bf16.mxu0 %v8806_v47  ;;  %v8887_v24 = vld [vmem:[#allocation8 + $0x22c] ss:$16 sps:$4 sm:$0xff]   ;;  %v8882_v47 = vld [vmem:[#allocation8 + $0x220] ss:$16 sps:$4 sm:$0xff]  }
 0x5d5   :  { %5575 = vmatprep.subr.bf16.mxu1 %v8809_v31  ;;  %v8885_v31 = vld [vmem:[#allocation8 + $0x228] ss:$16 sps:$4 sm:$0xff]  }
 0x5d7   :  { %5453 = vmatpush1.bf16.msra.mxu0 %v8804_v39  ;;  %v8890_v39 = vld [vmem:[#allocation8 + $0x244] ss:$16 sps:$4 sm:$0xff]  }
 0x5d8   :  { %5576 = vmatpush1.bf16.msra.mxu1 %v8807_v0  ;;  %5454 = vmatprep.subr.bf16.mxu0 %v8812_v16  ;;  %v8893_v0 = vld [vmem:[#allocation8 + $0x24c] ss:$16 sps:$4 sm:$0xff]   ;;  %v8888_v16 = vld [vmem:[#allocation8 + $0x240] ss:$16 sps:$4 sm:$0xff]  }
 0x5d9   :  { %5577 = vmatprep.subr.bf16.mxu1 %v8815_v34  ;;  %v8896_v34 = vld [vmem:[#allocation8 + $0x264] ss:$16 sps:$4 sm:$0xff]  }
 0x5db   :  { %5455 = vmatpush1.bf16.msra.mxu0 %v8810_v7  ;;  %v8899_v7 = vld [vmem:[#allocation8 + $0x26c] ss:$16 sps:$4 sm:$0xff]  }
 0x5dc   :  { %5578 = vmatpush1.bf16.msra.mxu1 %v8813_v13  ;;  %5456 = vmatprep.subr.bf16.mxu0 %v8818_v25  ;;  %v8894_v13 = vld [vmem:[#allocation8 + $0x260] ss:$16 sps:$4 sm:$0xff]   ;;  %v8897_v25 = vld [vmem:[#allocation8 + $0x268] ss:$16 sps:$4 sm:$0xff]  }
 0x5dd   :  { %5579 = vmatprep.subr.bf16.mxu1 %v8821_v23  ;;  %v8902_v23 = vld [vmem:[#allocation8 + $0x284] ss:$16 sps:$4 sm:$0xff]  }
 0x5df   :  { %5457 = vmatpush1.bf16.msra.mxu0 %v8816_v12  ;;  %v8905_v12 = vld [vmem:[#allocation8 + $0x28c] ss:$16 sps:$4 sm:$0xff]  }
 0x5e0   :  { %5580 = vmatpush1.bf16.msra.mxu1 %v8819_v18  ;;  %5458 = vmatprep.subr.bf16.mxu0 %v8824_v46  ;;  %v8900_v18 = vld [vmem:[#allocation8 + $0x280] ss:$16 sps:$4 sm:$0xff]   ;;  %v8903_v46 = vld [vmem:[#allocation8 + $0x288] ss:$16 sps:$4 sm:$0xff]  }
 0x5e1   :  { %5581 = vmatprep.subr.bf16.mxu1 %v8827_v40  ;;  %v8908_v40 = vld [vmem:[#allocation8 + $0x2a4] ss:$16 sps:$4 sm:$0xff]  }
 0x5e3   :  { %5459 = vmatpush1.bf16.msra.mxu0 %v8822_v28  ;;  %v8911_v28 = vld [vmem:[#allocation8 + $0x2ac] ss:$16 sps:$4 sm:$0xff]  }
 0x5e4   :  { %5582 = vmatpush1.bf16.msra.mxu1 %v8825_v35  ;;  %5460 = vmatprep.subr.bf16.mxu0 %v8830_v63  ;;  %v8906_v35 = vld [vmem:[#allocation8 + $0x2a0] ss:$16 sps:$4 sm:$0xff]   ;;  %v8909_v63 = vld [vmem:[#allocation8 + $0x2a8] ss:$16 sps:$4 sm:$0xff]  }
 0x5e5   :  { %5583 = vmatprep.subr.bf16.mxu1 %v8833_v58  ;;  %v8914_v58 = vld [vmem:[#allocation8 + $0x2c4] ss:$16 sps:$4 sm:$0xff]  }
 0x5e7   :  { %5461 = vmatpush1.bf16.msra.mxu0 %v8828_v43  ;;  %v8917_v43 = vld [vmem:[#allocation8 + $0x2cc] ss:$16 sps:$4 sm:$0xff]  }
 0x5e8   :  { %5584 = vmatpush1.bf16.msra.mxu1 %v8831_v51  ;;  %5462 = vmatprep.subr.bf16.mxu0 %v8836_v38  ;;  %v8912_v51 = vld [vmem:[#allocation8 + $0x2c0] ss:$16 sps:$4 sm:$0xff]   ;;  %v8915_v38 = vld [vmem:[#allocation8 + $0x2c8] ss:$16 sps:$4 sm:$0xff]  }
 0x5e9   :  { %5585 = vmatprep.subr.bf16.mxu1 %v8839_v32  ;;  %v8920_v32 = vld [vmem:[#allocation8 + $0x2e4] ss:$16 sps:$4 sm:$0xff]  }
 0x5eb   :  { %5463 = vmatpush1.bf16.msra.mxu0 %v8834_v6  ;;  %v8923_v6 = vld [vmem:[#allocation8 + $0x2ec] ss:$16 sps:$4 sm:$0xff]  }
 0x5ec   :  { %5586 = vmatpush1.bf16.msra.mxu1 %v8837_v61  ;;  %5464 = vmatprep.subr.bf16.mxu0 %v8842_v41  ;;  %v8918_v61 = vld [vmem:[#allocation8 + $0x2e0] ss:$16 sps:$4 sm:$0xff]   ;;  %v8921_v41 = vld [vmem:[#allocation8 + $0x2e8] ss:$16 sps:$4 sm:$0xff]  }
 0x5ed   :  { %5587 = vmatprep.subr.bf16.mxu1 %v8845_v62  ;;  %v8926_v62 = vld [vmem:[#allocation8 + $0x304] ss:$16 sps:$4 sm:$0xff]  }
 0x5ef   :  { %5465 = vmatpush1.bf16.msra.mxu0 %v8840_v22  ;;  %v8929_v22 = vld [vmem:[#allocation8 + $0x30c] ss:$16 sps:$4 sm:$0xff]  }
 0x5f0   :  { %5588 = vmatpush1.bf16.msra.mxu1 %v8843_v10  ;;  %5466 = vmatprep.subr.bf16.mxu0 %v8848_v37  ;;  %v8924_v10 = vld [vmem:[#allocation8 + $0x300] ss:$16 sps:$4 sm:$0xff]   ;;  %v8927_v37 = vld [vmem:[#allocation8 + $0x308] ss:$16 sps:$4 sm:$0xff]  }
 0x5f1   :  { %5589 = vmatprep.subr.bf16.mxu1 %v8851_v55  ;;  %v8932_v55 = vld [vmem:[#allocation8 + $0x324] ss:$16 sps:$4 sm:$0xff]  }
 0x5f3   :  { %5467 = vmatpush1.bf16.msra.mxu0 %v8846_v15  ;;  %v8935_v15 = vld [vmem:[#allocation8 + $0x32c] ss:$16 sps:$4 sm:$0xff]  }
 0x5f4   :  { %5590 = vmatpush1.bf16.msra.mxu1 %v8849_v45  ;;  %5468 = vmatprep.subr.bf16.mxu0 %v8854_v1  ;;  %v8930_v45 = vld [vmem:[#allocation8 + $0x320] ss:$16 sps:$4 sm:$0xff]   ;;  %v8933_v1 = vld [vmem:[#allocation8 + $0x328] ss:$16 sps:$4 sm:$0xff]  }
 0x5f5   :  { %5591 = vmatprep.subr.bf16.mxu1 %v8857_v42  ;;  %v8938_v42 = vld [vmem:[#allocation8 + $0x344] ss:$16 sps:$4 sm:$0xff]  }
 0x5f7   :  { %5469 = vmatpush1.bf16.msra.mxu0 %v8852_v4  ;;  %v8941_v4 = vld [vmem:[#allocation8 + $0x34c] ss:$16 sps:$4 sm:$0xff]  }
 0x5f8   :  { %5592 = vmatpush1.bf16.msra.mxu1 %v8855_v60  ;;  %5470 = vmatprep.subr.bf16.mxu0 %v8860_v33  ;;  %v8936_v60 = vld [vmem:[#allocation8 + $0x340] ss:$16 sps:$4 sm:$0xff]   ;;  %v8939_v33 = vld [vmem:[#allocation8 + $0x348] ss:$16 sps:$4 sm:$0xff]  }
 0x5f9   :  { %5593 = vmatprep.subr.bf16.mxu1 %v8863_v36  ;;  %v8944_v36 = vld [vmem:[#allocation8 + $0x364] ss:$16 sps:$4 sm:$0xff]  }
 0x5fb   :  { %5471 = vmatpush1.bf16.msra.mxu0 %v8858_v59  ;;  %v8947_v59 = vld [vmem:[#allocation8 + $0x36c] ss:$16 sps:$4 sm:$0xff]  }
 0x5fc   :  { %5594 = vmatpush1.bf16.msra.mxu1 %v8861_v8  ;;  %5472 = vmatprep.subr.bf16.mxu0 %v8866_v17  ;;  %v8942_v8 = vld [vmem:[#allocation8 + $0x360] ss:$16 sps:$4 sm:$0xff]   ;;  %v8945_v17 = vld [vmem:[#allocation8 + $0x368] ss:$16 sps:$4 sm:$0xff]  }
 0x5fd   :  { %5595 = vmatprep.subr.bf16.mxu1 %v8869_v5  ;;  %v8950_v5 = vld [vmem:[#allocation8 + $0x384] ss:$16 sps:$4 sm:$0xff]  }
 0x5ff   :  { %5473 = vmatpush1.bf16.msra.mxu0 %v8864_v54  ;;  %v8953_v54 = vld [vmem:[#allocation8 + $0x38c] ss:$16 sps:$4 sm:$0xff]  }
 0x600   :  { %5596 = vmatpush1.bf16.msra.mxu1 %v8867_v19  ;;  %5474 = vmatprep.subr.bf16.mxu0 %v8872_v9  ;;  %v8948_v19 = vld [vmem:[#allocation8 + $0x380] ss:$16 sps:$4 sm:$0xff]   ;;  %v8951_v9 = vld [vmem:[#allocation8 + $0x388] ss:$16 sps:$4 sm:$0xff]  }
 0x601   :  { %5597 = vmatprep.subr.bf16.mxu1 %v8875_v3  ;;  %v8956_v3 = vld [vmem:[#allocation8 + $0x3a4] ss:$16 sps:$4 sm:$0xff]  }
 0x603   :  { %5475 = vmatpush1.bf16.msra.mxu0 %v8870_v2  ;;  %v8959_v2 = vld [vmem:[#allocation8 + $0x3ac] ss:$16 sps:$4 sm:$0xff]  }
 0x604   :  { %5598 = vmatpush1.bf16.msra.mxu1 %v8873_v56  ;;  %5485 = vmatprep.subr.bf16.mxu0 %v8878_v30  ;;  %v8954_v56 = vld [vmem:[#allocation8 + $0x3a0] ss:$16 sps:$4 sm:$0xff]   ;;  %v8957_v30 = vld [vmem:[#allocation8 + $0x3a8] ss:$16 sps:$4 sm:$0xff]  }
 0x605   :  { %5608 = vmatprep.subr.bf16.mxu1 %v8881_v50  ;;  %v8962_v50 = vld [vmem:[#allocation8 + $0x3c4] ss:$16 sps:$4 sm:$0xff]  }
 0x606   :  { %5477 = vmatmul.mubr.bf16.vlgmr.msra.gmra.mrb[12].mxu0 %v4332_v14 }
 0x607   :  { %5600 = vmatmul.mubr.bf16.vlgmr.msra.gmra.mrb[12].mxu1 %v4332_v14  ;;  %5486 = vmatpush1.bf16.msra.mxu0 %v8876_v21  ;;  %v8965_v21 = vld [vmem:[#allocation8 + $0x3cc] ss:$16 sps:$4 sm:$0xff]   ;;  %v8960_v14 = vld [vmem:[#allocation8 + $0x3c0] ss:$16 sps:$4 sm:$0xff]  }
 0x608   :  { %5609 = vmatpush1.bf16.msra.mxu1 %v8879_v26  ;;  %5487 = vmatprep.subr.bf16.mxu0 %v8884_v48  ;;  %v8963_v26 = vld [vmem:[#allocation8 + $0x3c8] ss:$16 sps:$4 sm:$0xff]   ;;  %v8968_v48 = vld [vmem:[#allocation8 + $0x3e4] ss:$16 sps:$4 sm:$0xff]  }
 0x609   :  { %5610 = vmatprep.subr.bf16.mxu1 %v8887_v24  ;;  %v8971_v24 = vld [vmem:[#allocation8 + $0x3ec] ss:$16 sps:$4 sm:$0xff]  }
 0x60b   :  { %5488 = vmatpush1.bf16.msra.mxu0 %v8882_v47  ;;  %v8966_v47 = vld [vmem:[#allocation8 + $0x3e0] ss:$16 sps:$4 sm:$0xff]  }
 0x60c   :  { %5611 = vmatpush1.bf16.msra.mxu1 %v8885_v31  ;;  %5489 = vmatprep.subr.bf16.mxu0 %v8890_v39  ;;  %v8969_v31 = vld [vmem:[#allocation8 + $0x3e8] ss:$16 sps:$4 sm:$0xff]   ;;  %v8974_v39 = vld [vmem:[#allocation8 + $0x404] ss:$16 sps:$4 sm:$0xff]  }
 0x60d   :  { %5612 = vmatprep.subr.bf16.mxu1 %v8893_v0  ;;  %v8977_v0 = vld [vmem:[#allocation8 + $0x40c] ss:$16 sps:$4 sm:$0xff]  }
 0x60f   :  { %5490 = vmatpush1.bf16.msra.mxu0 %v8888_v16 }
 0x610   :  { %5613 = vmatpush1.bf16.msra.mxu1 %v8891_v49  ;;  %5491 = vmatprep.subr.bf16.mxu0 %v8896_v34 }
 0x611   :  { %5614 = vmatprep.subr.bf16.mxu1 %v8899_v7 }
 0x613   :  { %5492 = vmatpush1.bf16.msra.mxu0 %v8894_v13 }
 0x614   :  { %5615 = vmatpush1.bf16.msra.mxu1 %v8897_v25  ;;  %5493 = vmatprep.subr.bf16.mxu0 %v8902_v23 }
 0x615   :  { %5616 = vmatprep.subr.bf16.mxu1 %v8905_v12 }
 0x617   :  { %5494 = vmatpush1.bf16.msra.mxu0 %v8900_v18 }
 0x618   :  { %5617 = vmatpush1.bf16.msra.mxu1 %v8903_v46  ;;  %5495 = vmatprep.subr.bf16.mxu0 %v8908_v40 }
 0x619   :  { %5618 = vmatprep.subr.bf16.mxu1 %v8911_v28 }
 0x61b   :  { %5496 = vmatpush1.bf16.msra.mxu0 %v8906_v35 }
 0x61c   :  { %5619 = vmatpush1.bf16.msra.mxu1 %v8909_v63  ;;  %5497 = vmatprep.subr.bf16.mxu0 %v8914_v58 }
 0x61d   :  { %5620 = vmatprep.subr.bf16.mxu1 %v8917_v43 }
 0x61f   :  { %5498 = vmatpush1.bf16.msra.mxu0 %v8912_v51  ;;  %v8975_v51 = vld [vmem:[#allocation8 + $0x408] ss:$16 sps:$4 sm:$0xff]  }
 0x620   :  { %5621 = vmatpush1.bf16.msra.mxu1 %v8915_v38  ;;  %5499 = vmatprep.subr.bf16.mxu0 %v8920_v32  ;;  %v8983_v38 = vld [vmem:[#allocation8 + $0x42c] ss:$16 sps:$4 sm:$0xff]  }
 0x621   :  { %5622 = vmatprep.subr.bf16.mxu1 %v8923_v6  ;;  %v8984_v6 = vld [vmem:[#allocation8 + $0x440] ss:$16 sps:$4 sm:$0xff]  }
 0x623   :  { %5500 = vmatpush1.bf16.msra.mxu0 %v8918_v61  ;;  %v8987_v61 = vld [vmem:[#allocation8 + $0x448] ss:$16 sps:$4 sm:$0xff]  }
 0x624   :  { %5623 = vmatpush1.bf16.msra.mxu1 %v8921_v41  ;;  %5501 = vmatprep.subr.bf16.mxu0 %v8926_v62  ;;  %v8992_v41 = vld [vmem:[#allocation8 + $0x464] ss:$16 sps:$4 sm:$0xff]   ;;  %v8995_v62 = vld [vmem:[#allocation8 + $0x46c] ss:$16 sps:$4 sm:$0xff]  }
 0x625   :  { %5624 = vmatprep.subr.bf16.mxu1 %v8929_v22  ;;  %v8990_v22 = vld [vmem:[#allocation8 + $0x460] ss:$16 sps:$4 sm:$0xff]  }
 0x627   :  { %5502 = vmatpush1.bf16.msra.mxu0 %v8924_v10  ;;  %v8993_v10 = vld [vmem:[#allocation8 + $0x468] ss:$16 sps:$4 sm:$0xff]  }
 0x628   :  { %5625 = vmatpush1.bf16.msra.mxu1 %v8927_v37  ;;  %5503 = vmatprep.subr.bf16.mxu0 %v8932_v55  ;;  %v8998_v37 = vld [vmem:[#allocation8 + $0x484] ss:$16 sps:$4 sm:$0xff]   ;;  %v9001_v55 = vld [vmem:[#allocation8 + $0x48c] ss:$16 sps:$4 sm:$0xff]  }
 0x629   :  { %5626 = vmatprep.subr.bf16.mxu1 %v8935_v15  ;;  %v8996_v15 = vld [vmem:[#allocation8 + $0x480] ss:$16 sps:$4 sm:$0xff]  }
 0x62b   :  { %5504 = vmatpush1.bf16.msra.mxu0 %v8930_v45  ;;  %v8999_v45 = vld [vmem:[#allocation8 + $0x488] ss:$16 sps:$4 sm:$0xff]  }
 0x62c   :  { %5627 = vmatpush1.bf16.msra.mxu1 %v8933_v1  ;;  %5505 = vmatprep.subr.bf16.mxu0 %v8938_v42  ;;  %v9004_v1 = vld [vmem:[#allocation8 + $0x4a4] ss:$16 sps:$4 sm:$0xff]   ;;  %v9007_v42 = vld [vmem:[#allocation8 + $0x4ac] ss:$16 sps:$4 sm:$0xff]  }
 0x62d   :  { %5628 = vmatprep.subr.bf16.mxu1 %v8941_v4  ;;  %v9002_v4 = vld [vmem:[#allocation8 + $0x4a0] ss:$16 sps:$4 sm:$0xff]  }
 0x62f   :  { %5506 = vmatpush1.bf16.msra.mxu0 %v8936_v60  ;;  %v9005_v60 = vld [vmem:[#allocation8 + $0x4a8] ss:$16 sps:$4 sm:$0xff]  }
 0x630   :  { %5629 = vmatpush1.bf16.msra.mxu1 %v8939_v33  ;;  %5507 = vmatprep.subr.bf16.mxu0 %v8944_v36  ;;  %v9010_v33 = vld [vmem:[#allocation8 + $0x4c4] ss:$16 sps:$4 sm:$0xff]   ;;  %v9013_v36 = vld [vmem:[#allocation8 + $0x4cc] ss:$16 sps:$4 sm:$0xff]  }
 0x631   :  { %5630 = vmatprep.subr.bf16.mxu1 %v8947_v59  ;;  %v9008_v59 = vld [vmem:[#allocation8 + $0x4c0] ss:$16 sps:$4 sm:$0xff]  }
 0x633   :  { %5508 = vmatpush1.bf16.msra.mxu0 %v8942_v8  ;;  %v9011_v8 = vld [vmem:[#allocation8 + $0x4c8] ss:$16 sps:$4 sm:$0xff]  }
 0x634   :  { %5631 = vmatpush1.bf16.msra.mxu1 %v8945_v17  ;;  %5509 = vmatprep.subr.bf16.mxu0 %v8950_v5  ;;  %v9016_v17 = vld [vmem:[#allocation8 + $0x4e4] ss:$16 sps:$4 sm:$0xff]   ;;  %v9019_v5 = vld [vmem:[#allocation8 + $0x4ec] ss:$16 sps:$4 sm:$0xff]  }
 0x635   :  { %5632 = vmatprep.subr.bf16.mxu1 %v8953_v54  ;;  %v9014_v54 = vld [vmem:[#allocation8 + $0x4e0] ss:$16 sps:$4 sm:$0xff]  }
 0x637   :  { %5510 = vmatpush1.bf16.msra.mxu0 %v8948_v19  ;;  %v9017_v19 = vld [vmem:[#allocation8 + $0x4e8] ss:$16 sps:$4 sm:$0xff]  }
 0x638   :  { %5633 = vmatpush1.bf16.msra.mxu1 %v8951_v9  ;;  %5511 = vmatprep.subr.bf16.mxu0 %v8956_v3  ;;  %v9022_v9 = vld [vmem:[#allocation8 + $0x504] ss:$16 sps:$4 sm:$0xff]   ;;  %v9025_v3 = vld [vmem:[#allocation8 + $0x50c] ss:$16 sps:$4 sm:$0xff]  }
 0x639   :  { %5634 = vmatprep.subr.bf16.mxu1 %v8959_v2  ;;  %v9020_v2 = vld [vmem:[#allocation8 + $0x500] ss:$16 sps:$4 sm:$0xff]  }
 0x63b   :  { %5512 = vmatpush1.bf16.msra.mxu0 %v8954_v56  ;;  %v9023_v56 = vld [vmem:[#allocation8 + $0x508] ss:$16 sps:$4 sm:$0xff]  }
 0x63c   :  { %5635 = vmatpush1.bf16.msra.mxu1 %v8957_v30  ;;  %5513 = vmatprep.subr.bf16.mxu0 %v8962_v50  ;;  %v9028_v30 = vld [vmem:[#allocation8 + $0x524] ss:$16 sps:$4 sm:$0xff]   ;;  %v9031_v50 = vld [vmem:[#allocation8 + $0x52c] ss:$16 sps:$4 sm:$0xff]  }
 0x63d   :  { %5636 = vmatprep.subr.bf16.mxu1 %v8965_v21  ;;  %v9026_v21 = vld [vmem:[#allocation8 + $0x520] ss:$16 sps:$4 sm:$0xff]  }
 0x63f   :  { %5514 = vmatpush1.bf16.msra.mxu0 %v8960_v14  ;;  %v9029_v14 = vld [vmem:[#allocation8 + $0x528] ss:$16 sps:$4 sm:$0xff]  }
 0x640   :  { %5637 = vmatpush1.bf16.msra.mxu1 %v8963_v26  ;;  %5515 = vmatprep.subr.bf16.mxu0 %v8968_v48  ;;  %v9034_v26 = vld [vmem:[#allocation8 + $0x544] ss:$16 sps:$4 sm:$0xff]   ;;  %v9037_v48 = vld [vmem:[#allocation8 + $0x54c] ss:$16 sps:$4 sm:$0xff]  }
 0x641   :  { %5638 = vmatprep.subr.bf16.mxu1 %v8971_v24  ;;  %v9032_v24 = vld [vmem:[#allocation8 + $0x540] ss:$16 sps:$4 sm:$0xff]  }
 0x643   :  { %5516 = vmatpush1.bf16.msra.mxu0 %v8966_v47  ;;  %v9035_v47 = vld [vmem:[#allocation8 + $0x548] ss:$16 sps:$4 sm:$0xff]  }
 0x644   :  { %5639 = vmatpush1.bf16.msra.mxu1 %v8969_v31  ;;  %5526 = vmatprep.subr.bf16.mxu0 %v8974_v39  ;;  %v9040_v31 = vld [vmem:[#allocation8 + $0x564] ss:$16 sps:$4 sm:$0xff]   ;;  %v9043_v39 = vld [vmem:[#allocation8 + $0x56c] ss:$16 sps:$4 sm:$0xff]  }
 0x645   :  { %5649 = vmatprep.subr.bf16.mxu1 %v8977_v0  ;;  %v9038_v0 = vld [vmem:[#allocation8 + $0x560] ss:$16 sps:$4 sm:$0xff]  }
 0x698   :  { %v4031_v16 = vpop.f32.mrb[10].mxu0 }
 0x699   :  { %v8672_v49 = vadd.f32 %v4031_v16, %v13432_v11  ;;  %v4315_v34 = vpop.f32.mrb[10].mxu1  ;;  %v4033_v7 = vpop.f32.mrb[11].mxu0  ;;  %v9041_v16 = vld [vmem:[#allocation8 + $0x568] ss:$16 sps:$4 sm:$0xff]  }
 0x69a   :  { %v8674_v13 = vadd.f32 %v4315_v34, %v13625_v53  ;;  %v8673_v25 = vadd.f32 %v4033_v7, %v11038_v29  ;;  %v4317_v23 = vpop.f32.mrb[11].mxu1  ;;  %v8972_v53 = vld [vmem:[#allocation8 + $0x400] ss:$16 sps:$4 sm:$0xff]   ;;  %v9049_v34 = vld [vmem:[#allocation8 + $0x58c] ss:$16 sps:$4 sm:$0xff]  }
 0x69b   :  { %v4322_v12 = vmax.f32 %v8672_v49, 0.0  ;;  %v8675_v18 = vadd.f32 %v4317_v23, %v13628_v52  ;;  %v8980_v52 = vld [vmem:[#allocation8 + $0x424] ss:$16 sps:$4 sm:$0xff]   ;;  %v9044_v7 = vld [vmem:[#allocation8 + $0x580] ss:$16 sps:$4 sm:$0xff]  }
 0x69c   :  { %v4324_v46 = vmax.f32 %v8674_v13, 0.0  ;;  %v4323_v40 = vmax.f32 %v8673_v25, 0.0  ;;  %v9046_v49 = vld [vmem:[#allocation8 + $0x584] ss:$16 sps:$4 sm:$0xff]   ;;  %v9047_v13 = vld [vmem:[#allocation8 + $0x588] ss:$16 sps:$4 sm:$0xff]  }
 0x69d   :  { %v4328_v28 = vmax.f32 %v11355_v44, %v4322_v12  ;;  %v4325_v35 = vmax.f32 %v8675_v18, 0.0  ;;  %v8978_v44 = vld [vmem:[#allocation8 + $0x420] ss:$16 sps:$4 sm:$0xff]  }
 0x69e   :  { %v11655_v63 = vmax.f32 %v11623_v57, %v4324_v46  ;;  %v4329_v11 = vmax.f32 %v11361_v20, %v4323_v40  ;;  %v8981_v57 = vld [vmem:[#allocation8 + $0x428] ss:$16 sps:$4 sm:$0xff]   ;;  %v8986_v20 = vld [vmem:[#allocation8 + $0x444] ss:$16 sps:$4 sm:$0xff]   ;;  %v4518_v23 = vld [vmem:[#allocation10] sm:$0xf] }
 0x69f   :  { %v4331_v58 = vmax.f32 %v11630_v27, %v4325_v35  ;;  %v4334_v29 = vpack.c.bf16 %v4328_v28, %v4328_v28  ;;  %v8989_v27 = vld [vmem:[#allocation8 + $0x44c] ss:$16 sps:$4 sm:$0xff]   ;;  %v13636_v12 = vld [vmem:[#allocation310_spill] sm:$0xff]  ;;  %v5694_v28 = vld [vmem:[#allocation11] sm:$0xf] }
 0x6a0   :  { %v4335_v43 = vpack.c.bf16 %v4329_v11, %v4329_v11  ;;  %v4336_v25 = vpack.c.bf16 %v11655_v63, %v11655_v63  ;;  %v4523_v18 = vrot.slane %v4518_v23, %v13636_v12  ;;  %v13637_v46 = vld [vmem:[#allocation29_spill] sm:$0xff]  ;;  %v13638_v35 = vld [vmem:[#allocation358_spill] sm:$0xff] }
 0x6a1   :  { %v4337_v32 = vpack.c.bf16 %v4331_v58, %v4331_v58  ;;  %v4531_v40 = vrot.slane %v4518_v23, %v13637_v46  ;;  %v4527_v11 = vrot.slane %v4518_v23, %v13638_v35  ;;  %v13639_v58 = vld [vmem:[#allocation31_spill] sm:$0xff] }
 0x6a2   :  { %5517 = vmatprep.mubr.bf16.mxu0 %v4335_v43  ;;  %5640 = vmatprep.mubr.bf16.mxu1 %v4335_v43  ;;  %v4535_v43 = vrot.slane %v4518_v23, %v13639_v58 }
 0x6a3   :  { %5518 = vmatmul.mubr.bf16.vlgmr.msra.gmra.mrb[12].mxu0 %v4334_v29  ;;  %5641 = vmatmul.mubr.bf16.vlgmr.msra.gmra.mrb[12].mxu1 %v4334_v29 }
 0x6a4   :  { %5527 = vmatpush1.bf16.msra.mxu0 %v8972_v53  ;;  %5650 = vmatpush1.bf16.msra.mxu1 %v8975_v51 }
 0x6a5   :  { %5961 = vmatprep.mubr.msk.bf16.mxu0 %vm5440_vm2, %v4337_v32  ;;  %5962 = vmatprep.mubr.msk.bf16.mxu1 %vm5440_vm2, %v4337_v32 }
 0x6a6   :  { %5528 = vmatprep.subr.bf16.mxu0 %v8980_v52  ;;  %5651 = vmatprep.subr.bf16.mxu1 %v8983_v38  ;;  %v5699_v52 = vrot.slane %v5694_v28, %v13636_v12 }
 0x6a8   :  { %5529 = vmatpush1.bf16.msra.mxu0 %v8978_v44  ;;  %5652 = vmatpush1.bf16.msra.mxu1 %v8981_v57  ;;  %v5703_v57 = vrot.slane %v5694_v28, %v13638_v35 }
 0x6a9   :  { %5530 = vmatprep.subr.bf16.mxu0 %v8986_v20  ;;  %5653 = vmatprep.subr.bf16.mxu1 %v8989_v27 }
 0x6ac   :  { %5531 = vmatpush1.bf16.msra.mxu0 %v8984_v6  ;;  %5654 = vmatpush1.bf16.msra.mxu1 %v8987_v61 }
 0x6ad   :  { %5532 = vmatprep.subr.bf16.mxu0 %v8992_v41  ;;  %5655 = vmatprep.subr.bf16.mxu1 %v8995_v62 }
 0x6b0   :  { %5533 = vmatpush1.bf16.msra.mxu0 %v8990_v22  ;;  %5656 = vmatpush1.bf16.msra.mxu1 %v8993_v10  ;;  %v5711_v22 = vrot.slane %v5694_v28, %v13639_v58 }
 0x6b1   :  { %5534 = vmatprep.subr.bf16.mxu0 %v8998_v37  ;;  %5657 = vmatprep.subr.bf16.mxu1 %v9001_v55  ;;  %v5707_v37 = vrot.slane %v5694_v28, %v13637_v46 }
 0x6b4   :  { %5535 = vmatpush1.bf16.msra.mxu0 %v8996_v15  ;;  %5658 = vmatpush1.bf16.msra.mxu1 %v8999_v45 }
 0x6b5   :  { %5536 = vmatprep.subr.bf16.mxu0 %v9004_v1  ;;  %5659 = vmatprep.subr.bf16.mxu1 %v9007_v42 }
 0x6b8   :  { %5537 = vmatpush1.bf16.msra.mxu0 %v9002_v4  ;;  %5660 = vmatpush1.bf16.msra.mxu1 %v9005_v60 }
 0x6b9   :  { %5538 = vmatprep.subr.bf16.mxu0 %v9010_v33  ;;  %5661 = vmatprep.subr.bf16.mxu1 %v9013_v36 }
 0x6bc   :  { %5539 = vmatpush1.bf16.msra.mxu0 %v9008_v59  ;;  %5662 = vmatpush1.bf16.msra.mxu1 %v9011_v8  ;;  %v5963_v8 = vld [vmem:[#allocation2] ss:$0 sm:$0xff] }
 0x6bd   :  { %5540 = vmatprep.subr.bf16.mxu0 %v9016_v17  ;;  %5663 = vmatprep.subr.bf16.mxu1 %v9019_v5 }
 0x6c0   :  { %5541 = vmatpush1.bf16.msra.mxu0 %v9014_v54  ;;  %5664 = vmatpush1.bf16.msra.mxu1 %v9017_v19 }
 0x6c1   :  { %5542 = vmatprep.subr.bf16.mxu0 %v9022_v9  ;;  %5665 = vmatprep.subr.bf16.mxu1 %v9025_v3 }
 0x6c4   :  { %5543 = vmatpush1.bf16.msra.mxu0 %v9020_v2  ;;  %5666 = vmatpush1.bf16.msra.mxu1 %v9023_v56 }
 0x6c5   :  { %5544 = vmatprep.subr.bf16.mxu0 %v9028_v30  ;;  %5667 = vmatprep.subr.bf16.mxu1 %v9031_v50 }
 0x6c8   :  { %5545 = vmatpush1.bf16.msra.mxu0 %v9026_v21  ;;  %5668 = vmatpush1.bf16.msra.mxu1 %v9029_v14 }
 0x6c9   :  { %5546 = vmatprep.subr.bf16.mxu0 %v9034_v26  ;;  %5669 = vmatprep.subr.bf16.mxu1 %v9037_v48 }
 0x6cc   :  { %5547 = vmatpush1.bf16.msra.mxu0 %v9032_v24  ;;  %5670 = vmatpush1.bf16.msra.mxu1 %v9035_v47 }
 0x6cd   :  { %5548 = vmatprep.subr.bf16.mxu0 %v9040_v31  ;;  %5671 = vmatprep.subr.bf16.mxu1 %v9043_v39 }
 0x6d0   :  { %5549 = vmatpush1.bf16.msra.mxu0 %v9038_v0  ;;  %5672 = vmatpush1.bf16.msra.mxu1 %v9041_v16 }
 0x6d1   :  { %5550 = vmatprep.subr.bf16.mxu0 %v9046_v49  ;;  %5673 = vmatprep.subr.bf16.mxu1 %v9049_v34 }
 0x6d4   :  { %5551 = vmatpush1.bf16.msra.mxu0 %v9044_v7  ;;  %5674 = vmatpush1.bf16.msra.mxu1 %v9047_v13 }
 0x6d7   :  { %5559 = vmatmul.mubr.bf16.vlgmr.msra.gmra.mrb[12].mxu0 %v4336_v25  ;;  %5682 = vmatmul.mubr.bf16.vlgmr.msra.gmra.mrb[12].mxu1 %v4336_v25 }
 0x7aa   :  { %v5560_v53 = vpop.f32.mrb[12].mxu0  ;;  %v5683_v51 = vpop.f32.mrb[12].mxu1 }
 0x7ab   :  { %v8676_v29 = vadd.f32 %v5560_v53, %v4523_v18  ;;  %v8678_v38 = vadd.f32 %v5683_v51, %v4531_v40  ;;  %v5562_v32 = vpop.f32.mrb[13].mxu0  ;;  %v5685_v63 = vpop.f32.mrb[13].mxu1 }
 0x7ac   :  { %v8677_v44 = vadd.f32 %v5562_v32, %v4527_v11  ;;  %v8679_v20 = vadd.f32 %v5685_v63, %v4535_v43  ;;  %v5564_v27 = vpop.f32.mrb[14].mxu0  ;;  %v5687_v6 = vpop.f32.mrb[14].mxu1 }
 0x7ad   :  { %v5690_v61 = vmax.f32 %v8676_v29, 0.0  ;;  %v5565_v41 = vpop.f32.mrb[15].mxu0  ;;  %v5688_v62 = vpop.f32.mrb[15].mxu1  ;;  %v5692_v10 = vmax.f32 %v8678_v38, 0.0 }
 0x7ae   :  { %v5691_v55 = vmax.f32 %v8677_v44, 0.0  ;;  %v5693_v15 = vmax.f32 %v8679_v20, 0.0 }
 0x7af   :  { %v5716_v45 = vmul.f32 %v5699_v52, %v5690_v61  ;;  %v5718_v4 = vmul.f32 %v5707_v37, %v5692_v10 }
 0x7b0   :  { %v5717_v1 = vmul.f32 %v5703_v57, %v5691_v55  ;;  %v5719_v42 = vmul.f32 %v5711_v22, %v5693_v15 }
 0x7b2   :  { %v5720_v60 = vadd.f32 %v5717_v1, %v5716_v45  ;;  %v5723_v36 = vsel %vm5722_vm3, %v5719_v42, 0.0 }
 0x7b4   :  { %v5721_v33 = vadd.f32 %v5720_v60, %v5718_v4 }
 0x7b6   :  { %v5724_v59 = vadd.f32 %v5723_v36, %v5721_v33 }
 0x7b8   :  { %5725 = vadd.xlane.f32.xlu0 %v5724_v59 }
 0x845   :  { %v5726_v17 = vpop.xlane.xlu0 %5725 }
 0x846   :  { %v5734_v5 = vadd.f32 %v5963_v8, %v5726_v17 }
 0x848   :  { %5736 = vst.msk [vmem:[%s11679_s7] sm:$0xff] %vm5735_vm4, %v5734_v5 }
 0x849   :  { %5741 = vsyncpa [#allocation4], 1 }
 0x84a   :  { %5742 = vsyncpa [#allocation6], 1 }
 0x84b   :  { %5743 = vsyncpa [#allocation9], 1 }
 0x84c   :  { %5744 = vsyncpa [#allocation12], 1 }

</bundles_post_ra>
